<compile_context>
chip_gen: v7x
topology: tpu7x:2x2x1
jax: 0.10.0
libtpu: 0.0.40
codegen_flags: <defaults>
</compile_context>

<pallas_src>
import numpy as np
import jax
import jax.numpy as jnp
from jax.experimental import pallas as pl
from jax.experimental.pallas import tpu as pltpu

TILE_B = 32          # samples per grid step (batches >= 64 use >= 2 steps / both TCs)
NEG_SLOPE = 0.2

# --- static row-layout tables (units of TILE_B rows = one "h-row") -----------------
# conv1 input (28 h rows, phase = h mod 8): plane starts, halo (zero) row at 25.
H_PLANE_ORDER = [m + 8 * j for m in range(8) for j in range(4) if m + 8 * j < 28]
_P1 = (0, 4, 8, 12, 16, 19, 22, 26)
_HALO_IMG = 25
# conv1: 4 output groups by (h1 mod 4): (dst h-row in act1, rows, slab starts kh=0,1,2)
_GROUPS1 = (
    (0, 4, (25, 0, 4)),     # h1 in {0,4,8,12}
    (4, 4, (4, 8, 12)),     # h1 in {1,5,9,13}
    (8, 3, (12, 16, 19)),   # h1 in {2,6,10}
    (12, 3, (19, 22, 26)),  # h1 in {3,7,11}
)
_HALO_ACT1 = 11             # zero h-row inside act1 (before the h1%4==3 plane)
# conv2: 2 output groups by (h2 mod 2): slab starts are act1 h-rows
_GROUPS2 = (
    (0, 4, (11, 0, 4)),     # h2 in {0,2,4,6}
    (5, 3, (4, 8, 12)),     # h2 in {1,3,5}
)
_HALOS_ACT2 = (4, 8)        # zero h-rows inside act2 (before / after the odd plane)
# conv3: single matmul; slab (start, rows) in act2 h-rows for kh = 0,1,2
_SLABS3 = ((4, 4), (0, 4), (5, 4))


def _leaky(x):
    return jnp.where(x >= 0.0, x, NEG_SLOPE * x)


# -----------------------------------------------------------------------------------
# Fused forward kernel: one grid step processes TILE_B samples entirely in VMEM.
# -----------------------------------------------------------------------------------
def _disc_kernel(vt_ref, wt_ref, m1_ref, m2_ref, m3_ref, wfc_ref, bfc_ref,
                 out_ref, img_ref, act1_ref, act2_ref):
    bt = out_ref.shape[0]

    # transform: Linear(794 -> 784) + LeakyReLU, batch in sublanes, bias folded.
    y = jnp.dot(vt_ref[...].astype(jnp.bfloat16), wt_ref[...],
                preferred_element_type=jnp.float32)                      # (bt, 784)
    y = _leaky(y).astype(jnp.bfloat16)

    # scatter the 28 image rows into the phase-ordered image scratch (+ zero halo).
    img_ref[_HALO_IMG * bt:(_HALO_IMG + 1) * bt, :] = jnp.zeros((bt, 28), jnp.bfloat16)
    for r in range(28):
        dst = r if r < _HALO_IMG else r + 1
        img_ref[dst * bt:(dst + 1) * bt, :] = y[:, r * 28:(r + 1) * 28]

    def conv(src_ref, m_ref, dst_ref, groups, halo_rows, width):
        for h in halo_rows:
            dst_ref[h * bt:(h + 1) * bt, :] = jnp.zeros((bt, width), jnp.bfloat16)
        for dst, sz, starts in groups:
            lhs = jnp.concatenate(
                [src_ref[s * bt:(s + sz) * bt, :] for s in starts], axis=1)
            o = jnp.dot(lhs, m_ref[...], preferred_element_type=jnp.float32)
            dst_ref[dst * bt:(dst + sz) * bt, :] = _leaky(o).astype(jnp.bfloat16)

    # conv1: 1 -> 64, 28 -> 14   (4 output-phase row groups)
    conv(img_ref, m1_ref, act1_ref, _GROUPS1, (_HALO_ACT1,), 896)
    # conv2: 64 -> 32, 14 -> 7   (2 output-phase row groups)
    conv(act1_ref, m2_ref, act2_ref, _GROUPS2, _HALOS_ACT2, 224)
    # conv3: 32 -> 16, 7 -> 4    (single matmul) + AvgPool2d(4) + Linear(16, 1)
    lhs = jnp.concatenate(
        [act2_ref[s * bt:(s + n) * bt, :] for s, n in _SLABS3], axis=1)
    act3 = _leaky(jnp.dot(lhs, m3_ref[...],
                          preferred_element_type=jnp.float32))           # (4*bt, 64)
    t = jnp.sum(act3 * wfc_ref[...], axis=1, keepdims=True)              # (4*bt, 1)
    out_ref[...] = (t[0:bt] + t[bt:2 * bt] + t[2 * bt:3 * bt] + t[3 * bt:4 * bt]
                    + bfc_ref[...])


def _const_spec(shape):
    nd = len(shape)
    return pl.BlockSpec(tuple(shape), lambda i, _n=nd: (0,) * _n)


def discriminator_forward(kp, x, c):
    B = x.shape[0]
    v = jnp.concatenate([x.reshape(B, -1).astype(jnp.float32),
                         c.astype(jnp.float32)], axis=1)                 # (B, 794)
    feat = jnp.concatenate([v, jnp.ones((B, 1), jnp.float32),
                            jnp.zeros((B, 5), jnp.float32)], axis=1)     # (B, 800)
    n_tiles = -(-B // TILE_B)
    bp = n_tiles * TILE_B
    feat = jnp.pad(feat, ((0, bp - B), (0, 0)))

    weights = [kp[k] for k in ("wt", "m1", "m2", "m3", "wfc", "bfc")]
    out = pl.pallas_call(
        _disc_kernel,
        out_shape=jax.ShapeDtypeStruct((bp, 1), jnp.float32),
        grid=(n_tiles,),
        in_specs=[pl.BlockSpec((TILE_B, 800), lambda i: (i, 0))]
                 + [_const_spec(w.shape) for w in weights],
        out_specs=pl.BlockSpec((TILE_B, 1), lambda i: (i, 0)),
        scratch_shapes=[
            pltpu.VMEM((29 * TILE_B, 28), jnp.bfloat16),    # image, phase-ordered rows
            pltpu.VMEM((15 * TILE_B, 896), jnp.bfloat16),   # act1 (14x14x64)
            pltpu.VMEM((9 * TILE_B, 224), jnp.bfloat16),    # act2 (7x7x32)
        ],
        compiler_params=pltpu.CompilerParams(
            dimension_semantics=("parallel",),
            vmem_limit_bytes=32 * 1024 * 1024),
    )(feat, *weights)
    return out[:B]


# -----------------------------------------------------------------------------------
# One-time weight preparation (kernel-friendly layouts, all precomputed on host)
# -----------------------------------------------------------------------------------
def prepare_kernel_params(params):
    W_t = np.asarray(params["w_t"], np.float32)      # (784, 794) torch (out, in)
    b_t = np.asarray(params["b_t"], np.float32)      # (784,)
    W1 = np.asarray(params["w_c1"], np.float32)      # (64, 1, 3, 3)
    W2 = np.asarray(params["w_c2"], np.float32)      # (32, 64, 3, 3)
    W3 = np.asarray(params["w_c3"], np.float32)      # (16, 32, 3, 3)
    wfc = np.asarray(params["w_fc"], np.float32)     # (1, 16)
    bfc = np.asarray(params["b_fc"], np.float32)     # (1,)

    # transform weight with columns permuted to the phase-ordered (h, w) layout the
    # in-kernel row scatter expects; bias folded into row 794 (the ones column).
    perm = np.array([h * 28 + w for h in H_PLANE_ORDER for w in range(28)], np.int64)
    wt = np.zeros((800, 784), np.float32)
    wt[:794, :] = W_t.T[:, perm]
    wt[794, :] = b_t[perm]

    def conv_mix(w, w_in, w_out, c_in, c_out):
        # (3*W_in*C_in, W_out*C_out): folds kw gather, w zero-pad and channel mix;
        # rows are (kh, w_in, c_in), columns are (w_out, c_out).
        m = np.zeros((3 * w_in * c_in, w_out * c_out), np.float32)
        for kh in range(3):
            for wo in range(w_out):
                for kw in range(3):
                    wi = 2 * wo + kw - 1
                    if 0 <= wi < w_in:
                        blk = w[:, :, kh, kw].T                      # (c_in, c_out)
                        r0 = kh * w_in * c_in + wi * c_in
                        m[r0:r0 + c_in, wo * c_out:(wo + 1) * c_out] = blk
        return m

    m1 = conv_mix(W1, 28, 14, 1, 64)      # (84, 896)
    m2 = conv_mix(W2, 14, 7, 64, 32)      # (2688, 224)
    m3 = conv_mix(W3, 7, 4, 32, 16)       # (672, 64)
    wfc_row = np.tile(wfc[0] / 16.0, 4).reshape(1, 64)   # AvgPool(4) folded into FC

    return {
        "wt": jnp.asarray(wt, jnp.bfloat16),
        "m1": jnp.asarray(m1, jnp.bfloat16),
        "m2": jnp.asarray(m2, jnp.bfloat16),
        "m3": jnp.asarray(m3, jnp.bfloat16),
        "wfc": jnp.asarray(wfc_row, jnp.float32),
        "bfc": jnp.asarray(bfc.reshape(1, 1), jnp.float32),
    }


# -----------------------------------------------------------------------------------
# Parameters (deterministic, PyTorch-default-style uniform init, torch layouts)
# -----------------------------------------------------------------------------------
def init_params(key, in_channel=1, input_size=784, condition_size=10):
    ks = jax.random.split(key, 7)

    def uni(k, shape, fan_in):
        bound = 1.0 / jnp.sqrt(float(fan_in))
        return jax.random.uniform(k, shape, jnp.float32, -bound, bound)

    d_in = input_size + condition_size
    return {
        "w_t":  uni(ks[0], (784, d_in), d_in),          # Linear(794, 784), torch (out,in)
        "b_t":  uni(ks[1], (784,), d_in),
        "w_c1": uni(ks[2], (64, in_channel, 3, 3), in_channel * 9),
        "w_c2": uni(ks[3], (32, 64, 3, 3), 64 * 9),
        "w_c3": uni(ks[4], (16, 32, 3, 3), 32 * 9),
        "w_fc": uni(ks[5], (1, 16), 16),
        "b_fc": uni(ks[6], (1,), 16),
    }


# -----------------------------------------------------------------------------------
# Pure-JAX reference (mirrors the PyTorch module) for a correctness check
# -----------------------------------------------------------------------------------
def _reference_forward(params, x, c):
    B = x.shape[0]
    v = jnp.concatenate([x.reshape(B, -1), c.astype(jnp.float32)], axis=1)
    y = v @ params["w_t"].T + params["b_t"]
    y = _leaky(y).reshape(B, 1, 28, 28)

    def conv(z, w):
        z = jax.lax.conv_general_dilated(
            z, w, window_strides=(2, 2), padding=((1, 1), (1, 1)),
            dimension_numbers=("NCHW", "OIHW", "NCHW"))
        return _leaky(z)

    y = conv(y, params["w_c1"])
    y = conv(y, params["w_c2"])
    y = conv(y, params["w_c3"])
    y = jnp.mean(y, axis=(2, 3))                          # AvgPool2d(4) on a 4x4 map
    return y @ params["w_fc"].T + params["b_fc"]


if __name__ == "__main__":
    key = jax.random.PRNGKey(0)
    k_p, k_x, k_c = jax.random.split(key, 3)

    params = init_params(k_p)
    kparams = prepare_kernel_params(params)

    B = 2
    x = jax.random.normal(k_x, (B, 1, 28, 28), dtype=jnp.float32)         # MNIST-like NCHW
    c = jax.nn.one_hot(jax.random.randint(k_c, (B,), 0, 10), 10, dtype=jnp.float32)

    fwd = jax.jit(discriminator_forward)
    out = fwd(kparams, x, c)
    jax.block_until_ready(out)
    assert out.shape == (B, 1), out.shape

    ref = _reference_forward(params, x, c)
    err = float(jnp.max(jnp.abs(out - ref)))
    assert err < 5e-2, f"mismatch vs reference: max abs err = {err}"
    print("KERNEL_OK")
</pallas_src>

<mosaic_0001>
module attributes {stable_mosaic.version = 11 : i64} {
  func.func @_disc_kernel(%arg0: i32, %arg1: memref<32x800xf32, #tpu.memory_space<vmem>>, %arg2: memref<800x784xbf16, #tpu.memory_space<vmem>>, %arg3: memref<84x896xbf16, #tpu.memory_space<vmem>>, %arg4: memref<2688x224xbf16, #tpu.memory_space<vmem>>, %arg5: memref<672x64xbf16, #tpu.memory_space<vmem>>, %arg6: memref<1x64xf32, #tpu.memory_space<vmem>>, %arg7: memref<1x1xf32, #tpu.memory_space<vmem>>, %arg8: memref<32x1xf32, #tpu.memory_space<vmem>>, %arg9: memref<928x28xbf16, #tpu.memory_space<vmem>>, %arg10: memref<480x896xbf16, #tpu.memory_space<vmem>>, %arg11: memref<288x224xbf16, #tpu.memory_space<vmem>>) attributes {dimension_semantics = [#tpu.dimension_semantics<parallel>], iteration_bounds = array<i64: 1>, scalar_prefetch = 0 : i64, scratch_operands = 3 : i64, tpu.core_type = #tpu.core_type<tc>, window_params = [{transform_indices = @transform_0, window_bounds = array<i64: 32, 800>}, {pipeline_mode = #tpu.pipeline_mode<synchronous>, transform_indices = @transform_1, window_bounds = array<i64: 800, 784>}, {pipeline_mode = #tpu.pipeline_mode<synchronous>, transform_indices = @transform_2, window_bounds = array<i64: 84, 896>}, {pipeline_mode = #tpu.pipeline_mode<synchronous>, transform_indices = @transform_3, window_bounds = array<i64: 2688, 224>}, {pipeline_mode = #tpu.pipeline_mode<synchronous>, transform_indices = @transform_4, window_bounds = array<i64: 672, 64>}, {pipeline_mode = #tpu.pipeline_mode<synchronous>, transform_indices = @transform_5, window_bounds = array<i64: 1, 64>}, {pipeline_mode = #tpu.pipeline_mode<synchronous>, transform_indices = @transform_6, window_bounds = array<i64: 1, 1>}, {transform_indices = @transform_7, window_bounds = array<i64: 32, 1>}]} {
    %c0 = arith.constant 0 : index
    %c0_0 = arith.constant 0 : index
    %0 = vector.load %arg1[%c0, %c0_0] : memref<32x800xf32, #tpu.memory_space<vmem>>, vector<32x800xf32>
    %1 = arith.truncf %0 : vector<32x800xf32> to vector<32x800xbf16>
    %c0_1 = arith.constant 0 : index
    %c0_2 = arith.constant 0 : index
    %2 = vector.load %arg2[%c0_1, %c0_2] : memref<800x784xbf16, #tpu.memory_space<vmem>>, vector<800x784xbf16>
    %cst = arith.constant dense<0.000000e+00> : vector<32x784xf32>
    %3 = tpu.matmul %1, %2, %cst {dimension_numbers = #tpu.dot_dimension_numbers<[1], [0], [0], [1], [0, 0, 1, 1], [], []>} : vector<32x800xbf16>, vector<800x784xbf16>, vector<32x784xf32> -> vector<32x784xf32>
    %cst_3 = arith.constant 0.000000e+00 : f32
    %4 = vector.broadcast %cst_3 : f32 to vector<32x784xf32>
    %5 = arith.cmpf oge, %3, %4 : vector<32x784xf32>
    %cst_4 = arith.constant 2.000000e-01 : f32
    %6 = vector.broadcast %cst_4 : f32 to vector<32x784xf32>
    %7 = arith.mulf %6, %3 : vector<32x784xf32>
    %8 = arith.select %5, %3, %7 : vector<32x784xi1>, vector<32x784xf32>
    %9 = arith.truncf %8 : vector<32x784xf32> to vector<32x784xbf16>
    %cst_5 = arith.constant 0.000000e+00 : bf16
    %10 = vector.broadcast %cst_5 : bf16 to vector<32x28xbf16>
    %c800 = arith.constant 800 : index
    %c0_6 = arith.constant 0 : index
    %11 = vector.load %arg9[%c800, %c0_6] : memref<928x28xbf16, #tpu.memory_space<vmem>>, vector<32x28xbf16>
    tpu.vector_store %arg9[%c800, %c0_6], %10 {strides = array<i32>} : memref<928x28xbf16, #tpu.memory_space<vmem>>, vector<32x28xbf16>,
    %12 = vector.extract_strided_slice %9 {offsets = [0, 0], sizes = [32, 28], strides = [1, 1]} : vector<32x784xbf16> to vector<32x28xbf16>
    %c0_7 = arith.constant 0 : index
    %c0_8 = arith.constant 0 : index
    %13 = vector.load %arg9[%c0_7, %c0_8] : memref<928x28xbf16, #tpu.memory_space<vmem>>, vector<32x28xbf16>
    tpu.vector_store %arg9[%c0_7, %c0_8], %12 {strides = array<i32>} : memref<928x28xbf16, #tpu.memory_space<vmem>>, vector<32x28xbf16>,
    %14 = vector.extract_strided_slice %9 {offsets = [0, 28], sizes = [32, 28], strides = [1, 1]} : vector<32x784xbf16> to vector<32x28xbf16>
    %c32 = arith.constant 32 : index
    %c0_9 = arith.constant 0 : index
    %15 = vector.load %arg9[%c32, %c0_9] : memref<928x28xbf16, #tpu.memory_space<vmem>>, vector<32x28xbf16>
    tpu.vector_store %arg9[%c32, %c0_9], %14 {strides = array<i32>} : memref<928x28xbf16, #tpu.memory_space<vmem>>, vector<32x28xbf16>,
    %16 = vector.extract_strided_slice %9 {offsets = [0, 56], sizes = [32, 28], strides = [1, 1]} : vector<32x784xbf16> to vector<32x28xbf16>
    %c64 = arith.constant 64 : index
    %c0_10 = arith.constant 0 : index
    %17 = vector.load %arg9[%c64, %c0_10] : memref<928x28xbf16, #tpu.memory_space<vmem>>, vector<32x28xbf16>
    tpu.vector_store %arg9[%c64, %c0_10], %16 {strides = array<i32>} : memref<928x28xbf16, #tpu.memory_space<vmem>>, vector<32x28xbf16>,
    %18 = vector.extract_strided_slice %9 {offsets = [0, 84], sizes = [32, 28], strides = [1, 1]} : vector<32x784xbf16> to vector<32x28xbf16>
    %c96 = arith.constant 96 : index
    %c0_11 = arith.constant 0 : index
    %19 = vector.load %arg9[%c96, %c0_11] : memref<928x28xbf16, #tpu.memory_space<vmem>>, vector<32x28xbf16>
    tpu.vector_store %arg9[%c96, %c0_11], %18 {strides = array<i32>} : memref<928x28xbf16, #tpu.memory_space<vmem>>, vector<32x28xbf16>,
    %20 = vector.extract_strided_slice %9 {offsets = [0, 112], sizes = [32, 28], strides = [1, 1]} : vector<32x784xbf16> to vector<32x28xbf16>
    %c128 = arith.constant 128 : index
    %c0_12 = arith.constant 0 : index
    %21 = vector.load %arg9[%c128, %c0_12] : memref<928x28xbf16, #tpu.memory_space<vmem>>, vector<32x28xbf16>
    tpu.vector_store %arg9[%c128, %c0_12], %20 {strides = array<i32>} : memref<928x28xbf16, #tpu.memory_space<vmem>>, vector<32x28xbf16>,
    %22 = vector.extract_strided_slice %9 {offsets = [0, 140], sizes = [32, 28], strides = [1, 1]} : vector<32x784xbf16> to vector<32x28xbf16>
    %c160 = arith.constant 160 : index
    %c0_13 = arith.constant 0 : index
    %23 = vector.load %arg9[%c160, %c0_13] : memref<928x28xbf16, #tpu.memory_space<vmem>>, vector<32x28xbf16>
    tpu.vector_store %arg9[%c160, %c0_13], %22 {strides = array<i32>} : memref<928x28xbf16, #tpu.memory_space<vmem>>, vector<32x28xbf16>,
    %24 = vector.extract_strided_slice %9 {offsets = [0, 168], sizes = [32, 28], strides = [1, 1]} : vector<32x784xbf16> to vector<32x28xbf16>
    %c192 = arith.constant 192 : index
    %c0_14 = arith.constant 0 : index
    %25 = vector.load %arg9[%c192, %c0_14] : memref<928x28xbf16, #tpu.memory_space<vmem>>, vector<32x28xbf16>
    tpu.vector_store %arg9[%c192, %c0_14], %24 {strides = array<i32>} : memref<928x28xbf16, #tpu.memory_space<vmem>>, vector<32x28xbf16>,
    %26 = vector.extract_strided_slice %9 {offsets = [0, 196], sizes = [32, 28], strides = [1, 1]} : vector<32x784xbf16> to vector<32x28xbf16>
    %c224 = arith.constant 224 : index
    %c0_15 = arith.constant 0 : index
    %27 = vector.load %arg9[%c224, %c0_15] : memref<928x28xbf16, #tpu.memory_space<vmem>>, vector<32x28xbf16>
    tpu.vector_store %arg9[%c224, %c0_15], %26 {strides = array<i32>} : memref<928x28xbf16, #tpu.memory_space<vmem>>, vector<32x28xbf16>,
    %28 = vector.extract_strided_slice %9 {offsets = [0, 224], sizes = [32, 28], strides = [1, 1]} : vector<32x784xbf16> to vector<32x28xbf16>
    %c256 = arith.constant 256 : index
    %c0_16 = arith.constant 0 : index
    %29 = vector.load %arg9[%c256, %c0_16] : memref<928x28xbf16, #tpu.memory_space<vmem>>, vector<32x28xbf16>
    tpu.vector_store %arg9[%c256, %c0_16], %28 {strides = array<i32>} : memref<928x28xbf16, #tpu.memory_space<vmem>>, vector<32x28xbf16>,
    %30 = vector.extract_strided_slice %9 {offsets = [0, 252], sizes = [32, 28], strides = [1, 1]} : vector<32x784xbf16> to vector<32x28xbf16>
    %c288 = arith.constant 288 : index
    %c0_17 = arith.constant 0 : index
    %31 = vector.load %arg9[%c288, %c0_17] : memref<928x28xbf16, #tpu.memory_space<vmem>>, vector<32x28xbf16>
    tpu.vector_store %arg9[%c288, %c0_17], %30 {strides = array<i32>} : memref<928x28xbf16, #tpu.memory_space<vmem>>, vector<32x28xbf16>,
    %32 = vector.extract_strided_slice %9 {offsets = [0, 280], sizes = [32, 28], strides = [1, 1]} : vector<32x784xbf16> to vector<32x28xbf16>
    %c320 = arith.constant 320 : index
    %c0_18 = arith.constant 0 : index
    %33 = vector.load %arg9[%c320, %c0_18] : memref<928x28xbf16, #tpu.memory_space<vmem>>, vector<32x28xbf16>
    tpu.vector_store %arg9[%c320, %c0_18], %32 {strides = array<i32>} : memref<928x28xbf16, #tpu.memory_space<vmem>>, vector<32x28xbf16>,
    %34 = vector.extract_strided_slice %9 {offsets = [0, 308], sizes = [32, 28], strides = [1, 1]} : vector<32x784xbf16> to vector<32x28xbf16>
    %c352 = arith.constant 352 : index
    %c0_19 = arith.constant 0 : index
    %35 = vector.load %arg9[%c352, %c0_19] : memref<928x28xbf16, #tpu.memory_space<vmem>>, vector<32x28xbf16>
    tpu.vector_store %arg9[%c352, %c0_19], %34 {strides = array<i32>} : memref<928x28xbf16, #tpu.memory_space<vmem>>, vector<32x28xbf16>,
    %36 = vector.extract_strided_slice %9 {offsets = [0, 336], sizes = [32, 28], strides = [1, 1]} : vector<32x784xbf16> to vector<32x28xbf16>
    %c384 = arith.constant 384 : index
    %c0_20 = arith.constant 0 : index
    %37 = vector.load %arg9[%c384, %c0_20] : memref<928x28xbf16, #tpu.memory_space<vmem>>, vector<32x28xbf16>
    tpu.vector_store %arg9[%c384, %c0_20], %36 {strides = array<i32>} : memref<928x28xbf16, #tpu.memory_space<vmem>>, vector<32x28xbf16>,
    %38 = vector.extract_strided_slice %9 {offsets = [0, 364], sizes = [32, 28], strides = [1, 1]} : vector<32x784xbf16> to vector<32x28xbf16>
    %c416 = arith.constant 416 : index
    %c0_21 = arith.constant 0 : index
    %39 = vector.load %arg9[%c416, %c0_21] : memref<928x28xbf16, #tpu.memory_space<vmem>>, vector<32x28xbf16>
    tpu.vector_store %arg9[%c416, %c0_21], %38 {strides = array<i32>} : memref<928x28xbf16, #tpu.memory_space<vmem>>, vector<32x28xbf16>,
    %40 = vector.extract_strided_slice %9 {offsets = [0, 392], sizes = [32, 28], strides = [1, 1]} : vector<32x784xbf16> to vector<32x28xbf16>
    %c448 = arith.constant 448 : index
    %c0_22 = arith.constant 0 : index
    %41 = vector.load %arg9[%c448, %c0_22] : memref<928x28xbf16, #tpu.memory_space<vmem>>, vector<32x28xbf16>
    tpu.vector_store %arg9[%c448, %c0_22], %40 {strides = array<i32>} : memref<928x28xbf16, #tpu.memory_space<vmem>>, vector<32x28xbf16>,
    %42 = vector.extract_strided_slice %9 {offsets = [0, 420], sizes = [32, 28], strides = [1, 1]} : vector<32x784xbf16> to vector<32x28xbf16>
    %c480 = arith.constant 480 : index
    %c0_23 = arith.constant 0 : index
    %43 = vector.load %arg9[%c480, %c0_23] : memref<928x28xbf16, #tpu.memory_space<vmem>>, vector<32x28xbf16>
    tpu.vector_store %arg9[%c480, %c0_23], %42 {strides = array<i32>} : memref<928x28xbf16, #tpu.memory_space<vmem>>, vector<32x28xbf16>,
    %44 = vector.extract_strided_slice %9 {offsets = [0, 448], sizes = [32, 28], strides = [1, 1]} : vector<32x784xbf16> to vector<32x28xbf16>
    %c512 = arith.constant 512 : index
    %c0_24 = arith.constant 0 : index
    %45 = vector.load %arg9[%c512, %c0_24] : memref<928x28xbf16, #tpu.memory_space<vmem>>, vector<32x28xbf16>
    tpu.vector_store %arg9[%c512, %c0_24], %44 {strides = array<i32>} : memref<928x28xbf16, #tpu.memory_space<vmem>>, vector<32x28xbf16>,
    %46 = vector.extract_strided_slice %9 {offsets = [0, 476], sizes = [32, 28], strides = [1, 1]} : vector<32x784xbf16> to vector<32x28xbf16>
    %c544 = arith.constant 544 : index
    %c0_25 = arith.constant 0 : index
    %47 = vector.load %arg9[%c544, %c0_25] : memref<928x28xbf16, #tpu.memory_space<vmem>>, vector<32x28xbf16>
    tpu.vector_store %arg9[%c544, %c0_25], %46 {strides = array<i32>} : memref<928x28xbf16, #tpu.memory_space<vmem>>, vector<32x28xbf16>,
    %48 = vector.extract_strided_slice %9 {offsets = [0, 504], sizes = [32, 28], strides = [1, 1]} : vector<32x784xbf16> to vector<32x28xbf16>
    %c576 = arith.constant 576 : index
    %c0_26 = arith.constant 0 : index
    %49 = vector.load %arg9[%c576, %c0_26] : memref<928x28xbf16, #tpu.memory_space<vmem>>, vector<32x28xbf16>
    tpu.vector_store %arg9[%c576, %c0_26], %48 {strides = array<i32>} : memref<928x28xbf16, #tpu.memory_space<vmem>>, vector<32x28xbf16>,
    %50 = vector.extract_strided_slice %9 {offsets = [0, 532], sizes = [32, 28], strides = [1, 1]} : vector<32x784xbf16> to vector<32x28xbf16>
    %c608 = arith.constant 608 : index
    %c0_27 = arith.constant 0 : index
    %51 = vector.load %arg9[%c608, %c0_27] : memref<928x28xbf16, #tpu.memory_space<vmem>>, vector<32x28xbf16>
    tpu.vector_store %arg9[%c608, %c0_27], %50 {strides = array<i32>} : memref<928x28xbf16, #tpu.memory_space<vmem>>, vector<32x28xbf16>,
    %52 = vector.extract_strided_slice %9 {offsets = [0, 560], sizes = [32, 28], strides = [1, 1]} : vector<32x784xbf16> to vector<32x28xbf16>
    %c640 = arith.constant 640 : index
    %c0_28 = arith.constant 0 : index
    %53 = vector.load %arg9[%c640, %c0_28] : memref<928x28xbf16, #tpu.memory_space<vmem>>, vector<32x28xbf16>
    tpu.vector_store %arg9[%c640, %c0_28], %52 {strides = array<i32>} : memref<928x28xbf16, #tpu.memory_space<vmem>>, vector<32x28xbf16>,
    %54 = vector.extract_strided_slice %9 {offsets = [0, 588], sizes = [32, 28], strides = [1, 1]} : vector<32x784xbf16> to vector<32x28xbf16>
    %c672 = arith.constant 672 : index
    %c0_29 = arith.constant 0 : index
    %55 = vector.load %arg9[%c672, %c0_29] : memref<928x28xbf16, #tpu.memory_space<vmem>>, vector<32x28xbf16>
    tpu.vector_store %arg9[%c672, %c0_29], %54 {strides = array<i32>} : memref<928x28xbf16, #tpu.memory_space<vmem>>, vector<32x28xbf16>,
    %56 = vector.extract_strided_slice %9 {offsets = [0, 616], sizes = [32, 28], strides = [1, 1]} : vector<32x784xbf16> to vector<32x28xbf16>
    %c704 = arith.constant 704 : index
    %c0_30 = arith.constant 0 : index
    %57 = vector.load %arg9[%c704, %c0_30] : memref<928x28xbf16, #tpu.memory_space<vmem>>, vector<32x28xbf16>
    tpu.vector_store %arg9[%c704, %c0_30], %56 {strides = array<i32>} : memref<928x28xbf16, #tpu.memory_space<vmem>>, vector<32x28xbf16>,
    %58 = vector.extract_strided_slice %9 {offsets = [0, 644], sizes = [32, 28], strides = [1, 1]} : vector<32x784xbf16> to vector<32x28xbf16>
    %c736 = arith.constant 736 : index
    %c0_31 = arith.constant 0 : index
    %59 = vector.load %arg9[%c736, %c0_31] : memref<928x28xbf16, #tpu.memory_space<vmem>>, vector<32x28xbf16>
    tpu.vector_store %arg9[%c736, %c0_31], %58 {strides = array<i32>} : memref<928x28xbf16, #tpu.memory_space<vmem>>, vector<32x28xbf16>,
    %60 = vector.extract_strided_slice %9 {offsets = [0, 672], sizes = [32, 28], strides = [1, 1]} : vector<32x784xbf16> to vector<32x28xbf16>
    %c768 = arith.constant 768 : index
    %c0_32 = arith.constant 0 : index
    %61 = vector.load %arg9[%c768, %c0_32] : memref<928x28xbf16, #tpu.memory_space<vmem>>, vector<32x28xbf16>
    tpu.vector_store %arg9[%c768, %c0_32], %60 {strides = array<i32>} : memref<928x28xbf16, #tpu.memory_space<vmem>>, vector<32x28xbf16>,
    %62 = vector.extract_strided_slice %9 {offsets = [0, 700], sizes = [32, 28], strides = [1, 1]} : vector<32x784xbf16> to vector<32x28xbf16>
    %c832 = arith.constant 832 : index
    %c0_33 = arith.constant 0 : index
    %63 = vector.load %arg9[%c832, %c0_33] : memref<928x28xbf16, #tpu.memory_space<vmem>>, vector<32x28xbf16>
    tpu.vector_store %arg9[%c832, %c0_33], %62 {strides = array<i32>} : memref<928x28xbf16, #tpu.memory_space<vmem>>, vector<32x28xbf16>,
    %64 = vector.extract_strided_slice %9 {offsets = [0, 728], sizes = [32, 28], strides = [1, 1]} : vector<32x784xbf16> to vector<32x28xbf16>
    %c864 = arith.constant 864 : index
    %c0_34 = arith.constant 0 : index
    %65 = vector.load %arg9[%c864, %c0_34] : memref<928x28xbf16, #tpu.memory_space<vmem>>, vector<32x28xbf16>
    tpu.vector_store %arg9[%c864, %c0_34], %64 {strides = array<i32>} : memref<928x28xbf16, #tpu.memory_space<vmem>>, vector<32x28xbf16>,
    %66 = vector.extract_strided_slice %9 {offsets = [0, 756], sizes = [32, 28], strides = [1, 1]} : vector<32x784xbf16> to vector<32x28xbf16>
    %c896 = arith.constant 896 : index
    %c0_35 = arith.constant 0 : index
    %67 = vector.load %arg9[%c896, %c0_35] : memref<928x28xbf16, #tpu.memory_space<vmem>>, vector<32x28xbf16>
    tpu.vector_store %arg9[%c896, %c0_35], %66 {strides = array<i32>} : memref<928x28xbf16, #tpu.memory_space<vmem>>, vector<32x28xbf16>,
    %cst_36 = arith.constant 0.000000e+00 : bf16
    %68 = vector.broadcast %cst_36 : bf16 to vector<32x896xbf16>
    %c352_37 = arith.constant 352 : index
    %c0_38 = arith.constant 0 : index
    %69 = vector.load %arg10[%c352_37, %c0_38] : memref<480x896xbf16, #tpu.memory_space<vmem>>, vector<32x896xbf16>
    tpu.vector_store %arg10[%c352_37, %c0_38], %68 {strides = array<i32>} : memref<480x896xbf16, #tpu.memory_space<vmem>>, vector<32x896xbf16>,
    %c800_39 = arith.constant 800 : index
    %c0_40 = arith.constant 0 : index
    %70 = vector.load %arg9[%c800_39, %c0_40] : memref<928x28xbf16, #tpu.memory_space<vmem>>, vector<128x28xbf16>
    %c0_41 = arith.constant 0 : index
    %c0_42 = arith.constant 0 : index
    %71 = vector.load %arg9[%c0_41, %c0_42] : memref<928x28xbf16, #tpu.memory_space<vmem>>, vector<128x28xbf16>
    %c128_43 = arith.constant 128 : index
    %c0_44 = arith.constant 0 : index
    %72 = vector.load %arg9[%c128_43, %c0_44] : memref<928x28xbf16, #tpu.memory_space<vmem>>, vector<128x28xbf16>
    %73 = tpu.concatenate %70, %71, %72 in 1 : vector<128x28xbf16>, vector<128x28xbf16>, vector<128x28xbf16> -> vector<128x84xbf16>
    %c0_45 = arith.constant 0 : index
    %c0_46 = arith.constant 0 : index
    %74 = vector.load %arg3[%c0_45, %c0_46] : memref<84x896xbf16, #tpu.memory_space<vmem>>, vector<84x896xbf16>
    %cst_47 = arith.constant dense<0.000000e+00> : vector<128x896xf32>
    %75 = tpu.matmul %73, %74, %cst_47 {dimension_numbers = #tpu.dot_dimension_numbers<[1], [0], [0], [1], [0, 0, 1, 1], [], []>} : vector<128x84xbf16>, vector<84x896xbf16>, vector<128x896xf32> -> vector<128x896xf32>
    %cst_48 = arith.constant 0.000000e+00 : f32
    %76 = vector.broadcast %cst_48 : f32 to vector<128x896xf32>
    %77 = arith.cmpf oge, %75, %76 : vector<128x896xf32>
    %cst_49 = arith.constant 2.000000e-01 : f32
    %78 = vector.broadcast %cst_49 : f32 to vector<128x896xf32>
    %79 = arith.mulf %78, %75 : vector<128x896xf32>
    %80 = arith.select %77, %75, %79 : vector<128x896xi1>, vector<128x896xf32>
    %81 = arith.truncf %80 : vector<128x896xf32> to vector<128x896xbf16>
    %c0_50 = arith.constant 0 : index
    %c0_51 = arith.constant 0 : index
    %82 = vector.load %arg10[%c0_50, %c0_51] : memref<480x896xbf16, #tpu.memory_space<vmem>>, vector<128x896xbf16>
    tpu.vector_store %arg10[%c0_50, %c0_51], %81 {strides = array<i32>} : memref<480x896xbf16, #tpu.memory_space<vmem>>, vector<128x896xbf16>,
    %c128_52 = arith.constant 128 : index
    %c0_53 = arith.constant 0 : index
    %83 = vector.load %arg9[%c128_52, %c0_53] : memref<928x28xbf16, #tpu.memory_space<vmem>>, vector<128x28xbf16>
    %c256_54 = arith.constant 256 : index
    %c0_55 = arith.constant 0 : index
    %84 = vector.load %arg9[%c256_54, %c0_55] : memref<928x28xbf16, #tpu.memory_space<vmem>>, vector<128x28xbf16>
    %c384_56 = arith.constant 384 : index
    %c0_57 = arith.constant 0 : index
    %85 = vector.load %arg9[%c384_56, %c0_57] : memref<928x28xbf16, #tpu.memory_space<vmem>>, vector<128x28xbf16>
    %86 = tpu.concatenate %83, %84, %85 in 1 : vector<128x28xbf16>, vector<128x28xbf16>, vector<128x28xbf16> -> vector<128x84xbf16>
    %c0_58 = arith.constant 0 : index
    %c0_59 = arith.constant 0 : index
    %87 = vector.load %arg3[%c0_58, %c0_59] : memref<84x896xbf16, #tpu.memory_space<vmem>>, vector<84x896xbf16>
    %cst_60 = arith.constant dense<0.000000e+00> : vector<128x896xf32>
    %88 = tpu.matmul %86, %87, %cst_60 {dimension_numbers = #tpu.dot_dimension_numbers<[1], [0], [0], [1], [0, 0, 1, 1], [], []>} : vector<128x84xbf16>, vector<84x896xbf16>, vector<128x896xf32> -> vector<128x896xf32>
    %cst_61 = arith.constant 0.000000e+00 : f32
    %89 = vector.broadcast %cst_61 : f32 to vector<128x896xf32>
    %90 = arith.cmpf oge, %88, %89 : vector<128x896xf32>
    %cst_62 = arith.constant 2.000000e-01 : f32
    %91 = vector.broadcast %cst_62 : f32 to vector<128x896xf32>
    %92 = arith.mulf %91, %88 : vector<128x896xf32>
    %93 = arith.select %90, %88, %92 : vector<128x896xi1>, vector<128x896xf32>
    %94 = arith.truncf %93 : vector<128x896xf32> to vector<128x896xbf16>
    %c128_63 = arith.constant 128 : index
    %c0_64 = arith.constant 0 : index
    %95 = vector.load %arg10[%c128_63, %c0_64] : memref<480x896xbf16, #tpu.memory_space<vmem>>, vector<128x896xbf16>
    tpu.vector_store %arg10[%c128_63, %c0_64], %94 {strides = array<i32>} : memref<480x896xbf16, #tpu.memory_space<vmem>>, vector<128x896xbf16>,
    %c384_65 = arith.constant 384 : index
    %c0_66 = arith.constant 0 : index
    %96 = vector.load %arg9[%c384_65, %c0_66] : memref<928x28xbf16, #tpu.memory_space<vmem>>, vector<96x28xbf16>
    %c512_67 = arith.constant 512 : index
    %c0_68 = arith.constant 0 : index
    %97 = vector.load %arg9[%c512_67, %c0_68] : memref<928x28xbf16, #tpu.memory_space<vmem>>, vector<96x28xbf16>
    %c608_69 = arith.constant 608 : index
    %c0_70 = arith.constant 0 : index
    %98 = vector.load %arg9[%c608_69, %c0_70] : memref<928x28xbf16, #tpu.memory_space<vmem>>, vector<96x28xbf16>
    %99 = tpu.concatenate %96, %97, %98 in 1 : vector<96x28xbf16>, vector<96x28xbf16>, vector<96x28xbf16> -> vector<96x84xbf16>
    %c0_71 = arith.constant 0 : index
    %c0_72 = arith.constant 0 : index
    %100 = vector.load %arg3[%c0_71, %c0_72] : memref<84x896xbf16, #tpu.memory_space<vmem>>, vector<84x896xbf16>
    %cst_73 = arith.constant dense<0.000000e+00> : vector<96x896xf32>
    %101 = tpu.matmul %99, %100, %cst_73 {dimension_numbers = #tpu.dot_dimension_numbers<[1], [0], [0], [1], [0, 0, 1, 1], [], []>} : vector<96x84xbf16>, vector<84x896xbf16>, vector<96x896xf32> -> vector<96x896xf32>
    %cst_74 = arith.constant 0.000000e+00 : f32
    %102 = vector.broadcast %cst_74 : f32 to vector<96x896xf32>
    %103 = arith.cmpf oge, %101, %102 : vector<96x896xf32>
    %cst_75 = arith.constant 2.000000e-01 : f32
    %104 = vector.broadcast %cst_75 : f32 to vector<96x896xf32>
    %105 = arith.mulf %104, %101 : vector<96x896xf32>
    %106 = arith.select %103, %101, %105 : vector<96x896xi1>, vector<96x896xf32>
    %107 = arith.truncf %106 : vector<96x896xf32> to vector<96x896xbf16>
    %c256_76 = arith.constant 256 : index
    %c0_77 = arith.constant 0 : index
    %108 = vector.load %arg10[%c256_76, %c0_77] : memref<480x896xbf16, #tpu.memory_space<vmem>>, vector<96x896xbf16>
    tpu.vector_store %arg10[%c256_76, %c0_77], %107 {strides = array<i32>} : memref<480x896xbf16, #tpu.memory_space<vmem>>, vector<96x896xbf16>,
    %c608_78 = arith.constant 608 : index
    %c0_79 = arith.constant 0 : index
    %109 = vector.load %arg9[%c608_78, %c0_79] : memref<928x28xbf16, #tpu.memory_space<vmem>>, vector<96x28xbf16>
    %c704_80 = arith.constant 704 : index
    %c0_81 = arith.constant 0 : index
    %110 = vector.load %arg9[%c704_80, %c0_81] : memref<928x28xbf16, #tpu.memory_space<vmem>>, vector<96x28xbf16>
    %c832_82 = arith.constant 832 : index
    %c0_83 = arith.constant 0 : index
    %111 = vector.load %arg9[%c832_82, %c0_83] : memref<928x28xbf16, #tpu.memory_space<vmem>>, vector<96x28xbf16>
    %112 = tpu.concatenate %109, %110, %111 in 1 : vector<96x28xbf16>, vector<96x28xbf16>, vector<96x28xbf16> -> vector<96x84xbf16>
    %c0_84 = arith.constant 0 : index
    %c0_85 = arith.constant 0 : index
    %113 = vector.load %arg3[%c0_84, %c0_85] : memref<84x896xbf16, #tpu.memory_space<vmem>>, vector<84x896xbf16>
    %cst_86 = arith.constant dense<0.000000e+00> : vector<96x896xf32>
    %114 = tpu.matmul %112, %113, %cst_86 {dimension_numbers = #tpu.dot_dimension_numbers<[1], [0], [0], [1], [0, 0, 1, 1], [], []>} : vector<96x84xbf16>, vector<84x896xbf16>, vector<96x896xf32> -> vector<96x896xf32>
    %cst_87 = arith.constant 0.000000e+00 : f32
    %115 = vector.broadcast %cst_87 : f32 to vector<96x896xf32>
    %116 = arith.cmpf oge, %114, %115 : vector<96x896xf32>
    %cst_88 = arith.constant 2.000000e-01 : f32
    %117 = vector.broadcast %cst_88 : f32 to vector<96x896xf32>
    %118 = arith.mulf %117, %114 : vector<96x896xf32>
    %119 = arith.select %116, %114, %118 : vector<96x896xi1>, vector<96x896xf32>
    %120 = arith.truncf %119 : vector<96x896xf32> to vector<96x896xbf16>
    %c384_89 = arith.constant 384 : index
    %c0_90 = arith.constant 0 : index
    %121 = vector.load %arg10[%c384_89, %c0_90] : memref<480x896xbf16, #tpu.memory_space<vmem>>, vector<96x896xbf16>
    tpu.vector_store %arg10[%c384_89, %c0_90], %120 {strides = array<i32>} : memref<480x896xbf16, #tpu.memory_space<vmem>>, vector<96x896xbf16>,
    %cst_91 = arith.constant 0.000000e+00 : bf16
    %122 = vector.broadcast %cst_91 : bf16 to vector<32x224xbf16>
    %c128_92 = arith.constant 128 : index
    %c0_93 = arith.constant 0 : index
    %123 = vector.load %arg11[%c128_92, %c0_93] : memref<288x224xbf16, #tpu.memory_space<vmem>>, vector<32x224xbf16>
    tpu.vector_store %arg11[%c128_92, %c0_93], %122 {strides = array<i32>} : memref<288x224xbf16, #tpu.memory_space<vmem>>, vector<32x224xbf16>,
    %cst_94 = arith.constant 0.000000e+00 : bf16
    %124 = vector.broadcast %cst_94 : bf16 to vector<32x224xbf16>
    %c256_95 = arith.constant 256 : index
    %c0_96 = arith.constant 0 : index
    %125 = vector.load %arg11[%c256_95, %c0_96] : memref<288x224xbf16, #tpu.memory_space<vmem>>, vector<32x224xbf16>
    tpu.vector_store %arg11[%c256_95, %c0_96], %124 {strides = array<i32>} : memref<288x224xbf16, #tpu.memory_space<vmem>>, vector<32x224xbf16>,
    %c352_97 = arith.constant 352 : index
    %c0_98 = arith.constant 0 : index
    %126 = vector.load %arg10[%c352_97, %c0_98] : memref<480x896xbf16, #tpu.memory_space<vmem>>, vector<128x896xbf16>
    %c0_99 = arith.constant 0 : index
    %c0_100 = arith.constant 0 : index
    %127 = vector.load %arg10[%c0_99, %c0_100] : memref<480x896xbf16, #tpu.memory_space<vmem>>, vector<128x896xbf16>
    %c128_101 = arith.constant 128 : index
    %c0_102 = arith.constant 0 : index
    %128 = vector.load %arg10[%c128_101, %c0_102] : memref<480x896xbf16, #tpu.memory_space<vmem>>, vector<128x896xbf16>
    %129 = tpu.concatenate %126, %127, %128 in 1 : vector<128x896xbf16>, vector<128x896xbf16>, vector<128x896xbf16> -> vector<128x2688xbf16>
    %c0_103 = arith.constant 0 : index
    %c0_104 = arith.constant 0 : index
    %130 = vector.load %arg4[%c0_103, %c0_104] : memref<2688x224xbf16, #tpu.memory_space<vmem>>, vector<2688x224xbf16>
    %cst_105 = arith.constant dense<0.000000e+00> : vector<128x224xf32>
    %131 = tpu.matmul %129, %130, %cst_105 {dimension_numbers = #tpu.dot_dimension_numbers<[1], [0], [0], [1], [0, 0, 1, 1], [], []>} : vector<128x2688xbf16>, vector<2688x224xbf16>, vector<128x224xf32> -> vector<128x224xf32>
    %cst_106 = arith.constant 0.000000e+00 : f32
    %132 = vector.broadcast %cst_106 : f32 to vector<128x224xf32>
    %133 = arith.cmpf oge, %131, %132 : vector<128x224xf32>
    %cst_107 = arith.constant 2.000000e-01 : f32
    %134 = vector.broadcast %cst_107 : f32 to vector<128x224xf32>
    %135 = arith.mulf %134, %131 : vector<128x224xf32>
    %136 = arith.select %133, %131, %135 : vector<128x224xi1>, vector<128x224xf32>
    %137 = arith.truncf %136 : vector<128x224xf32> to vector<128x224xbf16>
    %c0_108 = arith.constant 0 : index
    %c0_109 = arith.constant 0 : index
    %138 = vector.load %arg11[%c0_108, %c0_109] : memref<288x224xbf16, #tpu.memory_space<vmem>>, vector<128x224xbf16>
    tpu.vector_store %arg11[%c0_108, %c0_109], %137 {strides = array<i32>} : memref<288x224xbf16, #tpu.memory_space<vmem>>, vector<128x224xbf16>,
    %c128_110 = arith.constant 128 : index
    %c0_111 = arith.constant 0 : index
    %139 = vector.load %arg10[%c128_110, %c0_111] : memref<480x896xbf16, #tpu.memory_space<vmem>>, vector<96x896xbf16>
    %c256_112 = arith.constant 256 : index
    %c0_113 = arith.constant 0 : index
    %140 = vector.load %arg10[%c256_112, %c0_113] : memref<480x896xbf16, #tpu.memory_space<vmem>>, vector<96x896xbf16>
    %c384_114 = arith.constant 384 : index
    %c0_115 = arith.constant 0 : index
    %141 = vector.load %arg10[%c384_114, %c0_115] : memref<480x896xbf16, #tpu.memory_space<vmem>>, vector<96x896xbf16>
    %142 = tpu.concatenate %139, %140, %141 in 1 : vector<96x896xbf16>, vector<96x896xbf16>, vector<96x896xbf16> -> vector<96x2688xbf16>
    %c0_116 = arith.constant 0 : index
    %c0_117 = arith.constant 0 : index
    %143 = vector.load %arg4[%c0_116, %c0_117] : memref<2688x224xbf16, #tpu.memory_space<vmem>>, vector<2688x224xbf16>
    %cst_118 = arith.constant dense<0.000000e+00> : vector<96x224xf32>
    %144 = tpu.matmul %142, %143, %cst_118 {dimension_numbers = #tpu.dot_dimension_numbers<[1], [0], [0], [1], [0, 0, 1, 1], [], []>} : vector<96x2688xbf16>, vector<2688x224xbf16>, vector<96x224xf32> -> vector<96x224xf32>
    %cst_119 = arith.constant 0.000000e+00 : f32
    %145 = vector.broadcast %cst_119 : f32 to vector<96x224xf32>
    %146 = arith.cmpf oge, %144, %145 : vector<96x224xf32>
    %cst_120 = arith.constant 2.000000e-01 : f32
    %147 = vector.broadcast %cst_120 : f32 to vector<96x224xf32>
    %148 = arith.mulf %147, %144 : vector<96x224xf32>
    %149 = arith.select %146, %144, %148 : vector<96x224xi1>, vector<96x224xf32>
    %150 = arith.truncf %149 : vector<96x224xf32> to vector<96x224xbf16>
    %c160_121 = arith.constant 160 : index
    %c0_122 = arith.constant 0 : index
    %151 = vector.load %arg11[%c160_121, %c0_122] : memref<288x224xbf16, #tpu.memory_space<vmem>>, vector<96x224xbf16>
    tpu.vector_store %arg11[%c160_121, %c0_122], %150 {strides = array<i32>} : memref<288x224xbf16, #tpu.memory_space<vmem>>, vector<96x224xbf16>,
    %c128_123 = arith.constant 128 : index
    %c0_124 = arith.constant 0 : index
    %152 = vector.load %arg11[%c128_123, %c0_124] : memref<288x224xbf16, #tpu.memory_space<vmem>>, vector<128x224xbf16>
    %c0_125 = arith.constant 0 : index
    %c0_126 = arith.constant 0 : index
    %153 = vector.load %arg11[%c0_125, %c0_126] : memref<288x224xbf16, #tpu.memory_space<vmem>>, vector<128x224xbf16>
    %c160_127 = arith.constant 160 : index
    %c0_128 = arith.constant 0 : index
    %154 = vector.load %arg11[%c160_127, %c0_128] : memref<288x224xbf16, #tpu.memory_space<vmem>>, vector<128x224xbf16>
    %155 = tpu.concatenate %152, %153, %154 in 1 : vector<128x224xbf16>, vector<128x224xbf16>, vector<128x224xbf16> -> vector<128x672xbf16>
    %c0_129 = arith.constant 0 : index
    %c0_130 = arith.constant 0 : index
    %156 = vector.load %arg5[%c0_129, %c0_130] : memref<672x64xbf16, #tpu.memory_space<vmem>>, vector<672x64xbf16>
    %cst_131 = arith.constant dense<0.000000e+00> : vector<128x64xf32>
    %157 = tpu.matmul %155, %156, %cst_131 {dimension_numbers = #tpu.dot_dimension_numbers<[1], [0], [0], [1], [0, 0, 1, 1], [], []>} : vector<128x672xbf16>, vector<672x64xbf16>, vector<128x64xf32> -> vector<128x64xf32>
    %cst_132 = arith.constant 0.000000e+00 : f32
    %158 = vector.broadcast %cst_132 : f32 to vector<128x64xf32>
    %159 = arith.cmpf oge, %157, %158 : vector<128x64xf32>
    %cst_133 = arith.constant 2.000000e-01 : f32
    %160 = vector.broadcast %cst_133 : f32 to vector<128x64xf32>
    %161 = arith.mulf %160, %157 : vector<128x64xf32>
    %162 = arith.select %159, %157, %161 : vector<128x64xi1>, vector<128x64xf32>
    %c0_134 = arith.constant 0 : index
    %c0_135 = arith.constant 0 : index
    %163 = vector.load %arg6[%c0_134, %c0_135] : memref<1x64xf32, #tpu.memory_space<vmem>>, vector<1x64xf32>
    %164 = vector.broadcast %163 : vector<1x64xf32> to vector<128x64xf32>
    %165 = arith.mulf %162, %164 : vector<128x64xf32>
    %cst_136 = arith.constant dense<0.000000e+00> : vector<128xf32>
    %166 = vector.multi_reduction <add>, %165, %cst_136 [1] : vector<128x64xf32> to vector<128xf32>
    %167 = vector.shape_cast %166 : vector<128xf32> to vector<128x1xf32>
    %168 = vector.extract_strided_slice %167 {offsets = [0, 0], sizes = [32, 1], strides = [1, 1]} : vector<128x1xf32> to vector<32x1xf32>
    %169 = vector.extract_strided_slice %167 {offsets = [32, 0], sizes = [32, 1], strides = [1, 1]} : vector<128x1xf32> to vector<32x1xf32>
    %170 = arith.addf %168, %169 : vector<32x1xf32>
    %171 = vector.extract_strided_slice %167 {offsets = [64, 0], sizes = [32, 1], strides = [1, 1]} : vector<128x1xf32> to vector<32x1xf32>
    %172 = arith.addf %170, %171 : vector<32x1xf32>
    %173 = vector.extract_strided_slice %167 {offsets = [96, 0], sizes = [32, 1], strides = [1, 1]} : vector<128x1xf32> to vector<32x1xf32>
    %174 = arith.addf %172, %173 : vector<32x1xf32>
    %c0_137 = arith.constant 0 : index
    %c0_138 = arith.constant 0 : index
    %175 = vector.load %arg7[%c0_137, %c0_138] : memref<1x1xf32, #tpu.memory_space<vmem>>, vector<1x1xf32>
    %176 = vector.broadcast %175 : vector<1x1xf32> to vector<32x1xf32>
    %177 = arith.addf %174, %176 : vector<32x1xf32>
    %c0_139 = arith.constant 0 : index
    %c0_140 = arith.constant 0 : index
    %178 = vector.load %arg8[%c0_139, %c0_140] : memref<32x1xf32, #tpu.memory_space<vmem>>, vector<32x1xf32>
    tpu.vector_store %arg8[%c0_139, %c0_140], %177 {strides = array<i32>} : memref<32x1xf32, #tpu.memory_space<vmem>>, vector<32x1xf32>,
    return
  }
  func.func @transform_0(%arg0: i32) -> (i32, i32) {
    %c0_i32 = arith.constant 0 : i32
    %c0_i32_0 = arith.constant 0 : i32
    return %arg0, %c0_i32 : i32, i32
  }
  func.func @transform_1(%arg0: i32) -> (i32, i32) {
    %c0_i32 = arith.constant 0 : i32
    %c0_i32_0 = arith.constant 0 : i32
    %c0_i32_1 = arith.constant 0 : i32
    return %c0_i32, %c0_i32_0 : i32, i32
  }
  func.func @transform_2(%arg0: i32) -> (i32, i32) {
    %c0_i32 = arith.constant 0 : i32
    %c0_i32_0 = arith.constant 0 : i32
    %c0_i32_1 = arith.constant 0 : i32
    return %c0_i32, %c0_i32_0 : i32, i32
  }
  func.func @transform_3(%arg0: i32) -> (i32, i32) {
    %c0_i32 = arith.constant 0 : i32
    %c0_i32_0 = arith.constant 0 : i32
    %c0_i32_1 = arith.constant 0 : i32
    return %c0_i32, %c0_i32_0 : i32, i32
  }
  func.func @transform_4(%arg0: i32) -> (i32, i32) {
    %c0_i32 = arith.constant 0 : i32
    %c0_i32_0 = arith.constant 0 : i32
    %c0_i32_1 = arith.constant 0 : i32
    return %c0_i32, %c0_i32_0 : i32, i32
  }
  func.func @transform_5(%arg0: i32) -> (i32, i32) {
    %c0_i32 = arith.constant 0 : i32
    %c0_i32_0 = arith.constant 0 : i32
    %c0_i32_1 = arith.constant 0 : i32
    return %c0_i32, %c0_i32_0 : i32, i32
  }
  func.func @transform_6(%arg0: i32) -> (i32, i32) {
    %c0_i32 = arith.constant 0 : i32
    %c0_i32_0 = arith.constant 0 : i32
    %c0_i32_1 = arith.constant 0 : i32
    return %c0_i32, %c0_i32_0 : i32, i32
  }
  func.func @transform_7(%arg0: i32) -> (i32, i32) {
    %c0_i32 = arith.constant 0 : i32
    %c0_i32_0 = arith.constant 0 : i32
    return %arg0, %c0_i32 : i32, i32
  }
}

</mosaic_0001>

<bundles_post_ra>
// kernel: discriminator_forward.1
= control target key start
LH: loop header
LB: loop body
LE: loop exit
PB: predicated region body
PF: predicated region fallthrough
CT: control target
= control target key end

     0   :  { %v19787_v1 = vmov 0   ;;  %vm2271_vm0 = vcmask 261120   ;;  %vm3208_vm1 = vcmask 228352   ;;  %s19789_s8 = smov 100   ;;  %s19790_s9 = smov 72   ;;  %s26599_s1 = inlined_call_operand.vmem [shape: bf16[800,784], index: 1, kind: input, shape index: {}]   ;;  %s26600_s0 = inlined_call_operand.vmem [shape: f32[32,800], index: 0, kind: input, shape index: {}]   ;;  %s26601_s2 = inlined_call_operand.vmem [shape: bf16[84,896], index: 2, kind: input, shape index: {}]   ;;  %s26602_s3 = inlined_call_operand.vmem [shape: bf16[2688,224], index: 3, kind: input, shape index: {}]   ;;  %s26603_s4 = inlined_call_operand.vmem [shape: bf16[672,64], index: 4, kind: input, shape index: {}]   ;;  %s26604_s5 = inlined_call_operand.vmem [shape: f32[1,64], index: 5, kind: input, shape index: {}]   ;;  %s26605_s6 = inlined_call_operand.<no memory space> [shape: f32[1,1], index: 6, kind: input, shape index: {}]   ;;  %s26606_s7 = inlined_call_operand.vmem [shape: f32[32,1], index: 7, kind: output, shape index: {}]  }
   0x1   :  { %v18460_v0 = vld [vmem:[%s26599_s1 + $0x4] ss:$28 sps:$4 sm:$0xff]   ;;  %2469 = vmatprep.mubr.bf16.mxu1 %v19787_v1  ;;  %8162 = vst [vmem:[#allocation4 + $0x80] sm:$0xff] %v19787_v1  ;;  %v18466_v5 = vld [vmem:[%s26599_s1 + $0x3c] ss:$28 sps:$4 sm:$0xff]   ;;  %v35_v13 = vld [vmem:[%s26600_s0 + $0x30] sm:$0xff] }
   0x2   :  { %v18462_v2 = vld [vmem:[%s26599_s1 + $0xa84] ss:$28 sps:$4 sm:$0xff]   ;;  %2278 = vmatprep.subr.bf16.mxu0 %v18460_v0  ;;  %v18468_v6 = vld [vmem:[%s26599_s1 + $0xabc] ss:$28 sps:$4 sm:$0xff]   ;;  %v18472_v9 = vld [vmem:[%s26599_s1 + $0x74] ss:$28 sps:$4 sm:$0xff]  }
   0x3   :  { %v18464_v3 = vld [vmem:[%s26599_s1] ss:$28 sps:$4 sm:$0xff]   ;;  %2437 = vmatprep.subr.bf16.mxu1 %v18462_v2  ;;  %v18470_v7 = vld [vmem:[%s26599_s1 + $0x38] ss:$28 sps:$4 sm:$0xff]   ;;  %v18474_v10 = vld [vmem:[%s26599_s1 + $0x8] ss:$28 sps:$4 sm:$0xff]  }
   0x4   :  { %v18465_v4 = vld [vmem:[%s26599_s1 + $0xa80] ss:$28 sps:$4 sm:$0xff]   ;;  %2279 = vmatpush1.bf16.msra.mxu0 %v18464_v3  ;;  %v18471_v8 = vld [vmem:[%s26599_s1 + $0xab8] ss:$28 sps:$4 sm:$0xff]   ;;  %v18476_v11 = vld [vmem:[%s26599_s1 + $0xc] ss:$28 sps:$4 sm:$0xff]  }
   0x5   :  { %2438 = vmatpush1.bf16.msra.mxu1 %v18465_v4  ;;  %2280 = vmatprep.subr.bf16.mxu0 %v18466_v5  ;;  %v18477_v12 = vld [vmem:[%s26599_s1 + $0x70] ss:$28 sps:$4 sm:$0xff]   ;;  %v18482_v17 = vld [vmem:[%s26599_s1 + $0x44] ss:$28 sps:$4 sm:$0xff]   ;;  %v18488_v21 = vld [vmem:[%s26599_s1 + $0x7c] ss:$28 sps:$4 sm:$0xff]  }
   0x6   :  { %2439 = vmatprep.subr.bf16.mxu1 %v18468_v6  ;;  %v42_v14 = vld [vmem:[%s26600_s0 + $0x68] sm:$0xff]  ;;  %v18480_v18 = vld [vmem:[%s26599_s1 + $0x40] ss:$28 sps:$4 sm:$0xff]   ;;  %v18486_v22 = vld [vmem:[%s26599_s1 + $0x78] ss:$28 sps:$4 sm:$0xff]   ;;  %s19791_s10 = smov 116  }
   0x7   :  { %v19899_v15 = vpack.c.bf16 %v42_v14, %v35_v13  ;;  %v18478_v16 = vld [vmem:[%s26599_s1 + $0xac] ss:$28 sps:$4 sm:$0xff]   ;;  %v18484_v20 = vld [vmem:[%s26599_s1 + $0xe4] ss:$28 sps:$4 sm:$0xff]   ;;  %v18490_v24 = vld [vmem:[%s26599_s1 + $0x11c] ss:$28 sps:$4 sm:$0xff]  }
   0x8   :  { %2281 = vmatpush1.bf16.msra.mxu0 %v18470_v7  ;;  %v18483_v19 = vld [vmem:[%s26599_s1 + $0xa8] ss:$28 sps:$4 sm:$0xff]   ;;  %v18489_v23 = vld [vmem:[%s26599_s1 + $0xe0] ss:$28 sps:$4 sm:$0xff]   ;;  %v18494_v25 = vld [vmem:[%s26599_s1 + $0xb4] ss:$28 sps:$4 sm:$0xff]  }
   0x9   :  { %2440 = vmatpush1.bf16.msra.mxu1 %v18471_v8  ;;  %2282 = vmatprep.subr.bf16.mxu0 %v18472_v9  ;;  %v18492_v26 = vld [vmem:[%s26599_s1 + $0xb0] ss:$28 sps:$4 sm:$0xff]   ;;  %v18495_v27 = vld [vmem:[%s26599_s1 + $0x118] ss:$28 sps:$4 sm:$0xff]   ;;  %v18498_v30 = vld [vmem:[%s26599_s1 + $0xe8] ss:$28 sps:$4 sm:$0xff]  }
   0xa   :  { %2490 = vmatprep.subr.bf16.mxu1 %v18476_v11  ;;  %v18496_v28 = vld [vmem:[%s26599_s1 + $0x154] ss:$28 sps:$4 sm:$0xff]   ;;  %v18500_v29 = vld [vmem:[%s26599_s1 + $0xec] ss:$28 sps:$4 sm:$0xff]   ;;  %v18506_v33 = vld [vmem:[%s26599_s1 + $0x124] ss:$28 sps:$4 sm:$0xff]  }
   0xb   :  { %v18501_v31 = vld [vmem:[%s26599_s1 + $0x150] ss:$28 sps:$4 sm:$0xff]   ;;  %v18504_v34 = vld [vmem:[%s26599_s1 + $0x120] ss:$28 sps:$4 sm:$0xff]   ;;  %v18507_v35 = vld [vmem:[%s26599_s1 + $0x188] ss:$28 sps:$4 sm:$0xff]  }
   0xc   :  { %16370 = vmatmul.mubr.msk.bf16.vlgmr.msra.gmra.mrb[0].mxu1 %vm2271_vm0, %v19899_v15  ;;  %2283 = vmatpush1.bf16.msra.mxu0 %v18477_v12  ;;  %v18502_v32 = vld [vmem:[%s26599_s1 + $0x18c] ss:$28 sps:$4 sm:$0xff]   ;;  %v18508_v36 = vld [vmem:[%s26599_s1 + $0x1c4] ss:$28 sps:$4 sm:$0xff]   ;;  %v18512_v37 = vld [vmem:[%s26599_s1 + $0x15c] ss:$28 sps:$4 sm:$0xff]  }
   0xd   :  { %2491 = vmatpush1.bf16.msra.mxu1 %v18474_v10  ;;  %2284 = vmatprep.subr.bf16.mxu0 %v18478_v16  ;;  %v18510_v38 = vld [vmem:[%s26599_s1 + $0x158] ss:$28 sps:$4 sm:$0xff]   ;;  %v18513_v39 = vld [vmem:[%s26599_s1 + $0x1c0] ss:$28 sps:$4 sm:$0xff]   ;;  %v18516_v42 = vld [vmem:[%s26599_s1 + $0x190] ss:$28 sps:$4 sm:$0xff]  }
   0xe   :  { %2492 = vmatprep.subr.bf16.mxu1 %v18482_v17  ;;  %2479 = vmatprep.mubr.bf16.mxu1 %v19787_v1  ;;  %v18514_v40 = vld [vmem:[%s26599_s1 + $0x1fc] ss:$28 sps:$4 sm:$0xff]   ;;  %v18518_v41 = vld [vmem:[%s26599_s1 + $0x194] ss:$28 sps:$4 sm:$0xff]   ;;  %v18524_v45 = vld [vmem:[%s26599_s1 + $0x1cc] ss:$28 sps:$4 sm:$0xff]  }
   0xf   :  { %v18519_v43 = vld [vmem:[%s26599_s1 + $0x1f8] ss:$28 sps:$4 sm:$0xff]   ;;  %v18522_v46 = vld [vmem:[%s26599_s1 + $0x1c8] ss:$28 sps:$4 sm:$0xff]   ;;  %v18525_v47 = vld [vmem:[%s26599_s1 + $0x230] ss:$28 sps:$4 sm:$0xff]  }
  0x10   :  { %2285 = vmatpush1.bf16.msra.mxu0 %v18483_v19  ;;  %v18520_v44 = vld [vmem:[%s26599_s1 + $0x234] ss:$28 sps:$4 sm:$0xff]   ;;  %v18526_v48 = vld [vmem:[%s26599_s1 + $0x26c] ss:$28 sps:$4 sm:$0xff]   ;;  %v18530_v49 = vld [vmem:[%s26599_s1 + $0x204] ss:$28 sps:$4 sm:$0xff]  }
  0x11   :  { %2493 = vmatpush1.bf16.msra.mxu1 %v18480_v18  ;;  %2286 = vmatprep.subr.bf16.mxu0 %v18484_v20  ;;  %v18528_v50 = vld [vmem:[%s26599_s1 + $0x200] ss:$28 sps:$4 sm:$0xff]   ;;  %v18531_v51 = vld [vmem:[%s26599_s1 + $0x268] ss:$28 sps:$4 sm:$0xff]   ;;  %v18534_v57 = vld [vmem:[%s26599_s1 + $0x238] ss:$28 sps:$4 sm:$0xff]  }
  0x12   :  { %2494 = vmatprep.subr.bf16.mxu1 %v18488_v21  ;;  %v30_v52 = vld [vmem:[%s26600_s0 + $0x8] sm:$0xff]  ;;  %v37_v53 = vld [vmem:[%s26600_s0 + $0x40] sm:$0xff]  ;;  %v18536_v56 = vld [vmem:[%s26599_s1 + $0x23c] ss:$28 sps:$4 sm:$0xff]   ;;  %s19792_s11 = smov 44   ;;  %s19793_s12 = smov 88  }
  0x13   :  { %v18532_v54 = vld [vmem:[%s26599_s1 + $0x2a4] ss:$28 sps:$4 sm:$0xff]   ;;  %v20020_v55 = vpack.c.bf16 %v37_v53, %v30_v52  ;;  %v56_v60 = vld [vmem:[%s26600_s0 + $0xd8] sm:$0xff]  ;;  %v18542_v63 = vld [vmem:[%s26599_s1 + $0x274] ss:$28 sps:$4 sm:$0xff]   ;;  %s19794_s13 = smov 28  }
  0x14   :  { %2287 = vmatpush1.bf16.msra.mxu0 %v18489_v23  ;;  %v18537_v58 = vld [vmem:[%s26599_s1 + $0x2a0] ss:$28 sps:$4 sm:$0xff]   ;;  %v18540_v0 = vld [vmem:[%s26599_s1 + $0x270] ss:$28 sps:$4 sm:$0xff]   ;;  %v18543_v1 = vld [vmem:[%s26599_s1 + $0x2d8] ss:$28 sps:$4 sm:$0xff]  }
  0x15   :  { %2495 = vmatpush1.bf16.msra.mxu1 %v18486_v22  ;;  %2288 = vmatprep.subr.bf16.mxu0 %v18490_v24  ;;  %v49_v59 = vld [vmem:[%s26600_s0 + $0xa0] sm:$0xff]  ;;  %v18538_v61 = vld [vmem:[%s26599_s1 + $0x2dc] ss:$28 sps:$4 sm:$0xff]   ;;  %v18544_v2 = vld [vmem:[%s26599_s1 + $0x314] ss:$28 sps:$4 sm:$0xff]   ;;  %s19795_s14 = smov 60  }
  0x16   :  { %2496 = vmatprep.subr.bf16.mxu1 %v18494_v25  ;;  %2310 = vmatprep.mubr.bf16.mxu0 %v20020_v55  ;;  %v20041_v62 = vpack.c.bf16 %v56_v60, %v49_v59  ;;  %v18548_v3 = vld [vmem:[%s26599_s1 + $0x2ac] ss:$28 sps:$4 sm:$0xff]   ;;  %v18554_v7 = vld [vmem:[%s26599_s1 + $0x2e4] ss:$28 sps:$4 sm:$0xff]   ;;  %v36_v12 = vld [vmem:[%s26600_s0 + $0x38] sm:$0xff]  ;;  %s19799_s16 = smov 12  }
  0x17   :  { %v18546_v4 = vld [vmem:[%s26599_s1 + $0x2a8] ss:$28 sps:$4 sm:$0xff]   ;;  %v18549_v5 = vld [vmem:[%s26599_s1 + $0x310] ss:$28 sps:$4 sm:$0xff]   ;;  %v18552_v8 = vld [vmem:[%s26599_s1 + $0x2e0] ss:$28 sps:$4 sm:$0xff]  }
  0x18   :  { %2289 = vmatpush1.bf16.msra.mxu0 %v18495_v27  ;;  %16371 = vmatmul.mubr.msk.bf16.gmra.mrb[4].mxu1 %vm2271_vm0, %v20041_v62  ;;  %v18550_v6 = vld [vmem:[%s26599_s1 + $0x34c] ss:$28 sps:$4 sm:$0xff]   ;;  %v18558_v10 = vld [vmem:[%s26599_s1 + $0x384] ss:$28 sps:$4 sm:$0xff]   ;;  %v18561_v13 = vld [vmem:[%s26599_s1 + $0x31c] ss:$28 sps:$4 sm:$0xff]  }
  0x19   :  { %2497 = vmatpush1.bf16.msra.mxu1 %v18492_v26  ;;  %2290 = vmatprep.subr.bf16.mxu0 %v18496_v28  ;;  %v18555_v9 = vld [vmem:[%s26599_s1 + $0x348] ss:$28 sps:$4 sm:$0xff]   ;;  %v18556_v14 = vld [vmem:[%s26599_s1 + $0x380] ss:$28 sps:$4 sm:$0xff]   ;;  %v18559_v16 = vld [vmem:[%s26599_s1 + $0x318] ss:$28 sps:$4 sm:$0xff]  }
  0x1a   :  { %2498 = vmatprep.subr.bf16.mxu1 %v18500_v29  ;;  %2522 = vmatprep.mubr.bf16.mxu1 %v20020_v55  ;;  %v29_v11 = vld [vmem:[%s26600_s0] sm:$0xff]  ;;  %v18564_v18 = vld [vmem:[%s26599_s1 + $0x3bc] ss:$28 sps:$4 sm:$0xff]   ;;  %v18567_v19 = vld [vmem:[%s26599_s1 + $0x354] ss:$28 sps:$4 sm:$0xff]   ;;  %s19800_s26 = smov 32  }
  0x1b   :  { %v20097_v17 = vpack.c.bf16 %v36_v12, %v29_v11  ;;  %v18562_v20 = vld [vmem:[%s26599_s1 + $0x3b8] ss:$28 sps:$4 sm:$0xff]   ;;  %v18565_v21 = vld [vmem:[%s26599_s1 + $0x350] ss:$28 sps:$4 sm:$0xff]   ;;  %v18571_v25 = vld [vmem:[%s26599_s1 + $0x388] ss:$28 sps:$4 sm:$0xff]  }
  0x1c   :  { %2291 = vmatpush1.bf16.msra.mxu0 %v18501_v31  ;;  %v18570_v22 = vld [vmem:[%s26599_s1 + $0x3f4] ss:$28 sps:$4 sm:$0xff]   ;;  %v18573_v23 = vld [vmem:[%s26599_s1 + $0x38c] ss:$28 sps:$4 sm:$0xff]   ;;  %v18579_v27 = vld [vmem:[%s26599_s1 + $0x3c4] ss:$28 sps:$4 sm:$0xff]  }
  0x1d   :  { %2499 = vmatpush1.bf16.msra.mxu1 %v18498_v30  ;;  %2292 = vmatprep.subr.bf16.mxu0 %v18502_v32  ;;  %v18568_v24 = vld [vmem:[%s26599_s1 + $0x3f0] ss:$28 sps:$4 sm:$0xff]   ;;  %v18574_v28 = vld [vmem:[%s26599_s1 + $0x428] ss:$28 sps:$4 sm:$0xff]   ;;  %v18577_v29 = vld [vmem:[%s26599_s1 + $0x3c0] ss:$28 sps:$4 sm:$0xff]  }
  0x1e   :  { %2500 = vmatprep.subr.bf16.mxu1 %v18506_v33  ;;  %v18576_v26 = vld [vmem:[%s26599_s1 + $0x42c] ss:$28 sps:$4 sm:$0xff]   ;;  %v18582_v30 = vld [vmem:[%s26599_s1 + $0x464] ss:$28 sps:$4 sm:$0xff]   ;;  %v18585_v31 = vld [vmem:[%s26599_s1 + $0x3fc] ss:$28 sps:$4 sm:$0xff]  }
  0x1f   :  { %v18580_v32 = vld [vmem:[%s26599_s1 + $0x460] ss:$28 sps:$4 sm:$0xff]   ;;  %v18583_v33 = vld [vmem:[%s26599_s1 + $0x3f8] ss:$28 sps:$4 sm:$0xff]   ;;  %v18598_v53 = vld [vmem:[%s26599_s1 + $0x508] ss:$28 sps:$4 sm:$0xff]  }
  0x20   :  { %2293 = vmatpush1.bf16.msra.mxu0 %v18507_v35  ;;  %v18591_v35 = vld [vmem:[%s26599_s1 + $0x434] ss:$28 sps:$4 sm:$0xff]   ;;  %v18612_v60 = vld [vmem:[%s26599_s1 + $0x57c] ss:$28 sps:$4 sm:$0xff]   ;;  %s19803_s17 = smov 20   ;;  %s19804_s18 = smov 104  }
  0x21   :  { %2501 = vmatpush1.bf16.msra.mxu1 %v18504_v34  ;;  %2294 = vmatprep.subr.bf16.mxu0 %v18508_v36  ;;  %v18588_v34 = vld [vmem:[%s26599_s1 + $0x49c] ss:$28 sps:$4 sm:$0xff]   ;;  %s19805_s19 = smov 120   ;;  %s19806_s20 = smov 76  }
  0x22   :  { %2502 = vmatprep.subr.bf16.mxu1 %v18512_v37  ;;  %v44_v36 = vld [vmem:[%s26600_s0 + $0x78] sm:$0xff]  ;;  %v51_v37 = vld [vmem:[%s26600_s0 + $0xb0] sm:$0xff]  ;;  %s19807_s21 = smov 92   ;;  %s19815_s27 = smov 124  }
  0x23   :  { %v18607_v59 = vld [vmem:[%s26599_s1 + $0x4d8] ss:$28 sps:$4 sm:$0xff]   ;;  %v18628_v11 = vld [vmem:[%s26599_s1 + $0x620] ss:$28 sps:$4 sm:$0xff]  }
  0x24   :  { %2295 = vmatpush1.bf16.msra.mxu0 %v18513_v39  ;;  %v18589_v39 = vld [vmem:[%s26599_s1 + $0x430] ss:$28 sps:$4 sm:$0xff]   ;;  %v18631_v12 = vld [vmem:[%s26599_s1 + $0x5b8] ss:$28 sps:$4 sm:$0xff]  }
  0x25   :  { %2503 = vmatpush1.bf16.msra.mxu1 %v18510_v38  ;;  %2296 = vmatprep.subr.bf16.mxu0 %v18514_v40  ;;  %v18586_v38 = vld [vmem:[%s26599_s1 + $0x498] ss:$28 sps:$4 sm:$0xff]   ;;  %v20167_v40 = vpack.c.bf16 %v51_v37, %v44_v36  ;;  %v53_v36 = vld [vmem:[%s26600_s0 + $0xc0] sm:$0xff] }
  0x26   :  { %2504 = vmatprep.subr.bf16.mxu1 %v18518_v41  ;;  %v18594_v41 = vld [vmem:[%s26599_s1 + $0x4d4] ss:$28 sps:$4 sm:$0xff]  }
  0x27   :  { %v18663_v37 = vld [vmem:[%s26599_s1 + $0x6d4] ss:$28 sps:$4 sm:$0xff]  }
  0x28   :  { %2297 = vmatpush1.bf16.msra.mxu0 %v18519_v43  ;;  %v43_v43 = vld [vmem:[%s26600_s0 + $0x70] sm:$0xff] }
  0x29   :  { %2505 = vmatpush1.bf16.msra.mxu1 %v18516_v42  ;;  %2298 = vmatprep.subr.bf16.mxu0 %v18520_v44  ;;  %v18597_v42 = vld [vmem:[%s26599_s1 + $0x46c] ss:$28 sps:$4 sm:$0xff]  }
  0x2a   :  { %2506 = vmatprep.subr.bf16.mxu1 %v18524_v45  ;;  %v50_v44 = vld [vmem:[%s26600_s0 + $0xa8] sm:$0xff] }
  0x2b   :  { %v18592_v45 = vld [vmem:[%s26599_s1 + $0x4d0] ss:$28 sps:$4 sm:$0xff]  }
  0x2c   :  { %2299 = vmatpush1.bf16.msra.mxu0 %v18525_v47  ;;  %v20189_v47 = vpack.c.bf16 %v50_v44, %v43_v43  ;;  %v45_v43 = vld [vmem:[%s26600_s0 + $0x80] sm:$0xff]  ;;  %v52_v44 = vld [vmem:[%s26600_s0 + $0xb8] sm:$0xff] }
  0x2d   :  { %2507 = vmatpush1.bf16.msra.mxu1 %v18522_v46  ;;  %2300 = vmatprep.subr.bf16.mxu0 %v18526_v48  ;;  %v18595_v46 = vld [vmem:[%s26599_s1 + $0x468] ss:$28 sps:$4 sm:$0xff]  }
  0x2e   :  { %2508 = vmatprep.subr.bf16.mxu1 %v18530_v49  ;;  %v18600_v48 = vld [vmem:[%s26599_s1 + $0x50c] ss:$28 sps:$4 sm:$0xff]   ;;  %v18603_v49 = vld [vmem:[%s26599_s1 + $0x4a4] ss:$28 sps:$4 sm:$0xff]  }
  0x30   :  { %2301 = vmatpush1.bf16.msra.mxu0 %v18531_v51  ;;  %v39_v51 = vld [vmem:[%s26600_s0 + $0x50] sm:$0xff] }
  0x31   :  { %2509 = vmatpush1.bf16.msra.mxu1 %v18528_v50  ;;  %2302 = vmatprep.subr.bf16.mxu0 %v18532_v54  ;;  %v32_v50 = vld [vmem:[%s26600_s0 + $0x18] sm:$0xff] }
  0x32   :  { %2510 = vmatprep.subr.bf16.mxu1 %v18536_v56  ;;  %v20204_v52 = vpack.c.bf16 %v39_v51, %v32_v50  ;;  %v18601_v54 = vld [vmem:[%s26599_s1 + $0x4a0] ss:$28 sps:$4 sm:$0xff]   ;;  %v34_v50 = vld [vmem:[%s26600_s0 + $0x28] sm:$0xff] }
  0x33   :  { %v18606_v56 = vld [vmem:[%s26599_s1 + $0x544] ss:$28 sps:$4 sm:$0xff]  }
  0x34   :  { %2303 = vmatpush1.bf16.msra.mxu0 %v18537_v58  ;;  %v18604_v58 = vld [vmem:[%s26599_s1 + $0x540] ss:$28 sps:$4 sm:$0xff]  }
  0x35   :  { %2511 = vmatpush1.bf16.msra.mxu1 %v18534_v57  ;;  %2304 = vmatprep.subr.bf16.mxu0 %v18538_v61  ;;  %v18609_v57 = vld [vmem:[%s26599_s1 + $0x4dc] ss:$28 sps:$4 sm:$0xff]   ;;  %v18615_v61 = vld [vmem:[%s26599_s1 + $0x514] ss:$28 sps:$4 sm:$0xff]   ;;  %v41_v51 = vld [vmem:[%s26600_s0 + $0x60] sm:$0xff] }
  0x36   :  { %2512 = vmatprep.subr.bf16.mxu1 %v18542_v63  ;;  %v18610_v63 = vld [vmem:[%s26599_s1 + $0x578] ss:$28 sps:$4 sm:$0xff]  }
  0x38   :  { %2305 = vmatpush1.bf16.msra.mxu0 %v18543_v1  ;;  %v18618_v1 = vld [vmem:[%s26599_s1 + $0x5b4] ss:$28 sps:$4 sm:$0xff]  }
  0x39   :  { %2513 = vmatpush1.bf16.msra.mxu1 %v18540_v0  ;;  %2306 = vmatprep.subr.bf16.mxu0 %v18544_v2  ;;  %v18613_v0 = vld [vmem:[%s26599_s1 + $0x510] ss:$28 sps:$4 sm:$0xff]  }
  0x3a   :  { %2514 = vmatprep.subr.bf16.mxu1 %v18548_v3  ;;  %v18621_v2 = vld [vmem:[%s26599_s1 + $0x54c] ss:$28 sps:$4 sm:$0xff]  }
  0x3b   :  { %v18616_v3 = vld [vmem:[%s26599_s1 + $0x5b0] ss:$28 sps:$4 sm:$0xff]  }
  0x3c   :  { %2307 = vmatpush1.bf16.msra.mxu0 %v18549_v5  ;;  %v18624_v5 = vld [vmem:[%s26599_s1 + $0x5ec] ss:$28 sps:$4 sm:$0xff]  }
  0x3d   :  { %2515 = vmatpush1.bf16.msra.mxu1 %v18546_v4  ;;  %2308 = vmatprep.subr.bf16.mxu0 %v18550_v6  ;;  %v18619_v4 = vld [vmem:[%s26599_s1 + $0x548] ss:$28 sps:$4 sm:$0xff]  }
  0x3e   :  { %2516 = vmatprep.subr.bf16.mxu1 %v18554_v7  ;;  %v18627_v6 = vld [vmem:[%s26599_s1 + $0x584] ss:$28 sps:$4 sm:$0xff]  }
  0x3f   :  { %v18622_v7 = vld [vmem:[%s26599_s1 + $0x5e8] ss:$28 sps:$4 sm:$0xff]  }
  0x40   :  { %2309 = vmatpush1.bf16.msra.mxu0 %v18555_v9  ;;  %v18630_v9 = vld [vmem:[%s26599_s1 + $0x624] ss:$28 sps:$4 sm:$0xff]  }
  0x41   :  { %2517 = vmatpush1.bf16.msra.mxu1 %v18552_v8  ;;  %2331 = vmatprep.subr.bf16.mxu0 %v18558_v10  ;;  %v18625_v8 = vld [vmem:[%s26599_s1 + $0x580] ss:$28 sps:$4 sm:$0xff]  }
  0x42   :  { %2518 = vmatprep.subr.bf16.mxu1 %v18561_v13  ;;  %v18633_v10 = vld [vmem:[%s26599_s1 + $0x5bc] ss:$28 sps:$4 sm:$0xff]  }
  0x43   :  { %2311 = vmatmul.mubr.bf16.vlgmr.msra.gmra.mrb[0].mxu0 %v20097_v17  ;;  %v18636_v13 = vld [vmem:[%s26599_s1 + $0x65c] ss:$28 sps:$4 sm:$0xff]  }
  0x44   :  { %2332 = vmatpush1.bf16.msra.mxu0 %v18556_v14  ;;  %2320 = vmatprep.mubr.bf16.mxu0 %v20167_v40  ;;  %v18639_v14 = vld [vmem:[%s26599_s1 + $0x5f4] ss:$28 sps:$4 sm:$0xff]  }
  0x45   :  { %2519 = vmatpush1.bf16.msra.mxu1 %v18559_v16  ;;  %2333 = vmatprep.subr.bf16.mxu0 %v18564_v18  ;;  %v18634_v16 = vld [vmem:[%s26599_s1 + $0x658] ss:$28 sps:$4 sm:$0xff]   ;;  %v18637_v18 = vld [vmem:[%s26599_s1 + $0x5f0] ss:$28 sps:$4 sm:$0xff]  }
  0x46   :  { %2520 = vmatprep.subr.bf16.mxu1 %v18567_v19  ;;  %v18642_v19 = vld [vmem:[%s26599_s1 + $0x694] ss:$28 sps:$4 sm:$0xff]  }
  0x48   :  { %2334 = vmatpush1.bf16.msra.mxu0 %v18562_v20  ;;  %v18645_v20 = vld [vmem:[%s26599_s1 + $0x62c] ss:$28 sps:$4 sm:$0xff]  }
  0x49   :  { %2521 = vmatpush1.bf16.msra.mxu1 %v18565_v21  ;;  %2335 = vmatprep.subr.bf16.mxu0 %v18570_v22  ;;  %v18640_v21 = vld [vmem:[%s26599_s1 + $0x690] ss:$28 sps:$4 sm:$0xff]   ;;  %v18643_v22 = vld [vmem:[%s26599_s1 + $0x628] ss:$28 sps:$4 sm:$0xff]  }
  0x4a   :  { %2543 = vmatprep.subr.bf16.mxu1 %v18573_v23  ;;  %v18648_v23 = vld [vmem:[%s26599_s1 + $0x6cc] ss:$28 sps:$4 sm:$0xff]  }
  0x4b   :  { %2321 = vmatmul.mubr.bf16.gmra.mrb[4].mxu0 %v20189_v47 }
  0x4c   :  { %2523 = vmatmul.mubr.bf16.vlgmr.msra.gmra.mrb[8].mxu1 %v20097_v17  ;;  %2336 = vmatpush1.bf16.msra.mxu0 %v18568_v24  ;;  %v18651_v24 = vld [vmem:[%s26599_s1 + $0x664] ss:$28 sps:$4 sm:$0xff]  }
  0x4d   :  { %2544 = vmatpush1.bf16.msra.mxu1 %v18571_v25  ;;  %2337 = vmatprep.subr.bf16.mxu0 %v18576_v26  ;;  %v18646_v25 = vld [vmem:[%s26599_s1 + $0x6c8] ss:$28 sps:$4 sm:$0xff]   ;;  %v18649_v26 = vld [vmem:[%s26599_s1 + $0x660] ss:$28 sps:$4 sm:$0xff]  }
  0x4e   :  { %2545 = vmatprep.subr.bf16.mxu1 %v18579_v27  ;;  %2532 = vmatprep.mubr.bf16.mxu1 %v20167_v40  ;;  %v18654_v27 = vld [vmem:[%s26599_s1 + $0x704] ss:$28 sps:$4 sm:$0xff]  }
  0x4f   :  { %2363 = vmatprep.mubr.bf16.mxu0 %v20204_v52 }
  0x50   :  { %2338 = vmatpush1.bf16.msra.mxu0 %v18574_v28  ;;  %v31_v28 = vld [vmem:[%s26600_s0 + $0x10] sm:$0xff] }
  0x51   :  { %2546 = vmatpush1.bf16.msra.mxu1 %v18577_v29  ;;  %2339 = vmatprep.subr.bf16.mxu0 %v18582_v30  ;;  %v38_v29 = vld [vmem:[%s26600_s0 + $0x48] sm:$0xff]  ;;  %v18657_v30 = vld [vmem:[%s26599_s1 + $0x69c] ss:$28 sps:$4 sm:$0xff]  }
  0x52   :  { %2547 = vmatprep.subr.bf16.mxu1 %v18585_v31  ;;  %v18652_v31 = vld [vmem:[%s26599_s1 + $0x700] ss:$28 sps:$4 sm:$0xff]  }
  0x54   :  { %2340 = vmatpush1.bf16.msra.mxu0 %v18580_v32  ;;  %2533 = vmatmul.mubr.bf16.gmra.mrb[12].mxu1 %v20189_v47  ;;  %v18655_v32 = vld [vmem:[%s26599_s1 + $0x698] ss:$28 sps:$4 sm:$0xff]  }
  0x55   :  { %2548 = vmatpush1.bf16.msra.mxu1 %v18583_v33  ;;  %2341 = vmatprep.subr.bf16.mxu0 %v18588_v34  ;;  %v20329_v33 = vpack.c.bf16 %v38_v29, %v31_v28  ;;  %v18660_v34 = vld [vmem:[%s26599_s1 + $0x73c] ss:$28 sps:$4 sm:$0xff]   ;;  %v18718_v28 = vld [vmem:[%s26599_s1 + $0x968] ss:$28 sps:$4 sm:$0xff]  }
  0x56   :  { %2549 = vmatprep.subr.bf16.mxu1 %v18591_v35  ;;  %2575 = vmatprep.mubr.bf16.mxu1 %v20204_v52  ;;  %v46_v35 = vld [vmem:[%s26600_s0 + $0x88] sm:$0xff]  ;;  %v18721_v29 = vld [vmem:[%s26599_s1 + $0x900] ss:$28 sps:$4 sm:$0xff]  }
  0x58   :  { %2342 = vmatpush1.bf16.msra.mxu0 %v18586_v38  ;;  %v18658_v38 = vld [vmem:[%s26599_s1 + $0x738] ss:$28 sps:$4 sm:$0xff]  }
  0x59   :  { %2550 = vmatpush1.bf16.msra.mxu1 %v18589_v39  ;;  %2343 = vmatprep.subr.bf16.mxu0 %v18594_v41  ;;  %v18661_v39 = vld [vmem:[%s26599_s1 + $0x6d0] ss:$28 sps:$4 sm:$0xff]   ;;  %v20349_v41 = vpack.c.bf16 %v53_v36, %v46_v35  ;;  %v18732_v35 = vld [vmem:[%s26599_s1 + $0x9dc] ss:$28 sps:$4 sm:$0xff]  }
  0x5a   :  { %2551 = vmatprep.subr.bf16.mxu1 %v18597_v42  ;;  %v18666_v42 = vld [vmem:[%s26599_s1 + $0x774] ss:$28 sps:$4 sm:$0xff]  }
  0x5b   :  { %v18735_v36 = vld [vmem:[%s26599_s1 + $0x974] ss:$28 sps:$4 sm:$0xff]  }
  0x5c   :  { %2344 = vmatpush1.bf16.msra.mxu0 %v18592_v45  ;;  %v18669_v45 = vld [vmem:[%s26599_s1 + $0x70c] ss:$28 sps:$4 sm:$0xff]  }
  0x5d   :  { %2552 = vmatpush1.bf16.msra.mxu1 %v18595_v46  ;;  %2345 = vmatprep.subr.bf16.mxu0 %v18600_v48  ;;  %v18664_v46 = vld [vmem:[%s26599_s1 + $0x770] ss:$28 sps:$4 sm:$0xff]   ;;  %v18667_v48 = vld [vmem:[%s26599_s1 + $0x708] ss:$28 sps:$4 sm:$0xff]  }
  0x5e   :  { %2553 = vmatprep.subr.bf16.mxu1 %v18603_v49  ;;  %v20371_v49 = vpack.c.bf16 %v52_v44, %v45_v43  ;;  %v18736_v43 = vld [vmem:[%s26599_s1 + $0xa10] ss:$28 sps:$4 sm:$0xff]   ;;  %v18739_v44 = vld [vmem:[%s26599_s1 + $0x9a8] ss:$28 sps:$4 sm:$0xff]  }
  0x60   :  { %2346 = vmatpush1.bf16.msra.mxu0 %v18598_v53  ;;  %v18672_v53 = vld [vmem:[%s26599_s1 + $0x7ac] ss:$28 sps:$4 sm:$0xff]  }
  0x61   :  { %2554 = vmatpush1.bf16.msra.mxu1 %v18601_v54  ;;  %2347 = vmatprep.subr.bf16.mxu0 %v18606_v56  ;;  %v18675_v54 = vld [vmem:[%s26599_s1 + $0x744] ss:$28 sps:$4 sm:$0xff]   ;;  %v20385_v56 = vpack.c.bf16 %v41_v51, %v34_v50 }
  0x62   :  { %2555 = vmatprep.subr.bf16.mxu1 %v18609_v57  ;;  %v18670_v57 = vld [vmem:[%s26599_s1 + $0x7a8] ss:$28 sps:$4 sm:$0xff]   ;;  %v18745_v50 = vld [vmem:[%s26599_s1 + $0x9e0] ss:$28 sps:$4 sm:$0xff]  }
  0x63   :  { %v33_v51 = vld [vmem:[%s26600_s0 + $0x20] sm:$0xff] }
  0x64   :  { %2348 = vmatpush1.bf16.msra.mxu0 %v18604_v58  ;;  %v18673_v58 = vld [vmem:[%s26599_s1 + $0x740] ss:$28 sps:$4 sm:$0xff]  }
  0x65   :  { %2556 = vmatpush1.bf16.msra.mxu1 %v18607_v59  ;;  %2349 = vmatprep.subr.bf16.mxu0 %v18612_v60  ;;  %v18678_v59 = vld [vmem:[%s26599_s1 + $0x7e4] ss:$28 sps:$4 sm:$0xff]   ;;  %v18681_v60 = vld [vmem:[%s26599_s1 + $0x77c] ss:$28 sps:$4 sm:$0xff]  }
  0x66   :  { %2557 = vmatprep.subr.bf16.mxu1 %v18615_v61  ;;  %v18676_v61 = vld [vmem:[%s26599_s1 + $0x7e0] ss:$28 sps:$4 sm:$0xff]  }
  0x68   :  { %2350 = vmatpush1.bf16.msra.mxu0 %v18610_v63  ;;  %v18679_v63 = vld [vmem:[%s26599_s1 + $0x778] ss:$28 sps:$4 sm:$0xff]  }
  0x69   :  { %2558 = vmatpush1.bf16.msra.mxu1 %v18613_v0  ;;  %2351 = vmatprep.subr.bf16.mxu0 %v18618_v1  ;;  %v18684_v0 = vld [vmem:[%s26599_s1 + $0x81c] ss:$28 sps:$4 sm:$0xff]   ;;  %v18687_v1 = vld [vmem:[%s26599_s1 + $0x7b4] ss:$28 sps:$4 sm:$0xff]  }
  0x6a   :  { %2559 = vmatprep.subr.bf16.mxu1 %v18621_v2  ;;  %v18682_v2 = vld [vmem:[%s26599_s1 + $0x818] ss:$28 sps:$4 sm:$0xff]  }
  0x6c   :  { %2352 = vmatpush1.bf16.msra.mxu0 %v18616_v3  ;;  %v18685_v3 = vld [vmem:[%s26599_s1 + $0x7b0] ss:$28 sps:$4 sm:$0xff]  }
  0x6d   :  { %2560 = vmatpush1.bf16.msra.mxu1 %v18619_v4  ;;  %2353 = vmatprep.subr.bf16.mxu0 %v18624_v5  ;;  %v18690_v4 = vld [vmem:[%s26599_s1 + $0x854] ss:$28 sps:$4 sm:$0xff]   ;;  %v18693_v5 = vld [vmem:[%s26599_s1 + $0x7ec] ss:$28 sps:$4 sm:$0xff]  }
  0x6e   :  { %2561 = vmatprep.subr.bf16.mxu1 %v18627_v6  ;;  %v18688_v6 = vld [vmem:[%s26599_s1 + $0x850] ss:$28 sps:$4 sm:$0xff]  }
  0x70   :  { %2354 = vmatpush1.bf16.msra.mxu0 %v18622_v7  ;;  %v18691_v7 = vld [vmem:[%s26599_s1 + $0x7e8] ss:$28 sps:$4 sm:$0xff]  }
  0x71   :  { %2562 = vmatpush1.bf16.msra.mxu1 %v18625_v8  ;;  %2355 = vmatprep.subr.bf16.mxu0 %v18630_v9  ;;  %v18696_v8 = vld [vmem:[%s26599_s1 + $0x88c] ss:$28 sps:$4 sm:$0xff]   ;;  %v18699_v9 = vld [vmem:[%s26599_s1 + $0x824] ss:$28 sps:$4 sm:$0xff]  }
  0x72   :  { %2563 = vmatprep.subr.bf16.mxu1 %v18633_v10  ;;  %v18694_v10 = vld [vmem:[%s26599_s1 + $0x888] ss:$28 sps:$4 sm:$0xff]  }
  0x74   :  { %2356 = vmatpush1.bf16.msra.mxu0 %v18628_v11  ;;  %v18697_v11 = vld [vmem:[%s26599_s1 + $0x820] ss:$28 sps:$4 sm:$0xff]  }
  0x75   :  { %2564 = vmatpush1.bf16.msra.mxu1 %v18631_v12  ;;  %2357 = vmatprep.subr.bf16.mxu0 %v18636_v13  ;;  %v18702_v12 = vld [vmem:[%s26599_s1 + $0x8c4] ss:$28 sps:$4 sm:$0xff]   ;;  %v18705_v13 = vld [vmem:[%s26599_s1 + $0x85c] ss:$28 sps:$4 sm:$0xff]  }
  0x76   :  { %2565 = vmatprep.subr.bf16.mxu1 %v18639_v14  ;;  %v18700_v14 = vld [vmem:[%s26599_s1 + $0x8c0] ss:$28 sps:$4 sm:$0xff]  }
  0x78   :  { %2358 = vmatpush1.bf16.msra.mxu0 %v18634_v16  ;;  %v18703_v16 = vld [vmem:[%s26599_s1 + $0x858] ss:$28 sps:$4 sm:$0xff]  }
  0x79   :  { %2566 = vmatpush1.bf16.msra.mxu1 %v18637_v18  ;;  %2359 = vmatprep.subr.bf16.mxu0 %v18642_v19  ;;  %v18708_v18 = vld [vmem:[%s26599_s1 + $0x8fc] ss:$28 sps:$4 sm:$0xff]   ;;  %v18711_v19 = vld [vmem:[%s26599_s1 + $0x894] ss:$28 sps:$4 sm:$0xff]  }
  0x7a   :  { %2567 = vmatprep.subr.bf16.mxu1 %v18645_v20  ;;  %v18706_v20 = vld [vmem:[%s26599_s1 + $0x8f8] ss:$28 sps:$4 sm:$0xff]  }
  0x7c   :  { %2360 = vmatpush1.bf16.msra.mxu0 %v18640_v21  ;;  %v18709_v21 = vld [vmem:[%s26599_s1 + $0x890] ss:$28 sps:$4 sm:$0xff]  }
  0x7d   :  { %2568 = vmatpush1.bf16.msra.mxu1 %v18643_v22  ;;  %2361 = vmatprep.subr.bf16.mxu0 %v18648_v23  ;;  %v18714_v22 = vld [vmem:[%s26599_s1 + $0x934] ss:$28 sps:$4 sm:$0xff]   ;;  %v18717_v23 = vld [vmem:[%s26599_s1 + $0x8cc] ss:$28 sps:$4 sm:$0xff]  }
  0x7e   :  { %2569 = vmatprep.subr.bf16.mxu1 %v18651_v24  ;;  %v18712_v24 = vld [vmem:[%s26599_s1 + $0x930] ss:$28 sps:$4 sm:$0xff]  }
  0x80   :  { %2362 = vmatpush1.bf16.msra.mxu0 %v18646_v25  ;;  %v18715_v25 = vld [vmem:[%s26599_s1 + $0x8c8] ss:$28 sps:$4 sm:$0xff]  }
  0x81   :  { %2570 = vmatpush1.bf16.msra.mxu1 %v18649_v26  ;;  %2384 = vmatprep.subr.bf16.mxu0 %v18654_v27  ;;  %v18720_v26 = vld [vmem:[%s26599_s1 + $0x96c] ss:$28 sps:$4 sm:$0xff]   ;;  %v18723_v27 = vld [vmem:[%s26599_s1 + $0x904] ss:$28 sps:$4 sm:$0xff]  }
  0x82   :  { %2571 = vmatprep.subr.bf16.mxu1 %v18657_v30  ;;  %v18726_v30 = vld [vmem:[%s26599_s1 + $0x9a4] ss:$28 sps:$4 sm:$0xff]  }
  0x83   :  { %2364 = vmatmul.mubr.bf16.vlgmr.msra.gmra.mrb[0].mxu0 %v20329_v33 }
  0x84   :  { %2385 = vmatpush1.bf16.msra.mxu0 %v18652_v31  ;;  %2373 = vmatprep.mubr.bf16.mxu0 %v20349_v41  ;;  %v18729_v31 = vld [vmem:[%s26599_s1 + $0x93c] ss:$28 sps:$4 sm:$0xff]  }
  0x85   :  { %2572 = vmatpush1.bf16.msra.mxu1 %v18655_v32  ;;  %2386 = vmatprep.subr.bf16.mxu0 %v18660_v34  ;;  %v18724_v32 = vld [vmem:[%s26599_s1 + $0x9a0] ss:$28 sps:$4 sm:$0xff]   ;;  %v18727_v34 = vld [vmem:[%s26599_s1 + $0x938] ss:$28 sps:$4 sm:$0xff]  }
  0x86   :  { %2573 = vmatprep.subr.bf16.mxu1 %v18663_v37  ;;  %v18730_v37 = vld [vmem:[%s26599_s1 + $0x9d8] ss:$28 sps:$4 sm:$0xff]  }
  0x88   :  { %2387 = vmatpush1.bf16.msra.mxu0 %v18658_v38  ;;  %v18733_v38 = vld [vmem:[%s26599_s1 + $0x970] ss:$28 sps:$4 sm:$0xff]  }
  0x89   :  { %2574 = vmatpush1.bf16.msra.mxu1 %v18661_v39  ;;  %2388 = vmatprep.subr.bf16.mxu0 %v18666_v42  ;;  %v18738_v39 = vld [vmem:[%s26599_s1 + $0xa14] ss:$28 sps:$4 sm:$0xff]   ;;  %v18741_v42 = vld [vmem:[%s26599_s1 + $0x9ac] ss:$28 sps:$4 sm:$0xff]  }
  0x8a   :  { %2596 = vmatprep.subr.bf16.mxu1 %v18669_v45  ;;  %v18744_v45 = vld [vmem:[%s26599_s1 + $0xa4c] ss:$28 sps:$4 sm:$0xff]  }
  0x8b   :  { %2374 = vmatmul.mubr.bf16.gmra.mrb[4].mxu0 %v20371_v49 }
  0x8c   :  { %2576 = vmatmul.mubr.bf16.vlgmr.msra.gmra.mrb[8].mxu1 %v20329_v33  ;;  %2389 = vmatpush1.bf16.msra.mxu0 %v18664_v46  ;;  %v18747_v46 = vld [vmem:[%s26599_s1 + $0x9e4] ss:$28 sps:$4 sm:$0xff]  }
  0x8d   :  { %2597 = vmatpush1.bf16.msra.mxu1 %v18667_v48  ;;  %2390 = vmatprep.subr.bf16.mxu0 %v18672_v53  ;;  %v18742_v48 = vld [vmem:[%s26599_s1 + $0xa48] ss:$28 sps:$4 sm:$0xff]   ;;  %v40_v53 = vld [vmem:[%s26600_s0 + $0x58] sm:$0xff] }
  0x8e   :  { %2598 = vmatprep.subr.bf16.mxu1 %v18675_v54  ;;  %2416 = vmatprep.mubr.bf16.mxu0 %v20385_v56  ;;  %v18750_v54 = vld [vmem:[%s26599_s1 + $0xa1c] ss:$28 sps:$4 sm:$0xff]  }
  0x8f   :  { %2585 = vmatprep.mubr.bf16.mxu1 %v20349_v41 }
  0x90   :  { %2391 = vmatpush1.bf16.msra.mxu0 %v18670_v57  ;;  %v18753_v57 = vld [vmem:[%s26599_s1 + $0x14] ss:$28 sps:$4 sm:$0xff]  }
  0x91   :  { %2599 = vmatpush1.bf16.msra.mxu1 %v18673_v58  ;;  %2392 = vmatprep.subr.bf16.mxu0 %v18678_v59  ;;  %v18748_v58 = vld [vmem:[%s26599_s1 + $0xa18] ss:$28 sps:$4 sm:$0xff]   ;;  %v18751_v59 = vld [vmem:[%s26599_s1 + $0x10] ss:$28 sps:$4 sm:$0xff]  }
  0x92   :  { %2600 = vmatprep.subr.bf16.mxu1 %v18681_v60  ;;  %v20561_v60 = vpack.c.bf16 %v40_v53, %v33_v51  ;;  %v18817_v51 = vld [vmem:[%s26599_s1 + $0xf8] ss:$28 sps:$4 sm:$0xff]   ;;  %v18821_v53 = vld [vmem:[%s26599_s1 + $0x2f0] ss:$28 sps:$4 sm:$0xff]  }
  0x94   :  { %2586 = vmatmul.mubr.bf16.gmra.mrb[12].mxu1 %v20371_v49  ;;  %2393 = vmatpush1.bf16.msra.mxu0 %v18676_v61  ;;  %v48_v61 = vld [vmem:[%s26600_s0 + $0x98] sm:$0xff] }
  0x95   :  { %2601 = vmatpush1.bf16.msra.mxu1 %v18679_v63  ;;  %2394 = vmatprep.subr.bf16.mxu0 %v18684_v0  ;;  %v55_v63 = vld [vmem:[%s26600_s0 + $0xd0] sm:$0xff] }
  0x96   :  { %2602 = vmatprep.subr.bf16.mxu1 %v18687_v1  ;;  %2628 = vmatprep.mubr.bf16.mxu1 %v20385_v56  ;;  %v18756_v0 = vld [vmem:[%s26599_s1 + $0xa54] ss:$28 sps:$4 sm:$0xff]   ;;  %v18759_v1 = vld [vmem:[%s26599_s1 + $0x4c] ss:$28 sps:$4 sm:$0xff]  }
  0x98   :  { %2395 = vmatpush1.bf16.msra.mxu0 %v18682_v2  ;;  %v18754_v2 = vld [vmem:[%s26599_s1 + $0xa50] ss:$28 sps:$4 sm:$0xff]  }
  0x99   :  { %2603 = vmatpush1.bf16.msra.mxu1 %v18685_v3  ;;  %2396 = vmatprep.subr.bf16.mxu0 %v18690_v4  ;;  %v18757_v3 = vld [vmem:[%s26599_s1 + $0x48] ss:$28 sps:$4 sm:$0xff]   ;;  %v20581_v4 = vpack.c.bf16 %v55_v63, %v48_v61  ;;  %v18798_v61 = vld [vmem:[%s26599_s1 + $0x2b0] ss:$28 sps:$4 sm:$0xff]  }
  0x9a   :  { %2604 = vmatprep.subr.bf16.mxu1 %v18693_v5  ;;  %v47_v5 = vld [vmem:[%s26600_s0 + $0x90] sm:$0xff]  ;;  %v18805_v63 = vld [vmem:[%s26599_s1 + $0x2ec] ss:$28 sps:$4 sm:$0xff]  }
  0x9c   :  { %2397 = vmatpush1.bf16.msra.mxu0 %v18688_v6  ;;  %v54_v6 = vld [vmem:[%s26600_s0 + $0xc8] sm:$0xff] }
  0x9d   :  { %2605 = vmatpush1.bf16.msra.mxu1 %v18691_v7  ;;  %2398 = vmatprep.subr.bf16.mxu0 %v18696_v8  ;;  %v18762_v7 = vld [vmem:[%s26599_s1 + $0x84] ss:$28 sps:$4 sm:$0xff]   ;;  %v18768_v8 = vld [vmem:[%s26599_s1 + $0xa8c] ss:$28 sps:$4 sm:$0xff]  }
  0x9e   :  { %2606 = vmatprep.subr.bf16.mxu1 %v18699_v9  ;;  %v20597_v9 = vpack.c.bf16 %v54_v6, %v47_v5  ;;  %v18832_v5 = vld [vmem:[%s26599_s1 + $0x1a0] ss:$28 sps:$4 sm:$0xff]   ;;  %v18836_v6 = vld [vmem:[%s26599_s1 + $0x558] ss:$28 sps:$4 sm:$0xff]  }
  0xa0   :  { %2399 = vmatpush1.bf16.msra.mxu0 %v18694_v10  ;;  %v18760_v10 = vld [vmem:[%s26599_s1 + $0x80] ss:$28 sps:$4 sm:$0xff]  }
  0xa1   :  { %2607 = vmatpush1.bf16.msra.mxu1 %v18697_v11  ;;  %2400 = vmatprep.subr.bf16.mxu0 %v18702_v12  ;;  %v18765_v11 = vld [vmem:[%s26599_s1 + $0xbc] ss:$28 sps:$4 sm:$0xff]   ;;  %v18766_v12 = vld [vmem:[%s26599_s1 + $0xa88] ss:$28 sps:$4 sm:$0xff]  }
  0xa2   :  { %2608 = vmatprep.subr.bf16.mxu1 %v18705_v13  ;;  %v18774_v13 = vld [vmem:[%s26599_s1 + $0xac4] ss:$28 sps:$4 sm:$0xff]  }
  0xa4   :  { %2401 = vmatpush1.bf16.msra.mxu0 %v18700_v14  ;;  %v18763_v14 = vld [vmem:[%s26599_s1 + $0xb8] ss:$28 sps:$4 sm:$0xff]  }
  0xa5   :  { %2609 = vmatpush1.bf16.msra.mxu1 %v18703_v16  ;;  %2402 = vmatprep.subr.bf16.mxu0 %v18708_v18  ;;  %v18771_v16 = vld [vmem:[%s26599_s1 + $0xf4] ss:$28 sps:$4 sm:$0xff]   ;;  %v18772_v18 = vld [vmem:[%s26599_s1 + $0xac0] ss:$28 sps:$4 sm:$0xff]  }
  0xa6   :  { %2610 = vmatprep.subr.bf16.mxu1 %v18711_v19  ;;  %v18796_v19 = vld [vmem:[%s26599_s1 + $0x1d8] ss:$28 sps:$4 sm:$0xff]  }
  0xa8   :  { %2403 = vmatpush1.bf16.msra.mxu0 %v18706_v20  ;;  %v18769_v20 = vld [vmem:[%s26599_s1 + $0xf0] ss:$28 sps:$4 sm:$0xff]  }
  0xa9   :  { %2611 = vmatpush1.bf16.msra.mxu1 %v18709_v21  ;;  %2404 = vmatprep.subr.bf16.mxu0 %v18714_v22  ;;  %v18777_v21 = vld [vmem:[%s26599_s1 + $0x12c] ss:$28 sps:$4 sm:$0xff]  }
  0xaa   :  { %2612 = vmatprep.subr.bf16.mxu1 %v18717_v23  ;;  %v18775_v22 = vld [vmem:[%s26599_s1 + $0x128] ss:$28 sps:$4 sm:$0xff]   ;;  %v20637_v23 = vld [vmem:[#allocation4 + $0x80] sm:$0xff] }
  0xab   :  { %3209 = vst.msk [vmem:[#allocation2 + $0x190] sm:$0xff] %vm3208_vm1, %v20637_v23  ;;  %3210 = vst.msk [vmem:[#allocation2 + $0x198] sm:$0xff] %vm3208_vm1, %v20637_v23 }
  0xac   :  { %2405 = vmatpush1.bf16.msra.mxu0 %v18712_v24  ;;  %v18780_v24 = vld [vmem:[%s26599_s1 + $0x164] ss:$28 sps:$4 sm:$0xff]  }
  0xad   :  { %2613 = vmatpush1.bf16.msra.mxu1 %v18715_v25  ;;  %2406 = vmatprep.subr.bf16.mxu0 %v18720_v26  ;;  %v18778_v25 = vld [vmem:[%s26599_s1 + $0x160] ss:$28 sps:$4 sm:$0xff]  }
  0xae   :  { %2614 = vmatprep.subr.bf16.mxu1 %v18723_v27  ;;  %v18783_v26 = vld [vmem:[%s26599_s1 + $0x19c] ss:$28 sps:$4 sm:$0xff]  }
  0xaf   :  { %v18797_v27 = vld [vmem:[%s26599_s1 + $0x18] ss:$28 sps:$4 sm:$0xff]  }
  0xb0   :  { %2407 = vmatpush1.bf16.msra.mxu0 %v18718_v28  ;;  %v18801_v28 = vld [vmem:[%s26599_s1 + $0x210] ss:$28 sps:$4 sm:$0xff]  }
  0xb1   :  { %2615 = vmatpush1.bf16.msra.mxu1 %v18721_v29  ;;  %2408 = vmatprep.subr.bf16.mxu0 %v18726_v30  ;;  %v18781_v29 = vld [vmem:[%s26599_s1 + $0x198] ss:$28 sps:$4 sm:$0xff]  }
  0xb2   :  { %2616 = vmatprep.subr.bf16.mxu1 %v18729_v31  ;;  %v18786_v30 = vld [vmem:[%s26599_s1 + $0x1d4] ss:$28 sps:$4 sm:$0xff]  }
  0xb3   :  { %v18802_v31 = vld [vmem:[%s26599_s1 + $0x50] ss:$28 sps:$4 sm:$0xff]  }
  0xb4   :  { %2409 = vmatpush1.bf16.msra.mxu0 %v18724_v32  ;;  %v18806_v32 = vld [vmem:[%s26599_s1 + $0x248] ss:$28 sps:$4 sm:$0xff]  }
  0xb5   :  { %2617 = vmatpush1.bf16.msra.mxu1 %v18727_v34  ;;  %2410 = vmatprep.subr.bf16.mxu0 %v18732_v35  ;;  %v18784_v34 = vld [vmem:[%s26599_s1 + $0x1d0] ss:$28 sps:$4 sm:$0xff]  }
  0xb6   :  { %2618 = vmatprep.subr.bf16.mxu1 %v18735_v36  ;;  %v18789_v35 = vld [vmem:[%s26599_s1 + $0x20c] ss:$28 sps:$4 sm:$0xff]  }
  0xb8   :  { %2411 = vmatpush1.bf16.msra.mxu0 %v18730_v37  ;;  %v18807_v37 = vld [vmem:[%s26599_s1 + $0x88] ss:$28 sps:$4 sm:$0xff]  }
  0xb9   :  { %2619 = vmatpush1.bf16.msra.mxu1 %v18733_v38  ;;  %2412 = vmatprep.subr.bf16.mxu0 %v18738_v39  ;;  %v18811_v38 = vld [vmem:[%s26599_s1 + $0x280] ss:$28 sps:$4 sm:$0xff]  }
  0xba   :  { %2620 = vmatprep.subr.bf16.mxu1 %v18741_v42 }
  0xbc   :  { %2413 = vmatpush1.bf16.msra.mxu0 %v18736_v43  ;;  %v18787_v43 = vld [vmem:[%s26599_s1 + $0x208] ss:$28 sps:$4 sm:$0xff]  }
  0xbd   :  { %2621 = vmatpush1.bf16.msra.mxu1 %v18739_v44  ;;  %2414 = vmatprep.subr.bf16.mxu0 %v18744_v45  ;;  %v18792_v44 = vld [vmem:[%s26599_s1 + $0x244] ss:$28 sps:$4 sm:$0xff]  }
  0xbe   :  { %2622 = vmatprep.subr.bf16.mxu1 %v18747_v46  ;;  %v18812_v46 = vld [vmem:[%s26599_s1 + $0xc0] ss:$28 sps:$4 sm:$0xff]  }
  0xc0   :  { %2415 = vmatpush1.bf16.msra.mxu0 %v18742_v48  ;;  %v18816_v48 = vld [vmem:[%s26599_s1 + $0x2b8] ss:$28 sps:$4 sm:$0xff]  }
  0xc1   :  { %2623 = vmatpush1.bf16.msra.mxu1 %v18745_v50  ;;  %2702 = vmatprep.subr.bf16.mxu0 %v18753_v57  ;;  %v18790_v50 = vld [vmem:[%s26599_s1 + $0x240] ss:$28 sps:$4 sm:$0xff]   ;;  %v18800_v57 = vld [vmem:[%s26599_s1 + $0x2b4] ss:$28 sps:$4 sm:$0xff]  }
  0xc2   :  { %2624 = vmatprep.subr.bf16.mxu1 %v18750_v54  ;;  %v18793_v54 = vld [vmem:[%s26599_s1 + $0x278] ss:$28 sps:$4 sm:$0xff]  }
  0xc3   :  { %2417 = vmatmul.mubr.bf16.vlgmr.msra.gmra.mrb[0].mxu0 %v20561_v60 }
  0xc4   :  { %2703 = vmatpush1.bf16.msra.mxu0 %v18751_v59  ;;  %2426 = vmatprep.mubr.bf16.mxu0 %v20581_v4  ;;  %v18826_v59 = vld [vmem:[%s26599_s1 + $0x328] ss:$28 sps:$4 sm:$0xff]  }
  0xc5   :  { %2625 = vmatpush1.bf16.msra.mxu1 %v18748_v58  ;;  %2704 = vmatprep.subr.bf16.mxu0 %v18759_v1  ;;  %v18822_v58 = vld [vmem:[%s26599_s1 + $0x130] ss:$28 sps:$4 sm:$0xff]   ;;  %v18831_v1 = vld [vmem:[%s26599_s1 + $0x360] ss:$28 sps:$4 sm:$0xff]  }
  0xc6   :  { %2626 = vmatprep.subr.bf16.mxu1 %v18756_v0  ;;  %v18827_v0 = vld [vmem:[%s26599_s1 + $0x168] ss:$28 sps:$4 sm:$0xff]  }
  0xc8   :  { %2705 = vmatpush1.bf16.msra.mxu0 %v18757_v3  ;;  %v18810_v3 = vld [vmem:[%s26599_s1 + $0x324] ss:$28 sps:$4 sm:$0xff]  }
  0xc9   :  { %2627 = vmatpush1.bf16.msra.mxu1 %v18754_v2  ;;  %2706 = vmatprep.subr.bf16.mxu0 %v18762_v7  ;;  %v18803_v2 = vld [vmem:[%s26599_s1 + $0x2e8] ss:$28 sps:$4 sm:$0xff]   ;;  %v18808_v7 = vld [vmem:[%s26599_s1 + $0x320] ss:$28 sps:$4 sm:$0xff]  }
  0xca   :  { %2649 = vmatprep.subr.bf16.mxu1 %v18768_v8  ;;  %v18815_v8 = vld [vmem:[%s26599_s1 + $0x35c] ss:$28 sps:$4 sm:$0xff]  }
  0xcb   :  { %2427 = vmatmul.mubr.bf16.gmra.mrb[4].mxu0 %v20597_v9 }
  0xcc   :  { %2629 = vmatmul.mubr.bf16.vlgmr.msra.gmra.mrb[8].mxu1 %v20561_v60  ;;  %2707 = vmatpush1.bf16.msra.mxu0 %v18760_v10  ;;  %v18837_v10 = vld [vmem:[%s26599_s1 + $0x398] ss:$28 sps:$4 sm:$0xff]  }
  0xcd   :  { %2638 = vmatprep.mubr.bf16.mxu1 %v20581_v4  ;;  %2708 = vmatprep.subr.bf16.mxu0 %v18765_v11  ;;  %v18841_v11 = vld [vmem:[%s26599_s1 + $0x590] ss:$28 sps:$4 sm:$0xff]  }
  0xce   :  { %2650 = vmatpush1.bf16.msra.mxu1 %v18766_v12  ;;  %2734 = vmatprep.mubr.bf16.mxu0 %v20020_v55  ;;  %v18813_v12 = vld [vmem:[%s26599_s1 + $0x358] ss:$28 sps:$4 sm:$0xff]  }
  0xcf   :  { %2651 = vmatprep.subr.bf16.mxu1 %v18774_v13  ;;  %v18820_v13 = vld [vmem:[%s26599_s1 + $0x394] ss:$28 sps:$4 sm:$0xff]  }
  0xd0   :  { %2709 = vmatpush1.bf16.msra.mxu0 %v18763_v14  ;;  %v18842_v14 = vld [vmem:[%s26599_s1 + $0x3d0] ss:$28 sps:$4 sm:$0xff]  }
  0xd1   :  { %2710 = vmatprep.subr.bf16.mxu0 %v18771_v16  ;;  %v18846_v16 = vld [vmem:[%s26599_s1 + $0x5c8] ss:$28 sps:$4 sm:$0xff]  }
  0xd2   :  { %2652 = vmatpush1.bf16.msra.mxu1 %v18772_v18  ;;  %v18818_v18 = vld [vmem:[%s26599_s1 + $0x390] ss:$28 sps:$4 sm:$0xff]  }
  0xd3   :  { %17394 = vmatprep.subr.bf16.mxu1 %v18796_v19  ;;  %v18825_v19 = vld [vmem:[%s26599_s1 + $0x3cc] ss:$28 sps:$4 sm:$0xff]  }
  0xd4   :  { %2639 = vmatmul.mubr.bf16.gmra.mrb[12].mxu1 %v20597_v9  ;;  %2711 = vmatpush1.bf16.msra.mxu0 %v18769_v20  ;;  %v18847_v20 = vld [vmem:[%s26599_s1 + $0x408] ss:$28 sps:$4 sm:$0xff]  }
  0xd5   :  { %2681 = vmatprep.mubr.bf16.mxu1 %v20637_v23  ;;  %2712 = vmatprep.subr.bf16.mxu0 %v18777_v21  ;;  %v18851_v21 = vld [vmem:[%s26599_s1 + $0x600] ss:$28 sps:$4 sm:$0xff]  }
  0xd8   :  { %2713 = vmatpush1.bf16.msra.mxu0 %v18775_v22  ;;  %v18823_v22 = vld [vmem:[%s26599_s1 + $0x3c8] ss:$28 sps:$4 sm:$0xff]  }
  0xd9   :  { %2714 = vmatprep.subr.bf16.mxu0 %v18780_v24  ;;  %v18830_v24 = vld [vmem:[%s26599_s1 + $0x404] ss:$28 sps:$4 sm:$0xff]  }
  0xdc   :  { %16372 = vmatmul.mubr.msk.bf16.vlgmr.msra.gmra.mrb[8].mxu1 %vm2271_vm0, %v19899_v15  ;;  %2715 = vmatpush1.bf16.msra.mxu0 %v18778_v25  ;;  %v18852_v25 = vld [vmem:[%s26599_s1 + $0x440] ss:$28 sps:$4 sm:$0xff]  }
  0xdd   :  { %2691 = vmatprep.mubr.bf16.mxu1 %v20637_v23  ;;  %2716 = vmatprep.subr.bf16.mxu0 %v18783_v26 }
  0xde   :  { %17395 = vmatpush3.bf16.msra.mxu1 %v18797_v27 }
  0xdf   :  { %17396 = vmatprep.subr.bf16.mxu1 %v18801_v28  ;;  %v20676_v36 = vpop.f32.mrb[0].mxu1 }
  0xe0   :  { %2717 = vmatpush1.bf16.msra.mxu0 %v18781_v29  ;;  %v20684_v39 = vpop.f32.mrb[1].mxu1  ;;  %v18828_v29 = vld [vmem:[%s26599_s1 + $0x400] ss:$28 sps:$4 sm:$0xff]  }
  0xe1   :  { %2718 = vmatprep.subr.bf16.mxu0 %v18786_v30  ;;  %v20688_v42 = vpop.f32.mrb[2].mxu1 }
  0xe2   :  { %17397 = vmatpush3.bf16.msra.mxu1 %v18802_v31  ;;  %v20697_v45 = vpop.f32.mrb[3].mxu1  ;;  %v18835_v31 = vld [vmem:[%s26599_s1 + $0x43c] ss:$28 sps:$4 sm:$0xff]  }
  0xe3   :  { %17398 = vmatprep.subr.bf16.mxu1 %v18806_v32  ;;  %v18857_v32 = vld [vmem:[%s26599_s1 + $0x478] ss:$28 sps:$4 sm:$0xff]  }
  0xe4   :  { %16373 = vmatmul.mubr.msk.bf16.gmra.mrb[12].mxu1 %vm2271_vm0, %v20041_v62  ;;  %2719 = vmatpush1.bf16.msra.mxu0 %v18784_v34  ;;  %v18833_v34 = vld [vmem:[%s26599_s1 + $0x438] ss:$28 sps:$4 sm:$0xff]  }
  0xe5   :  { %2946 = vmatprep.mubr.bf16.mxu1 %v20020_v55  ;;  %2720 = vmatprep.subr.bf16.mxu0 %v18789_v35  ;;  %v18795_v55 = vld [vmem:[%s26599_s1 + $0x27c] ss:$28 sps:$4 sm:$0xff]   ;;  %v18840_v35 = vld [vmem:[%s26599_s1 + $0x474] ss:$28 sps:$4 sm:$0xff]  }
  0xe6   :  { %17399 = vmatpush3.bf16.msra.mxu1 %v18807_v37  ;;  %v18862_v37 = vld [vmem:[%s26599_s1 + $0x4b0] ss:$28 sps:$4 sm:$0xff]  }
  0xe7   :  { %17400 = vmatprep.subr.bf16.mxu1 %v18811_v38  ;;  %v18845_v38 = vld [vmem:[%s26599_s1 + $0x4ac] ss:$28 sps:$4 sm:$0xff]  }
  0xe8   :  { %2721 = vmatpush1.bf16.msra.mxu0 %v18787_v43  ;;  %v18867_v43 = vld [vmem:[%s26599_s1 + $0x4e8] ss:$28 sps:$4 sm:$0xff]  }
  0xe9   :  { %2722 = vmatprep.subr.bf16.mxu0 %v18792_v44  ;;  %v18871_v44 = vld [vmem:[%s26599_s1 + $0x6e0] ss:$28 sps:$4 sm:$0xff]  }
  0xea   :  { %17401 = vmatpush3.bf16.msra.mxu1 %v18812_v46  ;;  %v18843_v46 = vld [vmem:[%s26599_s1 + $0x4a8] ss:$28 sps:$4 sm:$0xff]  }
  0xeb   :  { %17402 = vmatprep.subr.bf16.mxu1 %v18816_v48  ;;  %v20802_v26 = vpop.f32.mrb[4].mxu1  ;;  %v18850_v48 = vld [vmem:[%s26599_s1 + $0x4e4] ss:$28 sps:$4 sm:$0xff]  }
  0xec   :  { %2723 = vmatpush1.bf16.msra.mxu0 %v18790_v50  ;;  %v20808_v27 = vpop.f32.mrb[5].mxu1  ;;  %v18872_v50 = vld [vmem:[%s26599_s1 + $0x520] ss:$28 sps:$4 sm:$0xff]  }
  0xed   :  { %2724 = vmatprep.subr.bf16.mxu0 %v18795_v55  ;;  %v20811_v28 = vpop.f32.mrb[6].mxu1  ;;  %v18876_v55 = vld [vmem:[%s26599_s1 + $0x8d8] ss:$28 sps:$4 sm:$0xff]  }
  0xee   :  { %17403 = vmatpush3.bf16.msra.mxu1 %v18817_v51  ;;  %v20816_v30 = vpop.f32.mrb[7].mxu1  ;;  %v18848_v51 = vld [vmem:[%s26599_s1 + $0x4e0] ss:$28 sps:$4 sm:$0xff]  }
  0xef   :  { %17404 = vmatprep.subr.bf16.mxu1 %v18821_v53  ;;  %v18855_v53 = vld [vmem:[%s26599_s1 + $0x51c] ss:$28 sps:$4 sm:$0xff]  }
  0xf0   :  { %2725 = vmatpush1.bf16.msra.mxu0 %v18793_v54  ;;  %v18877_v54 = vld [vmem:[%s26599_s1 + $0x718] ss:$28 sps:$4 sm:$0xff]  }
  0xf1   :  { %2726 = vmatprep.subr.bf16.mxu0 %v18800_v57  ;;  %v18881_v57 = vld [vmem:[%s26599_s1 + $0x910] ss:$28 sps:$4 sm:$0xff]  }
  0xf2   :  { %17405 = vmatpush3.bf16.msra.mxu1 %v18822_v58  ;;  %v18853_v58 = vld [vmem:[%s26599_s1 + $0x518] ss:$28 sps:$4 sm:$0xff]  }
  0xf3   :  { %17406 = vmatprep.subr.bf16.mxu1 %v18826_v59  ;;  %v18860_v59 = vld [vmem:[%s26599_s1 + $0x554] ss:$28 sps:$4 sm:$0xff]  }
  0xf4   :  { %2727 = vmatpush1.bf16.msra.mxu0 %v18798_v61  ;;  %v18882_v61 = vld [vmem:[%s26599_s1 + $0x750] ss:$28 sps:$4 sm:$0xff]  }
  0xf5   :  { %2728 = vmatprep.subr.bf16.mxu0 %v18805_v63  ;;  %v18886_v63 = vld [vmem:[%s26599_s1 + $0x948] ss:$28 sps:$4 sm:$0xff]  }
  0xf6   :  { %17407 = vmatpush3.bf16.msra.mxu1 %v18827_v0  ;;  %v18858_v0 = vld [vmem:[%s26599_s1 + $0x550] ss:$28 sps:$4 sm:$0xff]  }
  0xf7   :  { %17408 = vmatprep.subr.bf16.mxu1 %v18831_v1  ;;  %v18865_v1 = vld [vmem:[%s26599_s1 + $0x58c] ss:$28 sps:$4 sm:$0xff]  }
  0xf8   :  { %2729 = vmatpush1.bf16.msra.mxu0 %v18803_v2  ;;  %v18887_v2 = vld [vmem:[%s26599_s1 + $0x788] ss:$28 sps:$4 sm:$0xff]  }
  0xf9   :  { %2730 = vmatprep.subr.bf16.mxu0 %v18810_v3  ;;  %v18891_v3 = vld [vmem:[%s26599_s1 + $0x980] ss:$28 sps:$4 sm:$0xff]  }
  0xfa   :  { %17409 = vmatpush3.bf16.msra.mxu1 %v18832_v5  ;;  %v18863_v5 = vld [vmem:[%s26599_s1 + $0x588] ss:$28 sps:$4 sm:$0xff]  }
  0xfb   :  { %17422 = vmatprep.subr.bf16.mxu1 %v18836_v6  ;;  %v18870_v6 = vld [vmem:[%s26599_s1 + $0x5c4] ss:$28 sps:$4 sm:$0xff]  }
  0xfc   :  { %2731 = vmatpush1.bf16.msra.mxu0 %v18808_v7  ;;  %v18892_v7 = vld [vmem:[%s26599_s1 + $0x7c0] ss:$28 sps:$4 sm:$0xff]  }
  0xfd   :  { %2947 = vmatmul.mubr.bf16.vlgmr.msra.gmra.mrb[16].mxu1 %v20097_v17  ;;  %2732 = vmatprep.subr.bf16.mxu0 %v18815_v8  ;;  %v18896_v8 = vld [vmem:[%s26599_s1 + $0x9b8] ss:$28 sps:$4 sm:$0xff]  }
  0xfe   :  { %17423 = vmatpush3.bf16.msra.mxu1 %v18837_v10  ;;  %2954 = vmatprep.mubr.bf16.mxu1 %v20167_v40  ;;  %v18868_v10 = vld [vmem:[%s26599_s1 + $0x5c0] ss:$28 sps:$4 sm:$0xff]  }
  0xff   :  { %17424 = vmatprep.subr.bf16.mxu1 %v18841_v11  ;;  %v18875_v11 = vld [vmem:[%s26599_s1 + $0x5fc] ss:$28 sps:$4 sm:$0xff]  }
 0x100   :  { %2733 = vmatpush1.bf16.msra.mxu0 %v18813_v12  ;;  %v18897_v12 = vld [vmem:[%s26599_s1 + $0x7f8] ss:$28 sps:$4 sm:$0xff]  }
 0x101   :  { %2755 = vmatprep.subr.bf16.mxu0 %v18820_v13  ;;  %v18901_v13 = vld [vmem:[%s26599_s1 + $0x9f0] ss:$28 sps:$4 sm:$0xff]  }
 0x102   :  { %17425 = vmatpush3.bf16.msra.mxu1 %v18842_v14  ;;  %v18873_v14 = vld [vmem:[%s26599_s1 + $0x5f8] ss:$28 sps:$4 sm:$0xff]  }
 0x103   :  { %17426 = vmatprep.subr.bf16.mxu1 %v18846_v16  ;;  %2735 = vmatmul.mubr.bf16.vlgmr.msra.gmra.mrb[8].mxu0 %v20097_v17  ;;  %v18856_v17 = vld [vmem:[%s26599_s1 + $0x638] ss:$28 sps:$4 sm:$0xff]  }
 0x104   :  { %2756 = vmatpush1.bf16.msra.mxu0 %v18818_v18  ;;  %2744 = vmatprep.mubr.bf16.mxu0 %v20167_v40  ;;  %v18861_v40 = vld [vmem:[%s26599_s1 + $0x670] ss:$28 sps:$4 sm:$0xff]  }
 0x105   :  { %2955 = vmatmul.mubr.bf16.gmra.mrb[20].mxu1 %v20189_v47  ;;  %2757 = vmatprep.subr.bf16.mxu0 %v18825_v19  ;;  %v18880_v16 = vld [vmem:[%s26599_s1 + $0x634] ss:$28 sps:$4 sm:$0xff]   ;;  %v18906_v19 = vld [vmem:[%s26599_s1 + $0xa28] ss:$28 sps:$4 sm:$0xff]  }
 0x106   :  { %17427 = vmatpush3.bf16.msra.mxu1 %v18847_v20  ;;  %2995 = vmatprep.mubr.bf16.mxu1 %v20204_v52  ;;  %v18902_v18 = vld [vmem:[%s26599_s1 + $0x830] ss:$28 sps:$4 sm:$0xff]  }
 0x107   :  { %17428 = vmatprep.subr.bf16.mxu1 %v18851_v21  ;;  %v18878_v20 = vld [vmem:[%s26599_s1 + $0x630] ss:$28 sps:$4 sm:$0xff]  }
 0x108   :  { %2758 = vmatpush1.bf16.msra.mxu0 %v18823_v22  ;;  %v18885_v21 = vld [vmem:[%s26599_s1 + $0x66c] ss:$28 sps:$4 sm:$0xff]  }
 0x109   :  { %2759 = vmatprep.subr.bf16.mxu0 %v18830_v24  ;;  %v18907_v22 = vld [vmem:[%s26599_s1 + $0x868] ss:$28 sps:$4 sm:$0xff]   ;;  %v18911_v24 = vld [vmem:[%s26599_s1 + $0xa60] ss:$28 sps:$4 sm:$0xff]  }
 0x10a   :  { %17429 = vmatpush3.bf16.msra.mxu1 %v18852_v25  ;;  %v18883_v25 = vld [vmem:[%s26599_s1 + $0x668] ss:$28 sps:$4 sm:$0xff]  }
 0x10b   :  { %17430 = vmatprep.subr.bf16.mxu1 %v18856_v17  ;;  %2745 = vmatmul.mubr.bf16.gmra.mrb[12].mxu0 %v20189_v47  ;;  %v18866_v47 = vld [vmem:[%s26599_s1 + $0x6a8] ss:$28 sps:$4 sm:$0xff]  }
 0x10c   :  { %2760 = vmatpush1.bf16.msra.mxu0 %v18828_v29  ;;  %2787 = vmatprep.mubr.bf16.mxu0 %v20204_v52  ;;  %v18838_v52 = vld [vmem:[%s26599_s1 + $0x470] ss:$28 sps:$4 sm:$0xff]   ;;  %v18890_v17 = vld [vmem:[%s26599_s1 + $0x6a4] ss:$28 sps:$4 sm:$0xff]  }
 0x10d   :  { %2761 = vmatprep.subr.bf16.mxu0 %v18835_v31  ;;  %v18912_v29 = vld [vmem:[%s26599_s1 + $0x8a0] ss:$28 sps:$4 sm:$0xff]   ;;  %v18922_v31 = vld [vmem:[%s26599_s1 + $0xa98] ss:$28 sps:$4 sm:$0xff]  }
 0x10e   :  { %17431 = vmatpush3.bf16.msra.mxu1 %v18857_v32  ;;  %v18888_v32 = vld [vmem:[%s26599_s1 + $0x6a0] ss:$28 sps:$4 sm:$0xff]  }
 0x10f   :  { %17432 = vmatprep.subr.bf16.mxu1 %v18861_v40  ;;  %v18895_v40 = vld [vmem:[%s26599_s1 + $0x6dc] ss:$28 sps:$4 sm:$0xff]  }
 0x110   :  { %2762 = vmatpush1.bf16.msra.mxu0 %v18833_v34  ;;  %v18926_v34 = vld [vmem:[%s26599_s1 + $0xad0] ss:$28 sps:$4 sm:$0xff]  }
 0x111   :  { %2763 = vmatprep.subr.bf16.mxu0 %v18840_v35  ;;  %v18893_v35 = vld [vmem:[%s26599_s1 + $0x6d8] ss:$28 sps:$4 sm:$0xff]  }
 0x112   :  { %17433 = vmatpush3.bf16.msra.mxu1 %v18862_v37  ;;  %v18900_v37 = vld [vmem:[%s26599_s1 + $0x714] ss:$28 sps:$4 sm:$0xff]  }
 0x113   :  { %17434 = vmatprep.subr.bf16.mxu1 %v18866_v47  ;;  %v18898_v47 = vld [vmem:[%s26599_s1 + $0x710] ss:$28 sps:$4 sm:$0xff]  }
 0x114   :  { %2764 = vmatpush1.bf16.msra.mxu0 %v18838_v52  ;;  %v18905_v52 = vld [vmem:[%s26599_s1 + $0x74c] ss:$28 sps:$4 sm:$0xff]  }
 0x115   :  { %2765 = vmatprep.subr.bf16.mxu0 %v18845_v38  ;;  %v18903_v38 = vld [vmem:[%s26599_s1 + $0x748] ss:$28 sps:$4 sm:$0xff]  }
 0x116   :  { %17435 = vmatpush3.bf16.msra.mxu1 %v18867_v43  ;;  %v18910_v43 = vld [vmem:[%s26599_s1 + $0x784] ss:$28 sps:$4 sm:$0xff]  }
 0x117   :  { %17436 = vmatprep.subr.bf16.mxu1 %v18871_v44  ;;  %v18915_v44 = vld [vmem:[%s26599_s1 + $0x7bc] ss:$28 sps:$4 sm:$0xff]  }
 0x118   :  { %2766 = vmatpush1.bf16.msra.mxu0 %v18843_v46  ;;  %v18913_v46 = vld [vmem:[%s26599_s1 + $0x7b8] ss:$28 sps:$4 sm:$0xff]  }
 0x119   :  { %2767 = vmatprep.subr.bf16.mxu0 %v18850_v48  ;;  %v18921_v48 = vld [vmem:[%s26599_s1 + $0x82c] ss:$28 sps:$4 sm:$0xff]  }
 0x11a   :  { %17437 = vmatpush3.bf16.msra.mxu1 %v18872_v50  ;;  %v18919_v50 = vld [vmem:[%s26599_s1 + $0x828] ss:$28 sps:$4 sm:$0xff]  }
 0x11b   :  { %17450 = vmatprep.subr.bf16.mxu1 %v18876_v55  ;;  %v18923_v55 = vld [vmem:[%s26599_s1 + $0x860] ss:$28 sps:$4 sm:$0xff]  }
 0x11c   :  { %2768 = vmatpush1.bf16.msra.mxu0 %v18848_v51  ;;  %v18929_v51 = vld [vmem:[%s26599_s1 + $0x89c] ss:$28 sps:$4 sm:$0xff]  }
 0x11d   :  { %2996 = vmatmul.mubr.bf16.vlgmr.msra.gmra.mrb[24].mxu1 %v20329_v33  ;;  %2769 = vmatprep.subr.bf16.mxu0 %v18855_v53  ;;  %v18927_v53 = vld [vmem:[%s26599_s1 + $0x898] ss:$28 sps:$4 sm:$0xff]  }
 0x11e   :  { %17451 = vmatpush3.bf16.msra.mxu1 %v18877_v54  ;;  %3003 = vmatprep.mubr.bf16.mxu1 %v20349_v41  ;;  %v18932_v54 = vld [vmem:[%s26599_s1 + $0x8d4] ss:$28 sps:$4 sm:$0xff]  }
 0x11f   :  { %17452 = vmatprep.subr.bf16.mxu1 %v18881_v57  ;;  %v18930_v57 = vld [vmem:[%s26599_s1 + $0x8d0] ss:$28 sps:$4 sm:$0xff]  }
 0x120   :  { %2770 = vmatpush1.bf16.msra.mxu0 %v18853_v58  ;;  %v18935_v58 = vld [vmem:[%s26599_s1 + $0x90c] ss:$28 sps:$4 sm:$0xff]  }
 0x121   :  { %2771 = vmatprep.subr.bf16.mxu0 %v18860_v59  ;;  %v18933_v59 = vld [vmem:[%s26599_s1 + $0x908] ss:$28 sps:$4 sm:$0xff]  }
 0x122   :  { %17453 = vmatpush3.bf16.msra.mxu1 %v18882_v61  ;;  %v18938_v61 = vld [vmem:[%s26599_s1 + $0x944] ss:$28 sps:$4 sm:$0xff]  }
 0x123   :  { %17454 = vmatprep.subr.bf16.mxu1 %v18886_v63  ;;  %v18936_v63 = vld [vmem:[%s26599_s1 + $0x940] ss:$28 sps:$4 sm:$0xff]  }
 0x124   :  { %2772 = vmatpush1.bf16.msra.mxu0 %v18858_v0  ;;  %v18941_v0 = vld [vmem:[%s26599_s1 + $0x97c] ss:$28 sps:$4 sm:$0xff]  }
 0x125   :  { %3004 = vmatmul.mubr.bf16.gmra.mrb[28].mxu1 %v20371_v49  ;;  %2773 = vmatprep.subr.bf16.mxu0 %v18865_v1  ;;  %v18939_v1 = vld [vmem:[%s26599_s1 + $0x978] ss:$28 sps:$4 sm:$0xff]  }
 0x126   :  { %17455 = vmatpush3.bf16.msra.mxu1 %v18887_v2  ;;  %3044 = vmatprep.mubr.bf16.mxu1 %v20385_v56  ;;  %v18944_v2 = vld [vmem:[%s26599_s1 + $0x9b4] ss:$28 sps:$4 sm:$0xff]  }
 0x127   :  { %17456 = vmatprep.subr.bf16.mxu1 %v18891_v3  ;;  %v18942_v3 = vld [vmem:[%s26599_s1 + $0x9b0] ss:$28 sps:$4 sm:$0xff]  }
 0x128   :  { %2774 = vmatpush1.bf16.msra.mxu0 %v18863_v5  ;;  %v18947_v5 = vld [vmem:[%s26599_s1 + $0x9ec] ss:$28 sps:$4 sm:$0xff]  }
 0x129   :  { %2775 = vmatprep.subr.bf16.mxu0 %v18870_v6  ;;  %v18945_v6 = vld [vmem:[%s26599_s1 + $0x9e8] ss:$28 sps:$4 sm:$0xff]  }
 0x12a   :  { %17457 = vmatpush3.bf16.msra.mxu1 %v18892_v7  ;;  %v18950_v7 = vld [vmem:[%s26599_s1 + $0xa24] ss:$28 sps:$4 sm:$0xff]  }
 0x12b   :  { %17458 = vmatprep.subr.bf16.mxu1 %v18896_v8  ;;  %v18948_v8 = vld [vmem:[%s26599_s1 + $0xa20] ss:$28 sps:$4 sm:$0xff]  }
 0x12c   :  { %2776 = vmatpush1.bf16.msra.mxu0 %v18868_v10  ;;  %v18953_v10 = vld [vmem:[%s26599_s1 + $0xa5c] ss:$28 sps:$4 sm:$0xff]  }
 0x12d   :  { %2777 = vmatprep.subr.bf16.mxu0 %v18875_v11  ;;  %v18951_v11 = vld [vmem:[%s26599_s1 + $0xa58] ss:$28 sps:$4 sm:$0xff]  }
 0x12e   :  { %17459 = vmatpush3.bf16.msra.mxu1 %v18897_v12  ;;  %v18956_v12 = vld [vmem:[%s26599_s1 + $0xa94] ss:$28 sps:$4 sm:$0xff]  }
 0x12f   :  { %17460 = vmatprep.subr.bf16.mxu1 %v18901_v13  ;;  %v18954_v13 = vld [vmem:[%s26599_s1 + $0xa90] ss:$28 sps:$4 sm:$0xff]  }
 0x130   :  { %2778 = vmatpush1.bf16.msra.mxu0 %v18873_v14  ;;  %v18959_v14 = vld [vmem:[%s26599_s1 + $0xacc] ss:$28 sps:$4 sm:$0xff]  }
 0x131   :  { %2779 = vmatprep.subr.bf16.mxu0 %v18880_v16  ;;  %v18957_v16 = vld [vmem:[%s26599_s1 + $0xac8] ss:$28 sps:$4 sm:$0xff]  }
 0x132   :  { %17461 = vmatpush3.bf16.msra.mxu1 %v18902_v18 }
 0x133   :  { %17462 = vmatprep.subr.bf16.mxu1 %v18906_v19 }
 0x134   :  { %2780 = vmatpush1.bf16.msra.mxu0 %v18878_v20 }
 0x135   :  { %2781 = vmatprep.subr.bf16.mxu0 %v18885_v21 }
 0x136   :  { %17463 = vmatpush3.bf16.msra.mxu1 %v18907_v22 }
 0x137   :  { %17464 = vmatprep.subr.bf16.mxu1 %v18911_v24 }
 0x138   :  { %2782 = vmatpush1.bf16.msra.mxu0 %v18883_v25 }
 0x139   :  { %2783 = vmatprep.subr.bf16.mxu0 %v18890_v17 }
 0x13a   :  { %17465 = vmatpush3.bf16.msra.mxu1 %v18912_v29 }
 0x13b   :  { %17662 = vmatprep.subr.bf16.mxu1 %v18922_v31 }
 0x13c   :  { %2784 = vmatpush1.bf16.msra.mxu0 %v18888_v32 }
 0x13d   :  { %3045 = vmatmul.mubr.bf16.vlgmr.msra.gmra.mrb[32].mxu1 %v20561_v60  ;;  %2785 = vmatprep.subr.bf16.mxu0 %v18895_v40 }
 0x13e   :  { %3052 = vmatprep.mubr.bf16.mxu1 %v20581_v4  ;;  %17663 = vmatpush3.bf16.msra.mxu1 %v18922_v31 }
 0x13f   :  { %17664 = vmatprep.subr.bf16.mxu1 %v18926_v34 }
 0x140   :  { %2786 = vmatpush1.bf16.msra.mxu0 %v18893_v35 }
 0x141   :  { %2808 = vmatprep.subr.bf16.mxu0 %v18900_v37 }
 0x142   :  { %17665 = vmatpush3.bf16.msra.mxu1 %v18926_v34 }
 0x143   :  { %2788 = vmatmul.mubr.bf16.vlgmr.msra.gmra.mrb[8].mxu0 %v20329_v33  ;;  %v18908_v33 = vld [vmem:[%s26599_s1 + $0x780] ss:$28 sps:$4 sm:$0xff]  }
 0x144   :  { %2809 = vmatpush1.bf16.msra.mxu0 %v18898_v47  ;;  %2797 = vmatprep.mubr.bf16.mxu0 %v20349_v41  ;;  %v18918_v41 = vld [vmem:[%s26599_s1 + $0x7f4] ss:$28 sps:$4 sm:$0xff]  }
 0x145   :  { %3053 = vmatmul.mubr.bf16.gmra.mrb[36].mxu1 %v20597_v9  ;;  %2810 = vmatprep.subr.bf16.mxu0 %v18905_v52 }
 0x146   :  { %17666 = vmatprep.mubr.msk.bf16.mxu1 %vm2271_vm0, %v19899_v15 }
 0x148   :  { %2811 = vmatpush1.bf16.msra.mxu0 %v18903_v38 }
 0x149   :  { %2812 = vmatprep.subr.bf16.mxu0 %v18910_v43 }
 0x14b   :  { %2798 = vmatmul.mubr.bf16.gmra.mrb[12].mxu0 %v20371_v49  ;;  %v18916_v49 = vld [vmem:[%s26599_s1 + $0x7f0] ss:$28 sps:$4 sm:$0xff]  }
 0x14c   :  { %2813 = vmatpush1.bf16.msra.mxu0 %v18908_v33  ;;  %2840 = vmatprep.mubr.bf16.mxu0 %v20385_v56  ;;  %v18925_v56 = vld [vmem:[%s26599_s1 + $0x864] ss:$28 sps:$4 sm:$0xff]   ;;  %s19788_s1 = smov 16  }
 0x14d   :  { %17667 = vmatmul.mubr.msk.bf16.vlgmr.msra.gmra.mrb[40].mxu1 %vm2271_vm0, %v20041_v62  ;;  %2814 = vmatprep.subr.bf16.mxu0 %v18915_v44 }
 0x14e   :  { %3925 = vmatprep.mubr.bf16.mxu1 %v20637_v23 }
 0x150   :  { %2815 = vmatpush1.bf16.msra.mxu0 %v18913_v46 }
 0x151   :  { %2816 = vmatprep.subr.bf16.mxu0 %v18918_v41 }
 0x154   :  { %2817 = vmatpush1.bf16.msra.mxu0 %v18916_v49 }
 0x155   :  { %2818 = vmatprep.subr.bf16.mxu0 %v18921_v48 }
 0x158   :  { %2819 = vmatpush1.bf16.msra.mxu0 %v18919_v50 }
 0x159   :  { %2820 = vmatprep.subr.bf16.mxu0 %v18925_v56 }
 0x15c   :  { %2821 = vmatpush1.bf16.msra.mxu0 %v18923_v55 }
 0x15d   :  { %2822 = vmatprep.subr.bf16.mxu0 %v18929_v51 }
 0x160   :  { %2823 = vmatpush1.bf16.msra.mxu0 %v18927_v53 }
 0x161   :  { %2824 = vmatprep.subr.bf16.mxu0 %v18932_v54 }
 0x164   :  { %2825 = vmatpush1.bf16.msra.mxu0 %v18930_v57 }
 0x165   :  { %2826 = vmatprep.subr.bf16.mxu0 %v18935_v58 }
 0x168   :  { %2827 = vmatpush1.bf16.msra.mxu0 %v18933_v59 }
 0x169   :  { %2828 = vmatprep.subr.bf16.mxu0 %v18938_v61 }
 0x16c   :  { %2829 = vmatpush1.bf16.msra.mxu0 %v18936_v63 }
 0x16d   :  { %2830 = vmatprep.subr.bf16.mxu0 %v18941_v0 }
 0x170   :  { %2831 = vmatpush1.bf16.msra.mxu0 %v18939_v1 }
 0x171   :  { %2832 = vmatprep.subr.bf16.mxu0 %v18944_v2 }
 0x174   :  { %2833 = vmatpush1.bf16.msra.mxu0 %v18942_v3 }
 0x175   :  { %2834 = vmatprep.subr.bf16.mxu0 %v18947_v5 }
 0x178   :  { %2835 = vmatpush1.bf16.msra.mxu0 %v18945_v6 }
 0x179   :  { %2836 = vmatprep.subr.bf16.mxu0 %v18950_v7 }
 0x17c   :  { %2837 = vmatpush1.bf16.msra.mxu0 %v18948_v8 }
 0x17d   :  { %2838 = vmatprep.subr.bf16.mxu0 %v18953_v10 }
 0x180   :  { %2839 = vmatpush1.bf16.msra.mxu0 %v18951_v11 }
 0x181   :  { %2861 = vmatprep.subr.bf16.mxu0 %v18956_v12 }
 0x183   :  { %2841 = vmatmul.mubr.bf16.vlgmr.msra.gmra.mrb[8].mxu0 %v20561_v60 }
 0x184   :  { %2862 = vmatpush1.bf16.msra.mxu0 %v18954_v13  ;;  %2850 = vmatprep.mubr.bf16.mxu0 %v20581_v4 }
 0x185   :  { %2863 = vmatprep.subr.bf16.mxu0 %v18959_v14 }
 0x188   :  { %2864 = vmatpush1.bf16.msra.mxu0 %v18957_v16 }
 0x18b   :  { %2851 = vmatmul.mubr.bf16.gmra.mrb[12].mxu0 %v20597_v9 }
 0x18c   :  { %2893 = vmatprep.mubr.bf16.mxu0 %v20637_v23 }
 0x193   :  { %16374 = vmatmul.mubr.msk.bf16.vlgmr.msra.gmra.mrb[8].mxu0 %vm2271_vm0, %v19899_v15 }
 0x194   :  { %2903 = vmatprep.mubr.bf16.mxu0 %v20637_v23 }
 0x196   :  { %v2418_v18 = vpop.f32.mrb[0].mxu0 }
 0x197   :  { %v17794_v60 = vadd.f32 %v20676_v36, %v2418_v18  ;;  %v2420_v19 = vpop.f32.mrb[1].mxu0 }
 0x198   :  { %v17795_v4 = vadd.f32 %v20684_v39, %v2420_v19  ;;  %v2422_v20 = vpop.f32.mrb[2].mxu0 }
 0x199   :  { %v3138_v21 = vmul.f32 0.2, %v17794_v60  ;;  %v17796_v22 = vadd.f32 %v20688_v42, %v2422_v20  ;;  %v2424_v24 = vpop.f32.mrb[3].mxu0  ;;  %vm3110_vm2 = vcmp.ge.f32.partialorder %v17794_v60, 0.0 }
 0x19a   :  { %v3139_v9 = vmul.f32 0.2, %v17795_v4  ;;  %v17797_v25 = vadd.f32 %v20697_v45, %v2424_v24  ;;  %vm3111_vm3 = vcmp.ge.f32.partialorder %v17795_v4, 0.0 }
 0x19b   :  { %vm3117_vm4 = vcmp.ge.f32.partialorder %v17796_v22, 0.0  ;;  %v3145_v15 = vmul.f32 0.2, %v17796_v22  ;;  %16375 = vmatmul.mubr.msk.bf16.gmra.mrb[12].mxu0 %vm2271_vm0, %v20041_v62  ;;  %v3166_v39 = vsel %vm3110_vm2, %v17794_v60, %v3138_v21 }
 0x19c   :  { %vm3118_vm5 = vcmp.ge.f32.partialorder %v17797_v25, 0.0  ;;  %v3146_v36 = vmul.f32 0.2, %v17797_v25  ;;  %4151 = vmatprep.mubr.bf16.mxu0 %v20637_v23  ;;  %v3167_v29 = vsel %vm3111_vm3, %v17795_v4, %v3139_v9 }
 0x19d   :  { %v3173_v17 = vsel %vm3117_vm4, %v17796_v22, %v3145_v15  ;;  %vm3871_vm4 = vcmask 1041408  }
 0x19e   :  { %v21115_v31 = vpack.c.bf16 %v3173_v17, %v3166_v39  ;;  %v3174_v42 = vsel %vm3118_vm5, %v17797_v25, %v3146_v36  ;;  %v2428_v32 = vpop.f32.mrb[4].mxu0  ;;  %vm3249_vm5 = vcmask 130048  }
 0x19f   :  { %v21117_v40 = vpack.c.bf16 %v3174_v42, %v3167_v29  ;;  %v17798_v45 = vadd.f32 %v20802_v26, %v2428_v32  ;;  %v2430_v34 = vpop.f32.mrb[5].mxu0 }
 0x1a0   :  { %3211 = vst.msk [vmem:[#allocation2] sm:$0xff] %vm3208_vm1, %v21115_v31  ;;  %v17799_v62 = vadd.f32 %v20808_v27, %v2430_v34  ;;  %3241 = vrot.lane.b32.xlu0 %v21115_v31, %s19788_s1  ;;  %v2432_v23 = vpop.f32.mrb[6].mxu0 }
 0x1a1   :  { %v3152_v35 = vmul.f32 0.2, %v17798_v45  ;;  %v17800_v37 = vadd.f32 %v20811_v28, %v2432_v23  ;;  %v2434_v47 = vpop.f32.mrb[7].mxu0  ;;  %vm3124_vm6 = vcmp.ge.f32.partialorder %v17798_v45, 0.0 }
 0x1a2   :  { %v3153_v52 = vmul.f32 0.2, %v17799_v62  ;;  %v17801_v38 = vadd.f32 %v20816_v30, %v2434_v47  ;;  %vm3125_vm7 = vcmp.ge.f32.partialorder %v17799_v62, 0.0 }
 0x1a3   :  { %vm3131_vm8 = vcmp.ge.f32.partialorder %v17800_v37, 0.0  ;;  %v3159_v26 = vmul.f32 0.2, %v17800_v37  ;;  %v3180_v27 = vsel %vm3124_vm6, %v17798_v45, %v3152_v35 }
 0x1a4   :  { %vm3132_vm9 = vcmp.ge.f32.partialorder %v17801_v38, 0.0  ;;  %v3160_v43 = vmul.f32 0.2, %v17801_v38  ;;  %3243 = vrot.lane.b32.xlu0 %v21117_v40, %s19788_s1  ;;  %v3181_v44 = vsel %vm3125_vm7, %v17799_v62, %v3153_v52 }
 0x1a5   :  { %v3187_v33 = vsel %vm3131_vm8, %v17800_v37, %v3159_v26  ;;  %v21161_v26 = vld [vmem:[%s26601_s2] ss:$28 sps:$4 sm:$0xff]  }
 0x1a6   :  { %v3201_v46 = vpack.c.bf16 %v3187_v33, %v3180_v27  ;;  %v3188_v41 = vsel %vm3132_vm9, %v17801_v38, %v3160_v43  ;;  %v21156_v38 = vld [vmem:[%s26601_s2 + $0x4] ss:$28 sps:$4 sm:$0xff]   ;;  %v18963_v33 = vld [vmem:[%s26601_s2 + $0x10] ss:$28 sps:$4 sm:$0xff]  }
 0x1a7   :  { %v21127_v49 = vpack.c.bf16 %v3188_v41, %v3181_v44  ;;  %v3507_v18 = vld [vmem:[#allocation2] sm:$0xff]  ;;  %3893 = vmatprep.subr.bf16.mxu1 %v21156_v38  ;;  %v18965_v44 = vld [vmem:[%s26601_s2 + $0x14] ss:$28 sps:$4 sm:$0xff]   ;;  %v21178_v41 = vld [vmem:[%s26601_s2 + $0x3c] ss:$28 sps:$4 sm:$0xff]  }
 0x1a8   :  { %3212 = vst.msk [vmem:[#allocation2 + $0x8] sm:$0xff] %vm3208_vm1, %v3201_v46  ;;  %3215 = vrot.lane.b32.xlu0 %v21115_v31, %s19789_s8  ;;  %3245 = vrot.lane.b32.xlu1 %v3201_v46, %s19788_s1 }
 0x1a9   :  { %3894 = vmatpush1.bf16.msra.mxu1 %v21161_v26  ;;  %4119 = vmatprep.subr.bf16.mxu0 %v18965_v44 }
 0x1aa   :  { %4120 = vmatpush1.bf16.msra.mxu0 %v18963_v33  ;;  %3895 = vmatprep.subr.bf16.mxu1 %v21178_v41 }
 0x1ac   :  { %3217 = vrot.lane.b32.xlu0 %v3201_v46, %s19789_s8  ;;  %3247 = vrot.lane.b32.xlu1 %v21127_v49, %s19788_s1  ;;  %s19801_s1 = smov 48   ;;  %s19816_s8 = smov 96  }
 0x1af   :  { %v2683_v28 = vpop.f32.mrb[8].mxu1 }
 0x1b0   :  { %v3140_v30 = vmul.f32 0.2, %v2683_v28  ;;  %v2685_v48 = vpop.f32.mrb[9].mxu1  ;;  %vm3112_vm10 = vcmp.ge.f32.partialorder %v2683_v28, 0.0  ;;  %3223 = vrot.lane.b32.xlu0 %v21115_v31, %s19790_s9  ;;  %3256 = vrot.lane.b32.xlu1 %v21117_v40, %s19791_s10 }
 0x1b1   :  { %v3141_v50 = vmul.f32 0.2, %v2685_v48  ;;  %v2687_v56 = vpop.f32.mrb[10].mxu1  ;;  %vm3113_vm11 = vcmp.ge.f32.partialorder %v2685_v48, 0.0 }
 0x1b2   :  { %vm3119_vm12 = vcmp.ge.f32.partialorder %v2687_v56, 0.0  ;;  %v3147_v55 = vmul.f32 0.2, %v2687_v56  ;;  %v2689_v51 = vpop.f32.mrb[11].mxu1  ;;  %v3168_v54 = vsel %vm3112_vm10, %v2683_v28, %v3140_v30  ;;  %v18971_v28 = vld [vmem:[%s26601_s2 + $0x4c] ss:$28 sps:$4 sm:$0xff]  }
 0x1b3   :  { %vm3120_vm13 = vcmp.ge.f32.partialorder %v2689_v51, 0.0  ;;  %v3148_v53 = vmul.f32 0.2, %v2689_v51  ;;  %v3169_v58 = vsel %vm3113_vm11, %v2685_v48, %v3141_v50  ;;  %v21186_v30 = vld [vmem:[%s26601_s2 + $0x38] ss:$28 sps:$4 sm:$0xff]   ;;  %4121 = vmatprep.subr.bf16.mxu0 %v18971_v28 }
 0x1b4   :  { %v3175_v57 = vsel %vm3119_vm12, %v2687_v56, %v3147_v55  ;;  %3225 = vrot.lane.b32.xlu0 %v3201_v46, %s19790_s9  ;;  %3258 = vrot.lane.b32.xlu1 %v21127_v49, %s19791_s10  ;;  %v18969_v48 = vld [vmem:[%s26601_s2 + $0x48] ss:$28 sps:$4 sm:$0xff]   ;;  %v21196_v50 = vld [vmem:[%s26601_s2 + $0x74] ss:$28 sps:$4 sm:$0xff]   ;;  %s19796_s10 = smov 56  }
 0x1b5   :  { %v21134_v59 = vpack.c.bf16 %v3175_v57, %v3168_v54  ;;  %v3176_v61 = vsel %vm3120_vm13, %v2689_v51, %v3148_v53  ;;  %3896 = vmatpush1.bf16.msra.mxu1 %v21186_v30  ;;  %v18977_v56 = vld [vmem:[%s26601_s2 + $0x84] ss:$28 sps:$4 sm:$0xff]   ;;  %4122 = vmatpush1.bf16.msra.mxu0 %v18969_v48  ;;  %v21204_v55 = vld [vmem:[%s26601_s2 + $0x70] ss:$28 sps:$4 sm:$0xff]   ;;  %v18983_v54 = vld [vmem:[%s26601_s2 + $0xbc] ss:$28 sps:$4 sm:$0xff]  }
 0x1b6   :  { %v21137_v63 = vpack.c.bf16 %v3176_v61, %v3169_v58  ;;  %v18975_v51 = vld [vmem:[%s26601_s2 + $0x80] ss:$28 sps:$4 sm:$0xff]   ;;  %3897 = vmatprep.subr.bf16.mxu1 %v21196_v50  ;;  %4123 = vmatprep.subr.bf16.mxu0 %v18977_v56  ;;  %v21214_v53 = vld [vmem:[%s26601_s2 + $0xac] ss:$28 sps:$4 sm:$0xff]   ;;  %v18981_v58 = vld [vmem:[%s26601_s2 + $0xb8] ss:$28 sps:$4 sm:$0xff]  }
 0x1b7   :  { %v2693_v0 = vpop.f32.mrb[12].mxu1  ;;  %v21222_v57 = vld [vmem:[%s26601_s2 + $0xa8] ss:$28 sps:$4 sm:$0xff]  }
 0x1b8   :  { %v2695_v1 = vpop.f32.mrb[13].mxu1  ;;  %vm3126_vm14 = vcmp.ge.f32.partialorder %v2693_v0, 0.0  ;;  %v3154_v2 = vmul.f32 0.2, %v2693_v0  ;;  %3231 = vrot.lane.b32.xlu0 %v21115_v31, %s19792_s11  ;;  %3264 = vrot.lane.b32.xlu1 %v21117_v40, %s19793_s12  ;;  %v21232_v61 = vld [vmem:[%s26601_s2 + $0xe4] ss:$28 sps:$4 sm:$0xff]  }
 0x1b9   :  { %v2697_v3 = vpop.f32.mrb[14].mxu1  ;;  %vm3127_vm15 = vcmp.ge.f32.partialorder %v2695_v1, 0.0  ;;  %v3155_v5 = vmul.f32 0.2, %v2695_v1  ;;  %3898 = vmatpush1.bf16.msra.mxu1 %v21204_v55  ;;  %4124 = vmatpush1.bf16.msra.mxu0 %v18975_v51  ;;  %v3508_v48 = vld [vmem:[#allocation2 + $0x8] sm:$0xff] }
 0x1ba   :  { %v2699_v6 = vpop.f32.mrb[15].mxu1  ;;  %vm3133_vm2 = vcmp.ge.f32.partialorder %v2697_v3, 0.0  ;;  %v3161_v7 = vmul.f32 0.2, %v2697_v3  ;;  %v3182_v8 = vsel %vm3126_vm14, %v2693_v0, %v3154_v2  ;;  %3899 = vmatprep.subr.bf16.mxu1 %v21214_v53  ;;  %4125 = vmatprep.subr.bf16.mxu0 %v18983_v54  ;;  %v18989_v0 = vld [vmem:[%s26601_s2 + $0xf4] ss:$28 sps:$4 sm:$0xff]  }
 0x1bb   :  { %vm3134_vm3 = vcmp.ge.f32.partialorder %v2699_v6, 0.0  ;;  %v3162_v10 = vmul.f32 0.2, %v2699_v6  ;;  %v3183_v11 = vsel %vm3127_vm15, %v2695_v1, %v3155_v5  ;;  %v21240_v1 = vld [vmem:[%s26601_s2 + $0xe0] ss:$28 sps:$4 sm:$0xff]  }
 0x1bc   :  { %v3189_v12 = vsel %vm3133_vm2, %v2697_v3, %v3161_v7  ;;  %3233 = vrot.lane.b32.xlu0 %v3201_v46, %s19792_s11  ;;  %3266 = vrot.lane.b32.xlu1 %v21127_v49, %s19793_s12  ;;  %v18987_v2 = vld [vmem:[%s26601_s2 + $0xf0] ss:$28 sps:$4 sm:$0xff]   ;;  %v3652_v3 = vld [vmem:[%s26601_s2 + $0x118] sm:$0x33]  ;;  %s19797_s11 = smov 68   ;;  %s19798_s12 = smov 40  }
 0x1bd   :  { %v21142_v13 = vpack.c.bf16 %v3189_v12, %v3182_v8  ;;  %v3190_v14 = vsel %vm3134_vm3, %v2699_v6, %v3162_v10  ;;  %3900 = vmatpush1.bf16.msra.mxu1 %v21222_v57  ;;  %4126 = vmatpush1.bf16.msra.mxu0 %v18981_v58  ;;  %v3654_v5 = vld [vmem:[%s26601_s2 + $0x128] sm:$0x33]  ;;  %v16414_v6 = vcombine.high %v3652_v3, %v3652_v3 }
 0x1be   :  { %v21144_v16 = vpack.c.bf16 %v3190_v14, %v3183_v11  ;;  %3901 = vmatprep.subr.bf16.mxu1 %v21232_v61  ;;  %4127 = vmatprep.subr.bf16.mxu0 %v18989_v0  ;;  %v16418_v7 = vcombine.high %v3654_v5, %v3654_v5  ;;  %v16413_v8 = vcombine.low %v3652_v3, %v3652_v3 }
 0x1bf   :  { %v16417_v10 = vcombine.low %v3654_v5, %v3654_v5 }
 0x1c0   :  { %3531 = vrot.lane.b32.xlu0 %v3507_v18, %s19794_s13  ;;  %3272 = vrot.lane.b32.xlu1 %v21117_v40, %s19795_s14  ;;  %v3873_v14 = vsel %vm3871_vm4, %v16413_v8, 0 }
 0x1c1   :  { %3902 = vmatpush1.bf16.msra.mxu1 %v21240_v1  ;;  %4128 = vmatpush1.bf16.msra.mxu0 %v18987_v2  ;;  %v3885_v18 = vsel %vm3871_vm4, %v16417_v10, 0 }
 0x1c2   :  { %16420 = vmatprep.subr.msk.bf16.mxu1 %vm3871_vm4, %v16414_v6  ;;  %16438 = vmatprep.subr.msk.bf16.mxu0 %vm3871_vm4, %v16418_v7 }
 0x1c4   :  { %3274 = vrot.lane.b32.xlu1 %v21127_v49, %s19795_s14  ;;  %s19809_s14 = smov 108  }
 0x1c5   :  { %3904 = vmatpush1.bf16.msra.mxu1 %v3873_v14  ;;  %4130 = vmatpush1.bf16.msra.mxu0 %v3885_v18 }
 0x1c6   :  { %5168 = vmatprep.subr.bf16.mxu0 %v21156_v38 }
 0x1d0   :  { %v17410_v60 = vpop.f32.mrb[16].mxu1 }
 0x1d1   :  { %v17411_v19 = vpop.f32.mrb[17].mxu1 }
 0x1d2   :  { %v17413_v4 = vpop.f32.mrb[18].mxu1  ;;  %v17412_v20 = vadd.f32 %v17411_v19, %v17410_v60 }
 0x1d3   :  { %v17414_v21 = vpop.f32.mrb[19].mxu1 }
 0x1d4   :  { %v17415_v22 = vadd.f32 %v17414_v21, %v17413_v4 }
 0x1d8   :  { %v17416_v24 = vpop.f32.mrb[20].mxu1 }
 0x1d9   :  { %v17417_v9 = vpop.f32.mrb[21].mxu1 }
 0x1da   :  { %v17419_v25 = vpop.f32.mrb[22].mxu1  ;;  %v17418_v15 = vadd.f32 %v17417_v9, %v17416_v24 }
 0x1db   :  { %v17420_v36 = vpop.f32.mrb[23].mxu1 }
 0x1dc   :  { %v17421_v39 = vadd.f32 %v17420_v36, %v17419_v25 }
 0x1f0   :  { %v17438_v17 = vpop.f32.mrb[24].mxu1 }
 0x1f1   :  { %v17439_v29 = vpop.f32.mrb[25].mxu1 }
 0x1f2   :  { %v17441_v31 = vpop.f32.mrb[26].mxu1  ;;  %v17440_v42 = vadd.f32 %v17439_v29, %v17438_v17 }
 0x1f3   :  { %v17442_v32 = vpop.f32.mrb[27].mxu1 }
 0x1f4   :  { %v21149_v45 = vadd.f32 %v17440_v42, %v17412_v20  ;;  %v17443_v34 = vadd.f32 %v17442_v32, %v17441_v31 }
 0x1f6   :  { %v21151_v62 = vadd.f32 %v17443_v34, %v17415_v22 }
 0x1f8   :  { %v17444_v23 = vpop.f32.mrb[28].mxu1 }
 0x1f9   :  { %v17445_v35 = vpop.f32.mrb[29].mxu1 }
 0x1fa   :  { %v17447_v37 = vpop.f32.mrb[30].mxu1  ;;  %v17446_v47 = vadd.f32 %v17445_v35, %v17444_v23 }
 0x1fb   :  { %v17448_v52 = vpop.f32.mrb[31].mxu1 }
 0x1fc   :  { %v21163_v43 = vadd.f32 %v17446_v47, %v17418_v15  ;;  %v17449_v27 = vadd.f32 %v17448_v52, %v17447_v37 }
 0x1fe   :  { %v21173_v46 = vadd.f32 %v17449_v27, %v17421_v39 }
 0x210   :  { %v17466_v11 = vpop.f32.mrb[32].mxu1 }
 0x211   :  { %v17467_v12 = vpop.f32.mrb[33].mxu1 }
 0x212   :  { %v17469_v60 = vpop.f32.mrb[34].mxu1  ;;  %v17468_v19 = vadd.f32 %v17467_v12, %v17466_v11  ;;  %v3242_v4 = vpop.permute.xlu0 %3241 }
 0x213   :  { %v17470_v20 = vpop.f32.mrb[35].mxu1 }
 0x214   :  { %v3047_v21 = vadd.f32 %v17468_v19, %v21149_v45  ;;  %v17471_v22 = vadd.f32 %v17470_v20, %v17469_v60 }
 0x216   :  { %v3050_v24 = vadd.f32 %v17471_v22, %v21151_v62  ;;  %v3244_v9 = vpop.permute.xlu0 %3243 }
 0x217   :  { %v3250_v25 = vsel %vm3249_vm5, %v3242_v4, %v3244_v9 }
 0x218   :  { %v17472_v15 = vpop.f32.mrb[36].mxu1  ;;  %3254 = vst.msk [vmem:[#allocation2 + $0x40] sm:$0xff] %vm3208_vm1, %v3250_v25 }
 0x219   :  { %v17473_v36 = vpop.f32.mrb[37].mxu1 }
 0x21a   :  { %v17475_v39 = vpop.f32.mrb[38].mxu1  ;;  %v17474_v17 = vadd.f32 %v17473_v36, %v17472_v15  ;;  %v3216_v29 = vpop.permute.xlu0 %3215 }
 0x21b   :  { %v3246_v31 = vpop.permute.xlu1 %3245  ;;  %3221 = vst.msk [vmem:[#allocation2 + $0x10] sm:$0xff] %vm3208_vm1, %v3216_v29  ;;  %v17476_v42 = vpop.f32.mrb[39].mxu1 }
 0x21c   :  { %v3055_v32 = vadd.f32 %v17474_v17, %v21163_v43  ;;  %v17477_v45 = vadd.f32 %v17476_v42, %v17475_v39 }
 0x21e   :  { %v3218_v34 = vpop.permute.xlu0 %3217  ;;  %v3058_v62 = vadd.f32 %v17477_v45, %v21173_v46 }
 0x21f   :  { %v3248_v23 = vpop.permute.xlu1 %3247  ;;  %3222 = vst.msk [vmem:[#allocation2 + $0x18] sm:$0xff] %vm3208_vm1, %v3218_v34  ;;  %v3515_v37 = vld [vmem:[#allocation2 + $0x40] sm:$0xff] }
 0x220   :  { %v3251_v35 = vsel %vm3249_vm5, %v3246_v31, %v3248_v23  ;;  %v17668_v47 = vpop.f32.mrb[40].mxu1  ;;  %3555 = vrot.lane.b32.xlu1 %v3515_v37, %s19796_s10  ;;  %vm3595_vm5 = vcmask 457728  }
 0x221   :  { %3255 = vst.msk [vmem:[#allocation2 + $0x48] sm:$0xff] %vm3208_vm1, %v3251_v35  ;;  %v3095_v52 = vpop.f32.mrb[41].mxu1  ;;  %v3104_v38 = vadd.f32 %v17668_v47, %v3055_v32 }
 0x222   :  { %v17669_v27 = vpop.f32.mrb[42].mxu1  ;;  %v3096_v43 = vadd.f32 %v3095_v52, %v3047_v21  ;;  %v3224_v33 = vpop.permute.xlu0 %3223 }
 0x223   :  { %v3257_v44 = vpop.permute.xlu1 %3256  ;;  %v3107_v28 = vadd.f32 %v17669_v27, %v3058_v62  ;;  %vm3130_vm6 = vcmp.ge.f32.partialorder %v3104_v38, 0.0  ;;  %v3158_v46 = vmul.f32 0.2, %v3104_v38  ;;  %3229 = vst.msk [vmem:[#allocation2 + $0x20] sm:$0xff] %vm3208_vm1, %v3224_v33  ;;  %v3098_v56 = vpop.f32.mrb[43].mxu1 }
 0x224   :  { %3262 = vst.msk [vmem:[#allocation2 + $0x50] sm:$0xff] %vm3208_vm1, %v3257_v44  ;;  %vm3116_vm7 = vcmp.ge.f32.partialorder %v3096_v43, 0.0  ;;  %v3144_v51 = vmul.f32 0.2, %v3096_v43  ;;  %3533 = vrot.lane.b32.xlu1 %v3508_v48, %s19794_s13  ;;  %v3099_v54 = vadd.f32 %v3098_v56, %v3050_v24  ;;  %v3509_v48 = vld [vmem:[#allocation2 + $0x10] sm:$0xff] }
 0x225   :  { %vm3137_vm8 = vcmp.ge.f32.partialorder %v3107_v28, 0.0  ;;  %v3165_v58 = vmul.f32 0.2, %v3107_v28  ;;  %v21272_v0 = vsel %vm3130_vm6, %v3104_v38, %v3158_v46  ;;  %vm3854_vm6 = vcmask 687104  }
 0x226   :  { %v3226_v2 = vpop.permute.xlu0 %3225  ;;  %vm3123_vm9 = vcmp.ge.f32.partialorder %v3099_v54, 0.0  ;;  %v3151_v5 = vmul.f32 0.2, %v3099_v54  ;;  %v21274_v6 = vsel %vm3116_vm7, %v3096_v43, %v3144_v51  ;;  %v3510_v51 = vld [vmem:[#allocation2 + $0x18] sm:$0xff]  ;;  %vm3478_vm7 = vcmask 97280  }
 0x227   :  { %v3259_v3 = vpop.permute.xlu1 %3258  ;;  %v21276_v7 = vsel %vm3137_vm8, %v3107_v28, %v3165_v58  ;;  %3230 = vst.msk [vmem:[#allocation2 + $0x28] sm:$0xff] %vm3208_vm1, %v3226_v2  ;;  %v21313_v2 = vld [vmem:[%s26601_s2 + $0xc] ss:$28 sps:$4 sm:$0xff]   ;;  %vm3298_vm8 = vcmask 31744  }
 0x228   :  { %3263 = vst.msk [vmem:[#allocation2 + $0x58] sm:$0xff] %vm3208_vm1, %v3259_v3  ;;  %v3207_v8 = vpack.c.bf16 %v21276_v7, %v21272_v0  ;;  %v21282_v10 = vsel %vm3123_vm9, %v3099_v54, %v3151_v5  ;;  %v3516_v38 = vld [vmem:[#allocation2 + $0x48] sm:$0xff]  ;;  %4006 = vmatprep.subr.bf16.mxu1 %v21313_v2  ;;  %v21359_v7 = vld [vmem:[%s26601_s2 + $0x40] ss:$28 sps:$4 sm:$0xff]   ;;  %vm3339_vm9 = vcmask 162816  }
 0x229   :  { %v3200_v11 = vpack.c.bf16 %v21282_v10, %v21274_v6  ;;  %v21331_v6 = vld [vmem:[%s26601_s2 + $0x8] ss:$28 sps:$4 sm:$0xff]  }
 0x22a   :  { %v3232_v12 = vpop.permute.xlu0 %3231  ;;  %v3511_v58 = vld [vmem:[#allocation2 + $0x20] sm:$0xff] }
 0x22b   :  { %v3265_v14 = vpop.permute.xlu1 %3264  ;;  %3237 = vst.msk [vmem:[#allocation2 + $0x30] sm:$0xff] %vm3208_vm1, %v3232_v12  ;;  %v3517_v56 = vld [vmem:[#allocation2 + $0x50] sm:$0xff] }
 0x22c   :  { %3270 = vst.msk [vmem:[#allocation2 + $0x60] sm:$0xff] %vm3208_vm1, %v3265_v14  ;;  %v3499_v14 = vld [vmem:[#allocation2 + $0x190] sm:$0xff] }
 0x22e   :  { %v3234_v18 = vpop.permute.xlu0 %3233  ;;  %v3512_v5 = vld [vmem:[#allocation2 + $0x28] sm:$0xff] }
 0x22f   :  { %v3267_v60 = vpop.permute.xlu1 %3266  ;;  %3238 = vst.msk [vmem:[#allocation2 + $0x38] sm:$0xff] %vm3208_vm1, %v3234_v18  ;;  %v3518_v54 = vld [vmem:[#allocation2 + $0x58] sm:$0xff] }
 0x230   :  { %3271 = vst.msk [vmem:[#allocation2 + $0x68] sm:$0xff] %vm3208_vm1, %v3267_v60 }
 0x232   :  { %v3532_v18 = vpop.permute.xlu0 %3531 }
 0x233   :  { %v3273_v19 = vpop.permute.xlu1 %3272  ;;  %v3519_v3 = vld [vmem:[#allocation2 + $0x60] sm:$0xff]  ;;  %v3573_v60 = vsel %vm3208_vm1, %v3499_v14, %v3532_v18 }
 0x234   :  { %3278 = vst.msk [vmem:[#allocation2 + $0x70] sm:$0xff] %vm3208_vm1, %v3273_v19 }
 0x237   :  { %v3275_v4 = vpop.permute.xlu1 %3274  ;;  %v21322_v12 = vld [vmem:[#allocation2 + $0x68] sm:$0xff] }
 0x238   :  { %3279 = vst.msk [vmem:[#allocation2 + $0x78] sm:$0xff] %vm3208_vm1, %v3275_v4  ;;  %v3513_v4 = vld [vmem:[#allocation2 + $0x30] sm:$0xff] }
 0x23b   :  { %v21353_v0 = vld [vmem:[#allocation2 + $0x70] sm:$0xff] }
 0x266   :  { %v2895_v20 = vpop.f32.mrb[8].mxu0 }
 0x267   :  { %v3142_v21 = vmul.f32 0.2, %v2895_v20  ;;  %v2897_v22 = vpop.f32.mrb[9].mxu0  ;;  %vm3114_vm10 = vcmp.ge.f32.partialorder %v2895_v20, 0.0 }
 0x268   :  { %v3143_v24 = vmul.f32 0.2, %v2897_v22  ;;  %v2899_v9 = vpop.f32.mrb[10].mxu0  ;;  %vm3115_vm11 = vcmp.ge.f32.partialorder %v2897_v22, 0.0 }
 0x269   :  { %vm3121_vm12 = vcmp.ge.f32.partialorder %v2899_v9, 0.0  ;;  %v3149_v25 = vmul.f32 0.2, %v2899_v9  ;;  %v2901_v15 = vpop.f32.mrb[11].mxu0  ;;  %v3170_v39 = vsel %vm3114_vm10, %v2895_v20, %v3142_v21  ;;  %v21349_v20 = vld [vmem:[#allocation4 + $0x80] sm:$0xff]  ;;  %v3514_v21 = vld [vmem:[#allocation2 + $0x38] sm:$0xff] }
 0x26a   :  { %vm3122_vm13 = vcmp.ge.f32.partialorder %v2901_v15, 0.0  ;;  %v3150_v36 = vmul.f32 0.2, %v2901_v15  ;;  %v3171_v29 = vsel %vm3115_vm11, %v2897_v22, %v3143_v24  ;;  %v3522_v22 = vld [vmem:[#allocation2 + $0x78] sm:$0xff]  ;;  %v3653_v24 = vld [vmem:[%s26601_s2 + $0x120] sm:$0x33] }
 0x26b   :  { %v3177_v17 = vsel %vm3121_vm12, %v2899_v9, %v3149_v25  ;;  %v16415_v9 = vcombine.low %v3653_v24, %v3653_v24  ;;  %v16416_v25 = vcombine.high %v3653_v24, %v3653_v24 }
 0x26c   :  { %v21292_v31 = vpack.c.bf16 %v3177_v17, %v3170_v39  ;;  %v3178_v42 = vsel %vm3122_vm13, %v2901_v15, %v3150_v36 }
 0x26d   :  { %v21294_v32 = vpack.c.bf16 %v3178_v42, %v3171_v29 }
 0x26e   :  { %v2905_v45 = vpop.f32.mrb[12].mxu0 }
 0x26f   :  { %v3156_v34 = vmul.f32 0.2, %v2905_v45  ;;  %3452 = vrot.lane.b32.xlu0 %v21294_v32, %s19797_s11  ;;  %v2907_v23 = vpop.f32.mrb[13].mxu0  ;;  %vm3128_vm14 = vcmp.ge.f32.partialorder %v2905_v45, 0.0 }
 0x270   :  { %v3157_v62 = vmul.f32 0.2, %v2907_v23  ;;  %v2909_v35 = vpop.f32.mrb[14].mxu0  ;;  %vm3129_vm15 = vcmp.ge.f32.partialorder %v2907_v23, 0.0 }
 0x271   :  { %vm3135_vm2 = vcmp.ge.f32.partialorder %v2909_v35, 0.0  ;;  %v3163_v37 = vmul.f32 0.2, %v2909_v35  ;;  %v2911_v47 = vpop.f32.mrb[15].mxu0  ;;  %v3184_v27 = vsel %vm3128_vm14, %v2905_v45, %v3156_v34 }
 0x272   :  { %vm3136_vm3 = vcmp.ge.f32.partialorder %v2911_v47, 0.0  ;;  %v3164_v52 = vmul.f32 0.2, %v2911_v47  ;;  %v3185_v33 = vsel %vm3129_vm15, %v2907_v23, %v3157_v62 }
 0x273   :  { %v3191_v43 = vsel %vm3135_vm2, %v2909_v35, %v3163_v37  ;;  %3557 = vrot.lane.b32.xlu0 %v3516_v38, %s19796_s10 }
 0x274   :  { %v21298_v44 = vpack.c.bf16 %v3191_v43, %v3184_v27  ;;  %v3192_v28 = vsel %vm3136_vm3, %v2911_v47, %v3164_v52 }
 0x275   :  { %v21300_v46 = vpack.c.bf16 %v3192_v28, %v3185_v33 }
 0x277   :  { %3454 = vrot.lane.b32.xlu1 %v21300_v46, %s19797_s11  ;;  %3535 = vrot.lane.b32.xlu0 %v3509_v48, %s19794_s13 }
 0x27b   :  { %3460 = vrot.lane.b32.xlu0 %v21294_v32, %s19798_s12  ;;  %3559 = vrot.lane.b32.xlu1 %v3517_v56, %s19796_s10 }
 0x27f   :  { %3537 = vrot.lane.b32.xlu1 %v3510_v51, %s19794_s13  ;;  %3561 = vrot.lane.b32.xlu0 %v3518_v54, %s19796_s10 }
 0x283   :  { %3462 = vrot.lane.b32.xlu1 %v21300_v46, %s19798_s12  ;;  %3539 = vrot.lane.b32.xlu0 %v3511_v58, %s19794_s13  ;;  %s19808_s12 = smov 64  }
 0x287   :  { %3470 = vrot.lane.b32.xlu0 %v21294_v32, %s19799_s16  ;;  %3563 = vrot.lane.b32.xlu1 %v3519_v3, %s19796_s10 }
 0x28b   :  { %3541 = vrot.lane.b32.xlu0 %v3512_v5, %s19794_s13  ;;  %3472 = vrot.lane.b32.xlu1 %v3200_v11, %s19799_s16  ;;  %v21347_v11 = vld [vmem:[%s26601_s2 + $0x44] ss:$28 sps:$4 sm:$0xff]  }
 0x28f   :  { %3474 = vrot.lane.b32.xlu0 %v21300_v46, %s19799_s16  ;;  %3565 = vrot.lane.b32.xlu1 %v21322_v12, %s19796_s10 }
 0x292   :  { %v3556_v19 = vpop.permute.xlu1 %3555 }
 0x293   :  { %v21334_v10 = vsel %vm3595_vm5, %v3573_v60, %v3556_v19  ;;  %3543 = vrot.lane.b32.xlu0 %v3513_v4, %s19794_s13  ;;  %3476 = vrot.lane.b32.xlu1 %v3207_v8, %s19799_s16  ;;  %v21369_v8 = vld [vmem:[%s26601_s2 + $0x7c] ss:$28 sps:$4 sm:$0xff]   ;;  %s19802_s16 = smov 4  }
 0x294   :  { %16421 = vmatmul.mubr.msk.bf16.vlgmr.msra.gmra.mrb[44].mxu1 %vm3854_vm6, %v21334_v10  ;;  %16439 = vmatmul.mubr.msk.bf16.vlgmr.msra.gmra.mrb[16].mxu0 %vm3854_vm6, %v21334_v10 }
 0x295   :  { %3935 = vmatprep.mubr.bf16.mxu1 %v21349_v20  ;;  %4161 = vmatprep.mubr.bf16.mxu0 %v21349_v20 }
 0x296   :  { %4007 = vmatpush1.bf16.msra.mxu1 %v21331_v6  ;;  %5169 = vmatpush1.bf16.msra.mxu0 %v21161_v26  ;;  %v21376_v26 = vld [vmem:[%s26601_s2 + $0x78] ss:$28 sps:$4 sm:$0xff]  }
 0x297   :  { %3545 = vrot.lane.b32.xlu0 %v3514_v21, %s19794_s13  ;;  %3567 = vrot.lane.b32.xlu1 %v21353_v0, %s19796_s10 }
 0x298   :  { %4008 = vmatprep.subr.bf16.mxu1 %v21347_v11  ;;  %5170 = vmatprep.subr.bf16.mxu0 %v21178_v41  ;;  %v21385_v41 = vld [vmem:[%s26601_s2 + $0xb4] ss:$28 sps:$4 sm:$0xff]  }
 0x29a   :  { %4009 = vmatpush1.bf16.msra.mxu1 %v21359_v7  ;;  %5171 = vmatpush1.bf16.msra.mxu0 %v21186_v30  ;;  %v21392_v30 = vld [vmem:[%s26601_s2 + $0xb0] ss:$28 sps:$4 sm:$0xff]  }
 0x29b   :  { %3280 = vrot.lane.b32.xlu0 %v21117_v40, %s19800_s26  ;;  %3569 = vrot.lane.b32.xlu1 %v3522_v22, %s19796_s10  ;;  %v4929_v22 = vld [vmem:[%s26601_s2 + $0x118] sm:$0x33] }
 0x29c   :  { %4010 = vmatprep.subr.bf16.mxu1 %v21369_v8  ;;  %5172 = vmatprep.subr.bf16.mxu0 %v21196_v50  ;;  %v21401_v50 = vld [vmem:[%s26601_s2 + $0xec] ss:$28 sps:$4 sm:$0xff]  }
 0x29e   :  { %4011 = vmatpush1.bf16.msra.mxu1 %v21376_v26  ;;  %5173 = vmatpush1.bf16.msra.mxu0 %v21204_v55  ;;  %v21411_v55 = vld [vmem:[%s26601_s2 + $0xe8] ss:$28 sps:$4 sm:$0xff]  }
 0x29f   :  { %3282 = vrot.lane.b32.xlu0 %v21127_v49, %s19800_s26  ;;  %3321 = vrot.lane.b32.xlu1 %v21134_v59, %s19801_s1 }
 0x2a0   :  { %4012 = vmatprep.subr.bf16.mxu1 %v21385_v41  ;;  %5174 = vmatprep.subr.bf16.mxu0 %v21214_v53  ;;  %v3879_v53 = vsel %vm3871_vm4, %v16415_v9, 0  ;;  %v16491_v9 = vcombine.high %v4929_v22, %v4929_v22 }
 0x2a2   :  { %4013 = vmatpush1.bf16.msra.mxu1 %v21392_v30  ;;  %5175 = vmatpush1.bf16.msra.mxu0 %v21222_v57  ;;  %v3500_v57 = vld [vmem:[#allocation2 + $0x198] sm:$0xff] }
 0x2a3   :  { %3290 = vrot.lane.b32.xlu0 %v21117_v40, %s19802_s16  ;;  %3323 = vrot.lane.b32.xlu1 %v21142_v13, %s19801_s1  ;;  %v21440_v40 = vld [vmem:[%s26601_s2 + $0x18] ss:$28 sps:$4 sm:$0xff]  }
 0x2a4   :  { %4014 = vmatprep.subr.bf16.mxu1 %v21401_v50  ;;  %5176 = vmatprep.subr.bf16.mxu0 %v21232_v61  ;;  %v3534_v61 = vpop.permute.xlu1 %3533 }
 0x2a6   :  { %4015 = vmatpush1.bf16.msra.mxu1 %v21411_v55  ;;  %5177 = vmatpush1.bf16.msra.mxu0 %v21240_v1 }
 0x2a7   :  { %3331 = vrot.lane.b32.xlu0 %v21134_v59, %s19803_s17  ;;  %3292 = vrot.lane.b32.xlu1 %v21134_v59, %s19802_s16 }
 0x2a8   :  { %16429 = vmatprep.subr.msk.bf16.mxu1 %vm3871_vm4, %v16416_v25  ;;  %v16490_v25 = vcombine.low %v4929_v22, %v4929_v22  ;;  %16497 = vmatprep.subr.msk.bf16.mxu0 %vm3871_vm4, %v16491_v9  ;;  %v19015_v22 = vld [vmem:[%s26601_s2 + $0xf8] ss:$28 sps:$4 sm:$0xff]  }
 0x2aa   :  { %4017 = vmatpush1.bf16.msra.mxu1 %v3879_v53  ;;  %v5148_v53 = vsel %vm3871_vm4, %v16490_v25, 0 }
 0x2ab   :  { %3294 = vrot.lane.b32.xlu0 %v21127_v49, %s19802_s16  ;;  %3333 = vrot.lane.b32.xlu1 %v21137_v63, %s19803_s17 }
 0x2ac   :  { %17670 = vmatprep.subr.bf16.mxu1 %v21440_v40  ;;  %5179 = vmatpush1.bf16.msra.mxu0 %v5148_v53 }
 0x2af   :  { %3335 = vrot.lane.b32.xlu0 %v21142_v13, %s19803_s17  ;;  %3296 = vrot.lane.b32.xlu1 %v21142_v13, %s19802_s16 }
 0x2b3   :  { %3305 = vrot.lane.b32.xlu0 %v21134_v59, %s19804_s18  ;;  %3337 = vrot.lane.b32.xlu1 %v21144_v16, %s19803_s17  ;;  %s19810_s17 = smov 36  }
 0x2b7   :  { %3307 = vrot.lane.b32.xlu0 %v21142_v13, %s19804_s18  ;;  %3346 = vrot.lane.b32.xlu1 %v21137_v63, %s19805_s19  ;;  %s19811_s18 = smov 80  }
 0x2bb   :  { %3313 = vrot.lane.b32.xlu0 %v21134_v59, %s19806_s20  ;;  %3348 = vrot.lane.b32.xlu1 %v21144_v16, %s19805_s19  ;;  %v3576_v59 = vsel %vm3208_vm1, %v3500_v57, %v3534_v61  ;;  %s19812_s19 = smov 8  }
 0x2bf   :  { %3315 = vrot.lane.b32.xlu0 %v21142_v13, %s19806_s20  ;;  %3354 = vrot.lane.b32.xlu1 %v21137_v63, %s19807_s21  ;;  %s19813_s20 = smov 52  }
 0x2c3   :  { %3356 = vrot.lane.b32.xlu1 %v21144_v16, %s19807_s21 }
 0x2e1   :  { %v3453_v49 = vpop.permute.xlu0 %3452 }
 0x2e2   :  { %3458 = vst.msk [vmem:[#allocation2 + $0x1a0] sm:$0xff] %vm3208_vm1, %v3453_v49 }
 0x2e5   :  { %v3558_v13 = vpop.permute.xlu0 %3557 }
 0x2e6   :  { %v21446_v1 = vsel %vm3595_vm5, %v3576_v59, %v3558_v13 }
 0x2e7   :  { %16422 = vmatmul.mubr.msk.bf16.gmra.mrb[48].mxu1 %vm3854_vm6, %v21446_v1  ;;  %16440 = vmatmul.mubr.msk.bf16.gmra.mrb[20].mxu0 %vm3854_vm6, %v21446_v1 }
 0x2e8   :  { %3945 = vmatprep.mubr.bf16.mxu1 %v21349_v20  ;;  %4171 = vmatprep.mubr.bf16.mxu0 %v21349_v20 }
 0x2e9   :  { %v3536_v15 = vpop.permute.xlu0 %3535  ;;  %v3455_v36 = vpop.permute.xlu1 %3454  ;;  %v3501_v39 = vld [vmem:[#allocation2 + $0x1a0] sm:$0xff] }
 0x2ea   :  { %3459 = vst.msk [vmem:[#allocation2 + $0x1a8] sm:$0xff] %vm3208_vm1, %v3455_v36  ;;  %v3579_v17 = vsel %vm3208_vm1, %v3501_v39, %v3536_v15 }
 0x2ed   :  { %v3461_v29 = vpop.permute.xlu0 %3460  ;;  %v3560_v42 = vpop.permute.xlu1 %3559 }
 0x2ee   :  { %3466 = vst.msk [vmem:[#allocation2 + $0x1b0] sm:$0xff] %vm3208_vm1, %v3461_v29  ;;  %v21458_v45 = vsel %vm3595_vm5, %v3579_v17, %v3560_v42 }
 0x2ef   :  { %16423 = vmatmul.mubr.msk.bf16.gmra.mrb[52].mxu1 %vm3854_vm6, %v21458_v45  ;;  %16441 = vmatmul.mubr.msk.bf16.gmra.mrb[24].mxu0 %vm3854_vm6, %v21458_v45 }
 0x2f0   :  { %3955 = vmatprep.mubr.bf16.mxu1 %v21349_v20  ;;  %4181 = vmatprep.mubr.bf16.mxu0 %v21349_v20 }
 0x2f1   :  { %v3562_v34 = vpop.permute.xlu0 %3561  ;;  %v3502_v23 = vld [vmem:[#allocation2 + $0x1a8] sm:$0xff]  ;;  %v3538_v62 = vpop.permute.xlu1 %3537 }
 0x2f2   :  { %v3582_v35 = vsel %vm3208_vm1, %v3502_v23, %v3538_v62 }
 0x2f3   :  { %v21469_v52 = vsel %vm3595_vm5, %v3582_v35, %v3562_v34 }
 0x2f5   :  { %v3540_v37 = vpop.permute.xlu0 %3539  ;;  %v3463_v47 = vpop.permute.xlu1 %3462  ;;  %v3503_v43 = vld [vmem:[#allocation2 + $0x1b0] sm:$0xff] }
 0x2f6   :  { %3467 = vst.msk [vmem:[#allocation2 + $0x1b8] sm:$0xff] %vm3208_vm1, %v3463_v47  ;;  %v3585_v33 = vsel %vm3208_vm1, %v3503_v43, %v3540_v37 }
 0x2f7   :  { %16424 = vmatmul.mubr.msk.bf16.gmra.mrb[56].mxu1 %vm3854_vm6, %v21469_v52  ;;  %16442 = vmatmul.mubr.msk.bf16.gmra.mrb[28].mxu0 %vm3854_vm6, %v21469_v52 }
 0x2f8   :  { %3965 = vmatprep.mubr.bf16.mxu1 %v21349_v20  ;;  %4191 = vmatprep.mubr.bf16.mxu0 %v21349_v20 }
 0x2f9   :  { %v3471_v38 = vpop.permute.xlu0 %3470  ;;  %v3564_v27 = vpop.permute.xlu1 %3563 }
 0x2fa   :  { %v21479_v56 = vsel %vm3595_vm5, %v3585_v33, %v3564_v27  ;;  %v19012_v33 = vld [vmem:[%s26601_s2 + $0x50] ss:$28 sps:$4 sm:$0xff]  }
 0x2fd   :  { %v3542_v28 = vpop.permute.xlu0 %3541  ;;  %v3473_v48 = vpop.permute.xlu1 %3472  ;;  %v3504_v3 = vld [vmem:[#allocation2 + $0x1b8] sm:$0xff] }
 0x2fe   :  { %v3479_v51 = vsel %vm3478_vm7, %v3471_v38, %v3473_v48  ;;  %v3588_v5 = vsel %vm3208_vm1, %v3504_v3, %v3542_v28 }
 0x2ff   :  { %3483 = vst.msk [vmem:[#allocation2 + $0x1c0] sm:$0xff] %vm3208_vm1, %v3479_v51  ;;  %16425 = vmatmul.mubr.msk.bf16.gmra.mrb[60].mxu1 %vm3854_vm6, %v21479_v56  ;;  %16443 = vmatmul.mubr.msk.bf16.gmra.mrb[32].mxu0 %vm3854_vm6, %v21479_v56 }
 0x300   :  { %3975 = vmatprep.mubr.bf16.mxu1 %v21349_v20  ;;  %4201 = vmatprep.mubr.bf16.mxu0 %v21349_v20 }
 0x301   :  { %v3475_v54 = vpop.permute.xlu0 %3474  ;;  %v3566_v58 = vpop.permute.xlu1 %3565 }
 0x302   :  { %v21491_v60 = vsel %vm3595_vm5, %v3588_v5, %v3566_v58 }
 0x305   :  { %v3544_v14 = vpop.permute.xlu0 %3543  ;;  %v3477_v18 = vpop.permute.xlu1 %3476 }
 0x306   :  { %v3480_v19 = vsel %vm3478_vm7, %v3475_v54, %v3477_v18  ;;  %v3505_v24 = vld [vmem:[#allocation2 + $0x1c0] sm:$0xff] }
 0x307   :  { %3484 = vst.msk [vmem:[#allocation2 + $0x1c8] sm:$0xff] %vm3208_vm1, %v3480_v19  ;;  %16426 = vmatmul.mubr.msk.bf16.gmra.mrb[64].mxu1 %vm3854_vm6, %v21491_v60  ;;  %16444 = vmatmul.mubr.msk.bf16.gmra.mrb[36].mxu0 %vm3854_vm6, %v21491_v60  ;;  %v3591_v49 = vsel %vm3208_vm1, %v3505_v24, %v3544_v14  ;;  %v19013_v54 = vld [vmem:[%s26601_s2 + $0x88] ss:$28 sps:$4 sm:$0xff]  }
 0x308   :  { %3985 = vmatprep.mubr.bf16.mxu1 %v21349_v20  ;;  %4211 = vmatprep.mubr.bf16.mxu0 %v21349_v20 }
 0x309   :  { %v3546_v4 = vpop.permute.xlu0 %3545  ;;  %v3568_v21 = vpop.permute.xlu1 %3567 }
 0x30a   :  { %v21508_v59 = vsel %vm3595_vm5, %v3591_v49, %v3568_v21  ;;  %v19016_v49 = vld [vmem:[%s26601_s2 + $0x130] ss:$0 sps:$4 sm:$0x33]  }
 0x30d   :  { %v3281_v57 = vpop.permute.xlu0 %3280  ;;  %v3570_v61 = vpop.permute.xlu1 %3569 }
 0x30e   :  { %3286 = vst.msk [vmem:[#allocation2 + $0x80] sm:$0xff] %vm3208_vm1, %v3281_v57  ;;  %v3506_v13 = vld [vmem:[#allocation2 + $0x1c8] sm:$0xff] }
 0x30f   :  { %16427 = vmatmul.mubr.msk.bf16.gmra.mrb[68].mxu1 %vm3854_vm6, %v21508_v59  ;;  %16445 = vmatmul.mubr.msk.bf16.gmra.mrb[40].mxu0 %vm3854_vm6, %v21508_v59  ;;  %v3594_v39 = vsel %vm3208_vm1, %v3506_v13, %v3546_v4 }
 0x310   :  { %3995 = vmatprep.mubr.bf16.mxu1 %v21349_v20  ;;  %4221 = vmatprep.mubr.bf16.mxu0 %v21349_v20  ;;  %v21521_v34 = vsel %vm3595_vm5, %v3594_v39, %v3570_v61  ;;  %v19023_v39 = vld [vmem:[%s26601_s2 + $0x14] ss:$28 sps:$4 sm:$0xff]  }
 0x311   :  { %v3283_v15 = vpop.permute.xlu0 %3282  ;;  %v3322_v36 = vpop.permute.xlu1 %3321  ;;  %5394 = vmatprep.subr.bf16.mxu0 %v19023_v39 }
 0x312   :  { %3287 = vst.msk [vmem:[#allocation2 + $0x88] sm:$0xff] %vm3208_vm1, %v3283_v15  ;;  %3327 = vst.msk [vmem:[#allocation2 + $0xc0] sm:$0xff] %vm3208_vm1, %v3322_v36  ;;  %v3891_v15 = vsel %vm3871_vm4, %v19016_v49, 0 }
 0x315   :  { %v3291_v17 = vpop.permute.xlu0 %3290  ;;  %v3324_v29 = vpop.permute.xlu1 %3323  ;;  %v4785_v42 = vld [vmem:[#allocation2 + $0x80] sm:$0xff] }
 0x316   :  { %3328 = vst.msk [vmem:[#allocation2 + $0xc8] sm:$0xff] %vm3208_vm1, %v3324_v29  ;;  %4809 = vrot.lane.b32.xlu0 %v4785_v42, %s19794_s13 }
 0x317   :  { %16428 = vmatmul.mubr.msk.bf16.gmra.mrb[72].mxu1 %vm3854_vm6, %v21521_v34  ;;  %16446 = vmatmul.mubr.msk.bf16.gmra.mrb[44].mxu0 %vm3854_vm6, %v21521_v34 }
 0x318   :  { %4038 = vmatprep.mubr.bf16.mxu1 %v21349_v20  ;;  %5200 = vmatprep.mubr.bf16.mxu0 %v21349_v20 }
 0x319   :  { %v3332_v23 = vpop.permute.xlu0 %3331  ;;  %v3293_v62 = vpop.permute.xlu1 %3292  ;;  %v4786_v35 = vld [vmem:[#allocation2 + $0x88] sm:$0xff]  ;;  %v4793_v37 = vld [vmem:[#allocation2 + $0xc0] sm:$0xff] }
 0x31a   :  { %v3299_v47 = vsel %vm3298_vm8, %v3291_v17, %v3293_v62  ;;  %4811 = vrot.lane.b32.xlu0 %v4786_v35, %s19794_s13  ;;  %4833 = vrot.lane.b32.xlu1 %v4793_v37, %s19796_s10 }
 0x31b   :  { %3303 = vst.msk [vmem:[#allocation2 + $0x90] sm:$0xff] %vm3208_vm1, %v3299_v47 }
 0x31d   :  { %v3295_v38 = vpop.permute.xlu0 %3294  ;;  %v3334_v27 = vpop.permute.xlu1 %3333  ;;  %v4794_v43 = vld [vmem:[#allocation2 + $0xc8] sm:$0xff] }
 0x31e   :  { %v3340_v28 = vsel %vm3339_vm9, %v3332_v23, %v3334_v27  ;;  %4835 = vrot.lane.b32.xlu1 %v4794_v43, %s19796_s10 }
 0x31f   :  { %3344 = vst.msk [vmem:[#allocation2 + $0xd0] sm:$0xff] %vm3208_vm1, %v3340_v28  ;;  %16430 = vmatmul.mubr.msk.bf16.vlgmr.msra.gmra.mrb[76].mxu1 %vm3854_vm6, %v21334_v10 }
 0x320   :  { %4048 = vmatprep.mubr.bf16.mxu1 %v21349_v20  ;;  %17671 = vmatpush3.bf16.msra.mxu1 %v21440_v40  ;;  %v19014_v40 = vld [vmem:[%s26601_s2 + $0xc0] ss:$28 sps:$4 sm:$0xff]  }
 0x321   :  { %v3336_v48 = vpop.permute.xlu0 %3335  ;;  %v3297_v51 = vpop.permute.xlu1 %3296  ;;  %17672 = vmatprep.subr.bf16.mxu1 %v19012_v33 }
 0x322   :  { %v3300_v58 = vsel %vm3298_vm8, %v3295_v38, %v3297_v51  ;;  %v4787_v3 = vld [vmem:[#allocation2 + $0x90] sm:$0xff] }
 0x323   :  { %3304 = vst.msk [vmem:[#allocation2 + $0x98] sm:$0xff] %vm3208_vm1, %v3300_v58  ;;  %4813 = vrot.lane.b32.xlu0 %v4787_v3, %s19794_s13 }
 0x324   :  { %17673 = vmatpush3.bf16.msra.mxu1 %v19012_v33 }
 0x325   :  { %v3306_v5 = vpop.permute.xlu0 %3305  ;;  %v3338_v14 = vpop.permute.xlu1 %3337  ;;  %17674 = vmatprep.subr.bf16.mxu1 %v19013_v54 }
 0x326   :  { %3311 = vst.msk [vmem:[#allocation2 + $0xa0] sm:$0xff] %vm3208_vm1, %v3306_v5  ;;  %v3341_v18 = vsel %vm3339_vm9, %v3336_v48, %v3338_v14  ;;  %v4795_v19 = vld [vmem:[#allocation2 + $0xd0] sm:$0xff] }
 0x327   :  { %3345 = vst.msk [vmem:[#allocation2 + $0xd8] sm:$0xff] %vm3208_vm1, %v3341_v18  ;;  %16431 = vmatmul.mubr.msk.bf16.gmra.mrb[80].mxu1 %vm3854_vm6, %v21446_v1  ;;  %4837 = vrot.lane.b32.xlu1 %v4795_v19, %s19796_s10 }
 0x328   :  { %4058 = vmatprep.mubr.bf16.mxu1 %v21349_v20  ;;  %17675 = vmatpush3.bf16.msra.mxu1 %v19013_v54 }
 0x329   :  { %v3308_v4 = vpop.permute.xlu0 %3307  ;;  %v3347_v21 = vpop.permute.xlu1 %3346  ;;  %17676 = vmatprep.subr.bf16.mxu1 %v19014_v40 }
 0x32a   :  { %3312 = vst.msk [vmem:[#allocation2 + $0xa8] sm:$0xff] %vm3208_vm1, %v3308_v4  ;;  %3352 = vst.msk [vmem:[#allocation2 + $0xe0] sm:$0xff] %vm3208_vm1, %v3347_v21  ;;  %v4788_v24 = vld [vmem:[#allocation2 + $0x98] sm:$0xff]  ;;  %v4777_v21 = vld [vmem:[#allocation2 + $0x40] sm:$0xff] }
 0x32b   :  { %4815 = vrot.lane.b32.xlu0 %v4788_v24, %s19794_s13  ;;  %v19024_v4 = vld [vmem:[%s26601_s2 + $0x18] ss:$28 sps:$4 sm:$0xff]  }
 0x32c   :  { %17677 = vmatpush3.bf16.msra.mxu1 %v19014_v40 }
 0x32d   :  { %v3314_v9 = vpop.permute.xlu0 %3313  ;;  %v3349_v25 = vpop.permute.xlu1 %3348  ;;  %17678 = vmatprep.subr.bf16.mxu1 %v19015_v22  ;;  %v4789_v13 = vld [vmem:[#allocation2 + $0xa0] sm:$0xff] }
 0x32e   :  { %3319 = vst.msk [vmem:[#allocation2 + $0xb0] sm:$0xff] %vm3208_vm1, %v3314_v9  ;;  %3353 = vst.msk [vmem:[#allocation2 + $0xe8] sm:$0xff] %vm3208_vm1, %v3349_v25  ;;  %v4796_v53 = vld [vmem:[#allocation2 + $0xd8] sm:$0xff]  ;;  %v19027_v9 = vld [vmem:[%s26601_s2 + $0x4c] ss:$28 sps:$4 sm:$0xff]  }
 0x32f   :  { %16432 = vmatmul.mubr.msk.bf16.gmra.mrb[84].mxu1 %vm3854_vm6, %v21458_v45  ;;  %3362 = vrot.lane.b32.xlu0 %v21137_v63, %s19808_s12  ;;  %v19025_v25 = vld [vmem:[%s26601_s2 + $0x48] ss:$28 sps:$4 sm:$0xff]  }
 0x330   :  { %4839 = vrot.lane.b32.xlu1 %v4796_v53, %s19796_s10  ;;  %4068 = vmatprep.mubr.bf16.mxu1 %v21349_v20 }
 0x331   :  { %v3316_v57 = vpop.permute.xlu0 %3315  ;;  %v3355_v61 = vpop.permute.xlu1 %3354  ;;  %17679 = vmatpush3.bf16.msra.mxu1 %v19015_v22  ;;  %v4797_v17 = vld [vmem:[#allocation2 + $0xe0] sm:$0xff]  ;;  %v4790_v29 = vld [vmem:[#allocation2 + $0xa8] sm:$0xff] }
 0x332   :  { %3320 = vst.msk [vmem:[#allocation2 + $0xb8] sm:$0xff] %vm3208_vm1, %v3316_v57  ;;  %3360 = vst.msk [vmem:[#allocation2 + $0xf0] sm:$0xff] %vm3208_vm1, %v3355_v61  ;;  %18426 = vmatprep.subr.msk.bf16.mxu1 %vm3871_vm4, %v19016_v49  ;;  %v19021_v22 = vld [vmem:[%s26601_s2 + $0x10] ss:$28 sps:$4 sm:$0xff]   ;;  %v19031_v49 = vld [vmem:[%s26601_s2 + $0x84] ss:$28 sps:$4 sm:$0xff]  }
 0x333   :  { %4817 = vrot.lane.b32.xlu0 %v4789_v13, %s19794_s13  ;;  %v19032_v57 = vld [vmem:[%s26601_s2 + $0x88] ss:$28 sps:$4 sm:$0xff]  }
 0x334   :  { %3395 = vrot.lane.b32.xlu1 %v21292_v31, %s19809_s14  ;;  %v4778_v13 = vld [vmem:[#allocation2 + $0x48] sm:$0xff] }
 0x335   :  { %v3357_v36 = vpop.permute.xlu1 %3356  ;;  %17681 = vmatpush3.bf16.msra.mxu1 %v3891_v15  ;;  %v4791_v42 = vld [vmem:[#allocation2 + $0xb0] sm:$0xff] }
 0x336   :  { %3361 = vst.msk [vmem:[#allocation2 + $0xf8] sm:$0xff] %vm3208_vm1, %v3357_v36  ;;  %5281 = vmatprep.subr.bf16.mxu1 %v21313_v2  ;;  %v4798_v2 = vld [vmem:[#allocation2 + $0xe8] sm:$0xff]  ;;  %v19029_v36 = vld [vmem:[%s26601_s2 + $0x80] ss:$28 sps:$4 sm:$0xff]  }
 0x337   :  { %16433 = vmatmul.mubr.msk.bf16.gmra.mrb[88].mxu1 %vm3854_vm6, %v21469_v52  ;;  %3364 = vrot.lane.b32.xlu0 %v21144_v16, %s19808_s12 }
 0x338   :  { %4841 = vrot.lane.b32.xlu1 %v4797_v17, %s19796_s10  ;;  %4078 = vmatprep.mubr.bf16.mxu1 %v21349_v20  ;;  %v19035_v17 = vld [vmem:[%s26601_s2 + $0xbc] ss:$28 sps:$4 sm:$0xff]  }
 0x339   :  { %v4799_v23 = vld [vmem:[#allocation2 + $0xf0] sm:$0xff]  ;;  %v4792_v62 = vld [vmem:[#allocation2 + $0xb8] sm:$0xff] }
 0x33b   :  { %4819 = vrot.lane.b32.xlu0 %v4790_v29, %s19794_s13  ;;  %v19036_v29 = vld [vmem:[%s26601_s2 + $0xc0] ss:$28 sps:$4 sm:$0xff]  }
 0x33c   :  { %3397 = vrot.lane.b32.xlu1 %v21298_v44, %s19809_s14 }
 0x33d   :  { %v4800_v35 = vld [vmem:[#allocation2 + $0xf8] sm:$0xff] }
 0x33f   :  { %16434 = vmatmul.mubr.msk.bf16.gmra.mrb[92].mxu1 %vm3854_vm6, %v21479_v56  ;;  %3370 = vrot.lane.b32.xlu0 %v21137_v63, %s19810_s17 }
 0x340   :  { %4843 = vrot.lane.b32.xlu1 %v4798_v2, %s19796_s10  ;;  %4088 = vmatprep.mubr.bf16.mxu1 %v21349_v20  ;;  %v19033_v2 = vld [vmem:[%s26601_s2 + $0xb8] ss:$28 sps:$4 sm:$0xff]  }
 0x343   :  { %4821 = vrot.lane.b32.xlu0 %v4791_v42, %s19794_s13 }
 0x344   :  { %3403 = vrot.lane.b32.xlu1 %v21292_v31, %s19811_s18 }
 0x347   :  { %16435 = vmatmul.mubr.msk.bf16.gmra.mrb[96].mxu1 %vm3854_vm6, %v21491_v60  ;;  %3372 = vrot.lane.b32.xlu0 %v21144_v16, %s19810_s17 }
 0x348   :  { %4845 = vrot.lane.b32.xlu1 %v4799_v23, %s19796_s10  ;;  %4098 = vmatprep.mubr.bf16.mxu1 %v21349_v20  ;;  %v19039_v23 = vld [vmem:[%s26601_s2 + $0xf4] ss:$28 sps:$4 sm:$0xff]  }
 0x34b   :  { %4823 = vrot.lane.b32.xlu0 %v4792_v62, %s19794_s13  ;;  %v19040_v62 = vld [vmem:[%s26601_s2 + $0xf8] ss:$28 sps:$4 sm:$0xff]  }
 0x34c   :  { %3405 = vrot.lane.b32.xlu1 %v21298_v44, %s19811_s18 }
 0x34f   :  { %16436 = vmatmul.mubr.msk.bf16.gmra.mrb[100].mxu1 %vm3854_vm6, %v21508_v59  ;;  %3380 = vrot.lane.b32.xlu0 %v21137_v63, %s19812_s19  ;;  %v4930_v63 = vld [vmem:[%s26601_s2 + $0x120] sm:$0x33] }
 0x350   :  { %4847 = vrot.lane.b32.xlu1 %v4800_v35, %s19796_s10  ;;  %4108 = vmatprep.mubr.bf16.mxu1 %v21349_v20 }
 0x353   :  { %3411 = vrot.lane.b32.xlu0 %v21292_v31, %s19813_s20 }
 0x354   :  { %3382 = vrot.lane.b32.xlu1 %v21292_v31, %s19812_s19 }
 0x357   :  { %16437 = vmatmul.mubr.msk.bf16.gmra.mrb[104].mxu1 %vm3854_vm6, %v21521_v34  ;;  %3386 = vrot.lane.b32.xlu0 %v21298_v44, %s19812_s19 }
 0x358   :  { %3384 = vrot.lane.b32.xlu1 %v21144_v16, %s19812_s19  ;;  %17682 = vmatprep.mubr.msk.bf16.mxu1 %vm3854_vm6, %v21334_v10  ;;  %s19814_s19 = smov 24  }
 0x35c   :  { %3413 = vrot.lane.b32.xlu1 %v21298_v44, %s19813_s20 }
 0x35f   :  { %17683 = vmatmul.mubr.msk.bf16.vlgmr.msra.gmra.mrb[108].mxu1 %vm3854_vm6, %v21446_v1 }
 0x360   :  { %17686 = vmatprep.mubr.msk.bf16.mxu1 %vm3854_vm6, %v21458_v45  ;;  %5282 = vmatpush1.bf16.msra.mxu1 %v21331_v6 }
 0x361   :  { %5283 = vmatprep.subr.bf16.mxu1 %v21347_v11 }
 0x364   :  { %5284 = vmatpush1.bf16.msra.mxu1 %v21359_v7 }
 0x365   :  { %5285 = vmatprep.subr.bf16.mxu1 %v21369_v8  ;;  %v16493_v8 = vcombine.high %v4930_v63, %v4930_v63 }
 0x367   :  { %v3927_v16 = vpop.f32.mrb[44].mxu1  ;;  %v4153_v10 = vpop.f32.mrb[16].mxu0  ;;  %17687 = vmatmul.mubr.msk.bf16.gmra.mrb[112].mxu1 %vm3854_vm6, %v21469_v52  ;;  %v16492_v52 = vcombine.low %v4930_v63, %v4930_v63  ;;  %v4931_v63 = vld [vmem:[%s26601_s2 + $0x128] sm:$0x33] }
 0x368   :  { %v4441_v1 = vmul.f32 0.2, %v3927_v16  ;;  %vm4333_vm10 = vcmp.ge.f32.partialorder %v4153_v10, 0.0  ;;  %v4445_v45 = vmul.f32 0.2, %v4153_v10  ;;  %v3929_v37 = vpop.f32.mrb[45].mxu1  ;;  %17690 = vmatprep.mubr.msk.bf16.mxu1 %vm3854_vm6, %v21479_v56  ;;  %5286 = vmatpush1.bf16.msra.mxu1 %v21376_v26 }
 0x369   :  { %vm4330_vm11 = vcmp.ge.f32.partialorder %v3929_v37, 0.0  ;;  %v4442_v6 = vmul.f32 0.2, %v3929_v37  ;;  %v4155_v11 = vpop.f32.mrb[17].mxu0  ;;  %v3931_v7 = vpop.f32.mrb[46].mxu1  ;;  %5287 = vmatprep.subr.bf16.mxu1 %v21385_v41  ;;  %vm4329_vm12 = vcmp.ge.f32.partialorder %v3927_v16, 0.0 }
 0x36a   :  { %v4446_v47 = vmul.f32 0.2, %v4155_v11  ;;  %v4448_v38 = vmul.f32 0.2, %v3931_v7  ;;  %v4157_v27 = vpop.f32.mrb[18].mxu0  ;;  %v21643_v43 = vsel %vm4333_vm10, %v4153_v10, %v4445_v45  ;;  %v3933_v56 = vpop.f32.mrb[47].mxu1  ;;  %v21649_v51 = vsel %vm4329_vm12, %v3927_v16, %v4441_v1 }
 0x36b   :  { %26910 = vst [vmem:[#allocation6_spill] sm:$0xff] %v21643_v43  ;;  %vm4340_vm13 = vcmp.ge.f32.partialorder %v4157_v27, 0.0  ;;  %v4452_v33 = vmul.f32 0.2, %v4157_v27  ;;  %v4159_v28 = vpop.f32.mrb[19].mxu0  ;;  %vm4336_vm14 = vcmp.ge.f32.partialorder %v3931_v7, 0.0  ;;  %v21654_v58 = vsel %vm4330_vm11, %v3929_v37, %v4442_v6 }
 0x36c   :  { %vm4334_vm15 = vcmp.ge.f32.partialorder %v4155_v11, 0.0  ;;  %vm4337_vm2 = vcmp.ge.f32.partialorder %v3933_v56, 0.0  ;;  %v4449_v26 = vmul.f32 0.2, %v3933_v56  ;;  %vm4341_vm3 = vcmp.ge.f32.partialorder %v4159_v28, 0.0  ;;  %5288 = vmatpush1.bf16.msra.mxu1 %v21392_v30  ;;  %26912 = vst [vmem:[#allocation8_spill] sm:$0xff] %v21649_v51 }
 0x36d   :  { %v21646_v41 = vsel %vm4340_vm13, %v4157_v27, %v4452_v33  ;;  %v4453_v48 = vmul.f32 0.2, %v4159_v28  ;;  %5289 = vmatprep.subr.bf16.mxu1 %v21401_v50  ;;  %v21651_v54 = vsel %vm4336_vm14, %v3931_v7, %v4448_v38  ;;  %26914 = vst [vmem:[#allocation10_spill] sm:$0xff] %v21654_v58  ;;  %v21662_v14 = vsel %vm4334_vm15, %v4155_v11, %v4446_v47  ;;  %v4779_v16 = vld [vmem:[#allocation2 + $0x50] sm:$0xff]  ;;  %v19046_v27 = vld [vmem:[%s26601_s2 + $0x4] ss:$28 sps:$4 sm:$0xff]  }
 0x36e   :  { %26911 = vst [vmem:[#allocation7_spill] sm:$0xff] %v21646_v41  ;;  %26913 = vst [vmem:[#allocation9_spill] sm:$0xff] %v21651_v54  ;;  %v21656_v3 = vsel %vm4337_vm2, %v3933_v56, %v4449_v26  ;;  %v5154_v19 = vsel %vm3871_vm4, %v16492_v52, 0  ;;  %v19037_v1 = vld [vmem:[%s26601_s2 + $0xf0] ss:$28 sps:$4 sm:$0xff]   ;;  %v16495_v6 = vcombine.high %v4931_v63, %v4931_v63  ;;  %v16494_v7 = vcombine.low %v4931_v63, %v4931_v63  ;;  %v4780_v56 = vld [vmem:[#allocation2 + $0x58] sm:$0xff] }
 0x36f   :  { %26915 = vst [vmem:[#allocation11_spill] sm:$0xff] %v21656_v3  ;;  %26916 = vst [vmem:[#allocation12_spill] sm:$0xff] %v21662_v14  ;;  %v21666_v40 = vsel %vm4341_vm3, %v4159_v28, %v4453_v48  ;;  %17691 = vmatmul.mubr.msk.bf16.gmra.mrb[116].mxu1 %vm3854_vm6, %v21491_v60  ;;  %v19042_v11 = vld [vmem:[%s26601_s2 + $0x130] ss:$0 sps:$4 sm:$0x33]   ;;  %vm3388_vm13 = vcmask 64512  }
 0x370   :  { %26917 = vst [vmem:[#allocation13_spill] sm:$0xff] %v21666_v40  ;;  %17694 = vmatprep.mubr.msk.bf16.mxu1 %vm3854_vm6, %v21508_v59  ;;  %5290 = vmatpush1.bf16.msra.mxu1 %v21411_v55  ;;  %v5160_v47 = vsel %vm3871_vm4, %v16494_v7, 0  ;;  %v5166_v38 = vsel %vm3871_vm4, %v19042_v11, 0  ;;  %v19049_v52 = vld [vmem:[%s26601_s2 + $0xc] ss:$28 sps:$4 sm:$0xff]  }
 0x371   :  { %16506 = vmatprep.subr.msk.bf16.mxu1 %vm3871_vm4, %v16493_v8  ;;  %v21818_v63 = vld [vmem:[%s26601_s2 + $0x118] sm:$0x33]  ;;  %v19055_v30 = vld [vmem:[%s26601_s2 + $0x44] ss:$28 sps:$4 sm:$0xff]  }
 0x372   :  { %v19145_v51 = vld [vmem:[%s26601_s2 + $0x84] ss:$28 sps:$4 sm:$0xff]  }
 0x374   :  { %5292 = vmatpush1.bf16.msra.mxu1 %v5154_v19 }
 0x375   :  { %17698 = vmatprep.subr.bf16.mxu1 %v19024_v4 }
 0x377   :  { %17695 = vmatmul.mubr.msk.bf16.gmra.mrb[120].mxu1 %vm3854_vm6, %v21521_v34  ;;  %v19028_v34 = vld [vmem:[%s26601_s2 + $0x50] ss:$28 sps:$4 sm:$0xff]  }
 0x378   :  { %5313 = vmatprep.mubr.bf16.mxu1 %v21349_v20 }
 0x388   :  { %v4810_v60 = vpop.permute.xlu0 %4809 }
 0x389   :  { %v4851_v59 = vsel %vm3208_vm1, %v4777_v21, %v4810_v60 }
 0x38c   :  { %v4834_v55 = vpop.permute.xlu1 %4833  ;;  %v4812_v53 = vpop.permute.xlu0 %4811 }
 0x38d   :  { %v21688_v24 = vsel %vm3595_vm5, %v4851_v59, %v4834_v55  ;;  %v4854_v15 = vsel %vm3208_vm1, %v4778_v13, %v4812_v53  ;;  %v4781_v59 = vld [vmem:[#allocation2 + $0x60] sm:$0xff] }
 0x38e   :  { %16498 = vmatmul.mubr.msk.bf16.vlgmr.msra.gmra.mrb[48].mxu0 %vm3854_vm6, %v21688_v24  ;;  %16507 = vmatmul.mubr.msk.bf16.vlgmr.msra.gmra.mrb[124].mxu1 %vm3854_vm6, %v21688_v24 }
 0x38f   :  { %5210 = vmatprep.mubr.bf16.mxu0 %v21349_v20  ;;  %5323 = vmatprep.mubr.bf16.mxu1 %v21349_v20 }
 0x390   :  { %5395 = vmatpush1.bf16.msra.mxu0 %v19021_v22  ;;  %17699 = vmatpush3.bf16.msra.mxu1 %v19024_v4  ;;  %v4836_v61 = vpop.permute.xlu1 %4835 }
 0x391   :  { %5396 = vmatprep.subr.bf16.mxu0 %v19027_v9  ;;  %17700 = vmatprep.subr.bf16.mxu1 %v19028_v34  ;;  %v21716_v39 = vsel %vm3595_vm5, %v4854_v15, %v4836_v61 }
 0x394   :  { %5397 = vmatpush1.bf16.msra.mxu0 %v19025_v25  ;;  %17701 = vmatpush3.bf16.msra.mxu1 %v19028_v34 }
 0x395   :  { %5398 = vmatprep.subr.bf16.mxu0 %v19031_v49  ;;  %17702 = vmatprep.subr.bf16.mxu1 %v19032_v57  ;;  %v4814_v42 = vpop.permute.xlu0 %4813 }
 0x396   :  { %16499 = vmatmul.mubr.msk.bf16.gmra.mrb[52].mxu0 %vm3854_vm6, %v21716_v39  ;;  %16508 = vmatmul.mubr.msk.bf16.gmra.mrb[128].mxu1 %vm3854_vm6, %v21716_v39  ;;  %v4857_v10 = vsel %vm3208_vm1, %v4779_v16, %v4814_v42 }
 0x397   :  { %5220 = vmatprep.mubr.bf16.mxu0 %v21349_v20  ;;  %5333 = vmatprep.mubr.bf16.mxu1 %v21349_v20 }
 0x398   :  { %5399 = vmatpush1.bf16.msra.mxu0 %v19029_v36  ;;  %17703 = vmatpush3.bf16.msra.mxu1 %v19032_v57 }
 0x399   :  { %5400 = vmatprep.subr.bf16.mxu0 %v19035_v17  ;;  %17704 = vmatprep.subr.bf16.mxu1 %v19036_v29  ;;  %v4838_v35 = vpop.permute.xlu1 %4837 }
 0x39a   :  { %v21747_v45 = vsel %vm3595_vm5, %v4857_v10, %v4838_v35 }
 0x39c   :  { %5401 = vmatpush1.bf16.msra.mxu0 %v19033_v2  ;;  %17705 = vmatpush3.bf16.msra.mxu1 %v19036_v29 }
 0x39d   :  { %v4816_v37 = vpop.permute.xlu0 %4815  ;;  %5402 = vmatprep.subr.bf16.mxu0 %v19039_v23  ;;  %17706 = vmatprep.subr.bf16.mxu1 %v19040_v62 }
 0x39e   :  { %16500 = vmatmul.mubr.msk.bf16.gmra.mrb[56].mxu0 %vm3854_vm6, %v21747_v45  ;;  %16509 = vmatmul.mubr.msk.bf16.gmra.mrb[132].mxu1 %vm3854_vm6, %v21747_v45  ;;  %v4860_v28 = vsel %vm3208_vm1, %v4780_v56, %v4816_v37  ;;  %v16567_v56 = vcombine.low %v21818_v63, %v21818_v63 }
 0x39f   :  { %5230 = vmatprep.mubr.bf16.mxu0 %v21349_v20  ;;  %5343 = vmatprep.mubr.bf16.mxu1 %v21349_v20 }
 0x3a0   :  { %5403 = vmatpush1.bf16.msra.mxu0 %v19037_v1  ;;  %17707 = vmatpush3.bf16.msra.mxu1 %v19040_v62 }
 0x3a1   :  { %v3363_v8 = vpop.permute.xlu0 %3362  ;;  %16515 = vmatprep.subr.msk.bf16.mxu0 %vm3871_vm4, %v16495_v6  ;;  %18427 = vmatprep.subr.msk.bf16.mxu1 %vm3871_vm4, %v19042_v11 }
 0x3a2   :  { %3368 = vst.msk [vmem:[#allocation2 + $0x100] sm:$0xff] %vm3208_vm1, %v3363_v8  ;;  %v4840_v33 = vpop.permute.xlu1 %4839 }
 0x3a3   :  { %v21771_v26 = vsel %vm3595_vm5, %v4860_v28, %v4840_v33 }
 0x3a4   :  { %5405 = vmatpush1.bf16.msra.mxu0 %v5160_v47  ;;  %17709 = vmatpush3.bf16.msra.mxu1 %v5166_v38 }
 0x3a5   :  { %v4818_v48 = vpop.permute.xlu0 %4817  ;;  %6411 = vmatprep.subr.bf16.mxu1 %v19046_v27  ;;  %6504 = vmatprep.subr.bf16.mxu0 %v19049_v52 }
 0x3a6   :  { %v3396_v19 = vpop.permute.xlu1 %3395  ;;  %16501 = vmatmul.mubr.msk.bf16.gmra.mrb[60].mxu0 %vm3854_vm6, %v21771_v26  ;;  %16510 = vmatmul.mubr.msk.bf16.gmra.mrb[136].mxu1 %vm3854_vm6, %v21771_v26  ;;  %v4863_v55 = vsel %vm3208_vm1, %v4781_v59, %v4818_v48 }
 0x3a7   :  { %3401 = vst.msk [vmem:[#allocation2 + $0x130] sm:$0xff] %vm3208_vm1, %v3396_v19  ;;  %5240 = vmatprep.mubr.bf16.mxu0 %v21349_v20  ;;  %5353 = vmatprep.mubr.bf16.mxu1 %v21349_v20 }
 0x3a9   :  { %v3365_v4 = vpop.permute.xlu0 %3364  ;;  %v6058_v60 = vld [vmem:[#allocation2 + $0x100] sm:$0xff] }
 0x3aa   :  { %3369 = vst.msk [vmem:[#allocation2 + $0x108] sm:$0xff] %vm3208_vm1, %v3365_v4  ;;  %v4842_v21 = vpop.permute.xlu1 %4841  ;;  %6076 = vrot.lane.b32.xlu0 %v6058_v60, %s19794_s13 }
 0x3ab   :  { %v21784_v22 = vsel %vm3595_vm5, %v4863_v55, %v4842_v21 }
 0x3ad   :  { %v4820_v9 = vpop.permute.xlu0 %4819 }
 0x3ae   :  { %v3398_v34 = vpop.permute.xlu1 %3397  ;;  %v6064_v25 = vld [vmem:[#allocation2 + $0x130] sm:$0xff]  ;;  %16502 = vmatmul.mubr.msk.bf16.gmra.mrb[64].mxu0 %vm3854_vm6, %v21784_v22  ;;  %16511 = vmatmul.mubr.msk.bf16.gmra.mrb[140].mxu1 %vm3854_vm6, %v21784_v22  ;;  %v4866_v61 = vsel %vm3208_vm1, %v21322_v12, %v4820_v9 }
 0x3af   :  { %3402 = vst.msk [vmem:[#allocation2 + $0x138] sm:$0xff] %vm3208_vm1, %v3398_v34  ;;  %6094 = vrot.lane.b32.xlu1 %v6064_v25, %s19796_s10  ;;  %5250 = vmatprep.mubr.bf16.mxu0 %v21349_v20  ;;  %v19050_v34 = vld [vmem:[%s26601_s2 + $0x38] ss:$28 sps:$4 sm:$0xff]  }
 0x3b0   :  { %5363 = vmatprep.mubr.bf16.mxu1 %v21349_v20 }
 0x3b1   :  { %v3371_v53 = vpop.permute.xlu0 %3370  ;;  %v6059_v49 = vld [vmem:[#allocation2 + $0x108] sm:$0xff] }
 0x3b2   :  { %3376 = vst.msk [vmem:[#allocation2 + $0x110] sm:$0xff] %vm3208_vm1, %v3371_v53  ;;  %v4844_v57 = vpop.permute.xlu1 %4843  ;;  %6078 = vrot.lane.b32.xlu0 %v6059_v49, %s19794_s13  ;;  %v4784_v53 = vld [vmem:[#allocation2 + $0x78] sm:$0xff] }
 0x3b3   :  { %v21799_v13 = vsel %vm3595_vm5, %v4866_v61, %v4844_v57 }
 0x3b5   :  { %v4822_v15 = vpop.permute.xlu0 %4821 }
 0x3b6   :  { %v3404_v36 = vpop.permute.xlu1 %3403  ;;  %v6065_v17 = vld [vmem:[#allocation2 + $0x138] sm:$0xff]  ;;  %16503 = vmatmul.mubr.msk.bf16.gmra.mrb[68].mxu0 %vm3854_vm6, %v21799_v13  ;;  %16512 = vmatmul.mubr.msk.bf16.gmra.mrb[144].mxu1 %vm3854_vm6, %v21799_v13  ;;  %v4869_v35 = vsel %vm3208_vm1, %v21353_v0, %v4822_v15 }
 0x3b7   :  { %3409 = vst.msk [vmem:[#allocation2 + $0x140] sm:$0xff] %vm3208_vm1, %v3404_v36  ;;  %6096 = vrot.lane.b32.xlu1 %v6065_v17, %s19796_s10  ;;  %5260 = vmatprep.mubr.bf16.mxu0 %v21349_v20 }
 0x3b8   :  { %5373 = vmatprep.mubr.bf16.mxu1 %v21349_v20 }
 0x3b9   :  { %v3373_v12 = vpop.permute.xlu0 %3372  ;;  %v6060_v29 = vld [vmem:[#allocation2 + $0x110] sm:$0xff] }
 0x3ba   :  { %3377 = vst.msk [vmem:[#allocation2 + $0x118] sm:$0xff] %vm3208_vm1, %v3373_v12  ;;  %v4846_v2 = vpop.permute.xlu1 %4845  ;;  %v21810_v42 = vpop.f32.mrb[48].mxu1  ;;  %6080 = vrot.lane.b32.xlu0 %v6060_v29, %s19794_s13  ;;  %v21866_v12 = vld [vmem:[%s26601_s2 + $0x120] sm:$0x33] }
 0x3bb   :  { %v4163_v23 = vpop.f32.mrb[20].mxu0  ;;  %v3939_v62 = vpop.f32.mrb[49].mxu1  ;;  %v21821_v16 = vsel %vm3595_vm5, %v4869_v35, %v4846_v2  ;;  %v4455_v29 = vmul.f32 0.2, %v21810_v42  ;;  %vm4343_vm15 = vcmp.ge.f32.partialorder %v21810_v42, 0.0 }
 0x3bc   :  { %vm4347_vm7 = vcmp.ge.f32.partialorder %v4163_v23, 0.0  ;;  %v4459_v10 = vmul.f32 0.2, %v4163_v23  ;;  %v4165_v1 = vpop.f32.mrb[21].mxu0  ;;  %v21823_v37 = vpop.f32.mrb[50].mxu1  ;;  %vm4344_vm8 = vcmp.ge.f32.partialorder %v3939_v62, 0.0 }
 0x3bd   :  { %v4456_v6 = vmul.f32 0.2, %v3939_v62  ;;  %v4167_v11 = vpop.f32.mrb[22].mxu0  ;;  %v3943_v7 = vpop.f32.mrb[51].mxu1  ;;  %v4460_v0 = vmul.f32 0.2, %v4165_v1 }
 0x3be   :  { %v6066_v8 = vld [vmem:[#allocation2 + $0x140] sm:$0xff]  ;;  %16504 = vmatmul.mubr.msk.bf16.gmra.mrb[72].mxu0 %vm3854_vm6, %v21821_v16  ;;  %16513 = vmatmul.mubr.msk.bf16.gmra.mrb[148].mxu1 %vm3854_vm6, %v21821_v16  ;;  %vm4354_vm9 = vcmp.ge.f32.partialorder %v4167_v11, 0.0  ;;  %v4466_v47 = vmul.f32 0.2, %v4167_v11  ;;  %vm4351_vm10 = vcmp.ge.f32.partialorder %v3943_v7, 0.0  ;;  %v4824_v38 = vpop.permute.xlu0 %4823  ;;  %v3406_v27 = vpop.permute.xlu1 %3405  ;;  %vm4348_vm11 = vcmp.ge.f32.partialorder %v4165_v1, 0.0 }
 0x3bf   :  { %6098 = vrot.lane.b32.xlu1 %v6066_v8, %s19796_s10  ;;  %5270 = vmatprep.mubr.bf16.mxu0 %v21349_v20  ;;  %v4463_v52 = vmul.f32 0.2, %v3943_v7  ;;  %v4169_v33 = vpop.f32.mrb[23].mxu0  ;;  %3410 = vst.msk [vmem:[#allocation2 + $0x148] sm:$0xff] %vm3208_vm1, %v3406_v27  ;;  %v21836_v28 = vsel %vm4347_vm7, %v4163_v23, %v4459_v10  ;;  %v21841_v60 = vsel %vm4344_vm8, %v3939_v62, %v4456_v6  ;;  %v4462_v2 = vmul.f32 0.2, %v21823_v37 }
 0x3c0   :  { %5383 = vmatprep.mubr.bf16.mxu1 %v21349_v20  ;;  %26918 = vst [vmem:[#allocation14_spill] sm:$0xff] %v21836_v28  ;;  %v21838_v48 = vsel %vm4354_vm9, %v4167_v11, %v4466_v47  ;;  %vm4355_vm12 = vcmp.ge.f32.partialorder %v4169_v33, 0.0  ;;  %v4467_v19 = vmul.f32 0.2, %v4169_v33  ;;  %26920 = vst [vmem:[#allocation16_spill] sm:$0xff] %v21841_v60  ;;  %v21854_v9 = vsel %vm4348_vm11, %v4165_v1, %v4460_v0  ;;  %v21885_v0 = vld [vmem:[#allocation4 + $0x80] sm:$0xff] }
 0x3c1   :  { %26919 = vst [vmem:[#allocation15_spill] sm:$0xff] %v21838_v48  ;;  %v6061_v4 = vld [vmem:[#allocation2 + $0x118] sm:$0xff]  ;;  %v21844_v21 = vsel %vm4351_vm10, %v3943_v7, %v4463_v52  ;;  %26922 = vst [vmem:[#allocation18_spill] sm:$0xff] %v21854_v9  ;;  %v4872_v15 = vsel %vm3208_vm1, %v4784_v53, %v4824_v38  ;;  %v21874_v62 = vsel %vm3871_vm4, %v16567_v56, 0  ;;  %v16569_v47 = vcombine.low %v21866_v12, %v21866_v12 }
 0x3c2   :  { %26921 = vst [vmem:[#allocation17_spill] sm:$0xff] %v21844_v21  ;;  %v21846_v59 = vpop.f32.mrb[52].mxu1  ;;  %v21848_v20 = vpop.f32.mrb[24].mxu0  ;;  %6082 = vrot.lane.b32.xlu0 %v6061_v4, %s19794_s13  ;;  %v21858_v25 = vsel %vm4355_vm12, %v4169_v33, %v4467_v19  ;;  %vm4350_vm9 = vcmp.ge.f32.partialorder %v21823_v37, 0.0 }
 0x3c3   :  { %26923 = vst [vmem:[#allocation19_spill] sm:$0xff] %v21858_v25  ;;  %v3381_v49 = vpop.permute.xlu0 %3380  ;;  %v4848_v57 = vpop.permute.xlu1 %4847  ;;  %v4473_v4 = vmul.f32 0.2, %v21848_v20  ;;  %v21910_v61 = vsel %vm4350_vm9, %v21823_v37, %v4462_v2  ;;  %vm4361_vm10 = vcmp.ge.f32.partialorder %v21848_v20, 0.0  ;;  %v21925_v37 = vmul.f32 0.2, %v21846_v59 }
 0x3c4   :  { %v3949_v36 = vpop.f32.mrb[53].mxu1  ;;  %v4175_v17 = vpop.f32.mrb[25].mxu0  ;;  %v21871_v23 = vsel %vm3595_vm5, %v4872_v15, %v4848_v57  ;;  %26926 = vst [vmem:[#allocation22_spill] sm:$0xff] %v21910_v61  ;;  %v21966_v50 = vsel %vm3871_vm4, %v16569_v47, 0  ;;  %v19142_v61 = vld [vmem:[%s26601_s2 + $0x88] ss:$28 sps:$4 sm:$0xff]  }
 0x3c5   :  { %vm4358_vm14 = vcmp.ge.f32.partialorder %v3949_v36, 0.0  ;;  %v4470_v35 = vmul.f32 0.2, %v3949_v36  ;;  %v21876_v10 = vpop.f32.mrb[54].mxu1  ;;  %v4177_v1 = vpop.f32.mrb[26].mxu0  ;;  %vm4362_vm2 = vcmp.ge.f32.partialorder %v4175_v17, 0.0 }
 0x3c6   :  { %3421 = vrot.lane.b32.xlu0 %v21292_v31, %s19814_s19  ;;  %16505 = vmatmul.mubr.msk.bf16.gmra.mrb[76].mxu0 %vm3854_vm6, %v21871_v23  ;;  %v4474_v6 = vmul.f32 0.2, %v4175_v17  ;;  %v3953_v11 = vpop.f32.mrb[55].mxu1  ;;  %v4179_v7 = vpop.f32.mrb[27].mxu0  ;;  %v6067_v8 = vld [vmem:[#allocation2 + $0x148] sm:$0xff]  ;;  %vm4368_vm8 = vcmp.ge.f32.partialorder %v4177_v1, 0.0 }
 0x3c7   :  { %16514 = vmatmul.mubr.msk.bf16.gmra.mrb[152].mxu1 %vm3854_vm6, %v21871_v23  ;;  %5426 = vmatprep.mubr.bf16.mxu0 %v21885_v0  ;;  %v4480_v38 = vmul.f32 0.2, %v4177_v1  ;;  %vm4365_vm3 = vcmp.ge.f32.partialorder %v3953_v11, 0.0  ;;  %v4477_v27 = vmul.f32 0.2, %v3953_v11  ;;  %vm4369_vm7 = vcmp.ge.f32.partialorder %v4179_v7, 0.0  ;;  %v3412_v52 = vpop.permute.xlu0 %3411  ;;  %v3383_v33 = vpop.permute.xlu1 %3382 }
 0x3c8   :  { %6100 = vrot.lane.b32.xlu1 %v6067_v8, %s19796_s10  ;;  %17710 = vmatprep.mubr.msk.bf16.mxu1 %vm3854_vm6, %v21688_v24  ;;  %v4481_v56 = vmul.f32 0.2, %v4179_v7  ;;  %3417 = vst.msk [vmem:[#allocation2 + $0x150] sm:$0xff] %vm3208_vm1, %v3412_v52  ;;  %v3389_v19 = vsel %vm3388_vm13, %v3381_v49, %v3383_v33  ;;  %v21900_v53 = vsel %vm4358_vm14, %v3949_v36, %v4470_v35  ;;  %v19044_v52 = vld [vmem:[%s26601_s2] ss:$28 sps:$4 sm:$0xff]  }
 0x3c9   :  { %26924 = vst [vmem:[#allocation20_spill] sm:$0xff] %v21900_v53  ;;  %v21902_v57 = vsel %vm4365_vm3, %v3953_v11, %v4477_v27  ;;  %3393 = vst.msk [vmem:[#allocation2 + $0x120] sm:$0xff] %vm3208_vm1, %v3389_v19  ;;  %v21914_v49 = vsel %vm4362_vm2, %v4175_v17, %v4474_v6  ;;  %v21928_v2 = vsel %vm4368_vm8, %v4177_v1, %v4480_v38  ;;  %v21976_v5 = vmul.f32 0.2, %v21876_v10 }
 0x3ca   :  { %26925 = vst [vmem:[#allocation21_spill] sm:$0xff] %v21902_v57  ;;  %v21905_v15 = vpop.f32.mrb[56].mxu1  ;;  %v21907_v8 = vpop.f32.mrb[28].mxu0  ;;  %26927 = vst [vmem:[#allocation23_spill] sm:$0xff] %v21914_v49  ;;  %v21919_v35 = vsel %vm4369_vm7, %v4179_v7, %v4481_v56  ;;  %v19047_v7 = vld [vmem:[%s26601_s2 + $0x8] ss:$28 sps:$4 sm:$0xff]   ;;  %v21943_v1 = vsel %vm4343_vm15, %v21810_v42, %v4455_v29  ;;  %v21957_v42 = vsel %vm4361_vm10, %v21848_v20, %v4473_v4 }
 0x3cb   :  { %26928 = vst [vmem:[#allocation24_spill] sm:$0xff] %v21919_v35  ;;  %v3959_v11 = vpop.f32.mrb[57].mxu1  ;;  %v4185_v27 = vpop.f32.mrb[29].mxu0  ;;  %26929 = vst [vmem:[#allocation25_spill] sm:$0xff] %v21928_v2  ;;  %v19052_v56 = vld [vmem:[%s26601_s2 + $0x3c] ss:$28 sps:$4 sm:$0xff]  }
 0x3cc   :  { %v3387_v6 = vpop.permute.xlu0 %3386  ;;  %v3385_v33 = vpop.permute.xlu1 %3384  ;;  %3423 = vrot.lane.b32.xlu1 %v21294_v32, %s19814_s19  ;;  %26930 = vst [vmem:[#allocation26_spill] sm:$0xff] %v21943_v1  ;;  %v4487_v19 = vmul.f32 0.2, %v21907_v8  ;;  %v4484_v17 = vmul.f32 0.2, %v3959_v11  ;;  %26931 = vst [vmem:[#allocation27_spill] sm:$0xff] %v21957_v42 }
 0x3cd   :  { %v3390_v38 = vsel %vm3388_vm13, %v3385_v33, %v3387_v6  ;;  %v21947_v18 = vpop.f32.mrb[58].mxu1  ;;  %v4187_v55 = vpop.f32.mrb[30].mxu0  ;;  %vm4372_vm11 = vcmp.ge.f32.partialorder %v3959_v11, 0.0  ;;  %v4488_v29 = vmul.f32 0.2, %v4185_v27  ;;  %vm4376_vm12 = vcmp.ge.f32.partialorder %v4185_v27, 0.0 }
 0x3ce   :  { %3394 = vst.msk [vmem:[#allocation2 + $0x128] sm:$0xff] %vm3208_vm1, %v3390_v38  ;;  %v3963_v6 = vpop.f32.mrb[59].mxu1  ;;  %v4189_v33 = vpop.f32.mrb[31].mxu0  ;;  %16516 = vmatmul.mubr.msk.bf16.vlgmr.msra.gmra.mrb[80].mxu0 %vm3854_vm6, %v21688_v24  ;;  %v4494_v36 = vmul.f32 0.2, %v4187_v55  ;;  %vm4382_vm14 = vcmp.ge.f32.partialorder %v4187_v55, 0.0  ;;  %v21980_v31 = vsel %vm4372_vm11, %v3959_v11, %v4484_v17 }
 0x3cf   :  { %vm4379_vm13 = vcmp.ge.f32.partialorder %v3963_v6, 0.0  ;;  %v4491_v20 = vmul.f32 0.2, %v3963_v6  ;;  %17711 = vmatmul.mubr.msk.bf16.vlgmr.msra.gmra.mrb[156].mxu1 %vm3854_vm6, %v21716_v39  ;;  %5436 = vmatprep.mubr.bf16.mxu0 %v21885_v0  ;;  %vm4383_vm15 = vcmp.ge.f32.partialorder %v4189_v33, 0.0  ;;  %v4495_v4 = vmul.f32 0.2, %v4189_v33 }
 0x3d0   :  { %v3414_v24 = vpop.permute.xlu1 %3413  ;;  %v6068_v38 = vld [vmem:[#allocation2 + $0x150] sm:$0xff]  ;;  %17714 = vmatprep.mubr.msk.bf16.mxu1 %vm3854_vm6, %v21747_v45  ;;  %6412 = vmatpush1.bf16.msra.mxu1 %v19044_v52  ;;  %vm4375_vm2 = vcmp.ge.f32.partialorder %v21907_v8, 0.0  ;;  %26932 = vst [vmem:[#allocation28_spill] sm:$0xff] %v21980_v31  ;;  %v6062_v35 = vld [vmem:[#allocation2 + $0x120] sm:$0xff]  ;;  %v21990_v47 = vsel %vm4376_vm12, %v4185_v27, %v4488_v29  ;;  %vm4357_vm3 = vcmp.ge.f32.partialorder %v21846_v59, 0.0 }
 0x3d1   :  { %v21982_v49 = vsel %vm4379_vm13, %v3963_v6, %v4491_v20  ;;  %3418 = vst.msk [vmem:[#allocation2 + $0x158] sm:$0xff] %vm3208_vm1, %v3414_v24  ;;  %6102 = vrot.lane.b32.xlu1 %v6068_v38, %s19796_s10  ;;  %6505 = vmatpush1.bf16.msra.mxu0 %v19047_v7  ;;  %v19053_v52 = vld [vmem:[%s26601_s2 + $0x40] ss:$28 sps:$4 sm:$0xff]   ;;  %26934 = vst [vmem:[#allocation30_spill] sm:$0xff] %v21990_v47  ;;  %v21995_v11 = vsel %vm4383_vm15, %v4189_v33, %v4495_v4  ;;  %v19058_v7 = vld [vmem:[%s26601_s2 + $0x74] ss:$28 sps:$4 sm:$0xff]  }
 0x3d2   :  { %26933 = vst [vmem:[#allocation29_spill] sm:$0xff] %v21982_v49  ;;  %26935 = vst [vmem:[#allocation31_spill] sm:$0xff] %v21995_v11  ;;  %6084 = vrot.lane.b32.xlu0 %v6062_v35, %s19794_s13  ;;  %v21998_v17 = vpop.f32.mrb[60].mxu1  ;;  %v4193_v6 = vpop.f32.mrb[32].mxu0  ;;  %6413 = vmatprep.subr.bf16.mxu1 %v19052_v56  ;;  %v22005_v27 = vmul.f32 0.2, %v21905_v15  ;;  %v22011_v33 = vsel %vm4382_vm14, %v4187_v55, %v4494_v36  ;;  %v22021_v4 = vsel %vm4375_vm2, %v21907_v8, %v4487_v19 }
 0x3d3   :  { %v22008_v29 = vmul.f32 0.2, %v21947_v18  ;;  %26936 = vst [vmem:[#allocation32_spill] sm:$0xff] %v22011_v33  ;;  %v3969_v20 = vpop.f32.mrb[61].mxu1  ;;  %6506 = vmatprep.subr.bf16.mxu0 %v19055_v30  ;;  %v19061_v56 = vld [vmem:[%s26601_s2 + $0x7c] ss:$28 sps:$4 sm:$0xff]   ;;  %v22042_v35 = vsel %vm4357_vm3, %v21846_v59, %v21925_v37 }
 0x3d4   :  { %26937 = vst [vmem:[#allocation33_spill] sm:$0xff] %v22021_v4  ;;  %v4501_v24 = vmul.f32 0.2, %v4193_v6  ;;  %v4498_v38 = vmul.f32 0.2, %v3969_v20  ;;  %v4195_v9 = vpop.f32.mrb[33].mxu0  ;;  %6414 = vmatpush1.bf16.msra.mxu1 %v19050_v34 }
 0x3d5   :  { %v22023_v25 = vpop.f32.mrb[62].mxu1  ;;  %v19056_v55 = vld [vmem:[%s26601_s2 + $0x70] ss:$28 sps:$4 sm:$0xff]   ;;  %vm4389_vm7 = vcmp.ge.f32.partialorder %v4193_v6, 0.0  ;;  %3427 = vrot.lane.b32.xlu1 %v21300_v46, %s19814_s19  ;;  %vm4386_vm8 = vcmp.ge.f32.partialorder %v3969_v20, 0.0  ;;  %v4197_v36 = vpop.f32.mrb[34].mxu0  ;;  %6507 = vmatpush1.bf16.msra.mxu0 %v19053_v52 }
 0x3d6   :  { %v4502_v8 = vmul.f32 0.2, %v4195_v9  ;;  %v19059_v19 = vld [vmem:[%s26601_s2 + $0x78] ss:$28 sps:$4 sm:$0xff]   ;;  %v19064_v34 = vld [vmem:[%s26601_s2 + $0xac] ss:$28 sps:$4 sm:$0xff]   ;;  %3425 = vrot.lane.b32.xlu0 %v21298_v44, %s19814_s19  ;;  %16517 = vmatmul.mubr.msk.bf16.gmra.mrb[84].mxu0 %vm3854_vm6, %v21716_v39  ;;  %v22060_v44 = vsel %vm4389_vm7, %v4193_v6, %v4501_v24  ;;  %v22063_v39 = vsel %vm4386_vm8, %v3969_v20, %v4498_v38 }
 0x3d7   :  { %26938 = vst [vmem:[#allocation34_spill] sm:$0xff] %v22042_v35  ;;  %vm4390_vm9 = vcmp.ge.f32.partialorder %v4195_v9, 0.0  ;;  %vm4396_vm10 = vcmp.ge.f32.partialorder %v4197_v36, 0.0  ;;  %v4508_v52 = vmul.f32 0.2, %v4197_v36  ;;  %v3973_v30 = vpop.f32.mrb[63].mxu1  ;;  %17715 = vmatmul.mubr.msk.bf16.gmra.mrb[160].mxu1 %vm3854_vm6, %v21771_v26  ;;  %5446 = vmatprep.mubr.bf16.mxu0 %v21885_v0 }
 0x3d8   :  { %v4199_v47 = vpop.f32.mrb[35].mxu0  ;;  %v19067_v11 = vld [vmem:[%s26601_s2 + $0xb4] ss:$28 sps:$4 sm:$0xff]   ;;  %v22054_v59 = vmul.f32 0.2, %v21998_v17  ;;  %vm4393_vm11 = vcmp.ge.f32.partialorder %v3973_v30, 0.0  ;;  %17718 = vmatprep.mubr.msk.bf16.mxu1 %vm3854_vm6, %v21784_v22  ;;  %6415 = vmatprep.subr.bf16.mxu1 %v19058_v7  ;;  %v22071_v33 = vsel %vm4390_vm9, %v4195_v9, %v4502_v8 }
 0x3d9   :  { %v4505_v37 = vmul.f32 0.2, %v3973_v30  ;;  %vm4397_vm12 = vcmp.ge.f32.partialorder %v4199_v47, 0.0  ;;  %26939 = vst [vmem:[#allocation35_spill] sm:$0xff] %v22060_v44  ;;  %26940 = vst [vmem:[#allocation36_spill] sm:$0xff] %v22063_v39  ;;  %v6069_v4 = vld [vmem:[#allocation2 + $0x158] sm:$0xff]  ;;  %v22074_v42 = vsel %vm4396_vm10, %v4197_v36, %v4508_v52  ;;  %6508 = vmatprep.subr.bf16.mxu0 %v19061_v56  ;;  %6416 = vmatpush1.bf16.msra.mxu1 %v19056_v55 }
 0x3da   :  { %v22066_v40 = vmul.f32 0.2, %v22023_v25  ;;  %v4509_v14 = vmul.f32 0.2, %v4199_v47  ;;  %26941 = vst [vmem:[#allocation37_spill] sm:$0xff] %v22071_v33  ;;  %26942 = vst [vmem:[#allocation38_spill] sm:$0xff] %v22074_v42  ;;  %6104 = vrot.lane.b32.xlu1 %v6069_v4, %s19796_s10  ;;  %6509 = vmatpush1.bf16.msra.mxu0 %v19059_v19 }
 0x3db   :  { %v22076_v6 = vsel %vm4393_vm11, %v3973_v30, %v4505_v37  ;;  %v6063_v20 = vld [vmem:[#allocation2 + $0x128] sm:$0xff]  ;;  %vm4364_vm13 = vcmp.ge.f32.partialorder %v21876_v10, 0.0  ;;  %v22086_v9 = vpop.f32.mrb[64].mxu1  ;;  %v4203_v7 = vpop.f32.mrb[36].mxu0  ;;  %vm4371_vm14 = vcmp.ge.f32.partialorder %v21905_v15, 0.0  ;;  %6417 = vmatprep.subr.bf16.mxu1 %v19064_v34  ;;  %6510 = vmatprep.subr.bf16.mxu0 %v19067_v11  ;;  %vm4378_vm3 = vcmp.ge.f32.partialorder %v21947_v18, 0.0 }
 0x3dc   :  { %26943 = vst [vmem:[#allocation39_spill] sm:$0xff] %v22076_v6  ;;  %v22083_v38 = vsel %vm4397_vm12, %v4199_v47, %v4509_v14  ;;  %6086 = vrot.lane.b32.xlu0 %v6063_v20, %s19794_s13  ;;  %v19062_v4 = vld [vmem:[%s26601_s2 + $0xa8] ss:$28 sps:$4 sm:$0xff]   ;;  %v22093_v56 = vsel %vm4364_vm13, %v21876_v10, %v21976_v5  ;;  %v22099_v47 = vmul.f32 0.2, %v22086_v9  ;;  %vm4403_vm15 = vcmp.ge.f32.partialorder %v4203_v7, 0.0 }
 0x3dd   :  { %26944 = vst [vmem:[#allocation40_spill] sm:$0xff] %v22083_v38  ;;  %26945 = vst [vmem:[#allocation41_spill] sm:$0xff] %v22093_v56  ;;  %v4515_v30 = vmul.f32 0.2, %v4203_v7  ;;  %v3979_v8 = vpop.f32.mrb[65].mxu1  ;;  %v4205_v10 = vpop.f32.mrb[37].mxu0  ;;  %6418 = vmatpush1.bf16.msra.mxu1 %v19062_v4 }
 0x3de   :  { %v19065_v55 = vld [vmem:[%s26601_s2 + $0xb0] ss:$28 sps:$4 sm:$0xff]   ;;  %vm4400_vm2 = vcmp.ge.f32.partialorder %v3979_v8, 0.0  ;;  %v4512_v5 = vmul.f32 0.2, %v3979_v8  ;;  %v22104_v36 = vpop.f32.mrb[66].mxu1  ;;  %3438 = vrot.lane.b32.xlu1 %v21300_v46, %s19815_s27  ;;  %16518 = vmatmul.mubr.msk.bf16.gmra.mrb[88].mxu0 %vm3854_vm6, %v21747_v45 }
 0x3df   :  { %v19070_v52 = vld [vmem:[%s26601_s2 + $0xe4] ss:$28 sps:$4 sm:$0xff]   ;;  %v22112_v19 = vsel %vm4403_vm15, %v4203_v7, %v4515_v30  ;;  %vm4404_vm7 = vcmp.ge.f32.partialorder %v4205_v10, 0.0  ;;  %v4516_v34 = vmul.f32 0.2, %v4205_v10  ;;  %v4207_v11 = vpop.f32.mrb[38].mxu0  ;;  %v22127_v7 = vsel %vm4371_vm14, %v21905_v15, %v22005_v27  ;;  %17719 = vmatmul.mubr.msk.bf16.gmra.mrb[164].mxu1 %vm3854_vm6, %v21799_v13  ;;  %5456 = vmatprep.mubr.bf16.mxu0 %v21885_v0 }
 0x3e0   :  { %26946 = vst [vmem:[#allocation42_spill] sm:$0xff] %v22112_v19  ;;  %v22116_v20 = vmul.f32 0.2, %v22104_v36  ;;  %v22118_v14 = vsel %vm4400_vm2, %v3979_v8, %v4512_v5  ;;  %3436 = vrot.lane.b32.xlu0 %v21294_v32, %s19815_s27  ;;  %vm4410_vm8 = vcmp.ge.f32.partialorder %v4207_v11, 0.0  ;;  %v4522_v24 = vmul.f32 0.2, %v4207_v11  ;;  %17722 = vmatprep.mubr.msk.bf16.mxu1 %vm3854_vm6, %v21821_v16 }
 0x3e1   :  { %26947 = vst [vmem:[#allocation43_spill] sm:$0xff] %v22118_v14  ;;  %v3983_v37 = vpop.f32.mrb[67].mxu1  ;;  %v4209_v33 = vpop.f32.mrb[39].mxu0  ;;  %26948 = vst [vmem:[#allocation44_spill] sm:$0xff] %v22127_v7  ;;  %v22129_v30 = vsel %vm4404_vm7, %v4205_v10, %v4516_v34  ;;  %v19073_v45 = vld [vmem:[%s26601_s2 + $0xec] ss:$28 sps:$4 sm:$0xff]   ;;  %v22148_v27 = vsel %vm4378_vm3, %v21947_v18, %v22008_v29  ;;  %6511 = vmatpush1.bf16.msra.mxu0 %v19065_v55  ;;  %6419 = vmatprep.subr.bf16.mxu1 %v19070_v52 }
 0x3e2   :  { %26949 = vst [vmem:[#allocation45_spill] sm:$0xff] %v22129_v30  ;;  %vm4407_vm9 = vcmp.ge.f32.partialorder %v3983_v37, 0.0  ;;  %v4519_v8 = vmul.f32 0.2, %v3983_v37  ;;  %vm4411_vm10 = vcmp.ge.f32.partialorder %v4209_v33, 0.0  ;;  %v22137_v5 = vsel %vm4410_vm8, %v4207_v11, %v4522_v24  ;;  %26951 = vst [vmem:[#allocation47_spill] sm:$0xff] %v22148_v27  ;;  %3446 = vrot.lane.b32.xlu1 %v21300_v46, %s19816_s8  ;;  %6512 = vmatprep.subr.bf16.mxu0 %v19073_v45 }
 0x3e3   :  { %26950 = vst [vmem:[#allocation46_spill] sm:$0xff] %v22137_v5  ;;  %v4523_v38 = vmul.f32 0.2, %v4209_v33  ;;  %v19068_v15 = vld [vmem:[%s26601_s2 + $0xe0] ss:$28 sps:$4 sm:$0xff]   ;;  %vm4385_vm11 = vcmp.ge.f32.partialorder %v21998_v17, 0.0 }
 0x3e4   :  { %v22151_v10 = vsel %vm4407_vm9, %v3983_v37, %v4519_v8  ;;  %v19071_v24 = vld [vmem:[%s26601_s2 + $0xe8] ss:$28 sps:$4 sm:$0xff]   ;;  %vm4392_vm12 = vcmp.ge.f32.partialorder %v22023_v25, 0.0  ;;  %v22163_v18 = vsel %vm4385_vm11, %v21998_v17, %v22054_v59  ;;  %3444 = vrot.lane.b32.xlu0 %v21294_v32, %s19816_s8  ;;  %v3987_v46 = vpop.f32.mrb[68].mxu1  ;;  %v4213_v55 = vpop.f32.mrb[40].mxu0  ;;  %vm4399_vm13 = vcmp.ge.f32.partialorder %v22086_v9, 0.0  ;;  %6420 = vmatpush1.bf16.msra.mxu1 %v19068_v15 }
 0x3e5   :  { %26952 = vst [vmem:[#allocation48_spill] sm:$0xff] %v22151_v10  ;;  %26953 = vst [vmem:[#allocation49_spill] sm:$0xff] %v22163_v18  ;;  %v22168_v37 = vsel %vm4411_vm10, %v4209_v33, %v4523_v38  ;;  %v7119_v34 = vld [vmem:[#allocation2 + $0x1a0] sm:$0xff]  ;;  %v22174_v11 = vsel %vm4392_vm12, %v22023_v25, %v22066_v40  ;;  %v4525_v59 = vmul.f32 0.2, %v3987_v46  ;;  %vm4417_vm14 = vcmp.ge.f32.partialorder %v4213_v55, 0.0  ;;  %6513 = vmatpush1.bf16.msra.mxu0 %v19071_v24 }
 0x3e6   :  { %26954 = vst [vmem:[#allocation50_spill] sm:$0xff] %v22168_v37  ;;  %26955 = vst [vmem:[#allocation51_spill] sm:$0xff] %v22174_v11  ;;  %v4529_v33 = vmul.f32 0.2, %v4213_v55  ;;  %v3989_v38 = vpop.f32.mrb[69].mxu1  ;;  %v4215_v8 = vpop.f32.mrb[41].mxu0  ;;  %7149 = vrot.lane.b32.xlu1 %v7119_v34, %s19796_s10  ;;  %16519 = vmatmul.mubr.msk.bf16.gmra.mrb[92].mxu0 %vm3854_vm6, %v21771_v26  ;;  %v22200_v34 = vsel %vm4399_vm13, %v22086_v9, %v22099_v47  ;;  %v26962_v47 = vcombine.high %v21866_v12, %v21866_v12 }
 0x3e7   :  { %vm4414_vm15 = vcmp.ge.f32.partialorder %v3989_v38, 0.0  ;;  %v4526_v32 = vmul.f32 0.2, %v3989_v38  ;;  %v3991_v29 = vpop.f32.mrb[70].mxu1  ;;  %v19080_v40 = vld [vmem:[%s26601_s2 + $0x14] ss:$28 sps:$4 sm:$0xff]   ;;  %17723 = vmatmul.mubr.msk.bf16.gmra.mrb[168].mxu1 %vm3854_vm6, %v21871_v23  ;;  %5466 = vmatprep.mubr.bf16.mxu0 %v21885_v0 }
 0x3e8   :  { %vm4406_vm2 = vcmp.ge.f32.partialorder %v22104_v36, 0.0  ;;  %v22185_v52 = vsel %vm4417_vm14, %v4213_v55, %v4529_v33  ;;  %vm4418_vm3 = vcmp.ge.f32.partialorder %v4215_v8, 0.0  ;;  %v4530_v45 = vmul.f32 0.2, %v4215_v8  ;;  %v4217_v4 = vpop.f32.mrb[42].mxu0  ;;  %v3993_v37 = vpop.f32.mrb[71].mxu1  ;;  %16581 = vmatprep.subr.msk.bf16.mxu0 %vm3871_vm4, %v26962_v47  ;;  %6443 = vmatprep.mubr.bf16.mxu1 %v21885_v0 }
 0x3e9   :  { %26956 = vst [vmem:[#allocation52_spill] sm:$0xff] %v22185_v52  ;;  %v4532_v17 = vmul.f32 0.2, %v3991_v29  ;;  %v22188_v30 = vsel %vm4414_vm15, %v3989_v38, %v4526_v32  ;;  %vm4424_vm7 = vcmp.ge.f32.partialorder %v4217_v4, 0.0  ;;  %v4536_v15 = vmul.f32 0.2, %v4217_v4  ;;  %6515 = vmatpush1.bf16.msra.mxu0 %v21966_v50 }
 0x3ea   :  { %26957 = vst [vmem:[#allocation53_spill] sm:$0xff] %v22188_v30  ;;  %v4219_v2 = vpop.f32.mrb[43].mxu0  ;;  %v26958_v55 = vcombine.high %v21818_v63, %v21818_v63  ;;  %26959 = vst [vmem:[#allocation54_spill] sm:$0xff] %v22200_v34  ;;  %v22202_v24 = vsel %vm4418_vm3, %v4215_v8, %v4530_v45  ;;  %vm4421_vm8 = vcmp.ge.f32.partialorder %v3993_v37, 0.0  ;;  %v4533_v33 = vmul.f32 0.2, %v3993_v37 }
 0x3eb   :  { %26960 = vst [vmem:[#allocation55_spill] sm:$0xff] %v22202_v24  ;;  %vm4425_vm9 = vcmp.ge.f32.partialorder %v4219_v2, 0.0  ;;  %v22210_v26 = vld [vmem:[%s26601_s2 + $0x18] ss:$28 sps:$4 sm:$0xff]   ;;  %v22212_v63 = vsel %vm4424_vm7, %v4217_v4, %v4536_v15  ;;  %v4537_v38 = vmul.f32 0.2, %v4219_v2  ;;  %v22223_v32 = vsel %vm4406_vm2, %v22104_v36, %v22116_v20 }
 0x3ec   :  { %16574 = vmatprep.subr.msk.bf16.mxu1 %vm3871_vm4, %v26958_v55  ;;  %26961 = vst [vmem:[#allocation56_spill] sm:$0xff] %v22212_v63  ;;  %v7120_v9 = vld [vmem:[#allocation2 + $0x1a8] sm:$0xff]  ;;  %26963 = vst [vmem:[#allocation57_spill] sm:$0xff] %v22223_v32  ;;  %vm4413_vm10 = vcmp.ge.f32.partialorder %v3987_v46, 0.0  ;;  %v22225_v8 = vsel %vm4421_vm8, %v3993_v37, %v4533_v33  ;;  %vm4420_vm11 = vcmp.ge.f32.partialorder %v3991_v29, 0.0  ;;  %v3997_v36 = vpop.f32.mrb[72].mxu1  ;;  %17726 = vmatprep.subr.bf16.mxu0 %v22210_v26 }
 0x3ed   :  { %6422 = vmatpush1.bf16.msra.mxu1 %v21874_v62  ;;  %26964 = vst [vmem:[#allocation58_spill] sm:$0xff] %v22225_v8  ;;  %7151 = vrot.lane.b32.xlu1 %v7120_v9, %s19796_s10  ;;  %v22231_v4 = vsel %vm4413_vm10, %v3987_v46, %v4525_v59  ;;  %v22236_v45 = vsel %vm4425_vm9, %v4219_v2, %v4537_v38  ;;  %v4223_v20 = vpop.f32.mrb[44].mxu0  ;;  %v7121_v37 = vld [vmem:[#allocation2 + $0x1b0] sm:$0xff]  ;;  %v4539_v55 = vmul.f32 0.2, %v3997_v36  ;;  %v3999_v59 = vpop.f32.mrb[73].mxu1 }
 0x3ee   :  { %26965 = vst [vmem:[#allocation59_spill] sm:$0xff] %v22231_v4  ;;  %26966 = vst [vmem:[#allocation60_spill] sm:$0xff] %v22236_v45  ;;  %6597 = vmatprep.subr.bf16.mxu1 %v19080_v40  ;;  %v22239_v15 = vsel %vm4420_vm11, %v3991_v29, %v4532_v17  ;;  %vm4431_vm12 = vcmp.ge.f32.partialorder %v4223_v20, 0.0  ;;  %v4543_v46 = vmul.f32 0.2, %v4223_v20  ;;  %vm4428_vm13 = vcmp.ge.f32.partialorder %v3999_v59, 0.0  ;;  %16520 = vmatmul.mubr.msk.bf16.gmra.mrb[96].mxu0 %vm3854_vm6, %v21784_v22 }
 0x3ef   :  { %26967 = vst [vmem:[#allocation61_spill] sm:$0xff] %v22239_v15  ;;  %v4540_v2 = vmul.f32 0.2, %v3999_v59  ;;  %v4225_v33 = vpop.f32.mrb[45].mxu0  ;;  %v4001_v38 = vpop.f32.mrb[74].mxu1  ;;  %vm4427_vm14 = vcmp.ge.f32.partialorder %v3997_v36, 0.0  ;;  %5476 = vmatprep.mubr.bf16.mxu0 %v21885_v0 }
 0x3f0   :  { %v22246_v40 = vsel %vm4431_vm12, %v4223_v20, %v4543_v46  ;;  %vm4432_vm15 = vcmp.ge.f32.partialorder %v4225_v33, 0.0  ;;  %v4544_v29 = vmul.f32 0.2, %v4225_v33  ;;  %v4546_v17 = vmul.f32 0.2, %v4001_v38  ;;  %v4227_v47 = vpop.f32.mrb[46].mxu0 }
 0x3f1   :  { %26968 = vst [vmem:[#allocation62_spill] sm:$0xff] %v22246_v40  ;;  %7153 = vrot.lane.b32.xlu1 %v7121_v37, %s19796_s10  ;;  %v22249_v50 = vsel %vm4428_vm13, %v3999_v59, %v4540_v2  ;;  %vm4438_vm2 = vcmp.ge.f32.partialorder %v4227_v47, 0.0  ;;  %v4550_v62 = vmul.f32 0.2, %v4227_v47  ;;  %v4003_v12 = vpop.f32.mrb[75].mxu1  ;;  %v4229_v25 = vpop.f32.mrb[47].mxu0  ;;  %v22259_v2 = vsel %vm4427_vm14, %v3997_v36, %v4539_v55 }
 0x3f2   :  { %26969 = vst [vmem:[#allocation63_spill] sm:$0xff] %v22249_v50  ;;  %vm4434_vm3 = vcmp.ge.f32.partialorder %v4001_v38, 0.0  ;;  %v22253_v9 = vsel %vm4432_vm15, %v4225_v33, %v4544_v29  ;;  %vm4435_vm7 = vcmp.ge.f32.partialorder %v4003_v12, 0.0  ;;  %v4547_v20 = vmul.f32 0.2, %v4003_v12  ;;  %v7122_v59 = vld [vmem:[#allocation2 + $0x1b8] sm:$0xff] }
 0x3f3   :  { %26970 = vst [vmem:[#allocation64_spill] sm:$0xff] %v22253_v9  ;;  %vm4439_vm8 = vcmp.ge.f32.partialorder %v4229_v25, 0.0  ;;  %v22256_v37 = vsel %vm4438_vm2, %v4227_v47, %v4550_v62  ;;  %v4551_v46 = vmul.f32 0.2, %v4229_v25  ;;  %26972 = vst [vmem:[#allocation66_spill] sm:$0xff] %v22259_v2  ;;  %v22261_v24 = vsel %vm4434_vm3, %v4001_v38, %v4546_v17  ;;  %v4040_v55 = vpop.f32.mrb[76].mxu1 }
 0x3f4   :  { %26971 = vst [vmem:[#allocation65_spill] sm:$0xff] %v22256_v37  ;;  %26973 = vst [vmem:[#allocation67_spill] sm:$0xff] %v22261_v24  ;;  %v22263_v45 = vsel %vm4435_vm7, %v4003_v12, %v4547_v20  ;;  %v4443_v47 = vmul.f32 0.2, %v4040_v55  ;;  %v4042_v20 = vpop.f32.mrb[77].mxu1  ;;  %vm4331_vm9 = vcmp.ge.f32.partialorder %v4040_v55, 0.0 }
 0x3f5   :  { %26974 = vst [vmem:[#allocation68_spill] sm:$0xff] %v22263_v45  ;;  %7155 = vrot.lane.b32.xlu1 %v7122_v59, %s19796_s10  ;;  %v22274_v36 = vsel %vm4439_vm8, %v4229_v25, %v4551_v46  ;;  %v7123_v59 = vld [vmem:[#allocation2 + $0x1c0] sm:$0xff]  ;;  %v4444_v33 = vmul.f32 0.2, %v4042_v20  ;;  %v4044_v62 = vpop.f32.mrb[78].mxu1  ;;  %vm4332_vm10 = vcmp.ge.f32.partialorder %v4042_v20, 0.0 }
 0x3f6   :  { %26975 = vst [vmem:[#allocation69_spill] sm:$0xff] %v22274_v36  ;;  %v4450_v25 = vmul.f32 0.2, %v4044_v62  ;;  %v4046_v46 = vpop.f32.mrb[79].mxu1  ;;  %vm4338_vm11 = vcmp.ge.f32.partialorder %v4044_v62, 0.0  ;;  %16521 = vmatmul.mubr.msk.bf16.gmra.mrb[100].mxu0 %vm3854_vm6, %v21799_v13  ;;  %v22286_v17 = vsel %vm4331_vm9, %v4040_v55, %v4443_v47  ;;  %v6053_v45 = vld [vmem:[#allocation2 + $0xc8] sm:$0xff] }
 0x3f7   :  { %vm4339_vm12 = vcmp.ge.f32.partialorder %v4046_v46, 0.0  ;;  %v4451_v12 = vmul.f32 0.2, %v4046_v46  ;;  %5486 = vmatprep.mubr.bf16.mxu0 %v21885_v0  ;;  %26976 = vst [vmem:[#allocation70_spill] sm:$0xff] %v22286_v17  ;;  %v22290_v29 = vsel %vm4332_vm10, %v4042_v20, %v4444_v33  ;;  %v7107_v35 = vld [vmem:[#allocation2 + $0x130] sm:$0xff] }
 0x3f8   :  { %v22288_v38 = vsel %vm4338_vm11, %v4044_v62, %v4450_v25  ;;  %26978 = vst [vmem:[#allocation72_spill] sm:$0xff] %v22290_v29 }
 0x3f9   :  { %7157 = vrot.lane.b32.xlu1 %v7123_v59, %s19796_s10  ;;  %26977 = vst [vmem:[#allocation71_spill] sm:$0xff] %v22288_v38  ;;  %v22292_v22 = vsel %vm4339_vm12, %v4046_v46, %v4451_v12  ;;  %v7124_v59 = vld [vmem:[#allocation2 + $0x1c8] sm:$0xff] }
 0x3fa   :  { %26979 = vst [vmem:[#allocation73_spill] sm:$0xff] %v22292_v22  ;;  %v4050_v13 = vpop.f32.mrb[80].mxu1 }
 0x3fb   :  { %v4457_v40 = vmul.f32 0.2, %v4050_v13  ;;  %v4052_v37 = vpop.f32.mrb[81].mxu1  ;;  %vm4345_vm13 = vcmp.ge.f32.partialorder %v4050_v13, 0.0 }
 0x3fc   :  { %v4458_v55 = vmul.f32 0.2, %v4052_v37  ;;  %v4054_v62 = vpop.f32.mrb[82].mxu1  ;;  %vm4346_vm14 = vcmp.ge.f32.partialorder %v4052_v37, 0.0 }
 0x3fd   :  { %7159 = vrot.lane.b32.xlu1 %v7124_v59, %s19796_s10  ;;  %vm4352_vm15 = vcmp.ge.f32.partialorder %v4054_v62, 0.0  ;;  %v4464_v33 = vmul.f32 0.2, %v4054_v62  ;;  %v4056_v12 = vpop.f32.mrb[83].mxu1  ;;  %v22301_v20 = vsel %vm4345_vm13, %v4050_v13, %v4457_v40 }
 0x3fe   :  { %vm4353_vm2 = vcmp.ge.f32.partialorder %v4056_v12, 0.0  ;;  %v4465_v47 = vmul.f32 0.2, %v4056_v12  ;;  %16522 = vmatmul.mubr.msk.bf16.gmra.mrb[104].mxu0 %vm3854_vm6, %v21821_v16  ;;  %26980 = vst [vmem:[#allocation74_spill] sm:$0xff] %v22301_v20  ;;  %v22306_v46 = vsel %vm4346_vm14, %v4052_v37, %v4458_v55 }
 0x3ff   :  { %v22303_v25 = vsel %vm4352_vm15, %v4054_v62, %v4464_v33  ;;  %5496 = vmatprep.mubr.bf16.mxu0 %v21885_v0  ;;  %26982 = vst [vmem:[#allocation76_spill] sm:$0xff] %v22306_v46 }
 0x400   :  { %26981 = vst [vmem:[#allocation75_spill] sm:$0xff] %v22303_v25  ;;  %v22308_v59 = vsel %vm4353_vm2, %v4056_v12, %v4465_v47 }
 0x401   :  { %26983 = vst [vmem:[#allocation77_spill] sm:$0xff] %v22308_v59 }
 0x402   :  { %v4060_v52 = vpop.f32.mrb[84].mxu1 }
 0x403   :  { %v4471_v63 = vmul.f32 0.2, %v4060_v52  ;;  %v4062_v19 = vpop.f32.mrb[85].mxu1  ;;  %vm4359_vm3 = vcmp.ge.f32.partialorder %v4060_v52, 0.0 }
 0x404   :  { %v4472_v16 = vmul.f32 0.2, %v4062_v19  ;;  %v4064_v40 = vpop.f32.mrb[86].mxu1  ;;  %vm4360_vm7 = vcmp.ge.f32.partialorder %v4062_v19, 0.0 }
 0x405   :  { %vm4366_vm8 = vcmp.ge.f32.partialorder %v4064_v40, 0.0  ;;  %v4478_v13 = vmul.f32 0.2, %v4064_v40  ;;  %v4066_v62 = vpop.f32.mrb[87].mxu1  ;;  %v22316_v55 = vsel %vm4359_vm3, %v4060_v52, %v4471_v63 }
 0x406   :  { %vm4367_vm9 = vcmp.ge.f32.partialorder %v4066_v62, 0.0  ;;  %v4479_v37 = vmul.f32 0.2, %v4066_v62  ;;  %16523 = vmatmul.mubr.msk.bf16.gmra.mrb[108].mxu0 %vm3854_vm6, %v21871_v23  ;;  %26984 = vst [vmem:[#allocation78_spill] sm:$0xff] %v22316_v55  ;;  %v22321_v12 = vsel %vm4360_vm7, %v4062_v19, %v4472_v16 }
 0x407   :  { %v22318_v33 = vsel %vm4366_vm8, %v4064_v40, %v4478_v13  ;;  %6536 = vmatprep.mubr.bf16.mxu0 %v21885_v0  ;;  %26986 = vst [vmem:[#allocation80_spill] sm:$0xff] %v22321_v12 }
 0x408   :  { %26985 = vst [vmem:[#allocation79_spill] sm:$0xff] %v22318_v33  ;;  %v22323_v47 = vsel %vm4367_vm9, %v4066_v62, %v4479_v37 }
 0x409   :  { %26987 = vst [vmem:[#allocation81_spill] sm:$0xff] %v22323_v47 }
 0x40a   :  { %v4070_v5 = vpop.f32.mrb[88].mxu1 }
 0x40b   :  { %v4485_v44 = vmul.f32 0.2, %v4070_v5  ;;  %v4072_v42 = vpop.f32.mrb[89].mxu1  ;;  %vm4373_vm10 = vcmp.ge.f32.partialorder %v4070_v5, 0.0 }
 0x40c   :  { %v4486_v23 = vmul.f32 0.2, %v4072_v42  ;;  %v4074_v52 = vpop.f32.mrb[90].mxu1  ;;  %vm4374_vm11 = vcmp.ge.f32.partialorder %v4072_v42, 0.0 }
 0x40d   :  { %vm4380_vm12 = vcmp.ge.f32.partialorder %v4074_v52, 0.0  ;;  %v4492_v63 = vmul.f32 0.2, %v4074_v52  ;;  %v4076_v40 = vpop.f32.mrb[91].mxu1  ;;  %v22329_v16 = vsel %vm4373_vm10, %v4070_v5, %v4485_v44 }
 0x40e   :  { %vm4381_vm13 = vcmp.ge.f32.partialorder %v4076_v40, 0.0  ;;  %v4493_v19 = vmul.f32 0.2, %v4076_v40  ;;  %26988 = vst [vmem:[#allocation82_spill] sm:$0xff] %v22329_v16  ;;  %v22333_v62 = vsel %vm4374_vm11, %v4072_v42, %v4486_v23 }
 0x40f   :  { %v22331_v13 = vsel %vm4380_vm12, %v4074_v52, %v4492_v63  ;;  %26990 = vst [vmem:[#allocation84_spill] sm:$0xff] %v22333_v62 }
 0x410   :  { %26989 = vst [vmem:[#allocation83_spill] sm:$0xff] %v22331_v13  ;;  %v22335_v37 = vsel %vm4381_vm13, %v4076_v40, %v4493_v19 }
 0x411   :  { %26991 = vst [vmem:[#allocation85_spill] sm:$0xff] %v22335_v37 }
 0x412   :  { %v4080_v12 = vpop.f32.mrb[92].mxu1 }
 0x413   :  { %v4499_v47 = vmul.f32 0.2, %v4080_v12  ;;  %v4082_v46 = vpop.f32.mrb[93].mxu1  ;;  %vm4387_vm14 = vcmp.ge.f32.partialorder %v4080_v12, 0.0 }
 0x414   :  { %v4500_v59 = vmul.f32 0.2, %v4082_v46  ;;  %v4084_v28 = vpop.f32.mrb[94].mxu1  ;;  %vm4388_vm15 = vcmp.ge.f32.partialorder %v4082_v46, 0.0 }
 0x415   :  { %vm4394_vm2 = vcmp.ge.f32.partialorder %v4084_v28, 0.0  ;;  %v4506_v44 = vmul.f32 0.2, %v4084_v28  ;;  %v4086_v5 = vpop.f32.mrb[95].mxu1  ;;  %v22341_v23 = vsel %vm4387_vm14, %v4080_v12, %v4499_v47 }
 0x416   :  { %vm4395_vm3 = vcmp.ge.f32.partialorder %v4086_v5, 0.0  ;;  %v4507_v42 = vmul.f32 0.2, %v4086_v5  ;;  %26992 = vst [vmem:[#allocation86_spill] sm:$0xff] %v22341_v23  ;;  %v22345_v63 = vsel %vm4388_vm15, %v4082_v46, %v4500_v59 }
 0x417   :  { %v22343_v52 = vsel %vm4394_vm2, %v4084_v28, %v4506_v44  ;;  %26994 = vst [vmem:[#allocation88_spill] sm:$0xff] %v22345_v63 }
 0x418   :  { %26993 = vst [vmem:[#allocation87_spill] sm:$0xff] %v22343_v52  ;;  %v22347_v40 = vsel %vm4395_vm3, %v4086_v5, %v4507_v42  ;;  %v6052_v42 = vld [vmem:[#allocation2 + $0xc0] sm:$0xff] }
 0x419   :  { %26995 = vst [vmem:[#allocation89_spill] sm:$0xff] %v22347_v40 }
 0x41a   :  { %v4090_v36 = vpop.f32.mrb[96].mxu1 }
 0x41b   :  { %v4513_v62 = vmul.f32 0.2, %v4090_v36  ;;  %v4092_v37 = vpop.f32.mrb[97].mxu1  ;;  %vm4401_vm7 = vcmp.ge.f32.partialorder %v4090_v36, 0.0 }
 0x41c   :  { %v4514_v48 = vmul.f32 0.2, %v4092_v37  ;;  %v4094_v29 = vpop.f32.mrb[98].mxu1  ;;  %vm4402_vm8 = vcmp.ge.f32.partialorder %v4092_v37, 0.0  ;;  %v6077_v46 = vpop.permute.xlu0 %6076 }
 0x41d   :  { %vm4408_vm9 = vcmp.ge.f32.partialorder %v4094_v29, 0.0  ;;  %v4520_v28 = vmul.f32 0.2, %v4094_v29  ;;  %v4096_v12 = vpop.f32.mrb[99].mxu1  ;;  %v22353_v47 = vsel %vm4401_vm7, %v4090_v36, %v4513_v62  ;;  %v6108_v63 = vsel %vm3208_vm1, %v6052_v42, %v6077_v46  ;;  %v19078_v36 = vld [vmem:[%s26601_s2 + $0x10] ss:$28 sps:$4 sm:$0xff]  }
 0x41e   :  { %vm4409_vm10 = vcmp.ge.f32.partialorder %v4096_v12, 0.0  ;;  %v4521_v59 = vmul.f32 0.2, %v4096_v12  ;;  %26996 = vst [vmem:[#allocation90_spill] sm:$0xff] %v22353_v47  ;;  %v22357_v5 = vsel %vm4402_vm8, %v4092_v37, %v4514_v48  ;;  %v19084_v62 = vld [vmem:[%s26601_s2 + $0x4c] ss:$28 sps:$4 sm:$0xff]  }
 0x41f   :  { %v22355_v44 = vsel %vm4408_vm9, %v4094_v29, %v4520_v28  ;;  %26998 = vst [vmem:[#allocation92_spill] sm:$0xff] %v22357_v5  ;;  %v19085_v37 = vld [vmem:[%s26601_s2 + $0x50] ss:$28 sps:$4 sm:$0xff]  }
 0x420   :  { %26997 = vst [vmem:[#allocation91_spill] sm:$0xff] %v22355_v44  ;;  %v22359_v9 = vsel %vm4409_vm10, %v4096_v12, %v4521_v59  ;;  %v19088_v59 = vld [vmem:[%s26601_s2 + $0x84] ss:$28 sps:$4 sm:$0xff]  }
 0x421   :  { %26999 = vst [vmem:[#allocation93_spill] sm:$0xff] %v22359_v9  ;;  %v6095_v22 = vpop.permute.xlu1 %6094  ;;  %v19089_v9 = vld [vmem:[%s26601_s2 + $0x88] ss:$28 sps:$4 sm:$0xff]  }
 0x422   :  { %v22370_v29 = vsel %vm3595_vm5, %v6108_v63, %v6095_v22  ;;  %v4100_v48 = vpop.f32.mrb[100].mxu1  ;;  %v19082_v22 = vld [vmem:[%s26601_s2 + $0x48] ss:$28 sps:$4 sm:$0xff]  }
 0x423   :  { %v4527_v28 = vmul.f32 0.2, %v4100_v48  ;;  %16575 = vmatmul.mubr.msk.bf16.vlgmr.msra.gmra.mrb[172].mxu1 %vm3854_vm6, %v22370_v29  ;;  %16582 = vmatmul.mubr.msk.bf16.vlgmr.msra.gmra.mrb[112].mxu0 %vm3854_vm6, %v22370_v29  ;;  %v4102_v12 = vpop.f32.mrb[101].mxu1  ;;  %vm4415_vm11 = vcmp.ge.f32.partialorder %v4100_v48, 0.0 }
 0x424   :  { %v4528_v63 = vmul.f32 0.2, %v4102_v12  ;;  %v4104_v46 = vpop.f32.mrb[102].mxu1  ;;  %6453 = vmatprep.mubr.bf16.mxu1 %v21885_v0  ;;  %6546 = vmatprep.mubr.bf16.mxu0 %v21885_v0  ;;  %vm4416_vm12 = vcmp.ge.f32.partialorder %v4102_v12, 0.0  ;;  %v6079_v19 = vpop.permute.xlu0 %6078 }
 0x425   :  { %vm4422_vm13 = vcmp.ge.f32.partialorder %v4104_v46, 0.0  ;;  %v4534_v42 = vmul.f32 0.2, %v4104_v46  ;;  %v4106_v40 = vpop.f32.mrb[103].mxu1  ;;  %6598 = vmatpush1.bf16.msra.mxu1 %v19078_v36  ;;  %17727 = vmatpush3.bf16.msra.mxu0 %v22210_v26  ;;  %v22395_v43 = vsel %vm4415_vm11, %v4100_v48, %v4527_v28  ;;  %v19086_v48 = vld [vmem:[%s26601_s2 + $0x80] ss:$28 sps:$4 sm:$0xff]  }
 0x426   :  { %vm4423_vm14 = vcmp.ge.f32.partialorder %v4106_v40, 0.0  ;;  %v4535_v5 = vmul.f32 0.2, %v4106_v40  ;;  %6599 = vmatprep.subr.bf16.mxu1 %v19084_v62  ;;  %17728 = vmatprep.subr.bf16.mxu0 %v19085_v37  ;;  %27000 = vst [vmem:[#allocation94_spill] sm:$0xff] %v22395_v43  ;;  %v22399_v50 = vsel %vm4416_vm12, %v4102_v12, %v4528_v63  ;;  %v6111_v62 = vsel %vm3208_vm1, %v6053_v45, %v6079_v19  ;;  %v19092_v45 = vld [vmem:[%s26601_s2 + $0xbc] ss:$28 sps:$4 sm:$0xff]  }
 0x427   :  { %v22397_v41 = vsel %vm4422_vm13, %v4104_v46, %v4534_v42  ;;  %27002 = vst [vmem:[#allocation96_spill] sm:$0xff] %v22399_v50  ;;  %v19093_v19 = vld [vmem:[%s26601_s2 + $0xc0] ss:$28 sps:$4 sm:$0xff]   ;;  %v19096_v63 = vld [vmem:[%s26601_s2 + $0xf4] ss:$28 sps:$4 sm:$0xff]   ;;  %vm3429_vm13 = vcmask 195584  }
 0x428   :  { %27001 = vst [vmem:[#allocation95_spill] sm:$0xff] %v22397_v41  ;;  %v22401_v36 = vsel %vm4423_vm14, %v4106_v40, %v4535_v5  ;;  %v6178_v46 = vld [vmem:[%s26601_s2 + $0x128] sm:$0x33]  ;;  %v6054_v43 = vld [vmem:[#allocation2 + $0xd0] sm:$0xff] }
 0x429   :  { %27003 = vst [vmem:[#allocation97_spill] sm:$0xff] %v22401_v36  ;;  %v6097_v8 = vpop.permute.xlu1 %6096  ;;  %6600 = vmatpush1.bf16.msra.mxu1 %v19082_v22  ;;  %17729 = vmatpush3.bf16.msra.mxu0 %v19085_v37  ;;  %v19090_v37 = vld [vmem:[%s26601_s2 + $0xb8] ss:$28 sps:$4 sm:$0xff]  }
 0x42a   :  { %v22412_v28 = vsel %vm3595_vm5, %v6111_v62, %v6097_v8  ;;  %v4110_v40 = vpop.f32.mrb[104].mxu1  ;;  %6601 = vmatprep.subr.bf16.mxu1 %v19088_v59  ;;  %17730 = vmatprep.subr.bf16.mxu0 %v19089_v9 }
 0x42b   :  { %v4541_v5 = vmul.f32 0.2, %v4110_v40  ;;  %16576 = vmatmul.mubr.msk.bf16.gmra.mrb[176].mxu1 %vm3854_vm6, %v22412_v28  ;;  %16583 = vmatmul.mubr.msk.bf16.gmra.mrb[116].mxu0 %vm3854_vm6, %v22412_v28  ;;  %v4112_v8 = vpop.f32.mrb[105].mxu1  ;;  %vm4429_vm15 = vcmp.ge.f32.partialorder %v4110_v40, 0.0 }
 0x42c   :  { %v4542_v12 = vmul.f32 0.2, %v4112_v8  ;;  %v4114_v22 = vpop.f32.mrb[106].mxu1  ;;  %6463 = vmatprep.mubr.bf16.mxu1 %v21885_v0  ;;  %6556 = vmatprep.mubr.bf16.mxu0 %v21885_v0  ;;  %vm4430_vm2 = vcmp.ge.f32.partialorder %v4112_v8, 0.0  ;;  %v6081_v62 = vpop.permute.xlu0 %6080  ;;  %v19097_v0 = vld [vmem:[%s26601_s2 + $0xf8] ss:$28 sps:$4 sm:$0xff]  }
 0x42d   :  { %vm4436_vm3 = vcmp.ge.f32.partialorder %v4114_v22, 0.0  ;;  %v4548_v59 = vmul.f32 0.2, %v4114_v22  ;;  %v4116_v42 = vpop.f32.mrb[107].mxu1  ;;  %6602 = vmatpush1.bf16.msra.mxu1 %v19086_v48  ;;  %17731 = vmatpush3.bf16.msra.mxu0 %v19089_v9  ;;  %v22439_v26 = vsel %vm4429_vm15, %v4110_v40, %v4541_v5  ;;  %v16571_v48 = vcombine.low %v6178_v46, %v6178_v46 }
 0x42e   :  { %vm4437_vm7 = vcmp.ge.f32.partialorder %v4116_v42, 0.0  ;;  %v4549_v30 = vmul.f32 0.2, %v4116_v42  ;;  %6603 = vmatprep.subr.bf16.mxu1 %v19092_v45  ;;  %17732 = vmatprep.subr.bf16.mxu0 %v19093_v19  ;;  %27004 = vst [vmem:[#allocation98_spill] sm:$0xff] %v22439_v26  ;;  %v22443_v36 = vsel %vm4430_vm2, %v4112_v8, %v4542_v12  ;;  %v6114_v14 = vsel %vm3208_vm1, %v6054_v43, %v6081_v62 }
 0x42f   :  { %v22441_v50 = vsel %vm4436_vm3, %v4114_v22, %v4548_v59  ;;  %27006 = vst [vmem:[#allocation100_spill] sm:$0xff] %v22443_v36  ;;  %v19099_v9 = vld [vmem:[%s26601_s2 + $0x130] ss:$0 sps:$4 sm:$0x33]   ;;  %v16572_v22 = vcombine.high %v6178_v46, %v6178_v46  ;;  %v19102_v46 = vld [vmem:[%s26601_s2 + $0x4] ss:$28 sps:$4 sm:$0xff]  }
 0x430   :  { %27005 = vst [vmem:[#allocation99_spill] sm:$0xff] %v22441_v50  ;;  %v22445_v41 = vsel %vm4437_vm7, %v4116_v42, %v4549_v30  ;;  %v19094_v30 = vld [vmem:[%s26601_s2 + $0xf0] ss:$28 sps:$4 sm:$0xff]  }
 0x431   :  { %27007 = vst [vmem:[#allocation101_spill] sm:$0xff] %v22445_v41  ;;  %v6099_v5 = vpop.permute.xlu1 %6098  ;;  %6604 = vmatpush1.bf16.msra.mxu1 %v19090_v37  ;;  %17733 = vmatpush3.bf16.msra.mxu0 %v19093_v19  ;;  %v22465_v37 = vld [vmem:[#allocation4 + $0x80] sm:$0xff] }
 0x432   :  { %v22459_v8 = vsel %vm3595_vm5, %v6114_v14, %v6099_v5  ;;  %v17684_v12 = vpop.f32.mrb[108].mxu1  ;;  %6605 = vmatprep.subr.bf16.mxu1 %v19096_v63  ;;  %17734 = vmatprep.subr.bf16.mxu0 %v19097_v0  ;;  %v6403_v14 = vsel %vm3871_vm4, %v16571_v48, 0  ;;  %v6409_v63 = vsel %vm3871_vm4, %v19099_v9, 0  ;;  %v19111_v48 = vld [vmem:[%s26601_s2 + $0xc] ss:$28 sps:$4 sm:$0xff]  }
 0x433   :  { %v4461_v59 = vmul.f32 0.2, %v17684_v12  ;;  %16577 = vmatmul.mubr.msk.bf16.gmra.mrb[180].mxu1 %vm3854_vm6, %v22459_v8  ;;  %16584 = vmatmul.mubr.msk.bf16.gmra.mrb[120].mxu0 %vm3854_vm6, %v22459_v8  ;;  %v4266_v43 = vpop.f32.mrb[109].mxu1  ;;  %vm4349_vm8 = vcmp.ge.f32.partialorder %v17684_v12, 0.0 }
 0x434   :  { %v17685_v19 = vpop.f32.mrb[110].mxu1  ;;  %6473 = vmatprep.mubr.bf16.mxu1 %v22465_v37  ;;  %6566 = vmatprep.mubr.bf16.mxu0 %v22465_v37  ;;  %v4447_v42 = vmul.f32 0.2, %v4266_v43  ;;  %vm4335_vm10 = vcmp.ge.f32.partialorder %v4266_v43, 0.0  ;;  %v6083_v41 = vpop.permute.xlu0 %6082 }
 0x435   :  { %vm4356_vm9 = vcmp.ge.f32.partialorder %v17685_v19, 0.0  ;;  %v4468_v62 = vmul.f32 0.2, %v17685_v19  ;;  %v4269_v5 = vpop.f32.mrb[111].mxu1  ;;  %6606 = vmatpush1.bf16.msra.mxu1 %v19094_v30  ;;  %17735 = vmatpush3.bf16.msra.mxu0 %v19097_v0  ;;  %v22480_v45 = vsel %vm4349_vm8, %v17684_v12, %v4461_v59 }
 0x436   :  { %vm4342_vm11 = vcmp.ge.f32.partialorder %v4269_v5, 0.0  ;;  %v4454_v40 = vmul.f32 0.2, %v4269_v5  ;;  %16588 = vmatprep.subr.msk.bf16.mxu1 %vm3871_vm4, %v16572_v22  ;;  %18428 = vmatprep.subr.msk.bf16.mxu0 %vm3871_vm4, %v19099_v9  ;;  %27008 = vst [vmem:[#allocation102_spill] sm:$0xff] %v22480_v45  ;;  %v22488_v30 = vsel %vm4335_vm10, %v4266_v43, %v4447_v42  ;;  %v6055_v22 = vld [vmem:[#allocation2 + $0xd8] sm:$0xff] }
 0x437   :  { %v22482_v36 = vsel %vm4356_vm9, %v17685_v19, %v4468_v62  ;;  %27011 = vst [vmem:[#allocation105_spill] sm:$0xff] %v22488_v30  ;;  %v6117_v9 = vsel %vm3208_vm1, %v6055_v22, %v6083_v41 }
 0x438   :  { %27009 = vst [vmem:[#allocation103_spill] sm:$0xff] %v22482_v36  ;;  %v22484_v26 = vsel %vm4342_vm11, %v4269_v5, %v4454_v40 }
 0x439   :  { %27010 = vst [vmem:[#allocation104_spill] sm:$0xff] %v22484_v26  ;;  %6608 = vmatpush1.bf16.msra.mxu1 %v6403_v14  ;;  %17737 = vmatpush3.bf16.msra.mxu0 %v6409_v63 }
 0x43a   :  { %v6101_v50 = vpop.permute.xlu1 %6100  ;;  %v17688_v10 = vpop.f32.mrb[112].mxu1  ;;  %7466 = vmatprep.subr.bf16.mxu1 %v19102_v46  ;;  %7559 = vmatprep.subr.bf16.mxu0 %v19111_v48 }
 0x43b   :  { %v22494_v40 = vsel %vm3595_vm5, %v6117_v9, %v6101_v50  ;;  %v4489_v59 = vmul.f32 0.2, %v17688_v10  ;;  %v4282_v19 = vpop.f32.mrb[113].mxu1  ;;  %vm4377_vm12 = vcmp.ge.f32.partialorder %v17688_v10, 0.0  ;;  %v3422_v50 = vpop.permute.xlu0 %3421 }
 0x43c   :  { %16578 = vmatmul.mubr.msk.bf16.gmra.mrb[184].mxu1 %vm3854_vm6, %v22494_v40  ;;  %16585 = vmatmul.mubr.msk.bf16.gmra.mrb[124].mxu0 %vm3854_vm6, %v22494_v40  ;;  %v4475_v41 = vmul.f32 0.2, %v4282_v19  ;;  %v17689_v43 = vpop.f32.mrb[114].mxu1  ;;  %vm4363_vm14 = vcmp.ge.f32.partialorder %v4282_v19, 0.0 }
 0x43d   :  { %vm4384_vm15 = vcmp.ge.f32.partialorder %v17689_v43, 0.0  ;;  %v4496_v14 = vmul.f32 0.2, %v17689_v43  ;;  %v4285_v63 = vpop.f32.mrb[115].mxu1  ;;  %6483 = vmatprep.mubr.bf16.mxu1 %v22465_v37  ;;  %6576 = vmatprep.mubr.bf16.mxu0 %v22465_v37  ;;  %v22503_v62 = vsel %vm4377_vm12, %v17688_v10, %v4489_v59 }
 0x43e   :  { %v3424_v46 = vpop.permute.xlu1 %3423  ;;  %vm4370_vm2 = vcmp.ge.f32.partialorder %v4285_v63, 0.0  ;;  %v4482_v42 = vmul.f32 0.2, %v4285_v63  ;;  %27012 = vst [vmem:[#allocation106_spill] sm:$0xff] %v22503_v62  ;;  %v22508_v22 = vsel %vm4363_vm14, %v4282_v19, %v4475_v41 }
 0x43f   :  { %v22505_v5 = vsel %vm4384_vm15, %v17689_v43, %v4496_v14  ;;  %v3430_v48 = vsel %vm3429_vm13, %v3422_v50, %v3424_v46  ;;  %27014 = vst [vmem:[#allocation108_spill] sm:$0xff] %v22508_v22  ;;  %v6056_v43 = vld [vmem:[#allocation2 + $0xe0] sm:$0xff] }
 0x440   :  { %27013 = vst [vmem:[#allocation107_spill] sm:$0xff] %v22505_v5  ;;  %3434 = vst.msk [vmem:[#allocation2 + $0x160] sm:$0xff] %vm3208_vm1, %v3430_v48  ;;  %v22511_v9 = vsel %vm4370_vm2, %v4285_v63, %v4482_v42 }
 0x441   :  { %27015 = vst [vmem:[#allocation109_spill] sm:$0xff] %v22511_v9 }
 0x442   :  { %v17692_v45 = vpop.f32.mrb[116].mxu1 }
 0x443   :  { %v6103_v36 = vpop.permute.xlu1 %6102  ;;  %v4517_v10 = vmul.f32 0.2, %v17692_v45  ;;  %v4298_v59 = vpop.f32.mrb[117].mxu1  ;;  %vm4405_vm3 = vcmp.ge.f32.partialorder %v17692_v45, 0.0 }
 0x444   :  { %v6085_v14 = vpop.permute.xlu0 %6084  ;;  %v4503_v50 = vmul.f32 0.2, %v4298_v59  ;;  %v17693_v19 = vpop.f32.mrb[118].mxu1  ;;  %vm4391_vm7 = vcmp.ge.f32.partialorder %v4298_v59, 0.0 }
 0x445   :  { %v6120_v41 = vsel %vm3208_vm1, %v6056_v43, %v6085_v14  ;;  %vm4412_vm8 = vcmp.ge.f32.partialorder %v17693_v19, 0.0  ;;  %v4524_v63 = vmul.f32 0.2, %v17693_v19  ;;  %v4301_v46 = vpop.f32.mrb[119].mxu1  ;;  %v22521_v0 = vsel %vm4405_vm3, %v17692_v45, %v4517_v10 }
 0x446   :  { %v22519_v42 = vsel %vm3595_vm5, %v6120_v41, %v6103_v36  ;;  %vm4398_vm9 = vcmp.ge.f32.partialorder %v4301_v46, 0.0  ;;  %v4510_v48 = vmul.f32 0.2, %v4301_v46  ;;  %27016 = vst [vmem:[#allocation110_spill] sm:$0xff] %v22521_v0  ;;  %v22529_v62 = vsel %vm4391_vm7, %v4298_v59, %v4503_v50 }
 0x447   :  { %v22523_v12 = vsel %vm4412_vm8, %v17693_v19, %v4524_v63  ;;  %16579 = vmatmul.mubr.msk.bf16.gmra.mrb[188].mxu1 %vm3854_vm6, %v22519_v42  ;;  %16586 = vmatmul.mubr.msk.bf16.gmra.mrb[128].mxu0 %vm3854_vm6, %v22519_v42  ;;  %v3428_v43 = vpop.permute.xlu1 %3427  ;;  %v7113_v14 = vld [vmem:[#allocation2 + $0x160] sm:$0xff]  ;;  %27018 = vst [vmem:[#allocation112_spill] sm:$0xff] %v22529_v62 }
 0x448   :  { %27017 = vst [vmem:[#allocation111_spill] sm:$0xff] %v22523_v12  ;;  %v22531_v5 = vsel %vm4398_vm9, %v4301_v46, %v4510_v48  ;;  %v3426_v36 = vpop.permute.xlu0 %3425  ;;  %7131 = vrot.lane.b32.xlu0 %v7113_v14, %s19794_s13  ;;  %6493 = vmatprep.mubr.bf16.mxu1 %v22465_v37  ;;  %v6057_v46 = vld [vmem:[#allocation2 + $0xe8] sm:$0xff] }
 0x449   :  { %27019 = vst [vmem:[#allocation113_spill] sm:$0xff] %v22531_v5  ;;  %v3431_v10 = vsel %vm3429_vm13, %v3426_v36, %v3428_v43  ;;  %6586 = vmatprep.mubr.bf16.mxu0 %v22465_v37  ;;  %v19129_v5 = vld [vmem:[%s26601_s2 + $0xec] ss:$28 sps:$4 sm:$0xff]  }
 0x44a   :  { %3435 = vst.msk [vmem:[#allocation2 + $0x168] sm:$0xff] %vm3208_vm1, %v3431_v10  ;;  %v17696_v59 = vpop.f32.mrb[120].mxu1 }
 0x44b   :  { %v4545_v41 = vmul.f32 0.2, %v17696_v59  ;;  %v4314_v63 = vpop.f32.mrb[121].mxu1  ;;  %vm4433_vm10 = vcmp.ge.f32.partialorder %v17696_v59, 0.0 }
 0x44c   :  { %v6105_v50 = vpop.permute.xlu1 %6104  ;;  %v4531_v14 = vmul.f32 0.2, %v4314_v63  ;;  %v17697_v22 = vpop.f32.mrb[122].mxu1  ;;  %vm4419_vm11 = vcmp.ge.f32.partialorder %v4314_v63, 0.0 }
 0x44d   :  { %vm4440_vm12 = vcmp.ge.f32.partialorder %v17697_v22, 0.0  ;;  %v4552_v43 = vmul.f32 0.2, %v17697_v22  ;;  %v4317_v36 = vpop.f32.mrb[123].mxu1  ;;  %v22546_v19 = vsel %vm4433_vm10, %v17696_v59, %v4545_v41 }
 0x44e   :  { %v6087_v48 = vpop.permute.xlu0 %6086  ;;  %vm4426_vm13 = vcmp.ge.f32.partialorder %v4317_v36, 0.0  ;;  %v4538_v10 = vmul.f32 0.2, %v4317_v36  ;;  %27020 = vst [vmem:[#allocation114_spill] sm:$0xff] %v22546_v19  ;;  %v19123_v19 = vld [vmem:[%s26601_s2 + $0xe4] ss:$28 sps:$4 sm:$0xff]  }
 0x44f   :  { %v6123_v45 = vsel %vm3208_vm1, %v6057_v46, %v6087_v48  ;;  %v22548_v12 = vsel %vm4440_vm12, %v17697_v22, %v4552_v43  ;;  %v22554_v48 = vsel %vm4419_vm11, %v4314_v63, %v4531_v14  ;;  %v19100_v14 = vld [vmem:[%s26601_s2] ss:$28 sps:$4 sm:$0xff]  }
 0x450   :  { %v22544_v0 = vsel %vm3595_vm5, %v6123_v45, %v6105_v50  ;;  %27021 = vst [vmem:[#allocation115_spill] sm:$0xff] %v22548_v12  ;;  %v3439_v46 = vpop.permute.xlu1 %3438  ;;  %27022 = vst [vmem:[#allocation116_spill] sm:$0xff] %v22554_v48  ;;  %v22557_v62 = vsel %vm4426_vm13, %v4317_v36, %v4538_v10  ;;  %v19105_v43 = vld [vmem:[%s26601_s2 + $0x3c] ss:$28 sps:$4 sm:$0xff]   ;;  %v19109_v36 = vld [vmem:[%s26601_s2 + $0x8] ss:$28 sps:$4 sm:$0xff]  }
 0x451   :  { %16580 = vmatmul.mubr.msk.bf16.gmra.mrb[192].mxu1 %vm3854_vm6, %v22544_v0  ;;  %16587 = vmatmul.mubr.msk.bf16.gmra.mrb[132].mxu0 %vm3854_vm6, %v22544_v0  ;;  %3443 = vst.msk [vmem:[#allocation2 + $0x178] sm:$0xff] %vm3208_vm1, %v3439_v46  ;;  %27023 = vst [vmem:[#allocation117_spill] sm:$0xff] %v22557_v62  ;;  %v7114_v59 = vld [vmem:[#allocation2 + $0x168] sm:$0xff]  ;;  %v19117_v10 = vld [vmem:[%s26601_s2 + $0x44] ss:$28 sps:$4 sm:$0xff]  }
 0x452   :  { %v3437_v45 = vpop.permute.xlu0 %3436  ;;  %17738 = vmatprep.mubr.msk.bf16.mxu0 %vm3854_vm6, %v22370_v29  ;;  %6629 = vmatprep.mubr.bf16.mxu1 %v22465_v37  ;;  %v19124_v48 = vld [vmem:[%s26601_s2 + $0xb0] ss:$28 sps:$4 sm:$0xff]  }
 0x453   :  { %3442 = vst.msk [vmem:[#allocation2 + $0x170] sm:$0xff] %vm3208_vm1, %v3437_v45  ;;  %7133 = vrot.lane.b32.xlu0 %v7114_v59, %s19794_s13  ;;  %v19108_v45 = vld [vmem:[%s26601_s2 + $0x74] ss:$28 sps:$4 sm:$0xff]   ;;  %v19115_v59 = vld [vmem:[%s26601_s2 + $0x40] ss:$28 sps:$4 sm:$0xff]  }
 0x454   :  { %v3447_v41 = vpop.permute.xlu1 %3446 }
 0x455   :  { %3451 = vst.msk [vmem:[#allocation2 + $0x188] sm:$0xff] %vm3208_vm1, %v3447_v41 }
 0x456   :  { %v3445_v63 = vpop.permute.xlu0 %3444 }
 0x457   :  { %3450 = vst.msk [vmem:[#allocation2 + $0x180] sm:$0xff] %vm3208_vm1, %v3445_v63  ;;  %v19106_v63 = vld [vmem:[%s26601_s2 + $0x70] ss:$28 sps:$4 sm:$0xff]  }
 0x458   :  { %v7116_v41 = vld [vmem:[#allocation2 + $0x178] sm:$0xff] }
 0x459   :  { %16589 = vmatmul.mubr.msk.bf16.vlgmr.msra.gmra.mrb[196].mxu1 %vm3854_vm6, %v22370_v29  ;;  %17739 = vmatmul.mubr.msk.bf16.vlgmr.msra.gmra.mrb[136].mxu0 %vm3854_vm6, %v22412_v28  ;;  %v19103_v29 = vld [vmem:[%s26601_s2 + $0x38] ss:$28 sps:$4 sm:$0xff]  }
 0x45a   :  { %17742 = vmatprep.mubr.msk.bf16.mxu0 %vm3854_vm6, %v22459_v8  ;;  %v7115_v46 = vld [vmem:[#allocation2 + $0x170] sm:$0xff]  ;;  %6639 = vmatprep.mubr.bf16.mxu1 %v22465_v37 }
 0x45b   :  { %7135 = vrot.lane.b32.xlu0 %v7115_v46, %s19794_s13  ;;  %7467 = vmatpush1.bf16.msra.mxu1 %v19100_v14  ;;  %v19114_v14 = vld [vmem:[%s26601_s2 + $0xac] ss:$28 sps:$4 sm:$0xff]   ;;  %v22624_v46 = vld [vmem:[%s26601_s2 + $0x120] sm:$0x33] }
 0x45c   :  { %7468 = vmatprep.subr.bf16.mxu1 %v19105_v43  ;;  %7560 = vmatpush1.bf16.msra.mxu0 %v19109_v36  ;;  %v19120_v43 = vld [vmem:[%s26601_s2 + $0x7c] ss:$28 sps:$4 sm:$0xff]  }
 0x45d   :  { %7561 = vmatprep.subr.bf16.mxu0 %v19117_v10  ;;  %v22612_v36 = vld [vmem:[%s26601_s2 + $0x118] sm:$0x33] }
 0x45e   :  { %v19118_v10 = vld [vmem:[%s26601_s2 + $0x78] ss:$28 sps:$4 sm:$0xff]   ;;  %v16636_v22 = vcombine.low %v22612_v36, %v22612_v36  ;;  %v16637_v9 = vcombine.high %v22612_v36, %v22612_v36 }
 0x45f   :  { %7137 = vrot.lane.b32.xlu0 %v7116_v41, %s19794_s13  ;;  %7469 = vmatpush1.bf16.msra.mxu1 %v19103_v29  ;;  %v7117_v29 = vld [vmem:[#allocation2 + $0x180] sm:$0xff] }
 0x460   :  { %7470 = vmatprep.subr.bf16.mxu1 %v19108_v45  ;;  %7562 = vmatpush1.bf16.msra.mxu0 %v19115_v59  ;;  %v19112_v41 = vld [vmem:[%s26601_s2 + $0xa8] ss:$28 sps:$4 sm:$0xff]   ;;  %v7446_v47 = vsel %vm3871_vm4, %v16636_v22, 0 }
 0x461   :  { %16590 = vmatmul.mubr.msk.bf16.gmra.mrb[200].mxu1 %vm3854_vm6, %v22412_v28  ;;  %17743 = vmatmul.mubr.msk.bf16.gmra.mrb[140].mxu0 %vm3854_vm6, %v22494_v40  ;;  %v19126_v28 = vld [vmem:[%s26601_s2 + $0xb4] ss:$28 sps:$4 sm:$0xff]   ;;  %v5202_v45 = vpop.f32.mrb[48].mxu0  ;;  %v5315_v59 = vpop.f32.mrb[124].mxu1 }
 0x462   :  { %17746 = vmatprep.mubr.msk.bf16.mxu0 %vm3854_vm6, %v22519_v42  ;;  %6649 = vmatprep.mubr.bf16.mxu1 %v22465_v37  ;;  %v5716_v50 = vmul.f32 0.2, %v5202_v45  ;;  %vm5604_vm14 = vcmp.ge.f32.partialorder %v5202_v45, 0.0  ;;  %v5204_v12 = vpop.f32.mrb[49].mxu0  ;;  %v5718_v26 = vmul.f32 0.2, %v5315_v59 }
 0x463   :  { %7139 = vrot.lane.b32.xlu0 %v7117_v29, %s19794_s13  ;;  %7471 = vmatpush1.bf16.msra.mxu1 %v19106_v63  ;;  %v16638_v29 = vcombine.low %v22624_v46, %v22624_v46  ;;  %v19121_v63 = vld [vmem:[%s26601_s2 + $0xe0] ss:$28 sps:$4 sm:$0xff]   ;;  %v5206_v62 = vpop.f32.mrb[50].mxu0  ;;  %vm5606_vm2 = vcmp.ge.f32.partialorder %v5315_v59, 0.0  ;;  %v5717_v44 = vmul.f32 0.2, %v5204_v12 }
 0x464   :  { %7472 = vmatprep.subr.bf16.mxu1 %v19114_v14  ;;  %7563 = vmatprep.subr.bf16.mxu0 %v19120_v43  ;;  %v5317_v14 = vpop.f32.mrb[125].mxu1  ;;  %v7118_v43 = vld [vmem:[#allocation2 + $0x188] sm:$0xff]  ;;  %vm5611_vm15 = vcmp.ge.f32.partialorder %v5206_v62, 0.0  ;;  %v5208_v6 = vpop.f32.mrb[51].mxu0  ;;  %vm5605_vm7 = vcmp.ge.f32.partialorder %v5204_v12, 0.0 }
 0x465   :  { %7564 = vmatpush1.bf16.msra.mxu0 %v19118_v10  ;;  %v5723_v10 = vmul.f32 0.2, %v5206_v62  ;;  %v5319_v39 = vpop.f32.mrb[126].mxu1  ;;  %v22660_v36 = vsel %vm3871_vm4, %v16638_v29, 0  ;;  %v5719_v23 = vmul.f32 0.2, %v5317_v14 }
 0x466   :  { %7565 = vmatprep.subr.bf16.mxu0 %v19126_v28  ;;  %v5828_v28 = vsel %vm5604_vm14, %v5202_v45, %v5716_v50  ;;  %vm5613_vm3 = vcmp.ge.f32.partialorder %v5319_v39, 0.0  ;;  %v5725_v52 = vmul.f32 0.2, %v5319_v39  ;;  %vm5607_vm8 = vcmp.ge.f32.partialorder %v5317_v14, 0.0 }
 0x467   :  { %7141 = vrot.lane.b32.xlu0 %v7118_v43, %s19794_s13  ;;  %7473 = vmatpush1.bf16.msra.mxu1 %v19112_v41  ;;  %v5835_v30 = vsel %vm5611_vm15, %v5206_v62, %v5723_v10  ;;  %v5321_v43 = vpop.f32.mrb[127].mxu1  ;;  %v5724_v50 = vmul.f32 0.2, %v5208_v6  ;;  %v19127_v62 = vld [vmem:[%s26601_s2 + $0xe8] ss:$28 sps:$4 sm:$0xff]   ;;  %vm5612_vm9 = vcmp.ge.f32.partialorder %v5208_v6, 0.0 }
 0x468   :  { %7474 = vmatprep.subr.bf16.mxu1 %v19123_v19  ;;  %v22666_v22 = vpack.c.bf16 %v5835_v30, %v5828_v28  ;;  %v5830_v19 = vsel %vm5606_vm2, %v5315_v59, %v5718_v26  ;;  %v5837_v45 = vsel %vm5613_vm3, %v5319_v39, %v5725_v52  ;;  %vm5614_vm10 = vcmp.ge.f32.partialorder %v5321_v43, 0.0  ;;  %v19137_v39 = vld [vmem:[%s26601_s2 + $0x14] ss:$28 sps:$4 sm:$0xff]  }
 0x469   :  { %16591 = vmatmul.mubr.msk.bf16.gmra.mrb[204].mxu1 %vm3854_vm6, %v22459_v8  ;;  %17747 = vmatmul.mubr.msk.bf16.gmra.mrb[144].mxu0 %vm3854_vm6, %v22544_v0  ;;  %v5726_v8 = vmul.f32 0.2, %v5321_v43  ;;  %v5212_v41 = vpop.f32.mrb[52].mxu0  ;;  %v22673_v29 = vpop.f32.mrb[128].mxu1  ;;  %v22675_v30 = vpack.c.bf16 %v5837_v45, %v5830_v19  ;;  %v5829_v52 = vsel %vm5605_vm7, %v5204_v12, %v5717_v44  ;;  %v5831_v26 = vsel %vm5607_vm8, %v5317_v14, %v5719_v23  ;;  %v22687_v59 = vld [vmem:[%s26601_s2 + $0x18] ss:$28 sps:$4 sm:$0xff]  }
 0x46a   :  { %27024 = vst [vmem:[#allocation118_spill] sm:$0xff] %v22666_v22  ;;  %6659 = vmatprep.mubr.bf16.mxu1 %v22465_v37  ;;  %7566 = vmatpush1.bf16.msra.mxu0 %v19124_v48  ;;  %v5214_v10 = vpop.f32.mrb[53].mxu0  ;;  %v5327_v28 = vpop.f32.mrb[129].mxu1  ;;  %vm5618_vm11 = vcmp.ge.f32.partialorder %v5212_v41, 0.0  ;;  %v5730_v48 = vmul.f32 0.2, %v5212_v41  ;;  %v27026_v14 = vcombine.high %v22624_v46, %v22624_v46 }
 0x46b   :  { %7475 = vmatpush1.bf16.msra.mxu1 %v19121_v63  ;;  %7567 = vmatprep.subr.bf16.mxu0 %v19129_v5  ;;  %27025 = vst [vmem:[#allocation119_spill] sm:$0xff] %v22675_v30  ;;  %v5216_v5 = vpop.f32.mrb[54].mxu0  ;;  %vm5619_vm12 = vcmp.ge.f32.partialorder %v5214_v10, 0.0  ;;  %v5731_v63 = vmul.f32 0.2, %v5214_v10  ;;  %v5329_v45 = vpop.f32.mrb[130].mxu1  ;;  %v5838_v31 = vsel %vm5614_vm10, %v5321_v43, %v5726_v8 }
 0x46c   :  { %16643 = vmatprep.subr.msk.bf16.mxu1 %vm3871_vm4, %v16637_v9  ;;  %7591 = vmatprep.mubr.bf16.mxu0 %v22465_v37  ;;  %v5836_v9 = vsel %vm5612_vm9, %v5208_v6, %v5724_v50  ;;  %v5733_v19 = vmul.f32 0.2, %v5327_v28  ;;  %vm5621_vm13 = vcmp.ge.f32.partialorder %v5327_v28, 0.0  ;;  %vm5625_vm14 = vcmp.ge.f32.partialorder %v5216_v5, 0.0  ;;  %v5218_v44 = vpop.f32.mrb[55].mxu0  ;;  %v5331_v12 = vpop.f32.mrb[131].mxu1 }
 0x46d   :  { %v5737_v23 = vmul.f32 0.2, %v5216_v5  ;;  %vm5620_vm15 = vcmp.ge.f32.partialorder %v22673_v29, 0.0  ;;  %vm5627_vm2 = vcmp.ge.f32.partialorder %v5329_v45, 0.0  ;;  %v5739_v6 = vmul.f32 0.2, %v5329_v45 }
 0x46e   :  { %7568 = vmatpush1.bf16.msra.mxu0 %v19127_v62  ;;  %vm5626_vm3 = vcmp.ge.f32.partialorder %v5218_v44, 0.0  ;;  %v5738_v62 = vmul.f32 0.2, %v5218_v44  ;;  %vm5628_vm7 = vcmp.ge.f32.partialorder %v5331_v12, 0.0  ;;  %v5740_v43 = vmul.f32 0.2, %v5331_v12 }
 0x46f   :  { %7477 = vmatpush1.bf16.msra.mxu1 %v7446_v47  ;;  %16650 = vmatprep.subr.msk.bf16.mxu0 %vm3871_vm4, %v27026_v14  ;;  %v5849_v50 = vsel %vm5625_vm14, %v5216_v5, %v5737_v23  ;;  %v5842_v47 = vsel %vm5618_vm11, %v5212_v41, %v5730_v48  ;;  %v5732_v8 = vmul.f32 0.2, %v22673_v29  ;;  %v5843_v46 = vsel %vm5619_vm12, %v5214_v10, %v5731_v63 }
 0x470   :  { %7652 = vmatprep.subr.bf16.mxu1 %v19137_v39  ;;  %v5845_v14 = vsel %vm5621_vm13, %v5327_v28, %v5733_v19  ;;  %v5850_v39 = vsel %vm5626_vm3, %v5218_v44, %v5738_v62  ;;  %v5852_v5 = vsel %vm5628_vm7, %v5331_v12, %v5740_v43  ;;  %v22705_v16 = vpack.c.bf16 %v5836_v9, %v5829_v52 }
 0x471   :  { %16592 = vmatmul.mubr.msk.bf16.gmra.mrb[208].mxu1 %vm3854_vm6, %v22494_v40  ;;  %v5222_v23 = vpop.f32.mrb[56].mxu0  ;;  %v5335_v49 = vpop.f32.mrb[132].mxu1  ;;  %v22707_v40 = vpack.c.bf16 %v5849_v50, %v5842_v47  ;;  %v5851_v41 = vsel %vm5627_vm2, %v5329_v45, %v5739_v6  ;;  %v22710_v19 = vpack.c.bf16 %v5850_v39, %v5843_v46  ;;  %v22714_v44 = vpack.c.bf16 %v5852_v5, %v5845_v14 }
 0x472   :  { %6669 = vmatprep.mubr.bf16.mxu1 %v22465_v37  ;;  %7570 = vmatpush1.bf16.msra.mxu0 %v22660_v36  ;;  %27027 = vst [vmem:[#allocation120_spill] sm:$0xff] %v22705_v16  ;;  %vm5632_vm8 = vcmp.ge.f32.partialorder %v5222_v23, 0.0  ;;  %v5744_v10 = vmul.f32 0.2, %v5222_v23  ;;  %v5746_v48 = vmul.f32 0.2, %v5335_v49  ;;  %v22712_v36 = vpack.c.bf16 %v5838_v31, %v5831_v26 }
 0x473   :  { %17750 = vmatprep.subr.bf16.mxu0 %v22687_v59  ;;  %27028 = vst [vmem:[#allocation121_spill] sm:$0xff] %v22707_v40  ;;  %vm5634_vm9 = vcmp.ge.f32.partialorder %v5335_v49, 0.0  ;;  %v5224_v28 = vpop.f32.mrb[57].mxu0  ;;  %v5337_v63 = vpop.f32.mrb[133].mxu1  ;;  %27029 = vst [vmem:[#allocation122_spill] sm:$0xff] %v22710_v19  ;;  %v5844_v52 = vsel %vm5620_vm15, %v22673_v29, %v5732_v8 }
 0x474   :  { %27030 = vst [vmem:[#allocation123_spill] sm:$0xff] %v22712_v36  ;;  %27031 = vst [vmem:[#allocation124_spill] sm:$0xff] %v22714_v44  ;;  %v5856_v9 = vsel %vm5632_vm8, %v5222_v23, %v5744_v10  ;;  %vm5633_vm10 = vcmp.ge.f32.partialorder %v5224_v28, 0.0  ;;  %v5226_v12 = vpop.f32.mrb[58].mxu0  ;;  %v5339_v45 = vpop.f32.mrb[134].mxu1  ;;  %vm5635_vm11 = vcmp.ge.f32.partialorder %v5337_v63, 0.0  ;;  %v5858_v62 = vsel %vm5634_vm9, %v5335_v49, %v5746_v48 }
 0x475   :  { %v5745_v6 = vmul.f32 0.2, %v5224_v28  ;;  %vm5639_vm12 = vcmp.ge.f32.partialorder %v5226_v12, 0.0  ;;  %v5751_v50 = vmul.f32 0.2, %v5226_v12  ;;  %vm5641_vm13 = vcmp.ge.f32.partialorder %v5339_v45, 0.0 }
 0x476   :  { %v5753_v43 = vmul.f32 0.2, %v5339_v45  ;;  %v5228_v47 = vpop.f32.mrb[59].mxu0  ;;  %v5341_v31 = vpop.f32.mrb[135].mxu1  ;;  %v22719_v26 = vpack.c.bf16 %v5851_v41, %v5844_v52  ;;  %v5747_v46 = vmul.f32 0.2, %v5337_v63 }
 0x477   :  { %v5863_v14 = vsel %vm5639_vm12, %v5226_v12, %v5751_v50  ;;  %vm5640_vm14 = vcmp.ge.f32.partialorder %v5228_v47, 0.0  ;;  %v5752_v39 = vmul.f32 0.2, %v5228_v47  ;;  %vm5642_vm15 = vcmp.ge.f32.partialorder %v5341_v31, 0.0 }
 0x478   :  { %27032 = vst [vmem:[#allocation125_spill] sm:$0xff] %v22719_v26  ;;  %v5865_v29 = vsel %vm5641_vm13, %v5339_v45, %v5753_v43  ;;  %v5754_v8 = vmul.f32 0.2, %v5341_v31  ;;  %v22724_v5 = vpack.c.bf16 %v5863_v14, %v5856_v9  ;;  %v5857_v41 = vsel %vm5633_vm10, %v5224_v28, %v5745_v6 }
 0x479   :  { %16593 = vmatmul.mubr.msk.bf16.gmra.mrb[212].mxu1 %vm3854_vm6, %v22519_v42  ;;  %v5864_v49 = vsel %vm5640_vm14, %v5228_v47, %v5752_v39  ;;  %v5232_v23 = vpop.f32.mrb[60].mxu0  ;;  %v5345_v10 = vpop.f32.mrb[136].mxu1  ;;  %v22726_v48 = vpack.c.bf16 %v5865_v29, %v5858_v62  ;;  %v5859_v42 = vsel %vm5635_vm11, %v5337_v63, %v5747_v46 }
 0x47a   :  { %6679 = vmatprep.mubr.bf16.mxu1 %v22465_v37  ;;  %27033 = vst [vmem:[#allocation126_spill] sm:$0xff] %v22724_v5  ;;  %v5866_v52 = vsel %vm5642_vm15, %v5341_v31, %v5754_v8  ;;  %vm5646_vm2 = vcmp.ge.f32.partialorder %v5232_v23, 0.0  ;;  %v5758_v12 = vmul.f32 0.2, %v5232_v23  ;;  %v5234_v50 = vpop.f32.mrb[61].mxu0  ;;  %v5347_v13 = vpop.f32.mrb[137].mxu1  ;;  %v22730_v14 = vpack.c.bf16 %v5864_v49, %v5857_v41 }
 0x47b   :  { %27034 = vst [vmem:[#allocation127_spill] sm:$0xff] %v22726_v48  ;;  %vm5648_vm3 = vcmp.ge.f32.partialorder %v5345_v10, 0.0  ;;  %v5760_v45 = vmul.f32 0.2, %v5345_v10  ;;  %vm5647_vm7 = vcmp.ge.f32.partialorder %v5234_v50, 0.0  ;;  %vm5649_vm8 = vcmp.ge.f32.partialorder %v5347_v13, 0.0 }
 0x47c   :  { %v5759_v43 = vmul.f32 0.2, %v5234_v50  ;;  %v5236_v9 = vpop.f32.mrb[62].mxu0  ;;  %v5349_v47 = vpop.f32.mrb[138].mxu1  ;;  %27035 = vst [vmem:[#allocation128_spill] sm:$0xff] %v22730_v14  ;;  %v22732_v62 = vpack.c.bf16 %v5866_v52, %v5859_v42  ;;  %v5870_v39 = vsel %vm5646_vm2, %v5232_v23, %v5758_v12 }
 0x47d   :  { %vm5653_vm9 = vcmp.ge.f32.partialorder %v5236_v9, 0.0  ;;  %v5765_v28 = vmul.f32 0.2, %v5236_v9  ;;  %v5238_v6 = vpop.f32.mrb[63].mxu0  ;;  %v5351_v31 = vpop.f32.mrb[139].mxu1  ;;  %vm5655_vm10 = vcmp.ge.f32.partialorder %v5349_v47, 0.0  ;;  %v5872_v49 = vsel %vm5648_vm3, %v5345_v10, %v5760_v45 }
 0x47e   :  { %27036 = vst [vmem:[#allocation129_spill] sm:$0xff] %v22732_v62  ;;  %v5761_v29 = vmul.f32 0.2, %v5347_v13  ;;  %v5767_v8 = vmul.f32 0.2, %v5349_v47  ;;  %vm5654_vm11 = vcmp.ge.f32.partialorder %v5238_v6, 0.0  ;;  %v5871_v52 = vsel %vm5647_vm7, %v5234_v50, %v5759_v43 }
 0x47f   :  { %v5877_v63 = vsel %vm5653_vm9, %v5236_v9, %v5765_v28  ;;  %v5766_v46 = vmul.f32 0.2, %v5238_v6  ;;  %vm5656_vm12 = vcmp.ge.f32.partialorder %v5351_v31, 0.0  ;;  %v5768_v53 = vmul.f32 0.2, %v5351_v31 }
 0x480   :  { %v5879_v41 = vsel %vm5655_vm10, %v5349_v47, %v5767_v8  ;;  %v22738_v23 = vpack.c.bf16 %v5877_v63, %v5870_v39  ;;  %v5873_v28 = vsel %vm5649_vm8, %v5347_v13, %v5761_v29 }
 0x481   :  { %16594 = vmatmul.mubr.msk.bf16.gmra.mrb[216].mxu1 %vm3854_vm6, %v22544_v0  ;;  %v5878_v12 = vsel %vm5654_vm11, %v5238_v6, %v5766_v46  ;;  %v5880_v42 = vsel %vm5656_vm12, %v5351_v31, %v5768_v53  ;;  %v5242_v57 = vpop.f32.mrb[64].mxu0  ;;  %v5355_v55 = vpop.f32.mrb[140].mxu1  ;;  %v22741_v9 = vpack.c.bf16 %v5879_v41, %v5872_v49 }
 0x482   :  { %7498 = vmatprep.mubr.bf16.mxu1 %v22465_v37  ;;  %27037 = vst [vmem:[#allocation130_spill] sm:$0xff] %v22738_v23  ;;  %vm5660_vm13 = vcmp.ge.f32.partialorder %v5242_v57, 0.0  ;;  %v5772_v33 = vmul.f32 0.2, %v5242_v57  ;;  %v5774_v0 = vmul.f32 0.2, %v5355_v55  ;;  %v22744_v47 = vpack.c.bf16 %v5878_v12, %v5871_v52 }
 0x483   :  { %27038 = vst [vmem:[#allocation131_spill] sm:$0xff] %v22741_v9  ;;  %vm5662_vm14 = vcmp.ge.f32.partialorder %v5355_v55, 0.0  ;;  %v5244_v10 = vpop.f32.mrb[65].mxu0  ;;  %v5357_v45 = vpop.f32.mrb[141].mxu1  ;;  %v22746_v37 = vpack.c.bf16 %v5880_v42, %v5873_v28 }
 0x484   :  { %27039 = vst [vmem:[#allocation132_spill] sm:$0xff] %v22744_v47  ;;  %vm5661_vm15 = vcmp.ge.f32.partialorder %v5244_v10, 0.0  ;;  %v5246_v50 = vpop.f32.mrb[66].mxu0  ;;  %v5359_v43 = vpop.f32.mrb[142].mxu1  ;;  %v5773_v53 = vmul.f32 0.2, %v5244_v10  ;;  %v5884_v6 = vsel %vm5660_vm13, %v5242_v57, %v5772_v33  ;;  %v5886_v31 = vsel %vm5662_vm14, %v5355_v55, %v5774_v0 }
 0x485   :  { %27040 = vst [vmem:[#allocation133_spill] sm:$0xff] %v22746_v37  ;;  %vm5663_vm2 = vcmp.ge.f32.partialorder %v5357_v45, 0.0  ;;  %vm5667_vm3 = vcmp.ge.f32.partialorder %v5246_v50, 0.0  ;;  %v5779_v39 = vmul.f32 0.2, %v5246_v50  ;;  %vm5669_vm7 = vcmp.ge.f32.partialorder %v5359_v43, 0.0 }
 0x486   :  { %v5781_v13 = vmul.f32 0.2, %v5359_v43  ;;  %v5248_v29 = vpop.f32.mrb[67].mxu0  ;;  %v5361_v8 = vpop.f32.mrb[143].mxu1  ;;  %v5775_v63 = vmul.f32 0.2, %v5357_v45  ;;  %v5885_v57 = vsel %vm5661_vm15, %v5244_v10, %v5773_v53 }
 0x487   :  { %v5891_v46 = vsel %vm5667_vm3, %v5246_v50, %v5779_v39  ;;  %vm5668_vm8 = vcmp.ge.f32.partialorder %v5248_v29, 0.0  ;;  %v5780_v49 = vmul.f32 0.2, %v5248_v29  ;;  %vm5670_vm9 = vcmp.ge.f32.partialorder %v5361_v8, 0.0 }
 0x488   :  { %v5893_v41 = vsel %vm5669_vm7, %v5359_v43, %v5781_v13  ;;  %v5782_v52 = vmul.f32 0.2, %v5361_v8  ;;  %v22748_v12 = vpack.c.bf16 %v5891_v46, %v5884_v6  ;;  %v5887_v50 = vsel %vm5663_vm2, %v5357_v45, %v5775_v63 }
 0x489   :  { %v5892_v42 = vsel %vm5668_vm8, %v5248_v29, %v5780_v49  ;;  %v5252_v28 = vpop.f32.mrb[68].mxu0  ;;  %v5365_v60 = vpop.f32.mrb[144].mxu1  ;;  %v22750_v21 = vpack.c.bf16 %v5893_v41, %v5886_v31 }
 0x48a   :  { %27041 = vst [vmem:[#allocation134_spill] sm:$0xff] %v22748_v12  ;;  %v5894_v55 = vsel %vm5670_vm9, %v5361_v8, %v5782_v52  ;;  %vm5674_vm10 = vcmp.ge.f32.partialorder %v5252_v28, 0.0  ;;  %v5786_v33 = vmul.f32 0.2, %v5252_v28  ;;  %v5254_v0 = vpop.f32.mrb[69].mxu0  ;;  %v5367_v20 = vpop.f32.mrb[145].mxu1  ;;  %v22754_v29 = vpack.c.bf16 %v5892_v42, %v5885_v57 }
 0x48b   :  { %27042 = vst [vmem:[#allocation135_spill] sm:$0xff] %v22750_v21  ;;  %vm5676_vm11 = vcmp.ge.f32.partialorder %v5365_v60, 0.0  ;;  %v5788_v43 = vmul.f32 0.2, %v5365_v60  ;;  %v5787_v39 = vmul.f32 0.2, %v5254_v0  ;;  %v22756_v31 = vpack.c.bf16 %v5894_v55, %v5887_v50 }
 0x48c   :  { %vm5675_vm12 = vcmp.ge.f32.partialorder %v5254_v0, 0.0  ;;  %vm5677_vm13 = vcmp.ge.f32.partialorder %v5367_v20, 0.0  ;;  %v5256_v6 = vpop.f32.mrb[70].mxu0  ;;  %v5369_v13 = vpop.f32.mrb[146].mxu1  ;;  %27043 = vst [vmem:[#allocation136_spill] sm:$0xff] %v22754_v29  ;;  %v5898_v46 = vsel %vm5674_vm10, %v5252_v28, %v5786_v33 }
 0x48d   :  { %27044 = vst [vmem:[#allocation137_spill] sm:$0xff] %v22756_v31  ;;  %vm5681_vm14 = vcmp.ge.f32.partialorder %v5256_v6, 0.0  ;;  %v5793_v10 = vmul.f32 0.2, %v5256_v6  ;;  %v5258_v53 = vpop.f32.mrb[71].mxu0  ;;  %v5371_v8 = vpop.f32.mrb[147].mxu1  ;;  %v5900_v25 = vsel %vm5676_vm11, %v5365_v60, %v5788_v43  ;;  %v5899_v57 = vsel %vm5675_vm12, %v5254_v0, %v5787_v39 }
 0x48e   :  { %v5789_v49 = vmul.f32 0.2, %v5367_v20  ;;  %vm5683_vm15 = vcmp.ge.f32.partialorder %v5369_v13, 0.0  ;;  %v5795_v41 = vmul.f32 0.2, %v5369_v13  ;;  %vm5682_vm2 = vcmp.ge.f32.partialorder %v5258_v53, 0.0 }
 0x48f   :  { %v5905_v45 = vsel %vm5681_vm14, %v5256_v6, %v5793_v10  ;;  %v5794_v63 = vmul.f32 0.2, %v5258_v53  ;;  %vm5684_vm3 = vcmp.ge.f32.partialorder %v5371_v8, 0.0  ;;  %v5796_v52 = vmul.f32 0.2, %v5371_v8 }
 0x490   :  { %v5907_v58 = vsel %vm5683_vm15, %v5369_v13, %v5795_v41  ;;  %v22759_v42 = vpack.c.bf16 %v5905_v45, %v5898_v46  ;;  %v5901_v17 = vsel %vm5677_vm13, %v5367_v20, %v5789_v49 }
 0x491   :  { %v5906_v28 = vsel %vm5682_vm2, %v5258_v53, %v5794_v63  ;;  %v5908_v55 = vsel %vm5684_vm3, %v5371_v8, %v5796_v52  ;;  %v5262_v33 = vpop.f32.mrb[72].mxu0  ;;  %v5375_v50 = vpop.f32.mrb[148].mxu1  ;;  %v22762_v3 = vpack.c.bf16 %v5907_v58, %v5900_v25 }
 0x492   :  { %27045 = vst [vmem:[#allocation138_spill] sm:$0xff] %v22759_v42  ;;  %vm5688_vm7 = vcmp.ge.f32.partialorder %v5262_v33, 0.0  ;;  %v5800_v6 = vmul.f32 0.2, %v5262_v33  ;;  %v5802_v10 = vmul.f32 0.2, %v5375_v50  ;;  %v22765_v60 = vpack.c.bf16 %v5906_v28, %v5899_v57 }
 0x493   :  { %27046 = vst [vmem:[#allocation139_spill] sm:$0xff] %v22762_v3  ;;  %vm5690_vm8 = vcmp.ge.f32.partialorder %v5375_v50, 0.0  ;;  %v5264_v38 = vpop.f32.mrb[73].mxu0  ;;  %v5377_v2 = vpop.f32.mrb[149].mxu1  ;;  %v22767_v43 = vpack.c.bf16 %v5908_v55, %v5901_v17 }
 0x494   :  { %27047 = vst [vmem:[#allocation140_spill] sm:$0xff] %v22765_v60  ;;  %vm5689_vm9 = vcmp.ge.f32.partialorder %v5264_v38, 0.0  ;;  %v5266_v0 = vpop.f32.mrb[74].mxu0  ;;  %v5379_v39 = vpop.f32.mrb[150].mxu1  ;;  %v5801_v13 = vmul.f32 0.2, %v5264_v38  ;;  %v22769_v25 = vsel %vm5688_vm7, %v5262_v33, %v5800_v6  ;;  %v22771_v20 = vsel %vm5690_vm8, %v5375_v50, %v5802_v10 }
 0x495   :  { %27048 = vst [vmem:[#allocation141_spill] sm:$0xff] %v22767_v43  ;;  %vm5691_vm10 = vcmp.ge.f32.partialorder %v5377_v2, 0.0  ;;  %vm5695_vm11 = vcmp.ge.f32.partialorder %v5266_v0, 0.0  ;;  %v5807_v58 = vmul.f32 0.2, %v5266_v0  ;;  %27049 = vst [vmem:[#allocation142_spill] sm:$0xff] %v22769_v25 }
 0x496   :  { %27050 = vst [vmem:[#allocation143_spill] sm:$0xff] %v22771_v20  ;;  %vm5697_vm12 = vcmp.ge.f32.partialorder %v5379_v39, 0.0  ;;  %v5809_v46 = vmul.f32 0.2, %v5379_v39  ;;  %v5268_v53 = vpop.f32.mrb[75].mxu0  ;;  %v5381_v8 = vpop.f32.mrb[151].mxu1  ;;  %v22780_v57 = vsel %vm5689_vm9, %v5264_v38, %v5801_v13 }
 0x497   :  { %v5803_v49 = vmul.f32 0.2, %v5377_v2  ;;  %v22773_v41 = vsel %vm5695_vm11, %v5266_v0, %v5807_v58  ;;  %vm5696_vm13 = vcmp.ge.f32.partialorder %v5268_v53, 0.0  ;;  %v5808_v17 = vmul.f32 0.2, %v5268_v53  ;;  %27053 = vst [vmem:[#allocation146_spill] sm:$0xff] %v22780_v57 }
 0x498   :  { %27051 = vst [vmem:[#allocation144_spill] sm:$0xff] %v22773_v41  ;;  %v22777_v63 = vsel %vm5697_vm12, %v5379_v39, %v5809_v46  ;;  %vm5698_vm14 = vcmp.ge.f32.partialorder %v5381_v8, 0.0  ;;  %v5810_v52 = vmul.f32 0.2, %v5381_v8 }
 0x499   :  { %27052 = vst [vmem:[#allocation145_spill] sm:$0xff] %v22777_v63  ;;  %v22784_v55 = vsel %vm5696_vm13, %v5268_v53, %v5808_v17  ;;  %v5272_v33 = vpop.f32.mrb[76].mxu0  ;;  %v22791_v58 = vsel %vm5691_vm10, %v5377_v2, %v5803_v49 }
 0x49a   :  { %27054 = vst [vmem:[#allocation147_spill] sm:$0xff] %v22784_v55  ;;  %v22786_v50 = vsel %vm5698_vm14, %v5381_v8, %v5810_v52  ;;  %vm5702_vm15 = vcmp.ge.f32.partialorder %v5272_v33, 0.0  ;;  %v5814_v6 = vmul.f32 0.2, %v5272_v33  ;;  %v5385_v10 = vpop.f32.mrb[152].mxu1  ;;  %v5274_v0 = vpop.f32.mrb[77].mxu0 }
 0x49b   :  { %27055 = vst [vmem:[#allocation148_spill] sm:$0xff] %v22786_v50  ;;  %27056 = vst [vmem:[#allocation149_spill] sm:$0xff] %v22791_v58  ;;  %vm5704_vm2 = vcmp.ge.f32.partialorder %v5385_v10, 0.0  ;;  %v5816_v38 = vmul.f32 0.2, %v5385_v10  ;;  %vm5703_vm3 = vcmp.ge.f32.partialorder %v5274_v0, 0.0 }
 0x49c   :  { %v5387_v13 = vpop.f32.mrb[153].mxu1  ;;  %v5276_v46 = vpop.f32.mrb[78].mxu0  ;;  %v22795_v8 = vsel %vm5702_vm15, %v5272_v33, %v5814_v6  ;;  %v5815_v17 = vmul.f32 0.2, %v5274_v0 }
 0x49d   :  { %27057 = vst [vmem:[#allocation150_spill] sm:$0xff] %v22795_v8  ;;  %vm5705_vm7 = vcmp.ge.f32.partialorder %v5387_v13, 0.0  ;;  %v5389_v52 = vpop.f32.mrb[154].mxu1  ;;  %v5278_v28 = vpop.f32.mrb[79].mxu0  ;;  %vm5709_vm8 = vcmp.ge.f32.partialorder %v5276_v46, 0.0  ;;  %v22797_v2 = vsel %vm5704_vm2, %v5385_v10, %v5816_v38 }
 0x49e   :  { %v5821_v45 = vmul.f32 0.2, %v5276_v46  ;;  %vm5711_vm9 = vcmp.ge.f32.partialorder %v5389_v52, 0.0  ;;  %v5823_v39 = vmul.f32 0.2, %v5389_v52  ;;  %27058 = vst [vmem:[#allocation151_spill] sm:$0xff] %v22797_v2  ;;  %v22804_v6 = vsel %vm5703_vm3, %v5274_v0, %v5815_v17 }
 0x49f   :  { %v5817_v49 = vmul.f32 0.2, %v5387_v13  ;;  %vm5710_vm10 = vcmp.ge.f32.partialorder %v5278_v28, 0.0  ;;  %v5822_v20 = vmul.f32 0.2, %v5278_v28  ;;  %v5391_v63 = vpop.f32.mrb[155].mxu1 }
 0x4a0   :  { %v22799_v25 = vsel %vm5709_vm8, %v5276_v46, %v5821_v45  ;;  %v22801_v41 = vsel %vm5711_vm9, %v5389_v52, %v5823_v39  ;;  %vm5712_vm11 = vcmp.ge.f32.partialorder %v5391_v63, 0.0  ;;  %v5824_v33 = vmul.f32 0.2, %v5391_v63  ;;  %27061 = vst [vmem:[#allocation154_spill] sm:$0xff] %v22804_v6 }
 0x4a1   :  { %27059 = vst [vmem:[#allocation152_spill] sm:$0xff] %v22799_v25  ;;  %27060 = vst [vmem:[#allocation153_spill] sm:$0xff] %v22801_v41  ;;  %v22810_v38 = vsel %vm5710_vm10, %v5278_v28, %v5822_v20  ;;  %v5428_v58 = vpop.f32.mrb[80].mxu0  ;;  %v22817_v0 = vsel %vm5705_vm7, %v5387_v13, %v5817_v49 }
 0x4a2   :  { %27062 = vst [vmem:[#allocation155_spill] sm:$0xff] %v22810_v38  ;;  %v22812_v50 = vsel %vm5712_vm11, %v5391_v63, %v5824_v33  ;;  %vm5608_vm12 = vcmp.ge.f32.partialorder %v5428_v58, 0.0  ;;  %v5720_v45 = vmul.f32 0.2, %v5428_v58  ;;  %v17712_v39 = vpop.f32.mrb[156].mxu1  ;;  %v5430_v46 = vpop.f32.mrb[81].mxu0 }
 0x4a3   :  { %27063 = vst [vmem:[#allocation156_spill] sm:$0xff] %v22812_v50  ;;  %27064 = vst [vmem:[#allocation157_spill] sm:$0xff] %v22817_v0  ;;  %v5736_v17 = vmul.f32 0.2, %v17712_v39  ;;  %vm5624_vm13 = vcmp.ge.f32.partialorder %v17712_v39, 0.0  ;;  %v5541_v8 = vpop.f32.mrb[157].mxu1 }
 0x4a4   :  { %v5721_v53 = vmul.f32 0.2, %v5430_v46  ;;  %v5432_v10 = vpop.f32.mrb[82].mxu0  ;;  %v5832_v63 = vsel %vm5608_vm12, %v5428_v58, %v5720_v45  ;;  %vm5609_vm14 = vcmp.ge.f32.partialorder %v5430_v46, 0.0  ;;  %v5722_v28 = vmul.f32 0.2, %v5541_v8 }
 0x4a5   :  { %v17713_v33 = vpop.f32.mrb[158].mxu1  ;;  %v5434_v2 = vpop.f32.mrb[83].mxu0  ;;  %vm5615_vm15 = vcmp.ge.f32.partialorder %v5432_v10, 0.0  ;;  %v5727_v41 = vmul.f32 0.2, %v5432_v10  ;;  %v5848_v25 = vsel %vm5624_vm13, %v17712_v39, %v5736_v17  ;;  %vm5610_vm3 = vcmp.ge.f32.partialorder %v5541_v8, 0.0 }
 0x4a6   :  { %vm5631_vm2 = vcmp.ge.f32.partialorder %v17713_v33, 0.0  ;;  %v5743_v52 = vmul.f32 0.2, %v17713_v33  ;;  %vm5616_vm7 = vcmp.ge.f32.partialorder %v5434_v2, 0.0  ;;  %v5728_v13 = vmul.f32 0.2, %v5434_v2 }
 0x4a7   :  { %v5544_v49 = vpop.f32.mrb[159].mxu1  ;;  %v5839_v6 = vsel %vm5615_vm15, %v5432_v10, %v5727_v41  ;;  %v5833_v20 = vsel %vm5609_vm14, %v5430_v46, %v5721_v53  ;;  %v5834_v55 = vsel %vm5610_vm3, %v5541_v8, %v5722_v28 }
 0x4a8   :  { %v5855_v38 = vsel %vm5631_vm2, %v17713_v33, %v5743_v52  ;;  %vm5617_vm8 = vcmp.ge.f32.partialorder %v5544_v49, 0.0  ;;  %v5729_v57 = vmul.f32 0.2, %v5544_v49  ;;  %v22822_v58 = vpack.c.bf16 %v5839_v6, %v5832_v63 }
 0x4a9   :  { %v5840_v45 = vsel %vm5616_vm7, %v5434_v2, %v5728_v13  ;;  %v5438_v0 = vpop.f32.mrb[84].mxu0  ;;  %v22824_v50 = vpack.c.bf16 %v5855_v38, %v5848_v25 }
 0x4aa   :  { %27065 = vst [vmem:[#allocation158_spill] sm:$0xff] %v22822_v58  ;;  %v5841_v24 = vsel %vm5617_vm8, %v5544_v49, %v5729_v57  ;;  %v5734_v4 = vmul.f32 0.2, %v5438_v0  ;;  %v17716_v39 = vpop.f32.mrb[160].mxu1  ;;  %v5440_v17 = vpop.f32.mrb[85].mxu0  ;;  %v22826_v15 = vpack.c.bf16 %v5840_v45, %v5833_v20  ;;  %vm5622_vm9 = vcmp.ge.f32.partialorder %v5438_v0, 0.0 }
 0x4ab   :  { %27066 = vst [vmem:[#allocation159_spill] sm:$0xff] %v22824_v50  ;;  %v22828_v34 = vpack.c.bf16 %v5841_v24, %v5834_v55  ;;  %vm5652_vm10 = vcmp.ge.f32.partialorder %v17716_v39, 0.0  ;;  %v5764_v41 = vmul.f32 0.2, %v17716_v39  ;;  %v5557_v10 = vpop.f32.mrb[161].mxu1  ;;  %v5442_v53 = vpop.f32.mrb[86].mxu0 }
 0x4ac   :  { %27067 = vst [vmem:[#allocation160_spill] sm:$0xff] %v22826_v15  ;;  %vm5623_vm11 = vcmp.ge.f32.partialorder %v5440_v17, 0.0  ;;  %v5735_v6 = vmul.f32 0.2, %v5440_v17  ;;  %v5750_v2 = vmul.f32 0.2, %v5557_v10  ;;  %v5846_v38 = vsel %vm5622_vm9, %v5438_v0, %v5734_v4 }
 0x4ad   :  { %27068 = vst [vmem:[#allocation161_spill] sm:$0xff] %v22828_v34  ;;  %v17717_v46 = vpop.f32.mrb[162].mxu1  ;;  %vm5629_vm12 = vcmp.ge.f32.partialorder %v5442_v53, 0.0  ;;  %v5741_v25 = vmul.f32 0.2, %v5442_v53  ;;  %v5444_v57 = vpop.f32.mrb[87].mxu0  ;;  %v5876_v63 = vsel %vm5652_vm10, %v17716_v39, %v5764_v41 }
 0x4ae   :  { %vm5659_vm13 = vcmp.ge.f32.partialorder %v17717_v46, 0.0  ;;  %v5560_v8 = vpop.f32.mrb[163].mxu1  ;;  %vm5638_vm14 = vcmp.ge.f32.partialorder %v5557_v10, 0.0  ;;  %v5771_v52 = vmul.f32 0.2, %v17717_v46  ;;  %vm5630_vm15 = vcmp.ge.f32.partialorder %v5444_v57, 0.0 }
 0x4af   :  { %v5853_v24 = vsel %vm5629_vm12, %v5442_v53, %v5741_v25  ;;  %v5742_v55 = vmul.f32 0.2, %v5444_v57  ;;  %vm5645_vm2 = vcmp.ge.f32.partialorder %v5560_v8, 0.0  ;;  %v5757_v20 = vmul.f32 0.2, %v5560_v8 }
 0x4b0   :  { %v5847_v28 = vsel %vm5623_vm11, %v5440_v17, %v5735_v6  ;;  %v5883_v33 = vsel %vm5659_vm13, %v17717_v46, %v5771_v52  ;;  %v22832_v13 = vpack.c.bf16 %v5853_v24, %v5846_v38  ;;  %v5862_v49 = vsel %vm5638_vm14, %v5557_v10, %v5750_v2 }
 0x4b1   :  { %v5854_v45 = vsel %vm5630_vm15, %v5444_v57, %v5742_v55  ;;  %v5869_v32 = vsel %vm5645_vm2, %v5560_v8, %v5757_v20  ;;  %v5448_v18 = vpop.f32.mrb[88].mxu0  ;;  %v22834_v11 = vpack.c.bf16 %v5883_v33, %v5876_v63 }
 0x4b2   :  { %27069 = vst [vmem:[#allocation162_spill] sm:$0xff] %v22832_v13  ;;  %vm5636_vm3 = vcmp.ge.f32.partialorder %v5448_v18, 0.0  ;;  %v5748_v4 = vmul.f32 0.2, %v5448_v18  ;;  %v17720_v0 = vpop.f32.mrb[164].mxu1  ;;  %v5450_v53 = vpop.f32.mrb[89].mxu0  ;;  %v22836_v25 = vpack.c.bf16 %v5854_v45, %v5847_v28  ;;  %v22838_v7 = vpack.c.bf16 %v5869_v32, %v5862_v49 }
 0x4b3   :  { %27070 = vst [vmem:[#allocation163_spill] sm:$0xff] %v22834_v11  ;;  %v5792_v39 = vmul.f32 0.2, %v17720_v0  ;;  %vm5680_vm7 = vcmp.ge.f32.partialorder %v17720_v0, 0.0  ;;  %v5749_v17 = vmul.f32 0.2, %v5450_v53  ;;  %v7150_v28 = vpop.permute.xlu1 %7149 }
 0x4b4   :  { %27071 = vst [vmem:[#allocation164_spill] sm:$0xff] %v22836_v25  ;;  %27072 = vst [vmem:[#allocation165_spill] sm:$0xff] %v22838_v7  ;;  %v5573_v41 = vpop.f32.mrb[165].mxu1  ;;  %v5452_v6 = vpop.f32.mrb[90].mxu0  ;;  %v5860_v46 = vsel %vm5636_vm3, %v5448_v18, %v5748_v4  ;;  %vm5637_vm8 = vcmp.ge.f32.partialorder %v5450_v53, 0.0 }
 0x4b5   :  { %v5778_v10 = vmul.f32 0.2, %v5573_v41  ;;  %v17721_v2 = vpop.f32.mrb[166].mxu1  ;;  %v5454_v57 = vpop.f32.mrb[91].mxu0  ;;  %vm5643_vm9 = vcmp.ge.f32.partialorder %v5452_v6, 0.0  ;;  %v5904_v52 = vsel %vm5680_vm7, %v17720_v0, %v5792_v39  ;;  %vm5666_vm11 = vcmp.ge.f32.partialorder %v5573_v41, 0.0 }
 0x4b6   :  { %v5755_v8 = vmul.f32 0.2, %v5452_v6  ;;  %vm5687_vm10 = vcmp.ge.f32.partialorder %v17721_v2, 0.0  ;;  %v5799_v38 = vmul.f32 0.2, %v17721_v2  ;;  %vm5644_vm12 = vcmp.ge.f32.partialorder %v5454_v57, 0.0 }
 0x4b7   :  { %v5756_v24 = vmul.f32 0.2, %v5454_v57  ;;  %v5576_v32 = vpop.f32.mrb[167].mxu1  ;;  %v5861_v18 = vsel %vm5637_vm8, %v5450_v53, %v5749_v17  ;;  %v19135_v45 = vld [vmem:[%s26601_s2 + $0x10] ss:$28 sps:$4 sm:$0xff]   ;;  %v5890_v39 = vsel %vm5666_vm11, %v5573_v41, %v5778_v10 }
 0x4b8   :  { %v5867_v55 = vsel %vm5643_vm9, %v5452_v6, %v5755_v8  ;;  %v5911_v20 = vsel %vm5687_vm10, %v17721_v2, %v5799_v38  ;;  %vm5673_vm13 = vcmp.ge.f32.partialorder %v5576_v32, 0.0  ;;  %v5785_v63 = vmul.f32 0.2, %v5576_v32  ;;  %v19138_v53 = vld [vmem:[%s26601_s2 + $0x50] ss:$28 sps:$4 sm:$0xff]  }
 0x4b9   :  { %v5868_v33 = vsel %vm5644_vm12, %v5454_v57, %v5756_v24  ;;  %v5458_v49 = vpop.f32.mrb[92].mxu0  ;;  %v22844_v4 = vpack.c.bf16 %v5867_v55, %v5860_v46  ;;  %v22846_v0 = vpack.c.bf16 %v5911_v20, %v5904_v52  ;;  %v19141_v17 = vld [vmem:[%s26601_s2 + $0x4c] ss:$28 sps:$4 sm:$0xff]  }
 0x4ba   :  { %v5897_v27 = vsel %vm5673_vm13, %v5576_v32, %v5785_v63  ;;  %v7132_v6 = vpop.permute.xlu0 %7131  ;;  %v5762_v2 = vmul.f32 0.2, %v5458_v49  ;;  %v17724_v8 = vpop.f32.mrb[168].mxu1  ;;  %v22854_v57 = vpack.c.bf16 %v5868_v33, %v5861_v18  ;;  %vm5650_vm14 = vcmp.ge.f32.partialorder %v5458_v49, 0.0 }
 0x4bb   :  { %27073 = vst [vmem:[#allocation166_spill] sm:$0xff] %v22844_v4  ;;  %27074 = vst [vmem:[#allocation167_spill] sm:$0xff] %v22846_v0  ;;  %v7163_v46 = vsel %vm3208_vm1, %v7107_v35, %v7132_v6  ;;  %v5820_v38 = vmul.f32 0.2, %v17724_v8  ;;  %v5460_v41 = vpop.f32.mrb[93].mxu0  ;;  %v5589_v10 = vpop.f32.mrb[169].mxu1  ;;  %v22857_v52 = vpack.c.bf16 %v5897_v27, %v5890_v39 }
 0x4bc   :  { %27075 = vst [vmem:[#allocation168_spill] sm:$0xff] %v22854_v57  ;;  %v22860_v24 = vsel %vm3595_vm5, %v7163_v46, %v7150_v28  ;;  %vm5708_vm15 = vcmp.ge.f32.partialorder %v17724_v8, 0.0  ;;  %v5763_v32 = vmul.f32 0.2, %v5460_v41  ;;  %v5462_v55 = vpop.f32.mrb[94].mxu0  ;;  %v17725_v20 = vpop.f32.mrb[170].mxu1  ;;  %v5874_v28 = vsel %vm5650_vm14, %v5458_v49, %v5762_v2 }
 0x4bd   :  { %27076 = vst [vmem:[#allocation169_spill] sm:$0xff] %v22857_v52  ;;  %vm5651_vm2 = vcmp.ge.f32.partialorder %v5460_v41, 0.0  ;;  %v5806_v63 = vmul.f32 0.2, %v5589_v10  ;;  %vm5657_vm3 = vcmp.ge.f32.partialorder %v5462_v55, 0.0  ;;  %16644 = vmatmul.mubr.msk.bf16.vlgmr.msra.gmra.mrb[220].mxu1 %vm3854_vm6, %v22860_v24  ;;  %16651 = vmatmul.mubr.msk.bf16.vlgmr.msra.gmra.mrb[148].mxu0 %vm3854_vm6, %v22860_v24  ;;  %v5464_v35 = vpop.f32.mrb[95].mxu0  ;;  %v22876_v56 = vsel %vm5708_vm15, %v17724_v8, %v5820_v38 }
 0x4be   :  { %v5592_v18 = vpop.f32.mrb[171].mxu1  ;;  %v19139_v27 = vld [vmem:[%s26601_s2 + $0x48] ss:$28 sps:$4 sm:$0xff]   ;;  %v5769_v33 = vmul.f32 0.2, %v5462_v55  ;;  %vm5715_vm7 = vcmp.ge.f32.partialorder %v17725_v20, 0.0  ;;  %17751 = vmatpush3.bf16.msra.mxu0 %v22687_v59  ;;  %7653 = vmatpush1.bf16.msra.mxu1 %v19135_v45  ;;  %v5875_v59 = vsel %vm5651_vm2, %v5460_v41, %v5763_v32 }
 0x4bf   :  { %v5827_v39 = vmul.f32 0.2, %v17725_v20  ;;  %v22870_v6 = vld [vmem:[#allocation4 + $0x80] sm:$0xff]  ;;  %vm5694_vm8 = vcmp.ge.f32.partialorder %v5589_v10, 0.0  ;;  %vm5658_vm9 = vcmp.ge.f32.partialorder %v5464_v35, 0.0  ;;  %vm5701_vm10 = vcmp.ge.f32.partialorder %v5592_v18, 0.0  ;;  %17752 = vmatprep.subr.bf16.mxu0 %v19138_v53  ;;  %7654 = vmatprep.subr.bf16.mxu1 %v19141_v17 }
 0x4c0   :  { %7508 = vmatprep.mubr.bf16.mxu1 %v22870_v6  ;;  %7601 = vmatprep.mubr.bf16.mxu0 %v22870_v6  ;;  %v5770_v46 = vmul.f32 0.2, %v5464_v35  ;;  %27077 = vst [vmem:[#allocation170_spill] sm:$0xff] %v22876_v56  ;;  %v5881_v49 = vsel %vm5657_vm3, %v5462_v55, %v5769_v33  ;;  %v5813_v1 = vmul.f32 0.2, %v5592_v18  ;;  %v7108_v32 = vld [vmem:[#allocation2 + $0x138] sm:$0xff] }
 0x4c1   :  { %v22879_v2 = vsel %vm5715_vm7, %v17725_v20, %v5827_v39  ;;  %v5468_v38 = vpop.f32.mrb[96].mxu0  ;;  %v22890_v55 = vpack.c.bf16 %v5881_v49, %v5874_v28  ;;  %v22893_v20 = vsel %vm5694_vm8, %v5589_v10, %v5806_v63  ;;  %v19143_v10 = vld [vmem:[%s26601_s2 + $0x80] ss:$28 sps:$4 sm:$0xff]   ;;  %v7152_v28 = vpop.permute.xlu1 %7151 }
 0x4c2   :  { %27078 = vst [vmem:[#allocation171_spill] sm:$0xff] %v22879_v2  ;;  %v5882_v8 = vsel %vm5658_vm9, %v5464_v35, %v5770_v46  ;;  %27080 = vst [vmem:[#allocation173_spill] sm:$0xff] %v22893_v20  ;;  %v22896_v17 = vsel %vm5701_vm10, %v5592_v18, %v5813_v1  ;;  %v5776_v33 = vmul.f32 0.2, %v5468_v38  ;;  %v5470_v39 = vpop.f32.mrb[97].mxu0  ;;  %vm5664_vm11 = vcmp.ge.f32.partialorder %v5468_v38, 0.0  ;;  %17753 = vmatpush3.bf16.msra.mxu0 %v19138_v53 }
 0x4c3   :  { %27079 = vst [vmem:[#allocation172_spill] sm:$0xff] %v22890_v55  ;;  %27081 = vst [vmem:[#allocation174_spill] sm:$0xff] %v22896_v17  ;;  %v22898_v54 = vpack.c.bf16 %v5882_v8, %v5875_v59  ;;  %vm5665_vm12 = vcmp.ge.f32.partialorder %v5470_v39, 0.0  ;;  %v5777_v35 = vmul.f32 0.2, %v5470_v39  ;;  %v5472_v46 = vpop.f32.mrb[98].mxu0  ;;  %7655 = vmatpush1.bf16.msra.mxu1 %v19139_v27  ;;  %17754 = vmatprep.subr.bf16.mxu0 %v19142_v61 }
 0x4c4   :  { %vm5671_vm13 = vcmp.ge.f32.partialorder %v5472_v46, 0.0  ;;  %v5783_v63 = vmul.f32 0.2, %v5472_v46  ;;  %v5474_v18 = vpop.f32.mrb[99].mxu0  ;;  %7656 = vmatprep.subr.bf16.mxu1 %v19145_v51  ;;  %v19146_v53 = vld [vmem:[%s26601_s2 + $0xc0] ss:$28 sps:$4 sm:$0xff]   ;;  %v5888_v27 = vsel %vm5664_vm11, %v5468_v38, %v5776_v33 }
 0x4c5   :  { %27082 = vst [vmem:[#allocation175_spill] sm:$0xff] %v22898_v54  ;;  %v7134_v1 = vpop.permute.xlu0 %7133  ;;  %vm5672_vm14 = vcmp.ge.f32.partialorder %v5474_v18, 0.0  ;;  %v5784_v59 = vmul.f32 0.2, %v5474_v18  ;;  %v19149_v41 = vld [vmem:[%s26601_s2 + $0xbc] ss:$28 sps:$4 sm:$0xff]   ;;  %v5889_v51 = vsel %vm5665_vm12, %v5470_v39, %v5777_v35  ;;  %v7154_v2 = vpop.permute.xlu1 %7153 }
 0x4c6   :  { %v7166_v49 = vsel %vm3208_vm1, %v7108_v32, %v7134_v1  ;;  %v5895_v8 = vsel %vm5671_vm13, %v5472_v46, %v5783_v63  ;;  %v19147_v38 = vld [vmem:[%s26601_s2 + $0xb8] ss:$28 sps:$4 sm:$0xff]   ;;  %v7233_v35 = vld [vmem:[%s26601_s2 + $0x128] sm:$0x33]  ;;  %v7109_v1 = vld [vmem:[#allocation2 + $0x140] sm:$0xff]  ;;  %17755 = vmatpush3.bf16.msra.mxu0 %v19142_v61 }
 0x4c7   :  { %v22911_v45 = vsel %vm3595_vm5, %v7166_v49, %v7152_v28  ;;  %v5896_v56 = vsel %vm5672_vm14, %v5474_v18, %v5784_v59  ;;  %v22924_v33 = vpack.c.bf16 %v5895_v8, %v5888_v27  ;;  %v19150_v39 = vld [vmem:[%s26601_s2 + $0xf8] ss:$28 sps:$4 sm:$0xff]   ;;  %7657 = vmatpush1.bf16.msra.mxu1 %v19143_v10  ;;  %17756 = vmatprep.subr.bf16.mxu0 %v19146_v53  ;;  %v19154_v8 = vld [vmem:[%s26601_s2 + $0x130] ss:$0 sps:$4 sm:$0x33]  }
 0x4c8   :  { %16645 = vmatmul.mubr.msk.bf16.gmra.mrb[224].mxu1 %vm3854_vm6, %v22911_v45  ;;  %16652 = vmatmul.mubr.msk.bf16.gmra.mrb[152].mxu0 %vm3854_vm6, %v22911_v45  ;;  %v19153_v32 = vld [vmem:[%s26601_s2 + $0xf4] ss:$28 sps:$4 sm:$0xff]   ;;  %v22937_v46 = vpack.c.bf16 %v5896_v56, %v5889_v51  ;;  %v16640_v17 = vcombine.low %v7233_v35, %v7233_v35 }
 0x4c9   :  { %27083 = vst [vmem:[#allocation176_spill] sm:$0xff] %v22924_v33  ;;  %7518 = vmatprep.mubr.bf16.mxu1 %v22870_v6  ;;  %7611 = vmatprep.mubr.bf16.mxu0 %v22870_v6  ;;  %v5478_v63 = vpop.f32.mrb[100].mxu0 }
 0x4ca   :  { %27084 = vst [vmem:[#allocation177_spill] sm:$0xff] %v22937_v46  ;;  %vm5678_vm15 = vcmp.ge.f32.partialorder %v5478_v63, 0.0  ;;  %v5790_v18 = vmul.f32 0.2, %v5478_v63  ;;  %v5480_v28 = vpop.f32.mrb[101].mxu0  ;;  %7658 = vmatprep.subr.bf16.mxu1 %v19149_v41  ;;  %17757 = vmatpush3.bf16.msra.mxu0 %v19146_v53  ;;  %v7110_v53 = vld [vmem:[#allocation2 + $0x148] sm:$0xff] }
 0x4cb   :  { %vm5679_vm2 = vcmp.ge.f32.partialorder %v5480_v28, 0.0  ;;  %v5791_v59 = vmul.f32 0.2, %v5480_v28  ;;  %v5482_v27 = vpop.f32.mrb[102].mxu0  ;;  %7659 = vmatpush1.bf16.msra.mxu1 %v19147_v38  ;;  %v19151_v41 = vld [vmem:[%s26601_s2 + $0xf0] ss:$28 sps:$4 sm:$0xff]   ;;  %17758 = vmatprep.subr.bf16.mxu0 %v19150_v39 }
 0x4cc   :  { %vm5685_vm3 = vcmp.ge.f32.partialorder %v5482_v27, 0.0  ;;  %v5797_v51 = vmul.f32 0.2, %v5482_v27  ;;  %v5484_v61 = vpop.f32.mrb[103].mxu0  ;;  %v5902_v0 = vsel %vm5678_vm15, %v5478_v63, %v5790_v18  ;;  %7660 = vmatprep.subr.bf16.mxu1 %v19153_v32  ;;  %v19159_v32 = vld [vmem:[%s26602_s3 + $0x4] ss:$8 sps:$4 sm:$0xff]  }
 0x4cd   :  { %v7136_v49 = vpop.permute.xlu0 %7135  ;;  %vm5686_vm7 = vcmp.ge.f32.partialorder %v5484_v61, 0.0  ;;  %v5798_v10 = vmul.f32 0.2, %v5484_v61  ;;  %v7464_v18 = vsel %vm3871_vm4, %v19154_v8, 0 }
 0x4ce   :  { %v7169_v56 = vsel %vm3208_vm1, %v7109_v1, %v7136_v49  ;;  %v5909_v52 = vsel %vm5685_vm3, %v5482_v27, %v5797_v51  ;;  %v16641_v1 = vcombine.high %v7233_v35, %v7233_v35  ;;  %v5903_v49 = vsel %vm5679_vm2, %v5480_v28, %v5791_v59  ;;  %17759 = vmatpush3.bf16.msra.mxu0 %v19150_v39  ;;  %v7156_v51 = vpop.permute.xlu1 %7155 }
 0x4cf   :  { %v22944_v20 = vsel %vm3595_vm5, %v7169_v56, %v7154_v2  ;;  %v5910_v11 = vsel %vm5686_vm7, %v5484_v61, %v5798_v10  ;;  %v22955_v2 = vpack.c.bf16 %v5909_v52, %v5902_v0  ;;  %7661 = vmatpush1.bf16.msra.mxu1 %v19151_v41  ;;  %v7458_v0 = vsel %vm3871_vm4, %v16640_v17, 0  ;;  %18429 = vmatprep.subr.msk.bf16.mxu0 %vm3871_vm4, %v19154_v8 }
 0x4d0   :  { %16646 = vmatmul.mubr.msk.bf16.gmra.mrb[228].mxu1 %vm3854_vm6, %v22944_v20  ;;  %16653 = vmatmul.mubr.msk.bf16.gmra.mrb[156].mxu0 %vm3854_vm6, %v22944_v20  ;;  %v22962_v35 = vpack.c.bf16 %v5910_v11, %v5903_v49 }
 0x4d1   :  { %27085 = vst [vmem:[#allocation178_spill] sm:$0xff] %v22955_v2  ;;  %v7138_v38 = vpop.permute.xlu0 %7137  ;;  %7528 = vmatprep.mubr.bf16.mxu1 %v22870_v6  ;;  %7621 = vmatprep.mubr.bf16.mxu0 %v22870_v6  ;;  %v5488_v63 = vpop.f32.mrb[104].mxu0 }
 0x4d2   :  { %27086 = vst [vmem:[#allocation179_spill] sm:$0xff] %v22962_v35  ;;  %vm5692_vm8 = vcmp.ge.f32.partialorder %v5488_v63, 0.0  ;;  %v5804_v52 = vmul.f32 0.2, %v5488_v63  ;;  %v5490_v28 = vpop.f32.mrb[105].mxu0  ;;  %16657 = vmatprep.subr.msk.bf16.mxu1 %vm3871_vm4, %v16641_v1  ;;  %v7172_v59 = vsel %vm3208_vm1, %v7110_v53, %v7138_v38  ;;  %17761 = vmatpush3.bf16.msra.mxu0 %v7464_v18 }
 0x4d3   :  { %vm5693_vm9 = vcmp.ge.f32.partialorder %v5490_v28, 0.0  ;;  %v5805_v27 = vmul.f32 0.2, %v5490_v28  ;;  %v5492_v11 = vpop.f32.mrb[106].mxu0  ;;  %7663 = vmatpush1.bf16.msra.mxu1 %v7458_v0  ;;  %v22975_v8 = vsel %vm3595_vm5, %v7172_v59, %v7156_v51  ;;  %13868 = vmatprep.subr.bf16.mxu0 %v19159_v32 }
 0x4d4   :  { %vm5699_vm10 = vcmp.ge.f32.partialorder %v5492_v11, 0.0  ;;  %v5811_v56 = vmul.f32 0.2, %v5492_v11  ;;  %v5494_v39 = vpop.f32.mrb[107].mxu0  ;;  %v22970_v17 = vsel %vm5692_vm8, %v5488_v63, %v5804_v52  ;;  %10355 = vmatprep.subr.bf16.mxu1 %v19159_v32  ;;  %v7111_v63 = vld [vmem:[#allocation2 + $0x150] sm:$0xff] }
 0x4d5   :  { %vm5700_vm11 = vcmp.ge.f32.partialorder %v5494_v39, 0.0  ;;  %v5812_v61 = vmul.f32 0.2, %v5494_v39  ;;  %27087 = vst [vmem:[#allocation180_spill] sm:$0xff] %v22970_v17  ;;  %v22978_v41 = vsel %vm5693_vm9, %v5490_v28, %v5805_v27  ;;  %v7140_v53 = vpop.permute.xlu0 %7139  ;;  %v23076_v17 = vld [vmem:[%s26602_s3 + $0x40] ss:$8 sps:$4 sm:$0xff]  }
 0x4d6   :  { %v22972_v10 = vsel %vm5699_vm10, %v5492_v11, %v5811_v56  ;;  %27089 = vst [vmem:[#allocation182_spill] sm:$0xff] %v22978_v41  ;;  %v7175_v52 = vsel %vm3208_vm1, %v7111_v63, %v7140_v53  ;;  %v7158_v56 = vpop.permute.xlu1 %7157  ;;  %v23056_v53 = vld [vmem:[%s26602_s3 + $0x30] ss:$8 sps:$4 sm:$0xff]  }
 0x4d7   :  { %27088 = vst [vmem:[#allocation181_spill] sm:$0xff] %v22972_v10  ;;  %v22982_v49 = vsel %vm5700_vm11, %v5494_v39, %v5812_v61  ;;  %v22998_v1 = vsel %vm3595_vm5, %v7175_v52, %v7158_v56  ;;  %v19160_v56 = vld [vmem:[%s26602_s3 + $0x10] ss:$8 sps:$4 sm:$0xff]  }
 0x4d8   :  { %27090 = vst [vmem:[#allocation183_spill] sm:$0xff] %v22982_v49  ;;  %16647 = vmatmul.mubr.msk.bf16.gmra.mrb[232].mxu1 %vm3854_vm6, %v22975_v8  ;;  %16654 = vmatmul.mubr.msk.bf16.gmra.mrb[160].mxu0 %vm3854_vm6, %v22975_v8 }
 0x4d9   :  { %7538 = vmatprep.mubr.bf16.mxu1 %v22870_v6  ;;  %7631 = vmatprep.mubr.bf16.mxu0 %v22870_v6  ;;  %v5498_v32 = vpop.f32.mrb[108].mxu0 }
 0x4da   :  { %v5818_v18 = vmul.f32 0.2, %v5498_v32  ;;  %v5500_v0 = vpop.f32.mrb[109].mxu0  ;;  %vm5706_vm4 = vcmp.ge.f32.partialorder %v5498_v32, 0.0 }
 0x4db   :  { %v5819_v28 = vmul.f32 0.2, %v5500_v0  ;;  %v5502_v59 = vpop.f32.mrb[110].mxu0  ;;  %vm5707_vm12 = vcmp.ge.f32.partialorder %v5500_v0, 0.0 }
 0x4dc   :  { %vm5713_vm13 = vcmp.ge.f32.partialorder %v5502_v59, 0.0  ;;  %v5825_v27 = vmul.f32 0.2, %v5502_v59  ;;  %v5504_v11 = vpop.f32.mrb[111].mxu0  ;;  %v22993_v51 = vsel %vm5706_vm4, %v5498_v32, %v5818_v18  ;;  %v7112_v32 = vld [vmem:[#allocation2 + $0x158] sm:$0xff]  ;;  %v7142_v18 = vpop.permute.xlu0 %7141 }
 0x4dd   :  { %vm5714_vm14 = vcmp.ge.f32.partialorder %v5504_v11, 0.0  ;;  %v5826_v39 = vmul.f32 0.2, %v5504_v11  ;;  %27091 = vst [vmem:[#allocation184_spill] sm:$0xff] %v22993_v51  ;;  %v23000_v38 = vsel %vm5707_vm12, %v5500_v0, %v5819_v28  ;;  %v7178_v52 = vsel %vm3208_vm1, %v7112_v32, %v7142_v18  ;;  %v7160_v28 = vpop.permute.xlu1 %7159  ;;  %v19168_v32 = vld [vmem:[%s26602_s3 + $0x34] ss:$8 sps:$4 sm:$0xff]  }
 0x4de   :  { %v22995_v61 = vsel %vm5713_vm13, %v5502_v59, %v5825_v27  ;;  %27093 = vst [vmem:[#allocation186_spill] sm:$0xff] %v23000_v38  ;;  %v23016_v59 = vsel %vm3595_vm5, %v7178_v52, %v7160_v28  ;;  %v19157_v27 = vld [vmem:[%s26602_s3] ss:$8 sps:$4 sm:$0xff]   ;;  %v19237_v18 = vld [vmem:[%s26602_s3 + $0x24] ss:$8 sps:$4 sm:$0xff]  }
 0x4df   :  { %27092 = vst [vmem:[#allocation185_spill] sm:$0xff] %v22995_v61  ;;  %v23004_v63 = vsel %vm5714_vm14, %v5504_v11, %v5826_v39  ;;  %v19162_v11 = vld [vmem:[%s26602_s3 + $0x14] ss:$8 sps:$4 sm:$0xff]   ;;  %v19165_v39 = vld [vmem:[%s26602_s3 + $0x24] ss:$8 sps:$4 sm:$0xff]  }
 0x4e0   :  { %27094 = vst [vmem:[#allocation187_spill] sm:$0xff] %v23004_v63  ;;  %16648 = vmatmul.mubr.msk.bf16.gmra.mrb[236].mxu1 %vm3854_vm6, %v22998_v1  ;;  %16655 = vmatmul.mubr.msk.bf16.gmra.mrb[164].mxu0 %vm3854_vm6, %v22998_v1 }
 0x4e1   :  { %7548 = vmatprep.mubr.bf16.mxu1 %v22870_v6  ;;  %7641 = vmatprep.mubr.bf16.mxu0 %v22870_v6 }
 0x4e8   :  { %16649 = vmatmul.mubr.msk.bf16.gmra.mrb[240].mxu1 %vm3854_vm6, %v23016_v59  ;;  %16656 = vmatmul.mubr.msk.bf16.gmra.mrb[168].mxu0 %vm3854_vm6, %v23016_v59 }
 0x4e9   :  { %17762 = vmatprep.mubr.msk.bf16.mxu0 %vm3854_vm6, %v22860_v24  ;;  %7684 = vmatprep.mubr.bf16.mxu1 %v22870_v6 }
 0x4f0   :  { %16658 = vmatmul.mubr.msk.bf16.vlgmr.msra.gmra.mrb[244].mxu1 %vm3854_vm6, %v22860_v24  ;;  %17763 = vmatmul.mubr.msk.bf16.vlgmr.msra.gmra.mrb[172].mxu0 %vm3854_vm6, %v22911_v45  ;;  %v19163_v24 = vld [vmem:[%s26602_s3 + $0x20] ss:$8 sps:$4 sm:$0xff]  }
 0x4f1   :  { %13869 = vmatpush1.bf16.msra.mxu0 %v19157_v27  ;;  %17766 = vmatprep.mubr.msk.bf16.mxu0 %vm3854_vm6, %v22944_v20 }
 0x4f2   :  { %13870 = vmatprep.subr.bf16.mxu0 %v19162_v11  ;;  %7694 = vmatprep.mubr.bf16.mxu1 %v22870_v6 }
 0x4f3   :  { %10356 = vmatpush1.bf16.msra.mxu1 %v19157_v27 }
 0x4f4   :  { %10357 = vmatprep.subr.bf16.mxu1 %v19162_v11 }
 0x4f5   :  { %13871 = vmatpush1.bf16.msra.mxu0 %v19160_v56 }
 0x4f6   :  { %13872 = vmatprep.subr.bf16.mxu0 %v19165_v39  ;;  %v6445_v52 = vpop.f32.mrb[172].mxu1  ;;  %v6538_v28 = vpop.f32.mrb[112].mxu0  ;;  %v19235_v39 = vld [vmem:[%s26602_s3 + $0x20] ss:$8 sps:$4 sm:$0xff]  }
 0x4f7   :  { %10358 = vmatpush1.bf16.msra.mxu1 %v19160_v56  ;;  %v6855_v27 = vmul.f32 0.2, %v6445_v52  ;;  %v6857_v11 = vmul.f32 0.2, %v6538_v28  ;;  %vm6771_vm1 = vcmp.ge.f32.partialorder %v6445_v52, 0.0  ;;  %vm6773_vm5 = vcmp.ge.f32.partialorder %v6538_v28, 0.0 }
 0x4f8   :  { %16659 = vmatmul.mubr.msk.bf16.gmra.mrb[248].mxu1 %vm3854_vm6, %v22911_v45  ;;  %17767 = vmatmul.mubr.msk.bf16.gmra.mrb[176].mxu0 %vm3854_vm6, %v22975_v8  ;;  %v6447_v0 = vpop.f32.mrb[173].mxu1  ;;  %v6540_v56 = vpop.f32.mrb[113].mxu0  ;;  %v23070_v45 = vld [vmem:[%s26602_s3 + $0x44] ss:$8 sps:$4 sm:$0xff]  }
 0x4f9   :  { %13873 = vmatpush1.bf16.msra.mxu0 %v19163_v24  ;;  %17770 = vmatprep.mubr.msk.bf16.mxu0 %vm3854_vm6, %v22998_v1  ;;  %v6856_v51 = vmul.f32 0.2, %v6447_v0  ;;  %v6449_v61 = vpop.f32.mrb[174].mxu1  ;;  %v6542_v38 = vpop.f32.mrb[114].mxu0  ;;  %vm6772_vm15 = vcmp.ge.f32.partialorder %v6447_v0, 0.0  ;;  %v23079_v10 = vsel %vm6771_vm1, %v6445_v52, %v6855_v27  ;;  %v23082_v41 = vsel %vm6773_vm5, %v6538_v28, %v6857_v11 }
 0x4fa   :  { %13874 = vmatprep.subr.bf16.mxu0 %v19168_v32  ;;  %7704 = vmatprep.mubr.bf16.mxu1 %v22870_v6  ;;  %v6858_v24 = vmul.f32 0.2, %v6540_v56  ;;  %vm6778_vm2 = vcmp.ge.f32.partialorder %v6449_v61, 0.0  ;;  %v6862_v63 = vmul.f32 0.2, %v6449_v61  ;;  %27095 = vst [vmem:[#allocation188_spill] sm:$0xff] %v23079_v10 }
 0x4fb   :  { %10359 = vmatprep.subr.bf16.mxu1 %v19237_v18  ;;  %27096 = vst [vmem:[#allocation189_spill] sm:$0xff] %v23082_v41  ;;  %vm6780_vm3 = vcmp.ge.f32.partialorder %v6542_v38, 0.0  ;;  %v6864_v49 = vmul.f32 0.2, %v6542_v38  ;;  %v6451_v7 = vpop.f32.mrb[175].mxu1  ;;  %v6544_v50 = vpop.f32.mrb[115].mxu0 }
 0x4fc   :  { %10360 = vmatpush1.bf16.msra.mxu1 %v19235_v39  ;;  %vm6774_vm7 = vcmp.ge.f32.partialorder %v6540_v56, 0.0  ;;  %v23084_v34 = vsel %vm6778_vm2, %v6449_v61, %v6862_v63  ;;  %vm6779_vm8 = vcmp.ge.f32.partialorder %v6451_v7, 0.0  ;;  %v6863_v2 = vmul.f32 0.2, %v6451_v7  ;;  %v19174_v28 = vld [vmem:[%s26602_s3 + $0x54] ss:$8 sps:$4 sm:$0xff]  }
 0x4fd   :  { %27097 = vst [vmem:[#allocation190_spill] sm:$0xff] %v23084_v34  ;;  %13875 = vmatpush1.bf16.msra.mxu0 %v23056_v53  ;;  %10361 = vmatprep.subr.bf16.mxu1 %v19168_v32  ;;  %v23087_v18 = vsel %vm6780_vm3, %v6542_v38, %v6864_v49  ;;  %vm6781_vm9 = vcmp.ge.f32.partialorder %v6544_v50, 0.0  ;;  %v6865_v52 = vmul.f32 0.2, %v6544_v50  ;;  %v23096_v61 = vsel %vm6772_vm15, %v6447_v0, %v6856_v51  ;;  %v23103_v49 = vld [vmem:[%s26602_s3 + $0x50] ss:$8 sps:$4 sm:$0xff]  }
 0x4fe   :  { %27098 = vst [vmem:[#allocation191_spill] sm:$0xff] %v23087_v18  ;;  %13876 = vmatprep.subr.bf16.mxu0 %v23070_v45  ;;  %27099 = vst [vmem:[#allocation192_spill] sm:$0xff] %v23096_v61  ;;  %v23098_v63 = vsel %vm6779_vm8, %v6451_v7, %v6863_v2  ;;  %v6455_v11 = vpop.f32.mrb[176].mxu1  ;;  %v6548_v32 = vpop.f32.mrb[116].mxu0  ;;  %v23108_v39 = vsel %vm6774_vm7, %v6540_v56, %v6858_v24  ;;  %v23121_v38 = vld [vmem:[%s26602_s3 + $0x64] ss:$8 sps:$4 sm:$0xff]  }
 0x4ff   :  { %27100 = vst [vmem:[#allocation193_spill] sm:$0xff] %v23098_v63  ;;  %27101 = vst [vmem:[#allocation194_spill] sm:$0xff] %v23108_v39  ;;  %v23112_v51 = vsel %vm6781_vm9, %v6544_v50, %v6865_v52  ;;  %v6869_v7 = vmul.f32 0.2, %v6455_v11  ;;  %v6457_v2 = vpop.f32.mrb[177].mxu1  ;;  %v6550_v0 = vpop.f32.mrb[117].mxu0 }
 0x500   :  { %27102 = vst [vmem:[#allocation195_spill] sm:$0xff] %v23112_v51  ;;  %16660 = vmatmul.mubr.msk.bf16.gmra.mrb[252].mxu1 %vm3854_vm6, %v22944_v20  ;;  %17771 = vmatmul.mubr.msk.bf16.gmra.mrb[180].mxu0 %vm3854_vm6, %v23016_v59  ;;  %vm6785_vm10 = vcmp.ge.f32.partialorder %v6455_v11, 0.0  ;;  %v6871_v50 = vmul.f32 0.2, %v6548_v32  ;;  %v6459_v20 = vpop.f32.mrb[178].mxu1  ;;  %v6552_v24 = vpop.f32.mrb[118].mxu0 }
 0x501   :  { %13877 = vmatpush1.bf16.msra.mxu0 %v23076_v17  ;;  %13900 = vmatprep.mubr.bf16.mxu0 %v22705_v16  ;;  %vm6787_vm11 = vcmp.ge.f32.partialorder %v6548_v32, 0.0  ;;  %vm6786_vm4 = vcmp.ge.f32.partialorder %v6457_v2, 0.0  ;;  %v6870_v52 = vmul.f32 0.2, %v6457_v2  ;;  %vm6788_vm12 = vcmp.ge.f32.partialorder %v6550_v0, 0.0  ;;  %v6461_v27 = vpop.f32.mrb[179].mxu1 }
 0x502   :  { %13878 = vmatprep.subr.bf16.mxu0 %v19174_v28  ;;  %7714 = vmatprep.mubr.bf16.mxu1 %v22870_v6  ;;  %vm6792_vm13 = vcmp.ge.f32.partialorder %v6459_v20, 0.0  ;;  %v6876_v61 = vmul.f32 0.2, %v6459_v20  ;;  %vm6794_vm14 = vcmp.ge.f32.partialorder %v6552_v24, 0.0  ;;  %v6554_v56 = vpop.f32.mrb[119].mxu0  ;;  %v23135_v16 = vsel %vm6785_vm10, %v6455_v11, %v6869_v7 }
 0x503   :  { %v23131_v39 = vld [vmem:[%s26602_s3 + $0x60] ss:$8 sps:$4 sm:$0xff]   ;;  %10362 = vmatpush1.bf16.msra.mxu1 %v23056_v53  ;;  %v6872_v51 = vmul.f32 0.2, %v6550_v0  ;;  %v6878_v63 = vmul.f32 0.2, %v6552_v24  ;;  %v23142_v34 = vsel %vm6787_vm11, %v6548_v32, %v6871_v50  ;;  %v23160_v32 = vsel %vm6786_vm4, %v6457_v2, %v6870_v52 }
 0x504   :  { %vm6793_vm1 = vcmp.ge.f32.partialorder %v6461_v27, 0.0  ;;  %10363 = vmatprep.subr.bf16.mxu1 %v23070_v45  ;;  %v23138_v41 = vsel %vm6792_vm13, %v6459_v20, %v6876_v61  ;;  %v6877_v18 = vmul.f32 0.2, %v6461_v27  ;;  %vm6795_vm5 = vcmp.ge.f32.partialorder %v6554_v56, 0.0  ;;  %27103 = vst [vmem:[#allocation196_spill] sm:$0xff] %v23142_v34  ;;  %27107 = vst [vmem:[#allocation200_spill] sm:$0xff] %v23160_v32 }
 0x505   :  { %v6879_v10 = vmul.f32 0.2, %v6554_v56  ;;  %13879 = vmatpush1.bf16.msra.mxu0 %v23103_v49  ;;  %v23144_v35 = vsel %vm6794_vm14, %v6552_v24, %v6878_v63  ;;  %v19180_v53 = vld [vmem:[%s26602_s3 + $0x74] ss:$8 sps:$4 sm:$0xff]   ;;  %v23163_v50 = vsel %vm6788_vm12, %v6550_v0, %v6872_v51  ;;  %v19178_v2 = vld [vmem:[%s26602_s3 + $0x70] ss:$8 sps:$4 sm:$0xff]  }
 0x506   :  { %27104 = vst [vmem:[#allocation197_spill] sm:$0xff] %v23144_v35  ;;  %13880 = vmatprep.subr.bf16.mxu0 %v23121_v38  ;;  %v23152_v61 = vsel %vm6793_vm1, %v6461_v27, %v6877_v18  ;;  %v6465_v7 = vpop.f32.mrb[180].mxu1  ;;  %v6558_v20 = vpop.f32.mrb[120].mxu0  ;;  %27108 = vst [vmem:[#allocation201_spill] sm:$0xff] %v23163_v50  ;;  %v23182_v63 = vld [vmem:[%s26602_s3 + $0x80] ss:$8 sps:$4 sm:$0xff]  }
 0x507   :  { %27105 = vst [vmem:[#allocation198_spill] sm:$0xff] %v23152_v61  ;;  %v23154_v11 = vsel %vm6795_vm5, %v6554_v56, %v6879_v10  ;;  %10364 = vmatpush1.bf16.msra.mxu1 %v23076_v17  ;;  %v6883_v18 = vmul.f32 0.2, %v6465_v7  ;;  %v6885_v27 = vmul.f32 0.2, %v6558_v20  ;;  %vm6799_vm15 = vcmp.ge.f32.partialorder %v6465_v7, 0.0 }
 0x508   :  { %27106 = vst [vmem:[#allocation199_spill] sm:$0xff] %v23154_v11  ;;  %16661 = vmatmul.mubr.msk.bf16.gmra.mrb[0].mxu1 %vm3854_vm6, %v22975_v8  ;;  %10365 = vmatprep.subr.bf16.mxu1 %v19174_v28  ;;  %vm6801_vm2 = vcmp.ge.f32.partialorder %v6558_v20, 0.0  ;;  %v6467_v17 = vpop.f32.mrb[181].mxu1  ;;  %v6560_v10 = vpop.f32.mrb[121].mxu0  ;;  %v19183_v56 = vld [vmem:[%s26602_s3 + $0x84] ss:$8 sps:$4 sm:$0xff]  }
 0x509   :  { %13881 = vmatpush1.bf16.msra.mxu0 %v23131_v39  ;;  %7724 = vmatprep.mubr.bf16.mxu1 %v22870_v6  ;;  %vm6800_vm3 = vcmp.ge.f32.partialorder %v6467_v17, 0.0  ;;  %v6469_v28 = vpop.f32.mrb[182].mxu1  ;;  %v6562_v0 = vpop.f32.mrb[122].mxu0  ;;  %v6884_v24 = vmul.f32 0.2, %v6467_v17  ;;  %vm6802_vm7 = vcmp.ge.f32.partialorder %v6560_v10, 0.0  ;;  %v23186_v8 = vsel %vm6799_vm15, %v6465_v7, %v6883_v18 }
 0x50a   :  { %13882 = vmatprep.subr.bf16.mxu0 %v19180_v53  ;;  %vm6806_vm8 = vcmp.ge.f32.partialorder %v6469_v28, 0.0  ;;  %v6890_v52 = vmul.f32 0.2, %v6469_v28  ;;  %27109 = vst [vmem:[#allocation202_spill] sm:$0xff] %v23186_v8  ;;  %v23189_v51 = vsel %vm6801_vm2, %v6558_v20, %v6885_v27  ;;  %vm6808_vm9 = vcmp.ge.f32.partialorder %v6562_v0, 0.0  ;;  %v6471_v50 = vpop.f32.mrb[183].mxu1 }
 0x50b   :  { %10366 = vmatpush1.bf16.msra.mxu1 %v23103_v49  ;;  %27110 = vst [vmem:[#allocation203_spill] sm:$0xff] %v23189_v51  ;;  %v6892_v45 = vmul.f32 0.2, %v6562_v0  ;;  %v6564_v11 = vpop.f32.mrb[123].mxu0  ;;  %v6886_v32 = vmul.f32 0.2, %v6560_v10 }
 0x50c   :  { %10367 = vmatprep.subr.bf16.mxu1 %v23121_v38  ;;  %v23192_v61 = vsel %vm6806_vm8, %v6469_v28, %v6890_v52  ;;  %vm6807_vm10 = vcmp.ge.f32.partialorder %v6471_v50, 0.0  ;;  %v6891_v34 = vmul.f32 0.2, %v6471_v50  ;;  %vm6809_vm11 = vcmp.ge.f32.partialorder %v6564_v11, 0.0  ;;  %v19186_v7 = vld [vmem:[%s26602_s3 + $0x94] ss:$8 sps:$4 sm:$0xff]  }
 0x50d   :  { %13883 = vmatpush1.bf16.msra.mxu0 %v19178_v2  ;;  %v23194_v35 = vsel %vm6808_vm9, %v6562_v0, %v6892_v45  ;;  %v6893_v49 = vmul.f32 0.2, %v6564_v11  ;;  %v23202_v38 = vsel %vm6800_vm3, %v6467_v17, %v6884_v24  ;;  %v19184_v52 = vld [vmem:[%s26602_s3 + $0x90] ss:$8 sps:$4 sm:$0xff]   ;;  %v19192_v20 = vld [vmem:[%s26602_s3 + $0xb4] ss:$8 sps:$4 sm:$0xff]  }
 0x50e   :  { %27111 = vst [vmem:[#allocation204_spill] sm:$0xff] %v23194_v35  ;;  %13884 = vmatprep.subr.bf16.mxu0 %v19183_v56  ;;  %27112 = vst [vmem:[#allocation205_spill] sm:$0xff] %v23202_v38  ;;  %v23204_v18 = vsel %vm6807_vm10, %v6471_v50, %v6891_v34  ;;  %v23219_v34 = vld [vmem:[%s26602_s3 + $0xa4] ss:$8 sps:$4 sm:$0xff]  }
 0x50f   :  { %27113 = vst [vmem:[#allocation206_spill] sm:$0xff] %v23204_v18  ;;  %10368 = vmatpush1.bf16.msra.mxu1 %v23131_v39  ;;  %v23209_v27 = vsel %vm6809_vm11, %v6564_v11, %v6893_v49  ;;  %v6475_v28 = vpop.f32.mrb[184].mxu1  ;;  %v6568_v0 = vpop.f32.mrb[124].mxu0  ;;  %v23224_v11 = vsel %vm6802_vm7, %v6560_v10, %v6886_v32  ;;  %v19187_v32 = vld [vmem:[%s26602_s3 + $0xa0] ss:$8 sps:$4 sm:$0xff]  }
 0x510   :  { %27114 = vst [vmem:[#allocation207_spill] sm:$0xff] %v23209_v27  ;;  %16662 = vmatmul.mubr.msk.bf16.gmra.mrb[4].mxu1 %vm3854_vm6, %v22998_v1  ;;  %10369 = vmatprep.subr.bf16.mxu1 %v19180_v53  ;;  %27115 = vst [vmem:[#allocation208_spill] sm:$0xff] %v23224_v11  ;;  %vm6813_vm4 = vcmp.ge.f32.partialorder %v6475_v28, 0.0  ;;  %v6897_v1 = vmul.f32 0.2, %v6475_v28  ;;  %vm6815_vm12 = vcmp.ge.f32.partialorder %v6568_v0, 0.0 }
 0x511   :  { %13885 = vmatpush1.bf16.msra.mxu0 %v23182_v63  ;;  %v6899_v50 = vmul.f32 0.2, %v6568_v0  ;;  %7734 = vmatprep.mubr.bf16.mxu1 %v22870_v6  ;;  %v6477_v17 = vpop.f32.mrb[185].mxu1  ;;  %v6570_v24 = vpop.f32.mrb[125].mxu0 }
 0x512   :  { %13886 = vmatprep.subr.bf16.mxu0 %v19186_v7  ;;  %vm6814_vm13 = vcmp.ge.f32.partialorder %v6477_v17, 0.0  ;;  %v6898_v49 = vmul.f32 0.2, %v6477_v17  ;;  %v6479_v39 = vpop.f32.mrb[186].mxu1  ;;  %v6572_v45 = vpop.f32.mrb[126].mxu0  ;;  %vm6816_vm14 = vcmp.ge.f32.partialorder %v6570_v24, 0.0  ;;  %v23237_v53 = vsel %vm6813_vm4, %v6475_v28, %v6897_v1 }
 0x513   :  { %10370 = vmatpush1.bf16.msra.mxu1 %v19178_v2  ;;  %v6900_v10 = vmul.f32 0.2, %v6570_v24  ;;  %vm6820_vm1 = vcmp.ge.f32.partialorder %v6479_v39, 0.0  ;;  %v6904_v6 = vmul.f32 0.2, %v6479_v39  ;;  %27116 = vst [vmem:[#allocation209_spill] sm:$0xff] %v23237_v53  ;;  %v23240_v18 = vsel %vm6815_vm12, %v6568_v0, %v6899_v50 }
 0x514   :  { %10371 = vmatprep.subr.bf16.mxu1 %v19183_v56  ;;  %vm6822_vm5 = vcmp.ge.f32.partialorder %v6572_v45, 0.0  ;;  %v6906_v11 = vmul.f32 0.2, %v6572_v45  ;;  %v6481_v27 = vpop.f32.mrb[187].mxu1  ;;  %v6574_v38 = vpop.f32.mrb[127].mxu0  ;;  %27117 = vst [vmem:[#allocation210_spill] sm:$0xff] %v23240_v18  ;;  %v23251_v1 = vsel %vm6814_vm13, %v6477_v17, %v6898_v49 }
 0x515   :  { %13887 = vmatpush1.bf16.msra.mxu0 %v19184_v52  ;;  %v23242_v2 = vsel %vm6820_vm1, %v6479_v39, %v6904_v6  ;;  %vm6821_vm15 = vcmp.ge.f32.partialorder %v6481_v27, 0.0  ;;  %v6905_v51 = vmul.f32 0.2, %v6481_v27  ;;  %vm6823_vm2 = vcmp.ge.f32.partialorder %v6574_v38, 0.0  ;;  %27120 = vst [vmem:[#allocation213_spill] sm:$0xff] %v23251_v1  ;;  %v23267_v50 = vld [vmem:[#allocation4 + $0x80] sm:$0xff] }
 0x516   :  { %27118 = vst [vmem:[#allocation211_spill] sm:$0xff] %v23242_v2  ;;  %13888 = vmatprep.subr.bf16.mxu0 %v23219_v34  ;;  %v23245_v35 = vsel %vm6822_vm5, %v6572_v45, %v6906_v11  ;;  %v6907_v56 = vmul.f32 0.2, %v6574_v38  ;;  %v19190_v45 = vld [vmem:[%s26602_s3 + $0xb0] ss:$8 sps:$4 sm:$0xff]  }
 0x517   :  { %27119 = vst [vmem:[#allocation212_spill] sm:$0xff] %v23245_v35  ;;  %10372 = vmatpush1.bf16.msra.mxu1 %v23182_v63  ;;  %v23253_v0 = vsel %vm6821_vm15, %v6481_v27, %v6905_v51  ;;  %v23263_v63 = vsel %vm6816_vm14, %v6570_v24, %v6900_v10  ;;  %v19195_v51 = vld [vmem:[%s26602_s3 + $0xc4] ss:$8 sps:$4 sm:$0xff]  }
 0x518   :  { %27121 = vst [vmem:[#allocation214_spill] sm:$0xff] %v23253_v0  ;;  %16663 = vmatmul.mubr.msk.bf16.gmra.mrb[8].mxu1 %vm3854_vm6, %v23016_v59  ;;  %10373 = vmatprep.subr.bf16.mxu1 %v19186_v7  ;;  %27122 = vst [vmem:[#allocation215_spill] sm:$0xff] %v23263_v63  ;;  %v23265_v11 = vsel %vm6823_vm2, %v6574_v38, %v6907_v56  ;;  %v23280_v38 = vld [vmem:[%s26602_s3 + $0xc0] ss:$8 sps:$4 sm:$0xff]   ;;  %v19198_v59 = vld [vmem:[%s26602_s3 + $0xd4] ss:$8 sps:$4 sm:$0xff]  }
 0x519   :  { %27123 = vst [vmem:[#allocation216_spill] sm:$0xff] %v23265_v11  ;;  %13889 = vmatpush1.bf16.msra.mxu0 %v19187_v32  ;;  %10387 = vmatprep.mubr.bf16.mxu1 %v23267_v50 }
 0x51a   :  { %13890 = vmatprep.subr.bf16.mxu0 %v19192_v20  ;;  %v6485_v27 = vpop.f32.mrb[188].mxu1  ;;  %v6578_v17 = vpop.f32.mrb[128].mxu0 }
 0x51b   :  { %10374 = vmatpush1.bf16.msra.mxu1 %v19184_v52  ;;  %vm6827_vm6 = vcmp.ge.f32.partialorder %v6485_v27, 0.0  ;;  %v6911_v24 = vmul.f32 0.2, %v6485_v27  ;;  %v6913_v49 = vmul.f32 0.2, %v6578_v17  ;;  %vm6829_vm3 = vcmp.ge.f32.partialorder %v6578_v17, 0.0 }
 0x51c   :  { %10375 = vmatprep.subr.bf16.mxu1 %v23219_v34  ;;  %v6487_v10 = vpop.f32.mrb[189].mxu1  ;;  %v6580_v6 = vpop.f32.mrb[129].mxu0  ;;  %v23289_v34 = vld [vmem:[%s26602_s3 + $0xd0] ss:$8 sps:$4 sm:$0xff]  }
 0x51d   :  { %13891 = vmatpush1.bf16.msra.mxu0 %v19190_v45  ;;  %vm6828_vm7 = vcmp.ge.f32.partialorder %v6487_v10, 0.0  ;;  %v6489_v56 = vpop.f32.mrb[190].mxu1  ;;  %v6582_v7 = vpop.f32.mrb[130].mxu0  ;;  %v6912_v39 = vmul.f32 0.2, %v6487_v10  ;;  %vm6830_vm8 = vcmp.ge.f32.partialorder %v6580_v6, 0.0  ;;  %v23292_v28 = vsel %vm6827_vm6, %v6485_v27, %v6911_v24 }
 0x51e   :  { %13892 = vmatprep.subr.bf16.mxu0 %v19195_v51  ;;  %vm6834_vm9 = vcmp.ge.f32.partialorder %v6489_v56, 0.0  ;;  %v6918_v52 = vmul.f32 0.2, %v6489_v56  ;;  %27124 = vst [vmem:[#allocation217_spill] sm:$0xff] %v23292_v28  ;;  %v23295_v63 = vsel %vm6829_vm3, %v6578_v17, %v6913_v49  ;;  %vm6836_vm10 = vcmp.ge.f32.partialorder %v6582_v7, 0.0  ;;  %v6491_v1 = vpop.f32.mrb[191].mxu1 }
 0x51f   :  { %10376 = vmatpush1.bf16.msra.mxu1 %v19187_v32  ;;  %27125 = vst [vmem:[#allocation218_spill] sm:$0xff] %v23295_v63  ;;  %v6920_v11 = vmul.f32 0.2, %v6582_v7  ;;  %v6584_v0 = vpop.f32.mrb[131].mxu0  ;;  %v6914_v18 = vmul.f32 0.2, %v6580_v6 }
 0x520   :  { %10377 = vmatprep.subr.bf16.mxu1 %v19192_v20  ;;  %v23297_v35 = vsel %vm6834_vm9, %v6489_v56, %v6918_v52  ;;  %vm6835_vm11 = vcmp.ge.f32.partialorder %v6491_v1, 0.0  ;;  %v6919_v53 = vmul.f32 0.2, %v6491_v1  ;;  %vm6837_vm4 = vcmp.ge.f32.partialorder %v6584_v0, 0.0  ;;  %v19201_v27 = vld [vmem:[%s26602_s3 + $0xe4] ss:$8 sps:$4 sm:$0xff]  }
 0x521   :  { %27126 = vst [vmem:[#allocation219_spill] sm:$0xff] %v23297_v35  ;;  %13893 = vmatpush1.bf16.msra.mxu0 %v23280_v38  ;;  %v23300_v2 = vsel %vm6836_vm10, %v6582_v7, %v6920_v11  ;;  %v6921_v32 = vmul.f32 0.2, %v6584_v0  ;;  %v23312_v56 = vld [vmem:[%s26602_s3 + $0xe0] ss:$8 sps:$4 sm:$0xff]   ;;  %v23317_v7 = vsel %vm6828_vm7, %v6487_v10, %v6912_v39  ;;  %v23322_v28 = vsel %vm6830_vm8, %v6580_v6, %v6914_v18 }
 0x522   :  { %27127 = vst [vmem:[#allocation220_spill] sm:$0xff] %v23300_v2  ;;  %13894 = vmatprep.subr.bf16.mxu0 %v19198_v59  ;;  %v23307_v20 = vsel %vm6835_vm11, %v6491_v1, %v6919_v53  ;;  %27129 = vst [vmem:[#allocation222_spill] sm:$0xff] %v23317_v7  ;;  %v23340_v2 = vld [vmem:[%s26602_s3 + $0xf0] ss:$8 sps:$4 sm:$0xff]  }
 0x523   :  { %27128 = vst [vmem:[#allocation221_spill] sm:$0xff] %v23307_v20  ;;  %10378 = vmatpush1.bf16.msra.mxu1 %v19190_v45  ;;  %v23319_v52 = vsel %vm6837_vm4, %v6584_v0, %v6921_v32  ;;  %27131 = vst [vmem:[#allocation224_spill] sm:$0xff] %v23322_v28  ;;  %v23328_v45 = vld [vmem:[%s26602_s3 + $0xf4] ss:$8 sps:$4 sm:$0xff]  }
 0x524   :  { %v6495_v24 = vpop.f32.mrb[192].mxu1  ;;  %v6588_v49 = vpop.f32.mrb[132].mxu0  ;;  %27130 = vst [vmem:[#allocation223_spill] sm:$0xff] %v23319_v52  ;;  %10379 = vmatprep.subr.bf16.mxu1 %v19195_v51 }
 0x525   :  { %vm6841_vm12 = vcmp.ge.f32.partialorder %v6495_v24, 0.0  ;;  %v6925_v17 = vmul.f32 0.2, %v6495_v24  ;;  %v6497_v53 = vpop.f32.mrb[193].mxu1  ;;  %v6590_v1 = vpop.f32.mrb[133].mxu0  ;;  %vm6843_vm13 = vcmp.ge.f32.partialorder %v6588_v49, 0.0  ;;  %13895 = vmatpush1.bf16.msra.mxu0 %v23289_v34 }
 0x526   :  { %v6927_v35 = vmul.f32 0.2, %v6588_v49  ;;  %vm6842_vm14 = vcmp.ge.f32.partialorder %v6497_v53, 0.0  ;;  %v6926_v0 = vmul.f32 0.2, %v6497_v53  ;;  %vm6844_vm1 = vcmp.ge.f32.partialorder %v6590_v1, 0.0  ;;  %13896 = vmatprep.subr.bf16.mxu0 %v19201_v27 }
 0x527   :  { %v6499_v39 = vpop.f32.mrb[194].mxu1  ;;  %v6592_v10 = vpop.f32.mrb[134].mxu0  ;;  %v23335_v6 = vsel %vm6841_vm12, %v6495_v24, %v6925_v17  ;;  %10380 = vmatpush1.bf16.msra.mxu1 %v23280_v38  ;;  %v6928_v8 = vmul.f32 0.2, %v6590_v1  ;;  %v23355_v38 = vld [vmem:[%s26602_s3 + $0x104] ss:$8 sps:$4 sm:$0xff]  }
 0x528   :  { %vm6848_vm5 = vcmp.ge.f32.partialorder %v6499_v39, 0.0  ;;  %v6932_v32 = vmul.f32 0.2, %v6499_v39  ;;  %v6501_v11 = vpop.f32.mrb[195].mxu1  ;;  %v6594_v63 = vpop.f32.mrb[135].mxu0  ;;  %vm6850_vm15 = vcmp.ge.f32.partialorder %v6592_v10, 0.0  ;;  %10381 = vmatprep.subr.bf16.mxu1 %v19198_v59  ;;  %v23347_v28 = vsel %vm6843_vm13, %v6588_v49, %v6927_v35 }
 0x529   :  { %v6934_v51 = vmul.f32 0.2, %v6592_v10  ;;  %vm6849_vm2 = vcmp.ge.f32.partialorder %v6501_v11, 0.0  ;;  %v6933_v17 = vmul.f32 0.2, %v6501_v11  ;;  %vm6851_vm6 = vcmp.ge.f32.partialorder %v6594_v63, 0.0  ;;  %13897 = vmatpush1.bf16.msra.mxu0 %v23312_v56 }
 0x52a   :  { %v23343_v18 = vsel %vm6848_vm5, %v6499_v39, %v6932_v32  ;;  %v6935_v24 = vmul.f32 0.2, %v6594_v63  ;;  %27132 = vst [vmem:[#allocation225_spill] sm:$0xff] %v23347_v28  ;;  %13898 = vmatprep.subr.bf16.mxu0 %v23328_v45  ;;  %v23360_v39 = vsel %vm6842_vm14, %v6497_v53, %v6926_v0  ;;  %v23375_v59 = vsel %vm6844_vm1, %v6590_v1, %v6928_v8  ;;  %v23386_v8 = vld [vmem:[%s26602_s3 + $0x114] ss:$8 sps:$4 sm:$0xff]  }
 0x52b   :  { %v23349_v52 = vsel %vm6850_vm15, %v6592_v10, %v6934_v51  ;;  %27134 = vst [vmem:[#allocation227_spill] sm:$0xff] %v23360_v39  ;;  %v23362_v32 = vsel %vm6849_vm2, %v6501_v11, %v6933_v17  ;;  %v23369_v10 = vld [vmem:[%s26602_s3 + $0x100] ss:$8 sps:$4 sm:$0xff]   ;;  %10382 = vmatpush1.bf16.msra.mxu1 %v23289_v34  ;;  %27137 = vst [vmem:[#allocation230_spill] sm:$0xff] %v23375_v59  ;;  %v23391_v17 = vld [vmem:[%s26602_s3 + $0x110] ss:$8 sps:$4 sm:$0xff]  }
 0x52c   :  { %27133 = vst [vmem:[#allocation226_spill] sm:$0xff] %v23349_v52  ;;  %27135 = vst [vmem:[#allocation228_spill] sm:$0xff] %v23362_v32  ;;  %v23364_v7 = vsel %vm6851_vm6, %v6594_v63, %v6935_v24  ;;  %v6631_v35 = vpop.f32.mrb[196].mxu1  ;;  %v17740_v49 = vpop.f32.mrb[136].mxu0  ;;  %10383 = vmatprep.subr.bf16.mxu1 %v19201_v27 }
 0x52d   :  { %27136 = vst [vmem:[#allocation229_spill] sm:$0xff] %v23364_v7  ;;  %vm6775_vm3 = vcmp.ge.f32.partialorder %v6631_v35, 0.0  ;;  %v6859_v11 = vmul.f32 0.2, %v6631_v35  ;;  %v6875_v53 = vmul.f32 0.2, %v17740_v49  ;;  %13899 = vmatpush1.bf16.msra.mxu0 %v23340_v2 }
 0x52e   :  { %vm6791_vm7 = vcmp.ge.f32.partialorder %v17740_v49, 0.0  ;;  %v6633_v63 = vpop.f32.mrb[197].mxu1  ;;  %v6724_v0 = vpop.f32.mrb[137].mxu0  ;;  %13961 = vmatprep.subr.bf16.mxu0 %v23355_v38 }
 0x52f   :  { %vm6776_vm8 = vcmp.ge.f32.partialorder %v6633_v63, 0.0  ;;  %v6635_v24 = vpop.f32.mrb[198].mxu1  ;;  %v17741_v51 = vpop.f32.mrb[138].mxu0  ;;  %v6860_v27 = vmul.f32 0.2, %v6633_v63  ;;  %vm6777_vm9 = vcmp.ge.f32.partialorder %v6724_v0, 0.0  ;;  %10384 = vmatpush1.bf16.msra.mxu1 %v23312_v56  ;;  %v23395_v34 = vsel %vm6775_vm3, %v6631_v35, %v6859_v11 }
 0x530   :  { %vm6782_vm10 = vcmp.ge.f32.partialorder %v6635_v24, 0.0  ;;  %v6866_v1 = vmul.f32 0.2, %v6635_v24  ;;  %27138 = vst [vmem:[#allocation231_spill] sm:$0xff] %v23395_v34  ;;  %v23398_v59 = vsel %vm6791_vm7, %v17740_v49, %v6875_v53  ;;  %vm6798_vm11 = vcmp.ge.f32.partialorder %v17741_v51, 0.0  ;;  %v6637_v39 = vpop.f32.mrb[199].mxu1  ;;  %13901 = vmatmul.mubr.bf16.vlgmr.msra.gmra.mrb[184].mxu0 %v22666_v22  ;;  %10385 = vmatprep.subr.bf16.mxu1 %v23328_v45 }
 0x531   :  { %27139 = vst [vmem:[#allocation232_spill] sm:$0xff] %v23398_v59  ;;  %v6882_v7 = vmul.f32 0.2, %v17741_v51  ;;  %v6727_v32 = vpop.f32.mrb[139].mxu0  ;;  %v6861_v28 = vmul.f32 0.2, %v6724_v0  ;;  %13910 = vmatprep.mubr.bf16.mxu0 %v22710_v19  ;;  %13962 = vmatpush1.bf16.msra.mxu0 %v23369_v10  ;;  %v23417_v11 = vsel %vm6776_vm8, %v6633_v63, %v6860_v27 }
 0x532   :  { %v23402_v52 = vsel %vm6782_vm10, %v6635_v24, %v6866_v1  ;;  %vm6783_vm4 = vcmp.ge.f32.partialorder %v6637_v39, 0.0  ;;  %v6867_v20 = vmul.f32 0.2, %v6637_v39  ;;  %vm6784_vm12 = vcmp.ge.f32.partialorder %v6727_v32, 0.0  ;;  %13963 = vmatprep.subr.bf16.mxu0 %v23386_v8  ;;  %v23412_v49 = vld [vmem:[%s26602_s3 + $0x124] ss:$8 sps:$4 sm:$0xff]  }
 0x533   :  { %27140 = vst [vmem:[#allocation233_spill] sm:$0xff] %v23402_v52  ;;  %v23406_v56 = vsel %vm6798_vm11, %v17741_v51, %v6882_v7  ;;  %v6868_v35 = vmul.f32 0.2, %v6727_v32  ;;  %27142 = vst [vmem:[#allocation235_spill] sm:$0xff] %v23417_v11  ;;  %v23424_v51 = vld [vmem:[%s26602_s3 + $0x120] ss:$8 sps:$4 sm:$0xff]   ;;  %10386 = vmatpush1.bf16.msra.mxu1 %v23340_v2  ;;  %v23435_v27 = vsel %vm6777_vm9, %v6724_v0, %v6861_v28 }
 0x534   :  { %27141 = vst [vmem:[#allocation234_spill] sm:$0xff] %v23406_v56  ;;  %v23419_v53 = vsel %vm6783_vm4, %v6637_v39, %v6867_v20  ;;  %v6641_v24 = vpop.f32.mrb[200].mxu1  ;;  %v17744_v7 = vpop.f32.mrb[140].mxu0  ;;  %10468 = vmatprep.subr.bf16.mxu1 %v23355_v38  ;;  %27145 = vst [vmem:[#allocation238_spill] sm:$0xff] %v23435_v27  ;;  %v23441_v2 = vld [vmem:[%s26602_s3 + $0x134] ss:$8 sps:$4 sm:$0xff]  }
 0x535   :  { %27143 = vst [vmem:[#allocation236_spill] sm:$0xff] %v23419_v53  ;;  %v23431_v19 = vsel %vm6784_vm12, %v6727_v32, %v6868_v35  ;;  %vm6789_vm13 = vcmp.ge.f32.partialorder %v6641_v24, 0.0  ;;  %v6873_v20 = vmul.f32 0.2, %v6641_v24  ;;  %v6643_v39 = vpop.f32.mrb[201].mxu1  ;;  %v6740_v63 = vpop.f32.mrb[141].mxu0  ;;  %13964 = vmatpush1.bf16.msra.mxu0 %v23391_v17 }
 0x536   :  { %27144 = vst [vmem:[#allocation237_spill] sm:$0xff] %v23431_v19  ;;  %vm6819_vm14 = vcmp.ge.f32.partialorder %v17744_v7, 0.0  ;;  %v6903_v22 = vmul.f32 0.2, %v17744_v7  ;;  %vm6790_vm1 = vcmp.ge.f32.partialorder %v6643_v39, 0.0  ;;  %vm6805_vm5 = vcmp.ge.f32.partialorder %v6740_v63, 0.0  ;;  %13965 = vmatprep.subr.bf16.mxu0 %v23412_v49  ;;  %10388 = vmatmul.mubr.bf16.vlgmr.msra.gmra.mrb[12].mxu1 %v23267_v50 }
 0x537   :  { %v6874_v32 = vmul.f32 0.2, %v6643_v39  ;;  %v6645_v35 = vpop.f32.mrb[202].mxu1  ;;  %v17745_v1 = vpop.f32.mrb[142].mxu0  ;;  %v23448_v38 = vsel %vm6789_vm13, %v6641_v24, %v6873_v20  ;;  %v23453_v56 = vld [vmem:[%s26602_s3 + $0x130] ss:$8 sps:$4 sm:$0xff]   ;;  %10469 = vmatpush1.bf16.msra.mxu1 %v23369_v10  ;;  %10397 = vmatprep.mubr.bf16.mxu1 %v23267_v50 }
 0x538   :  { %27146 = vst [vmem:[#allocation239_spill] sm:$0xff] %v23448_v38  ;;  %vm6796_vm15 = vcmp.ge.f32.partialorder %v6645_v35, 0.0  ;;  %v6880_v0 = vmul.f32 0.2, %v6645_v35  ;;  %v6647_v45 = vpop.f32.mrb[203].mxu1  ;;  %v6743_v59 = vpop.f32.mrb[143].mxu0  ;;  %13911 = vmatmul.mubr.bf16.gmra.mrb[188].mxu0 %v22707_v40  ;;  %10470 = vmatprep.subr.bf16.mxu1 %v23386_v8  ;;  %v23464_v10 = vsel %vm6819_vm14, %v17744_v7, %v6903_v22 }
 0x539   :  { %v6889_v11 = vmul.f32 0.2, %v6740_v63  ;;  %vm6826_vm2 = vcmp.ge.f32.partialorder %v17745_v1, 0.0  ;;  %v6910_v53 = vmul.f32 0.2, %v17745_v1  ;;  %vm6797_vm6 = vcmp.ge.f32.partialorder %v6647_v45, 0.0  ;;  %13920 = vmatprep.mubr.bf16.mxu0 %v22730_v14  ;;  %13966 = vmatpush1.bf16.msra.mxu0 %v23424_v51 }
 0x53a   :  { %v23459_v24 = vsel %vm6796_vm15, %v6645_v35, %v6880_v0  ;;  %v6881_v20 = vmul.f32 0.2, %v6647_v45  ;;  %vm6812_vm3 = vcmp.ge.f32.partialorder %v6743_v59, 0.0  ;;  %v6896_v28 = vmul.f32 0.2, %v6743_v59  ;;  %27148 = vst [vmem:[#allocation241_spill] sm:$0xff] %v23464_v10  ;;  %13967 = vmatprep.subr.bf16.mxu0 %v23441_v2 }
 0x53b   :  { %27147 = vst [vmem:[#allocation240_spill] sm:$0xff] %v23459_v24  ;;  %v23466_v27 = vsel %vm6826_vm2, %v17745_v1, %v6910_v53  ;;  %v19219_v8 = vld [vmem:[%s26602_s3 + $0x144] ss:$8 sps:$4 sm:$0xff]   ;;  %v23475_v0 = vsel %vm6790_vm1, %v6643_v39, %v6874_v32  ;;  %v23484_v53 = vld [vmem:[%s26602_s3 + $0x140] ss:$8 sps:$4 sm:$0xff]   ;;  %10471 = vmatpush1.bf16.msra.mxu1 %v23391_v17  ;;  %v23490_v35 = vsel %vm6805_vm5, %v6740_v63, %v6889_v11  ;;  %v27203_v24 = vld [vmem:[#allocation178_spill] sm:$0xff] }
 0x53c   :  { %27149 = vst [vmem:[#allocation242_spill] sm:$0xff] %v23466_v27  ;;  %27150 = vst [vmem:[#allocation243_spill] sm:$0xff] %v23475_v0  ;;  %v23477_v14 = vsel %vm6797_vm6, %v6647_v45, %v6881_v20  ;;  %v23479_v40 = vsel %vm6812_vm3, %v6743_v59, %v6896_v28  ;;  %v6651_v22 = vpop.f32.mrb[204].mxu1  ;;  %v17748_v7 = vpop.f32.mrb[144].mxu0  ;;  %v23495_v59 = vld [vmem:[%s26602_s3 + $0x154] ss:$8 sps:$4 sm:$0xff]   ;;  %10472 = vmatprep.subr.bf16.mxu1 %v23412_v49 }
 0x53d   :  { %27151 = vst [vmem:[#allocation244_spill] sm:$0xff] %v23477_v14  ;;  %27152 = vst [vmem:[#allocation245_spill] sm:$0xff] %v23479_v40  ;;  %vm6803_vm7 = vcmp.ge.f32.partialorder %v6651_v22, 0.0  ;;  %v6887_v45 = vmul.f32 0.2, %v6651_v22  ;;  %vm6847_vm8 = vcmp.ge.f32.partialorder %v17748_v7, 0.0  ;;  %13968 = vmatpush1.bf16.msra.mxu0 %v23453_v56 }
 0x53e   :  { %27153 = vst [vmem:[#allocation246_spill] sm:$0xff] %v23490_v35  ;;  %v6931_v39 = vmul.f32 0.2, %v17748_v7  ;;  %v6653_v32 = vpop.f32.mrb[205].mxu1  ;;  %v6756_v28 = vpop.f32.mrb[145].mxu0  ;;  %13969 = vmatprep.subr.bf16.mxu0 %v19219_v8  ;;  %10398 = vmatmul.mubr.bf16.gmra.mrb[16].mxu1 %v23267_v50 }
 0x53f   :  { %v6888_v63 = vmul.f32 0.2, %v6653_v32  ;;  %v6655_v20 = vpop.f32.mrb[206].mxu1  ;;  %v17749_v1 = vpop.f32.mrb[146].mxu0  ;;  %vm6804_vm9 = vcmp.ge.f32.partialorder %v6653_v32, 0.0  ;;  %10473 = vmatpush1.bf16.msra.mxu1 %v23424_v51  ;;  %v23509_v17 = vsel %vm6803_vm7, %v6651_v22, %v6887_v45  ;;  %vm6833_vm4 = vcmp.ge.f32.partialorder %v6756_v28, 0.0 }
 0x540   :  { %v6917_v10 = vmul.f32 0.2, %v6756_v28  ;;  %vm6810_vm10 = vcmp.ge.f32.partialorder %v6655_v20, 0.0  ;;  %v6894_v49 = vmul.f32 0.2, %v6655_v20  ;;  %27154 = vst [vmem:[#allocation247_spill] sm:$0xff] %v23509_v17  ;;  %v23512_v11 = vsel %vm6847_vm8, %v17748_v7, %v6931_v39  ;;  %13921 = vmatmul.mubr.bf16.gmra.mrb[192].mxu0 %v22724_v5  ;;  %10474 = vmatprep.subr.bf16.mxu1 %v23441_v2 }
 0x541   :  { %v19220_v27 = vld [vmem:[%s26602_s3 + $0x150] ss:$8 sps:$4 sm:$0xff]   ;;  %27155 = vst [vmem:[#allocation248_spill] sm:$0xff] %v23512_v11  ;;  %vm6854_vm11 = vcmp.ge.f32.partialorder %v17749_v1, 0.0  ;;  %v6938_v35 = vmul.f32 0.2, %v17749_v1  ;;  %13930 = vmatprep.mubr.bf16.mxu0 %v22744_v47  ;;  %13970 = vmatpush1.bf16.msra.mxu0 %v23484_v53  ;;  %v23529_v45 = vsel %vm6804_vm9, %v6653_v32, %v6888_v63 }
 0x542   :  { %v6657_v40 = vpop.f32.mrb[207].mxu1  ;;  %v6759_v50 = vpop.f32.mrb[147].mxu0  ;;  %v23516_v0 = vsel %vm6810_vm10, %v6655_v20, %v6894_v49  ;;  %13971 = vmatprep.subr.bf16.mxu0 %v23495_v59  ;;  %v19225_v7 = vld [vmem:[%s26602_s3 + $0x164] ss:$8 sps:$4 sm:$0xff]   ;;  %27158 = vst [vmem:[#allocation251_spill] sm:$0xff] %v23529_v45 }
 0x543   :  { %27156 = vst [vmem:[#allocation249_spill] sm:$0xff] %v23516_v0  ;;  %vm6811_vm12 = vcmp.ge.f32.partialorder %v6657_v40, 0.0  ;;  %v6895_v14 = vmul.f32 0.2, %v6657_v40  ;;  %v23520_v51 = vsel %vm6854_vm11, %v17749_v1, %v6938_v35  ;;  %vm6840_vm13 = vcmp.ge.f32.partialorder %v6759_v50, 0.0  ;;  %10475 = vmatpush1.bf16.msra.mxu1 %v23453_v56 }
 0x544   :  { %27157 = vst [vmem:[#allocation250_spill] sm:$0xff] %v23520_v51  ;;  %v6924_v22 = vmul.f32 0.2, %v6759_v50  ;;  %v6661_v20 = vpop.f32.mrb[208].mxu1  ;;  %v23537_v1 = vsel %vm6833_vm4, %v6756_v28, %v6917_v10  ;;  %v19223_v32 = vld [vmem:[%s26602_s3 + $0x160] ss:$8 sps:$4 sm:$0xff]   ;;  %10476 = vmatprep.subr.bf16.mxu1 %v19219_v8 }
 0x545   :  { %v23531_v39 = vsel %vm6811_vm12, %v6657_v40, %v6895_v14  ;;  %27160 = vst [vmem:[#allocation253_spill] sm:$0xff] %v23537_v1  ;;  %v6901_v47 = vmul.f32 0.2, %v6661_v20  ;;  %v6663_v5 = vpop.f32.mrb[209].mxu1  ;;  %vm6817_vm14 = vcmp.ge.f32.partialorder %v6661_v20, 0.0  ;;  %13972 = vmatpush1.bf16.msra.mxu0 %v19220_v27 }
 0x546   :  { %27159 = vst [vmem:[#allocation252_spill] sm:$0xff] %v23531_v39  ;;  %v23539_v49 = vsel %vm6840_vm13, %v6759_v50, %v6924_v22  ;;  %v6902_v14 = vmul.f32 0.2, %v6663_v5  ;;  %v6665_v56 = vpop.f32.mrb[210].mxu1  ;;  %v19228_v10 = vld [vmem:[%s26602_s3 + $0x174] ss:$8 sps:$4 sm:$0xff]   ;;  %13973 = vmatprep.subr.bf16.mxu0 %v19225_v7 }
 0x547   :  { %27161 = vst [vmem:[#allocation254_spill] sm:$0xff] %v23539_v49  ;;  %vm6818_vm1 = vcmp.ge.f32.partialorder %v6663_v5, 0.0  ;;  %vm6824_vm5 = vcmp.ge.f32.partialorder %v6665_v56, 0.0  ;;  %v6908_v63 = vmul.f32 0.2, %v6665_v56  ;;  %v6667_v50 = vpop.f32.mrb[211].mxu1  ;;  %10477 = vmatpush1.bf16.msra.mxu1 %v23484_v53  ;;  %v23552_v22 = vsel %vm6817_vm14, %v6661_v20, %v6901_v47 }
 0x548   :  { %vm6825_vm15 = vcmp.ge.f32.partialorder %v6667_v50, 0.0  ;;  %v6909_v8 = vmul.f32 0.2, %v6667_v50  ;;  %27162 = vst [vmem:[#allocation255_spill] sm:$0xff] %v23552_v22  ;;  %13931 = vmatmul.mubr.bf16.gmra.mrb[196].mxu0 %v22738_v23  ;;  %v19226_v40 = vld [vmem:[%s26602_s3 + $0x170] ss:$8 sps:$4 sm:$0xff]   ;;  %10478 = vmatprep.subr.bf16.mxu1 %v23495_v59  ;;  %v23564_v2 = vsel %vm6818_vm1, %v6663_v5, %v6902_v14 }
 0x549   :  { %v23554_v35 = vsel %vm6824_vm5, %v6665_v56, %v6908_v63  ;;  %v19231_v28 = vld [vmem:[%s26602_s3 + $0x184] ss:$8 sps:$4 sm:$0xff]   ;;  %27164 = vst [vmem:[#allocation257_spill] sm:$0xff] %v23564_v2  ;;  %13940 = vmatprep.mubr.bf16.mxu0 %v22754_v29  ;;  %13974 = vmatpush1.bf16.msra.mxu0 %v19223_v32  ;;  %v19229_v5 = vld [vmem:[%s26602_s3 + $0x180] ss:$8 sps:$4 sm:$0xff]  }
 0x54a   :  { %27163 = vst [vmem:[#allocation256_spill] sm:$0xff] %v23554_v35  ;;  %v23566_v11 = vsel %vm6825_vm15, %v6667_v50, %v6909_v8  ;;  %13975 = vmatprep.subr.bf16.mxu0 %v19228_v10  ;;  %v19234_v50 = vld [vmem:[%s26602_s3 + $0x194] ss:$8 sps:$4 sm:$0xff]   ;;  %v19240_v23 = vld [vmem:[%s26602_s3 + $0x1a4] ss:$8 sps:$4 sm:$0xff]  }
 0x54b   :  { %27165 = vst [vmem:[#allocation258_spill] sm:$0xff] %v23566_v11  ;;  %10479 = vmatpush1.bf16.msra.mxu1 %v19220_v27  ;;  %v24160_v34 = vld [vmem:[%s26602_s3 + $0x400] ss:$8 sps:$4 sm:$0xff]  }
 0x54c   :  { %v6671_v20 = vpop.f32.mrb[212].mxu1  ;;  %10480 = vmatprep.subr.bf16.mxu1 %v19225_v7  ;;  %v19232_v7 = vld [vmem:[%s26602_s3 + $0x190] ss:$8 sps:$4 sm:$0xff]  }
 0x54d   :  { %v6915_v56 = vmul.f32 0.2, %v6671_v20  ;;  %v6673_v63 = vpop.f32.mrb[213].mxu1  ;;  %vm6831_vm2 = vcmp.ge.f32.partialorder %v6671_v20, 0.0  ;;  %13976 = vmatpush1.bf16.msra.mxu0 %v19226_v40 }
 0x54e   :  { %v6916_v59 = vmul.f32 0.2, %v6673_v63  ;;  %v6675_v14 = vpop.f32.mrb[214].mxu1  ;;  %vm6832_vm6 = vcmp.ge.f32.partialorder %v6673_v63, 0.0  ;;  %13977 = vmatprep.subr.bf16.mxu0 %v19231_v28 }
 0x54f   :  { %vm6838_vm3 = vcmp.ge.f32.partialorder %v6675_v14, 0.0  ;;  %v6922_v8 = vmul.f32 0.2, %v6675_v14  ;;  %v6677_v53 = vpop.f32.mrb[215].mxu1  ;;  %10481 = vmatpush1.bf16.msra.mxu1 %v19223_v32  ;;  %v23579_v47 = vsel %vm6831_vm2, %v6671_v20, %v6915_v56 }
 0x550   :  { %vm6839_vm7 = vcmp.ge.f32.partialorder %v6677_v53, 0.0  ;;  %v6923_v27 = vmul.f32 0.2, %v6677_v53  ;;  %27166 = vst [vmem:[#allocation259_spill] sm:$0xff] %v23579_v47  ;;  %13941 = vmatmul.mubr.bf16.gmra.mrb[200].mxu0 %v22748_v12  ;;  %10482 = vmatprep.subr.bf16.mxu1 %v19228_v10  ;;  %v23590_v51 = vsel %vm6832_vm6, %v6673_v63, %v6916_v59  ;;  %v19238_v10 = vld [vmem:[%s26602_s3 + $0x1a0] ss:$8 sps:$4 sm:$0xff]  }
 0x551   :  { %v23581_v29 = vsel %vm6838_vm3, %v6675_v14, %v6922_v8  ;;  %27168 = vst [vmem:[#allocation261_spill] sm:$0xff] %v23590_v51  ;;  %13950 = vmatprep.mubr.bf16.mxu0 %v22765_v60  ;;  %13978 = vmatpush1.bf16.msra.mxu0 %v19229_v5  ;;  %v19243_v59 = vld [vmem:[%s26602_s3 + $0x1b4] ss:$8 sps:$4 sm:$0xff]   ;;  %v19246_v12 = vld [vmem:[%s26602_s3 + $0x1c4] ss:$8 sps:$4 sm:$0xff]  }
 0x552   :  { %27167 = vst [vmem:[#allocation260_spill] sm:$0xff] %v23581_v29  ;;  %v23592_v1 = vsel %vm6839_vm7, %v6677_v53, %v6923_v27  ;;  %13979 = vmatprep.subr.bf16.mxu0 %v19234_v50 }
 0x553   :  { %27169 = vst [vmem:[#allocation262_spill] sm:$0xff] %v23592_v1  ;;  %10483 = vmatpush1.bf16.msra.mxu1 %v19226_v40 }
 0x554   :  { %v6681_v56 = vpop.f32.mrb[216].mxu1  ;;  %10484 = vmatprep.subr.bf16.mxu1 %v19231_v28  ;;  %v19241_v28 = vld [vmem:[%s26602_s3 + $0x1b0] ss:$8 sps:$4 sm:$0xff]  }
 0x555   :  { %v6929_v14 = vmul.f32 0.2, %v6681_v56  ;;  %v6683_v8 = vpop.f32.mrb[217].mxu1  ;;  %vm6845_vm8 = vcmp.ge.f32.partialorder %v6681_v56, 0.0  ;;  %13980 = vmatpush1.bf16.msra.mxu0 %v19232_v7 }
 0x556   :  { %v6930_v53 = vmul.f32 0.2, %v6683_v8  ;;  %v6685_v63 = vpop.f32.mrb[218].mxu1  ;;  %vm6846_vm9 = vcmp.ge.f32.partialorder %v6683_v8, 0.0  ;;  %13981 = vmatprep.subr.bf16.mxu0 %v19240_v23 }
 0x557   :  { %vm6852_vm10 = vcmp.ge.f32.partialorder %v6685_v63, 0.0  ;;  %v6936_v27 = vmul.f32 0.2, %v6685_v63  ;;  %v6687_v20 = vpop.f32.mrb[219].mxu1  ;;  %10485 = vmatpush1.bf16.msra.mxu1 %v19229_v5  ;;  %v23605_v32 = vsel %vm6845_vm8, %v6681_v56, %v6929_v14  ;;  %v19318_v14 = vld [vmem:[%s26602_s3 + $0x1c4] ss:$8 sps:$4 sm:$0xff]  }
 0x558   :  { %vm6853_vm11 = vcmp.ge.f32.partialorder %v6687_v20, 0.0  ;;  %v6937_v40 = vmul.f32 0.2, %v6687_v20  ;;  %27170 = vst [vmem:[#allocation263_spill] sm:$0xff] %v23605_v32  ;;  %13951 = vmatmul.mubr.bf16.gmra.mrb[204].mxu0 %v22759_v42  ;;  %10486 = vmatprep.subr.bf16.mxu1 %v19234_v50  ;;  %v23616_v51 = vsel %vm6846_vm9, %v6683_v8, %v6930_v53  ;;  %v19244_v50 = vld [vmem:[%s26602_s3 + $0x1c0] ss:$8 sps:$4 sm:$0xff]  }
 0x559   :  { %v23607_v60 = vsel %vm6852_vm10, %v6685_v63, %v6936_v27  ;;  %27172 = vst [vmem:[#allocation265_spill] sm:$0xff] %v23616_v51  ;;  %13982 = vmatpush1.bf16.msra.mxu0 %v19238_v10  ;;  %13993 = vmatprep.mubr.bf16.mxu0 %v22712_v36  ;;  %v19316_v8 = vld [vmem:[%s26602_s3 + $0x1c0] ss:$8 sps:$4 sm:$0xff]   ;;  %v19255_v53 = vld [vmem:[%s26602_s3 + $0x1f4] ss:$8 sps:$4 sm:$0xff]  }
 0x55a   :  { %27171 = vst [vmem:[#allocation264_spill] sm:$0xff] %v23607_v60  ;;  %v23618_v1 = vsel %vm6853_vm11, %v6687_v20, %v6937_v40  ;;  %13983 = vmatprep.subr.bf16.mxu0 %v19243_v59  ;;  %v19249_v20 = vld [vmem:[%s26602_s3 + $0x1d4] ss:$8 sps:$4 sm:$0xff]   ;;  %v19322_v63 = vld [vmem:[%s26602_s3 + $0x1d0] ss:$8 sps:$4 sm:$0xff]  }
 0x55b   :  { %27173 = vst [vmem:[#allocation266_spill] sm:$0xff] %v23618_v1  ;;  %10487 = vmatpush1.bf16.msra.mxu1 %v19232_v7  ;;  %v19250_v7 = vld [vmem:[%s26602_s3 + $0x1e0] ss:$8 sps:$4 sm:$0xff]   ;;  %v19253_v27 = vld [vmem:[%s26602_s3 + $0x1f0] ss:$8 sps:$4 sm:$0xff]  }
 0x55c   :  { %10488 = vmatprep.subr.bf16.mxu1 %v19240_v23  ;;  %v19247_v23 = vld [vmem:[%s26602_s3 + $0x1d0] ss:$8 sps:$4 sm:$0xff]   ;;  %v19258_v40 = vld [vmem:[%s26602_s3 + $0x204] ss:$8 sps:$4 sm:$0xff]  }
 0x55d   :  { %13984 = vmatpush1.bf16.msra.mxu0 %v19241_v28 }
 0x55e   :  { %13985 = vmatprep.subr.bf16.mxu0 %v19246_v12  ;;  %v19252_v12 = vld [vmem:[%s26602_s3 + $0x1e4] ss:$8 sps:$4 sm:$0xff]  }
 0x55f   :  { %10489 = vmatpush1.bf16.msra.mxu1 %v19238_v10  ;;  %v19324_v10 = vld [vmem:[%s26602_s3 + $0x1d4] ss:$8 sps:$4 sm:$0xff]  }
 0x560   :  { %10490 = vmatprep.subr.bf16.mxu1 %v19243_v59  ;;  %v19330_v59 = vld [vmem:[%s26602_s3 + $0x1e4] ss:$8 sps:$4 sm:$0xff]  }
 0x561   :  { %13986 = vmatpush1.bf16.msra.mxu0 %v19244_v50  ;;  %v19328_v50 = vld [vmem:[%s26602_s3 + $0x1e0] ss:$8 sps:$4 sm:$0xff]  }
 0x562   :  { %13987 = vmatprep.subr.bf16.mxu0 %v19249_v20  ;;  %v19336_v20 = vld [vmem:[%s26602_s3 + $0x1f4] ss:$8 sps:$4 sm:$0xff]  }
 0x563   :  { %10491 = vmatpush1.bf16.msra.mxu1 %v19241_v28  ;;  %v19256_v28 = vld [vmem:[%s26602_s3 + $0x200] ss:$8 sps:$4 sm:$0xff]  }
 0x564   :  { %10492 = vmatprep.subr.bf16.mxu1 %v19318_v14  ;;  %v19261_v14 = vld [vmem:[%s26602_s3 + $0x214] ss:$8 sps:$4 sm:$0xff]  }
 0x565   :  { %13988 = vmatpush1.bf16.msra.mxu0 %v19247_v23  ;;  %v19334_v23 = vld [vmem:[%s26602_s3 + $0x1f0] ss:$8 sps:$4 sm:$0xff]  }
 0x566   :  { %13989 = vmatprep.subr.bf16.mxu0 %v19252_v12  ;;  %v19342_v12 = vld [vmem:[%s26602_s3 + $0x204] ss:$8 sps:$4 sm:$0xff]  }
 0x567   :  { %10493 = vmatpush1.bf16.msra.mxu1 %v19316_v8  ;;  %v19264_v8 = vld [vmem:[%s26602_s3 + $0x224] ss:$8 sps:$4 sm:$0xff]  }
 0x568   :  { %10494 = vmatprep.subr.bf16.mxu1 %v19324_v10  ;;  %v19262_v10 = vld [vmem:[%s26602_s3 + $0x220] ss:$8 sps:$4 sm:$0xff]  }
 0x569   :  { %13990 = vmatpush1.bf16.msra.mxu0 %v19250_v7  ;;  %v19259_v7 = vld [vmem:[%s26602_s3 + $0x210] ss:$8 sps:$4 sm:$0xff]  }
 0x56a   :  { %13991 = vmatprep.subr.bf16.mxu0 %v19255_v53  ;;  %v19267_v53 = vld [vmem:[%s26602_s3 + $0x234] ss:$8 sps:$4 sm:$0xff]  }
 0x56b   :  { %10495 = vmatpush1.bf16.msra.mxu1 %v19322_v63  ;;  %v19265_v63 = vld [vmem:[%s26602_s3 + $0x230] ss:$8 sps:$4 sm:$0xff]  }
 0x56c   :  { %10496 = vmatprep.subr.bf16.mxu1 %v19330_v59  ;;  %v19270_v59 = vld [vmem:[%s26602_s3 + $0x244] ss:$8 sps:$4 sm:$0xff]  }
 0x56d   :  { %13992 = vmatpush1.bf16.msra.mxu0 %v19253_v27  ;;  %v19268_v27 = vld [vmem:[%s26602_s3 + $0x240] ss:$8 sps:$4 sm:$0xff]  }
 0x56e   :  { %14054 = vmatprep.subr.bf16.mxu0 %v19258_v40  ;;  %v19273_v40 = vld [vmem:[%s26602_s3 + $0x254] ss:$8 sps:$4 sm:$0xff]  }
 0x56f   :  { %10497 = vmatpush1.bf16.msra.mxu1 %v19328_v50  ;;  %v19276_v50 = vld [vmem:[%s26602_s3 + $0x264] ss:$8 sps:$4 sm:$0xff]  }
 0x570   :  { %13994 = vmatmul.mubr.bf16.vlgmr.msra.gmra.mrb[184].mxu0 %v22675_v30  ;;  %10498 = vmatprep.subr.bf16.mxu1 %v19336_v20  ;;  %v19274_v20 = vld [vmem:[%s26602_s3 + $0x260] ss:$8 sps:$4 sm:$0xff]  }
 0x571   :  { %14003 = vmatprep.mubr.bf16.mxu0 %v22714_v44  ;;  %14055 = vmatpush1.bf16.msra.mxu0 %v19256_v28  ;;  %v19271_v28 = vld [vmem:[%s26602_s3 + $0x250] ss:$8 sps:$4 sm:$0xff]  }
 0x572   :  { %14056 = vmatprep.subr.bf16.mxu0 %v19261_v14  ;;  %v19279_v14 = vld [vmem:[%s26602_s3 + $0x274] ss:$8 sps:$4 sm:$0xff]  }
 0x573   :  { %10499 = vmatpush1.bf16.msra.mxu1 %v19334_v23  ;;  %v19277_v23 = vld [vmem:[%s26602_s3 + $0x270] ss:$8 sps:$4 sm:$0xff]  }
 0x574   :  { %10581 = vmatprep.subr.bf16.mxu1 %v19342_v12  ;;  %v19282_v12 = vld [vmem:[%s26602_s3 + $0x284] ss:$8 sps:$4 sm:$0xff]  }
 0x575   :  { %14057 = vmatpush1.bf16.msra.mxu0 %v19259_v7  ;;  %v19280_v7 = vld [vmem:[%s26602_s3 + $0x280] ss:$8 sps:$4 sm:$0xff]  }
 0x576   :  { %14058 = vmatprep.subr.bf16.mxu0 %v19264_v8  ;;  %v19285_v8 = vld [vmem:[%s26602_s3 + $0x294] ss:$8 sps:$4 sm:$0xff]  }
 0x578   :  { %14004 = vmatmul.mubr.bf16.gmra.mrb[188].mxu0 %v22719_v26 }
 0x579   :  { %14013 = vmatprep.mubr.bf16.mxu0 %v22732_v62  ;;  %14059 = vmatpush1.bf16.msra.mxu0 %v19262_v10 }
 0x57a   :  { %14060 = vmatprep.subr.bf16.mxu0 %v19267_v53 }
 0x57d   :  { %14061 = vmatpush1.bf16.msra.mxu0 %v19265_v63  ;;  %v19283_v63 = vld [vmem:[%s26602_s3 + $0x290] ss:$8 sps:$4 sm:$0xff]  }
 0x57e   :  { %14062 = vmatprep.subr.bf16.mxu0 %v19270_v59  ;;  %v19288_v59 = vld [vmem:[%s26602_s3 + $0x2a4] ss:$8 sps:$4 sm:$0xff]  }
 0x580   :  { %14014 = vmatmul.mubr.bf16.gmra.mrb[192].mxu0 %v22726_v48 }
 0x581   :  { %14023 = vmatprep.mubr.bf16.mxu0 %v22746_v37  ;;  %14063 = vmatpush1.bf16.msra.mxu0 %v19268_v27 }
 0x582   :  { %14064 = vmatprep.subr.bf16.mxu0 %v19273_v40 }
 0x585   :  { %14065 = vmatpush1.bf16.msra.mxu0 %v19271_v28 }
 0x586   :  { %14066 = vmatprep.subr.bf16.mxu0 %v19276_v50 }
 0x588   :  { %14024 = vmatmul.mubr.bf16.gmra.mrb[196].mxu0 %v22741_v9 }
 0x589   :  { %14033 = vmatprep.mubr.bf16.mxu0 %v22756_v31  ;;  %14067 = vmatpush1.bf16.msra.mxu0 %v19274_v20  ;;  %v19286_v20 = vld [vmem:[%s26602_s3 + $0x2a0] ss:$8 sps:$4 sm:$0xff]  }
 0x58a   :  { %14068 = vmatprep.subr.bf16.mxu0 %v19279_v14 }
 0x58d   :  { %14069 = vmatpush1.bf16.msra.mxu0 %v19277_v23 }
 0x58e   :  { %14070 = vmatprep.subr.bf16.mxu0 %v19282_v12 }
 0x590   :  { %14034 = vmatmul.mubr.bf16.gmra.mrb[200].mxu0 %v22750_v21  ;;  %v7500_v10 = vpop.f32.mrb[220].mxu1  ;;  %v7593_v53 = vpop.f32.mrb[148].mxu0 }
 0x591   :  { %14043 = vmatprep.mubr.bf16.mxu0 %v22767_v43  ;;  %14071 = vmatpush1.bf16.msra.mxu0 %v19280_v7  ;;  %vm7826_vm4 = vcmp.ge.f32.partialorder %v7500_v10, 0.0  ;;  %v7910_v27 = vmul.f32 0.2, %v7500_v10  ;;  %v7912_v40 = vmul.f32 0.2, %v7593_v53  ;;  %vm7828_vm12 = vcmp.ge.f32.partialorder %v7593_v53, 0.0 }
 0x592   :  { %14072 = vmatprep.subr.bf16.mxu0 %v19285_v8  ;;  %v7502_v28 = vpop.f32.mrb[221].mxu1  ;;  %v7595_v50 = vpop.f32.mrb[149].mxu0  ;;  %v19291_v7 = vld [vmem:[%s26602_s3 + $0x2b4] ss:$8 sps:$4 sm:$0xff]  }
 0x593   :  { %v7911_v14 = vmul.f32 0.2, %v7502_v28  ;;  %v7504_v23 = vpop.f32.mrb[222].mxu1  ;;  %v7597_v12 = vpop.f32.mrb[150].mxu0  ;;  %v7994_v56 = vsel %vm7826_vm4, %v7500_v10, %v7910_v27  ;;  %v7913_v5 = vmul.f32 0.2, %v7595_v50  ;;  %v7996_v8 = vsel %vm7828_vm12, %v7593_v53, %v7912_v40 }
 0x594   :  { %vm7833_vm13 = vcmp.ge.f32.partialorder %v7504_v23, 0.0  ;;  %v7917_v43 = vmul.f32 0.2, %v7504_v23  ;;  %vm7827_vm14 = vcmp.ge.f32.partialorder %v7502_v28, 0.0  ;;  %vm7835_vm1 = vcmp.ge.f32.partialorder %v7597_v12, 0.0  ;;  %v7506_v31 = vpop.f32.mrb[223].mxu1 }
 0x595   :  { %14073 = vmatpush1.bf16.msra.mxu0 %v19283_v63  ;;  %v7919_v21 = vmul.f32 0.2, %v7597_v12  ;;  %v7599_v9 = vpop.f32.mrb[151].mxu0  ;;  %vm7829_vm5 = vcmp.ge.f32.partialorder %v7595_v50, 0.0  ;;  %vm7834_vm15 = vcmp.ge.f32.partialorder %v7506_v31, 0.0  ;;  %v7995_v27 = vsel %vm7827_vm14, %v7502_v28, %v7911_v14 }
 0x596   :  { %14074 = vmatprep.subr.bf16.mxu0 %v19288_v59  ;;  %v8001_v37 = vsel %vm7833_vm13, %v7504_v23, %v7917_v43  ;;  %v7918_v48 = vmul.f32 0.2, %v7506_v31  ;;  %vm7836_vm2 = vcmp.ge.f32.partialorder %v7599_v9, 0.0  ;;  %v7920_v10 = vmul.f32 0.2, %v7599_v9 }
 0x597   :  { %v23752_v62 = vpack.c.bf16 %v8001_v37, %v7994_v56  ;;  %v8003_v26 = vsel %vm7835_vm1, %v7597_v12, %v7919_v21  ;;  %v19289_v43 = vld [vmem:[%s26602_s3 + $0x2b0] ss:$8 sps:$4 sm:$0xff]   ;;  %v7997_v59 = vsel %vm7829_vm5, %v7595_v50, %v7913_v5  ;;  %v19294_v21 = vld [vmem:[%s26602_s3 + $0x2c4] ss:$8 sps:$4 sm:$0xff]   ;;  %v19297_v12 = vld [vmem:[%s26602_s3 + $0x2d4] ss:$8 sps:$4 sm:$0xff]  }
 0x598   :  { %14044 = vmatmul.mubr.bf16.gmra.mrb[204].mxu0 %v22762_v3  ;;  %v23755_v63 = vpack.c.bf16 %v8003_v26, %v7996_v8  ;;  %v8002_v53 = vsel %vm7834_vm15, %v7506_v31, %v7918_v48  ;;  %v8004_v40 = vsel %vm7836_vm2, %v7599_v9, %v7920_v10  ;;  %v19292_v9 = vld [vmem:[%s26602_s3 + $0x2c0] ss:$8 sps:$4 sm:$0xff]   ;;  %v19295_v10 = vld [vmem:[%s26602_s3 + $0x2d0] ss:$8 sps:$4 sm:$0xff]  }
 0x599   :  { %27174 = vst [vmem:[#allocation267_spill] sm:$0xff] %v23752_v62  ;;  %14075 = vmatpush1.bf16.msra.mxu0 %v19286_v20  ;;  %14086 = vmatprep.mubr.bf16.mxu0 %v22826_v15  ;;  %v23761_v37 = vpack.c.bf16 %v8002_v53, %v7995_v27  ;;  %v23766_v28 = vpack.c.bf16 %v8004_v40, %v7997_v59 }
 0x59a   :  { %27175 = vst [vmem:[#allocation268_spill] sm:$0xff] %v23755_v63  ;;  %14076 = vmatprep.subr.bf16.mxu0 %v19291_v7 }
 0x59b   :  { %27176 = vst [vmem:[#allocation269_spill] sm:$0xff] %v23761_v37  ;;  %v7510_v56 = vpop.f32.mrb[224].mxu1  ;;  %v7603_v26 = vpop.f32.mrb[152].mxu0  ;;  %27177 = vst [vmem:[#allocation270_spill] sm:$0xff] %v23766_v28  ;;  %10407 = vmatprep.mubr.bf16.mxu1 %v23761_v37 }
 0x59c   :  { %vm7840_vm6 = vcmp.ge.f32.partialorder %v7510_v56, 0.0  ;;  %v7924_v48 = vmul.f32 0.2, %v7510_v56  ;;  %v7926_v31 = vmul.f32 0.2, %v7603_v26  ;;  %vm7842_vm3 = vcmp.ge.f32.partialorder %v7603_v26, 0.0  ;;  %10408 = vmatmul.mubr.bf16.gmra.mrb[20].mxu1 %v23752_v62 }
 0x59d   :  { %v7512_v20 = vpop.f32.mrb[225].mxu1  ;;  %v7605_v5 = vpop.f32.mrb[153].mxu0  ;;  %14077 = vmatpush1.bf16.msra.mxu0 %v19289_v43 }
 0x59e   :  { %v8008_v50 = vsel %vm7840_vm6, %v7510_v56, %v7924_v48  ;;  %v7514_v14 = vpop.f32.mrb[226].mxu1  ;;  %v7607_v23 = vpop.f32.mrb[154].mxu0  ;;  %14078 = vmatprep.subr.bf16.mxu0 %v19294_v21  ;;  %vm7841_vm7 = vcmp.ge.f32.partialorder %v7512_v20, 0.0  ;;  %v7925_v7 = vmul.f32 0.2, %v7512_v20  ;;  %v8010_v27 = vsel %vm7842_vm3, %v7603_v26, %v7926_v31 }
 0x59f   :  { %vm7847_vm8 = vcmp.ge.f32.partialorder %v7514_v14, 0.0  ;;  %v7931_v8 = vmul.f32 0.2, %v7514_v14  ;;  %vm7843_vm9 = vcmp.ge.f32.partialorder %v7605_v5, 0.0  ;;  %vm7849_vm10 = vcmp.ge.f32.partialorder %v7607_v23, 0.0  ;;  %v7516_v43 = vpop.f32.mrb[227].mxu1 }
 0x5a0   :  { %v7933_v53 = vmul.f32 0.2, %v7607_v23  ;;  %v7609_v59 = vpop.f32.mrb[155].mxu0  ;;  %v7927_v40 = vmul.f32 0.2, %v7605_v5  ;;  %vm7848_vm11 = vcmp.ge.f32.partialorder %v7516_v43, 0.0 }
 0x5a1   :  { %v8015_v21 = vsel %vm7847_vm8, %v7514_v14, %v7931_v8  ;;  %v7932_v56 = vmul.f32 0.2, %v7516_v43  ;;  %14079 = vmatpush1.bf16.msra.mxu0 %v19292_v9  ;;  %vm7850_vm4 = vcmp.ge.f32.partialorder %v7609_v59, 0.0  ;;  %v7934_v3 = vmul.f32 0.2, %v7609_v59 }
 0x5a2   :  { %v23780_v48 = vpack.c.bf16 %v8015_v21, %v8008_v50  ;;  %v8017_v15 = vsel %vm7849_vm10, %v7607_v23, %v7933_v53  ;;  %14080 = vmatprep.subr.bf16.mxu0 %v19297_v12  ;;  %v19300_v26 = vld [vmem:[%s26602_s3 + $0x2e4] ss:$8 sps:$4 sm:$0xff]   ;;  %v19298_v14 = vld [vmem:[%s26602_s3 + $0x2e0] ss:$8 sps:$4 sm:$0xff]   ;;  %v8009_v12 = vsel %vm7841_vm7, %v7512_v20, %v7925_v7  ;;  %v8011_v53 = vsel %vm7843_vm9, %v7605_v5, %v7927_v40  ;;  %v19301_v40 = vld [vmem:[%s26602_s3 + $0x2f0] ss:$8 sps:$4 sm:$0xff]  }
 0x5a3   :  { %v23785_v31 = vpack.c.bf16 %v8017_v15, %v8010_v27  ;;  %v8016_v44 = vsel %vm7848_vm11, %v7516_v43, %v7932_v56  ;;  %v7520_v30 = vpop.f32.mrb[228].mxu1  ;;  %v7613_v36 = vpop.f32.mrb[156].mxu0  ;;  %v8018_v9 = vsel %vm7850_vm4, %v7609_v59, %v7934_v3  ;;  %v19303_v15 = vld [vmem:[%s26602_s3 + $0x2f4] ss:$8 sps:$4 sm:$0xff]  }
 0x5a4   :  { %27178 = vst [vmem:[#allocation271_spill] sm:$0xff] %v23780_v48  ;;  %vm7854_vm12 = vcmp.ge.f32.partialorder %v7520_v30, 0.0  ;;  %v7938_v50 = vmul.f32 0.2, %v7520_v30  ;;  %v7522_v23 = vpop.f32.mrb[229].mxu1  ;;  %v7615_v8 = vpop.f32.mrb[157].mxu0  ;;  %v23795_v43 = vpack.c.bf16 %v8016_v44, %v8009_v12  ;;  %v23797_v56 = vpack.c.bf16 %v8018_v9, %v8011_v53 }
 0x5a5   :  { %27179 = vst [vmem:[#allocation272_spill] sm:$0xff] %v23785_v31  ;;  %vm7856_vm13 = vcmp.ge.f32.partialorder %v7613_v36, 0.0  ;;  %v7940_v21 = vmul.f32 0.2, %v7613_v36  ;;  %14081 = vmatpush1.bf16.msra.mxu0 %v19295_v10  ;;  %vm7855_vm14 = vcmp.ge.f32.partialorder %v7522_v23, 0.0  ;;  %v7524_v3 = vpop.f32.mrb[230].mxu1 }
 0x5a6   :  { %v7939_v27 = vmul.f32 0.2, %v7522_v23  ;;  %27180 = vst [vmem:[#allocation273_spill] sm:$0xff] %v23795_v43  ;;  %v7617_v59 = vpop.f32.mrb[158].mxu0  ;;  %14082 = vmatprep.subr.bf16.mxu0 %v19300_v26  ;;  %27181 = vst [vmem:[#allocation274_spill] sm:$0xff] %v23797_v56  ;;  %v8022_v20 = vsel %vm7854_vm12, %v7520_v30, %v7938_v50  ;;  %vm7857_vm1 = vcmp.ge.f32.partialorder %v7615_v8, 0.0  ;;  %10417 = vmatprep.mubr.bf16.mxu1 %v23795_v43 }
 0x5a7   :  { %vm7861_vm5 = vcmp.ge.f32.partialorder %v7524_v3, 0.0  ;;  %v7945_v5 = vmul.f32 0.2, %v7524_v3  ;;  %v7526_v7 = vpop.f32.mrb[231].mxu1  ;;  %v7619_v10 = vpop.f32.mrb[159].mxu0  ;;  %vm7863_vm15 = vcmp.ge.f32.partialorder %v7617_v59, 0.0  ;;  %10418 = vmatmul.mubr.bf16.gmra.mrb[24].mxu1 %v23780_v48  ;;  %v8024_v50 = vsel %vm7856_vm13, %v7613_v36, %v7940_v21 }
 0x5a8   :  { %v7941_v42 = vmul.f32 0.2, %v7615_v8  ;;  %v7947_v44 = vmul.f32 0.2, %v7617_v59  ;;  %vm7862_vm2 = vcmp.ge.f32.partialorder %v7526_v7, 0.0  ;;  %vm7864_vm6 = vcmp.ge.f32.partialorder %v7619_v10, 0.0 }
 0x5a9   :  { %v8029_v26 = vsel %vm7861_vm5, %v7524_v3, %v7945_v5  ;;  %v7946_v9 = vmul.f32 0.2, %v7526_v7  ;;  %v7948_v30 = vmul.f32 0.2, %v7619_v10  ;;  %14083 = vmatpush1.bf16.msra.mxu0 %v19298_v14  ;;  %v19306_v43 = vld [vmem:[%s26602_s3 + $0x304] ss:$8 sps:$4 sm:$0xff]   ;;  %v8023_v62 = vsel %vm7855_vm14, %v7522_v23, %v7939_v27 }
 0x5aa   :  { %v23806_v12 = vpack.c.bf16 %v8029_v26, %v8022_v20  ;;  %v8031_v53 = vsel %vm7863_vm15, %v7617_v59, %v7947_v44  ;;  %14084 = vmatprep.subr.bf16.mxu0 %v19303_v15  ;;  %v8025_v14 = vsel %vm7857_vm1, %v7615_v8, %v7941_v42  ;;  %v19309_v42 = vld [vmem:[%s26602_s3 + $0x314] ss:$8 sps:$4 sm:$0xff]  }
 0x5ab   :  { %v23812_v37 = vpack.c.bf16 %v8031_v53, %v8024_v50  ;;  %v8030_v3 = vsel %vm7862_vm2, %v7526_v7, %v7946_v9  ;;  %v8032_v5 = vsel %vm7864_vm6, %v7619_v10, %v7948_v30  ;;  %v7530_v48 = vpop.f32.mrb[232].mxu1  ;;  %v7623_v51 = vpop.f32.mrb[160].mxu0  ;;  %v19304_v7 = vld [vmem:[%s26602_s3 + $0x300] ss:$8 sps:$4 sm:$0xff]  }
 0x5ac   :  { %27182 = vst [vmem:[#allocation275_spill] sm:$0xff] %v23806_v12  ;;  %vm7868_vm3 = vcmp.ge.f32.partialorder %v7530_v48, 0.0  ;;  %v7952_v36 = vmul.f32 0.2, %v7530_v48  ;;  %v7954_v21 = vmul.f32 0.2, %v7623_v51  ;;  %v23815_v20 = vpack.c.bf16 %v8030_v3, %v8023_v62 }
 0x5ad   :  { %27183 = vst [vmem:[#allocation276_spill] sm:$0xff] %v23812_v37  ;;  %vm7870_vm7 = vcmp.ge.f32.partialorder %v7623_v51, 0.0  ;;  %v7532_v59 = vpop.f32.mrb[233].mxu1  ;;  %v7625_v15 = vpop.f32.mrb[161].mxu0  ;;  %14085 = vmatpush1.bf16.msra.mxu0 %v19301_v40  ;;  %v23817_v44 = vpack.c.bf16 %v8032_v5, %v8025_v14  ;;  %v19307_v5 = vld [vmem:[%s26602_s3 + $0x310] ss:$8 sps:$4 sm:$0xff]  }
 0x5ae   :  { %27184 = vst [vmem:[#allocation277_spill] sm:$0xff] %v23815_v20  ;;  %v8036_v23 = vsel %vm7868_vm3, %v7530_v48, %v7952_v36  ;;  %v7534_v27 = vpop.f32.mrb[234].mxu1  ;;  %v7627_v26 = vpop.f32.mrb[162].mxu0  ;;  %14147 = vmatprep.subr.bf16.mxu0 %v19306_v43  ;;  %vm7869_vm8 = vcmp.ge.f32.partialorder %v7532_v59, 0.0  ;;  %v7953_v8 = vmul.f32 0.2, %v7532_v59  ;;  %10427 = vmatprep.mubr.bf16.mxu1 %v23815_v20  ;;  %v8038_v10 = vsel %vm7870_vm7, %v7623_v51, %v7954_v21 }
 0x5af   :  { %27185 = vst [vmem:[#allocation278_spill] sm:$0xff] %v23817_v44  ;;  %vm7875_vm9 = vcmp.ge.f32.partialorder %v7534_v27, 0.0  ;;  %v7959_v62 = vmul.f32 0.2, %v7534_v27  ;;  %vm7871_vm10 = vcmp.ge.f32.partialorder %v7625_v15, 0.0  ;;  %vm7877_vm11 = vcmp.ge.f32.partialorder %v7627_v26, 0.0  ;;  %10428 = vmatmul.mubr.bf16.gmra.mrb[28].mxu1 %v23806_v12 }
 0x5b0   :  { %v7961_v48 = vmul.f32 0.2, %v7627_v26  ;;  %v7536_v40 = vpop.f32.mrb[235].mxu1  ;;  %v7629_v9 = vpop.f32.mrb[163].mxu0  ;;  %14087 = vmatmul.mubr.bf16.vlgmr.msra.gmra.mrb[184].mxu0 %v22822_v58  ;;  %v7955_v43 = vmul.f32 0.2, %v7625_v15 }
 0x5b1   :  { %v8043_v30 = vsel %vm7875_vm9, %v7534_v27, %v7959_v62  ;;  %vm7876_vm4 = vcmp.ge.f32.partialorder %v7536_v40, 0.0  ;;  %v7960_v50 = vmul.f32 0.2, %v7536_v40  ;;  %14096 = vmatprep.mubr.bf16.mxu0 %v22836_v25  ;;  %vm7878_vm12 = vcmp.ge.f32.partialorder %v7629_v9, 0.0  ;;  %14148 = vmatpush1.bf16.msra.mxu0 %v19304_v7  ;;  %v19312_v62 = vld [vmem:[%s26602_s3 + $0x324] ss:$8 sps:$4 sm:$0xff]  }
 0x5b2   :  { %v23830_v53 = vpack.c.bf16 %v8043_v30, %v8036_v23  ;;  %v8045_v3 = vsel %vm7877_vm11, %v7627_v26, %v7961_v48  ;;  %v7962_v51 = vmul.f32 0.2, %v7629_v9  ;;  %14149 = vmatprep.subr.bf16.mxu0 %v19309_v42  ;;  %v19310_v7 = vld [vmem:[%s26602_s3 + $0x320] ss:$8 sps:$4 sm:$0xff]   ;;  %v19315_v42 = vld [vmem:[%s26602_s3 + $0x334] ss:$8 sps:$4 sm:$0xff]  }
 0x5b3   :  { %v23835_v14 = vpack.c.bf16 %v8045_v3, %v8038_v10  ;;  %v8044_v36 = vsel %vm7876_vm4, %v7536_v40, %v7960_v50  ;;  %v7540_v21 = vpop.f32.mrb[236].mxu1  ;;  %v7633_v27 = vpop.f32.mrb[164].mxu0  ;;  %v8037_v10 = vsel %vm7869_vm8, %v7532_v59, %v7953_v8  ;;  %v8039_v40 = vsel %vm7871_vm10, %v7625_v15, %v7955_v43 }
 0x5b4   :  { %27186 = vst [vmem:[#allocation279_spill] sm:$0xff] %v23830_v53  ;;  %v8046_v23 = vsel %vm7878_vm12, %v7629_v9, %v7962_v51  ;;  %vm7882_vm13 = vcmp.ge.f32.partialorder %v7540_v21, 0.0  ;;  %v7966_v26 = vmul.f32 0.2, %v7540_v21  ;;  %v7542_v48 = vpop.f32.mrb[237].mxu1  ;;  %v7635_v30 = vpop.f32.mrb[165].mxu0  ;;  %v23848_v3 = vpack.c.bf16 %v8044_v36, %v8037_v10 }
 0x5b5   :  { %27187 = vst [vmem:[#allocation280_spill] sm:$0xff] %v23835_v14  ;;  %vm7884_vm14 = vcmp.ge.f32.partialorder %v7633_v27, 0.0  ;;  %v7968_v50 = vmul.f32 0.2, %v7633_v27  ;;  %vm7883_vm1 = vcmp.ge.f32.partialorder %v7542_v48, 0.0  ;;  %14150 = vmatpush1.bf16.msra.mxu0 %v19307_v5  ;;  %v7544_v51 = vpop.f32.mrb[238].mxu1  ;;  %v23850_v58 = vpack.c.bf16 %v8046_v23, %v8039_v40 }
 0x5b6   :  { %v7967_v9 = vmul.f32 0.2, %v7542_v48  ;;  %27188 = vst [vmem:[#allocation281_spill] sm:$0xff] %v23848_v3  ;;  %v7637_v25 = vpop.f32.mrb[166].mxu0  ;;  %v8050_v12 = vsel %vm7882_vm13, %v7540_v21, %v7966_v26  ;;  %vm7885_vm5 = vcmp.ge.f32.partialorder %v7635_v30, 0.0  ;;  %vm7889_vm15 = vcmp.ge.f32.partialorder %v7544_v51, 0.0  ;;  %14151 = vmatprep.subr.bf16.mxu0 %v19312_v62  ;;  %10437 = vmatprep.mubr.bf16.mxu1 %v23848_v3 }
 0x5b7   :  { %27189 = vst [vmem:[#allocation282_spill] sm:$0xff] %v23850_v58  ;;  %v7973_v59 = vmul.f32 0.2, %v7544_v51  ;;  %v7546_v15 = vpop.f32.mrb[239].mxu1  ;;  %v7639_v8 = vpop.f32.mrb[167].mxu0  ;;  %vm7891_vm2 = vcmp.ge.f32.partialorder %v7637_v25, 0.0  ;;  %10438 = vmatmul.mubr.bf16.gmra.mrb[32].mxu1 %v23830_v53  ;;  %v8052_v23 = vsel %vm7884_vm14, %v7633_v27, %v7968_v50 }
 0x5b8   :  { %v7969_v43 = vmul.f32 0.2, %v7635_v30  ;;  %v7975_v20 = vmul.f32 0.2, %v7637_v25  ;;  %vm7890_vm6 = vcmp.ge.f32.partialorder %v7546_v15, 0.0  ;;  %14097 = vmatmul.mubr.bf16.gmra.mrb[188].mxu0 %v22832_v13  ;;  %vm7892_vm3 = vcmp.ge.f32.partialorder %v7639_v8, 0.0 }
 0x5b9   :  { %v8057_v5 = vsel %vm7889_vm15, %v7544_v51, %v7973_v59  ;;  %v7974_v36 = vmul.f32 0.2, %v7546_v15  ;;  %v7976_v21 = vmul.f32 0.2, %v7639_v8  ;;  %14106 = vmatprep.mubr.bf16.mxu0 %v22854_v57  ;;  %14152 = vmatpush1.bf16.msra.mxu0 %v19310_v7  ;;  %v19313_v10 = vld [vmem:[%s26602_s3 + $0x330] ss:$8 sps:$4 sm:$0xff]   ;;  %v8051_v40 = vsel %vm7883_vm1, %v7542_v48, %v7967_v9 }
 0x5ba   :  { %v23858_v26 = vpack.c.bf16 %v8057_v5, %v8050_v12  ;;  %v8059_v62 = vsel %vm7891_vm2, %v7637_v25, %v7975_v20  ;;  %14153 = vmatprep.subr.bf16.mxu0 %v19315_v42  ;;  %v23869_v12 = vld [vmem:[%s26602_s3 + $0x344] ss:$8 sps:$4 sm:$0xff]   ;;  %v8053_v25 = vsel %vm7885_vm5, %v7635_v30, %v7969_v43  ;;  %v23879_v5 = vld [vmem:[%s26602_s3 + $0x340] ss:$8 sps:$4 sm:$0xff]   ;;  %v23884_v30 = vld [vmem:[%s26602_s3 + $0x354] ss:$8 sps:$4 sm:$0xff]  }
 0x5bb   :  { %v23864_v51 = vpack.c.bf16 %v8059_v62, %v8052_v23  ;;  %v8058_v59 = vsel %vm7890_vm6, %v7546_v15, %v7974_v36  ;;  %v8060_v13 = vsel %vm7892_vm3, %v7639_v8, %v7976_v21  ;;  %v7550_v53 = vpop.f32.mrb[240].mxu1  ;;  %v7643_v3 = vpop.f32.mrb[168].mxu0 }
 0x5bc   :  { %27190 = vst [vmem:[#allocation283_spill] sm:$0xff] %v23858_v26  ;;  %vm7896_vm7 = vcmp.ge.f32.partialorder %v7550_v53, 0.0  ;;  %v7980_v20 = vmul.f32 0.2, %v7550_v53  ;;  %v7982_v27 = vmul.f32 0.2, %v7643_v3  ;;  %v23872_v50 = vpack.c.bf16 %v8058_v59, %v8051_v40 }
 0x5bd   :  { %27191 = vst [vmem:[#allocation284_spill] sm:$0xff] %v23864_v51  ;;  %vm7898_vm8 = vcmp.ge.f32.partialorder %v7643_v3, 0.0  ;;  %v7552_v7 = vpop.f32.mrb[241].mxu1  ;;  %v7645_v48 = vpop.f32.mrb[169].mxu0  ;;  %v23874_v9 = vpack.c.bf16 %v8060_v13, %v8053_v25  ;;  %14154 = vmatpush1.bf16.msra.mxu0 %v19313_v10 }
 0x5be   :  { %27192 = vst [vmem:[#allocation285_spill] sm:$0xff] %v23872_v50  ;;  %v8064_v15 = vsel %vm7896_vm7, %v7550_v53, %v7980_v20  ;;  %v7554_v42 = vpop.f32.mrb[242].mxu1  ;;  %v7647_v8 = vpop.f32.mrb[170].mxu0  ;;  %vm7897_vm9 = vcmp.ge.f32.partialorder %v7552_v7, 0.0  ;;  %v7981_v43 = vmul.f32 0.2, %v7552_v7  ;;  %10447 = vmatprep.mubr.bf16.mxu1 %v23872_v50  ;;  %14155 = vmatprep.subr.bf16.mxu0 %v23869_v12  ;;  %v8066_v53 = vsel %vm7898_vm8, %v7643_v3, %v7982_v27 }
 0x5bf   :  { %27193 = vst [vmem:[#allocation286_spill] sm:$0xff] %v23874_v9  ;;  %vm7903_vm10 = vcmp.ge.f32.partialorder %v7554_v42, 0.0  ;;  %v7987_v13 = vmul.f32 0.2, %v7554_v42  ;;  %vm7899_vm11 = vcmp.ge.f32.partialorder %v7645_v48, 0.0  ;;  %vm7905_vm4 = vcmp.ge.f32.partialorder %v7647_v8, 0.0  ;;  %10448 = vmatmul.mubr.bf16.gmra.mrb[36].mxu1 %v23858_v26 }
 0x5c0   :  { %v7989_v36 = vmul.f32 0.2, %v7647_v8  ;;  %v7556_v21 = vpop.f32.mrb[243].mxu1  ;;  %v7649_v23 = vpop.f32.mrb[171].mxu0  ;;  %14107 = vmatmul.mubr.bf16.gmra.mrb[192].mxu0 %v22844_v4  ;;  %v7983_v62 = vmul.f32 0.2, %v7645_v48 }
 0x5c1   :  { %v8071_v10 = vsel %vm7903_vm10, %v7554_v42, %v7987_v13  ;;  %vm7904_vm12 = vcmp.ge.f32.partialorder %v7556_v21, 0.0  ;;  %v7988_v40 = vmul.f32 0.2, %v7556_v21  ;;  %14116 = vmatprep.mubr.bf16.mxu0 %v22898_v54  ;;  %vm7906_vm13 = vcmp.ge.f32.partialorder %v7649_v23, 0.0  ;;  %14156 = vmatpush1.bf16.msra.mxu0 %v23879_v5  ;;  %v23898_v20 = vld [vmem:[%s26602_s3 + $0x350] ss:$8 sps:$4 sm:$0xff]  }
 0x5c2   :  { %v23892_v59 = vpack.c.bf16 %v8071_v10, %v8064_v15  ;;  %v8073_v25 = vsel %vm7905_vm4, %v7647_v8, %v7989_v36  ;;  %v7990_v3 = vmul.f32 0.2, %v7649_v23  ;;  %14157 = vmatprep.subr.bf16.mxu0 %v23884_v30  ;;  %v23906_v15 = vld [vmem:[%s26602_s3 + $0x364] ss:$8 sps:$4 sm:$0xff]   ;;  %v8065_v8 = vsel %vm7897_vm9, %v7552_v7, %v7981_v43 }
 0x5c3   :  { %v23900_v27 = vpack.c.bf16 %v8073_v25, %v8066_v53  ;;  %v8072_v42 = vsel %vm7904_vm12, %v7556_v21, %v7988_v40  ;;  %v7686_v13 = vpop.f32.mrb[244].mxu1  ;;  %v17764_v4 = vpop.f32.mrb[172].mxu0  ;;  %v23912_v53 = vld [vmem:[%s26602_s3 + $0x360] ss:$8 sps:$4 sm:$0xff]   ;;  %v8067_v21 = vsel %vm7899_vm11, %v7645_v48, %v7983_v62  ;;  %v23918_v25 = vld [vmem:[%s26602_s3 + $0x374] ss:$8 sps:$4 sm:$0xff]  }
 0x5c4   :  { %27194 = vst [vmem:[#allocation287_spill] sm:$0xff] %v23892_v59  ;;  %v8074_v36 = vsel %vm7906_vm13, %v7649_v23, %v7990_v3  ;;  %v7914_v10 = vmul.f32 0.2, %v7686_v13  ;;  %v7688_v54 = vpop.f32.mrb[245].mxu1  ;;  %v7779_v57 = vpop.f32.mrb[173].mxu0  ;;  %vm7830_vm14 = vcmp.ge.f32.partialorder %v7686_v13, 0.0  ;;  %v23920_v23 = vpack.c.bf16 %v8072_v42, %v8065_v8 }
 0x5c5   :  { %27195 = vst [vmem:[#allocation288_spill] sm:$0xff] %v23900_v27  ;;  %vm7846_vm1 = vcmp.ge.f32.partialorder %v17764_v4, 0.0  ;;  %v7930_v40 = vmul.f32 0.2, %v17764_v4  ;;  %v7915_v7 = vmul.f32 0.2, %v7688_v54  ;;  %14158 = vmatpush1.bf16.msra.mxu0 %v23898_v20  ;;  %v23923_v50 = vpack.c.bf16 %v8074_v36, %v8067_v21 }
 0x5c6   :  { %v7916_v43 = vmul.f32 0.2, %v7779_v57  ;;  %27196 = vst [vmem:[#allocation289_spill] sm:$0xff] %v23920_v23  ;;  %v7690_v3 = vpop.f32.mrb[246].mxu1  ;;  %v17765_v26 = vpop.f32.mrb[174].mxu0  ;;  %vm7832_vm5 = vcmp.ge.f32.partialorder %v7779_v57, 0.0  ;;  %14159 = vmatprep.subr.bf16.mxu0 %v23906_v15  ;;  %v7998_v49 = vsel %vm7830_vm14, %v7686_v13, %v7914_v10  ;;  %10457 = vmatprep.mubr.bf16.mxu1 %v23920_v23 }
 0x5c7   :  { %27197 = vst [vmem:[#allocation290_spill] sm:$0xff] %v23923_v50  ;;  %vm7837_vm15 = vcmp.ge.f32.partialorder %v7690_v3, 0.0  ;;  %v7921_v48 = vmul.f32 0.2, %v7690_v3  ;;  %v7692_v62 = vpop.f32.mrb[247].mxu1  ;;  %v7782_v1 = vpop.f32.mrb[175].mxu0  ;;  %10458 = vmatmul.mubr.bf16.gmra.mrb[40].mxu1 %v23892_v59  ;;  %v8014_v2 = vsel %vm7846_vm1, %v17764_v4, %v7930_v40 }
 0x5c8   :  { %vm7853_vm2 = vcmp.ge.f32.partialorder %v17765_v26, 0.0  ;;  %v7937_v42 = vmul.f32 0.2, %v17765_v26  ;;  %vm7838_vm6 = vcmp.ge.f32.partialorder %v7692_v62, 0.0  ;;  %14117 = vmatmul.mubr.bf16.gmra.mrb[196].mxu0 %v22890_v55  ;;  %v7922_v36 = vmul.f32 0.2, %v7692_v62 }
 0x5c9   :  { %v8005_v8 = vsel %vm7837_vm15, %v7690_v3, %v7921_v48  ;;  %vm7839_vm3 = vcmp.ge.f32.partialorder %v7782_v1, 0.0  ;;  %v7923_v21 = vmul.f32 0.2, %v7782_v1  ;;  %14126 = vmatprep.mubr.bf16.mxu0 %v22937_v46  ;;  %vm7831_vm7 = vcmp.ge.f32.partialorder %v7688_v54, 0.0  ;;  %14160 = vmatpush1.bf16.msra.mxu0 %v23912_v53  ;;  %v23938_v10 = vld [vmem:[%s26602_s3 + $0x370] ss:$8 sps:$4 sm:$0xff]  }
 0x5ca   :  { %v23932_v11 = vpack.c.bf16 %v8005_v8, %v7998_v49  ;;  %v8021_v13 = vsel %vm7853_vm2, %v17765_v26, %v7937_v42  ;;  %v23940_v3 = vld [vmem:[#allocation4 + $0x80] sm:$0xff]  ;;  %v8000_v48 = vsel %vm7832_vm5, %v7779_v57, %v7916_v43  ;;  %v8006_v4 = vsel %vm7838_vm6, %v7692_v62, %v7922_v36  ;;  %14161 = vmatprep.subr.bf16.mxu0 %v23918_v25  ;;  %v23951_v42 = vld [vmem:[%s26602_s3 + $0x384] ss:$8 sps:$4 sm:$0xff]  }
 0x5cb   :  { %10500 = vmatprep.mubr.bf16.mxu1 %v23940_v3  ;;  %v23944_v46 = vpack.c.bf16 %v8021_v13, %v8014_v2  ;;  %v8007_v49 = vsel %vm7839_vm3, %v7782_v1, %v7923_v21  ;;  %v7696_v40 = vpop.f32.mrb[248].mxu1  ;;  %v17768_v26 = vpop.f32.mrb[176].mxu0  ;;  %v19340_v2 = vld [vmem:[%s26602_s3 + $0x200] ss:$8 sps:$4 sm:$0xff]   ;;  %v7999_v43 = vsel %vm7831_vm7, %v7688_v54, %v7915_v7  ;;  %v19348_v36 = vld [vmem:[%s26602_s3 + $0x214] ss:$8 sps:$4 sm:$0xff]  }
 0x5cc   :  { %v23953_v8 = vpack.c.bf16 %v8007_v49, %v8000_v48  ;;  %vm7844_vm8 = vcmp.ge.f32.partialorder %v7696_v40, 0.0  ;;  %v7928_v55 = vmul.f32 0.2, %v7696_v40  ;;  %v7698_v59 = vpop.f32.mrb[249].mxu1  ;;  %v7795_v57 = vpop.f32.mrb[177].mxu0  ;;  %vm7874_vm9 = vcmp.ge.f32.partialorder %v17768_v26, 0.0 }
 0x5cd   :  { %27198 = vst [vmem:[#allocation291_spill] sm:$0xff] %v23944_v46  ;;  %v23961_v1 = vld [vmem:[%s26602_s3 + $0x380] ss:$8 sps:$4 sm:$0xff]   ;;  %v7958_v62 = vmul.f32 0.2, %v17768_v26  ;;  %14162 = vmatpush1.bf16.msra.mxu0 %v23938_v10  ;;  %v7700_v49 = vpop.f32.mrb[250].mxu1  ;;  %v23973_v45 = vpack.c.bf16 %v8006_v4, %v7999_v43 }
 0x5ce   :  { %27199 = vst [vmem:[#allocation292_spill] sm:$0xff] %v23953_v8  ;;  %v23970_v21 = vld [vmem:[%s26602_s3 + $0x394] ss:$8 sps:$4 sm:$0xff]   ;;  %v7929_v13 = vmul.f32 0.2, %v7698_v59  ;;  %v17769_v23 = vpop.f32.mrb[178].mxu0  ;;  %v8012_v54 = vsel %vm7844_vm8, %v7696_v40, %v7928_v55  ;;  %14163 = vmatprep.subr.bf16.mxu0 %v23951_v42 }
 0x5cf   :  { %v7944_v48 = vmul.f32 0.2, %v7795_v57  ;;  %vm7860_vm10 = vcmp.ge.f32.partialorder %v7795_v57, 0.0  ;;  %vm7851_vm11 = vcmp.ge.f32.partialorder %v7700_v49, 0.0  ;;  %v7935_v7 = vmul.f32 0.2, %v7700_v49  ;;  %10501 = vmatmul.mubr.bf16.vlgmr.msra.gmra.mrb[12].mxu1 %v23940_v3 }
 0x5d0   :  { %v7702_v39 = vpop.f32.mrb[251].mxu1  ;;  %v7798_v19 = vpop.f32.mrb[179].mxu0  ;;  %v8042_v32 = vsel %vm7874_vm9, %v17768_v26, %v7958_v62  ;;  %vm7881_vm4 = vcmp.ge.f32.partialorder %v17769_v23, 0.0  ;;  %v7965_v60 = vmul.f32 0.2, %v17769_v23  ;;  %14127 = vmatmul.mubr.bf16.gmra.mrb[200].mxu0 %v22924_v33  ;;  %v27200_v40 = vld [vmem:[#allocation179_spill] sm:$0xff]  ;;  %10582 = vmatpush1.bf16.msra.mxu1 %v19340_v2 }
 0x5d1   :  { %vm7852_vm12 = vcmp.ge.f32.partialorder %v7702_v39, 0.0  ;;  %v8019_v47 = vsel %vm7851_vm11, %v7700_v49, %v7935_v7  ;;  %v7936_v4 = vmul.f32 0.2, %v7702_v39  ;;  %vm7867_vm13 = vcmp.ge.f32.partialorder %v7798_v19, 0.0  ;;  %14136 = vmatprep.mubr.bf16.mxu0 %v27200_v40  ;;  %14164 = vmatpush1.bf16.msra.mxu0 %v23961_v1  ;;  %v19346_v26 = vld [vmem:[%s26602_s3 + $0x210] ss:$8 sps:$4 sm:$0xff]  }
 0x5d2   :  { %v7951_v55 = vmul.f32 0.2, %v7798_v19  ;;  %vm7845_vm14 = vcmp.ge.f32.partialorder %v7698_v59, 0.0  ;;  %v8028_v43 = vsel %vm7860_vm10, %v7795_v57, %v7944_v48  ;;  %v23982_v29 = vpack.c.bf16 %v8019_v47, %v8012_v54  ;;  %v23991_v62 = vld [vmem:[%s26602_s3 + $0x390] ss:$8 sps:$4 sm:$0xff]   ;;  %10583 = vmatprep.subr.bf16.mxu1 %v19348_v36  ;;  %14165 = vmatprep.subr.bf16.mxu0 %v23970_v21 }
 0x5d3   :  { %v8049_v22 = vsel %vm7881_vm4, %v17769_v23, %v7965_v60  ;;  %v8020_v7 = vsel %vm7852_vm12, %v7702_v39, %v7936_v4  ;;  %v7706_v47 = vpop.f32.mrb[252].mxu1  ;;  %v17772_v60 = vpop.f32.mrb[180].mxu0  ;;  %v19354_v23 = vld [vmem:[%s26602_s3 + $0x224] ss:$8 sps:$4 sm:$0xff]   ;;  %10510 = vmatprep.mubr.bf16.mxu1 %v23940_v3  ;;  %v8013_v36 = vsel %vm7845_vm14, %v7698_v59, %v7929_v13 }
 0x5d4   :  { %v23993_v49 = vpack.c.bf16 %v8049_v22, %v8042_v32  ;;  %v8035_v57 = vsel %vm7867_vm13, %v7798_v19, %v7951_v55  ;;  %v24003_v2 = vld [vmem:[%s26602_s3 + $0x3a4] ss:$8 sps:$4 sm:$0xff]   ;;  %vm7858_vm1 = vcmp.ge.f32.partialorder %v7706_v47, 0.0  ;;  %v7942_v22 = vmul.f32 0.2, %v7706_v47  ;;  %v7708_v19 = vpop.f32.mrb[253].mxu1  ;;  %10584 = vmatpush1.bf16.msra.mxu1 %v19346_v26 }
 0x5d5   :  { %v24005_v48 = vpack.c.bf16 %v8035_v57, %v8028_v43  ;;  %vm7902_vm5 = vcmp.ge.f32.partialorder %v17772_v60, 0.0  ;;  %v7811_v39 = vpop.f32.mrb[181].mxu0  ;;  %v19352_v32 = vld [vmem:[%s26602_s3 + $0x220] ss:$8 sps:$4 sm:$0xff]   ;;  %v7986_v54 = vmul.f32 0.2, %v17772_v60  ;;  %14166 = vmatpush1.bf16.msra.mxu0 %v23991_v62  ;;  %v24021_v59 = vpack.c.bf16 %v8020_v7, %v8013_v36  ;;  %10585 = vmatprep.subr.bf16.mxu1 %v19354_v23 }
 0x5d6   :  { %27201 = vst [vmem:[#allocation293_spill] sm:$0xff] %v23993_v49  ;;  %vm7859_vm15 = vcmp.ge.f32.partialorder %v7708_v19, 0.0  ;;  %v7943_v4 = vmul.f32 0.2, %v7708_v19  ;;  %v24015_v55 = vld [vmem:[%s26602_s3 + $0x3a0] ss:$8 sps:$4 sm:$0xff]   ;;  %v8026_v13 = vsel %vm7858_vm1, %v7706_v47, %v7942_v22  ;;  %14167 = vmatprep.subr.bf16.mxu0 %v24003_v2 }
 0x5d7   :  { %27202 = vst [vmem:[#allocation294_spill] sm:$0xff] %v24005_v48  ;;  %v19360_v43 = vld [vmem:[%s26602_s3 + $0x234] ss:$8 sps:$4 sm:$0xff]   ;;  %vm7888_vm2 = vcmp.ge.f32.partialorder %v7811_v39, 0.0  ;;  %v7972_v57 = vmul.f32 0.2, %v7811_v39  ;;  %v8070_v35 = vsel %vm7902_vm5, %v17772_v60, %v7986_v54  ;;  %10511 = vmatmul.mubr.bf16.gmra.mrb[16].mxu1 %v23940_v3 }
 0x5d8   :  { %v7710_v40 = vpop.f32.mrb[254].mxu1  ;;  %v17773_v33 = vpop.f32.mrb[182].mxu0  ;;  %v8027_v26 = vsel %vm7859_vm15, %v7708_v19, %v7943_v4  ;;  %14137 = vmatmul.mubr.bf16.gmra.mrb[204].mxu0 %v27203_v24  ;;  %v24031_v7 = vld [vmem:[%s26602_s3 + $0x3b4] ss:$8 sps:$4 sm:$0xff]   ;;  %v27205_v36 = vld [vmem:[#allocation188_spill] sm:$0xff]  ;;  %10520 = vmatprep.mubr.bf16.mxu1 %v23766_v28 }
 0x5d9   :  { %vm7865_vm6 = vcmp.ge.f32.partialorder %v7710_v40, 0.0  ;;  %v7949_v17 = vmul.f32 0.2, %v7710_v40  ;;  %v7712_v0 = vpop.f32.mrb[255].mxu1  ;;  %v7814_v49 = vpop.f32.mrb[183].mxu0  ;;  %vm7909_vm3 = vcmp.ge.f32.partialorder %v17773_v33, 0.0  ;;  %v8056_v19 = vsel %vm7888_vm2, %v7811_v39, %v7972_v57  ;;  %10586 = vmatpush1.bf16.msra.mxu1 %v19352_v32  ;;  %14168 = vmatpush1.bf16.msra.mxu0 %v24015_v55 }
 0x5da   :  { %v7993_v38 = vmul.f32 0.2, %v17773_v33  ;;  %vm7866_vm7 = vcmp.ge.f32.partialorder %v7712_v0, 0.0  ;;  %v7950_v60 = vmul.f32 0.2, %v7712_v0  ;;  %vm7895_vm8 = vcmp.ge.f32.partialorder %v7814_v49, 0.0  ;;  %10587 = vmatprep.subr.bf16.mxu1 %v19360_v43  ;;  %14169 = vmatprep.subr.bf16.mxu0 %v24031_v7 }
 0x5db   :  { %v8033_v47 = vsel %vm7865_vm6, %v7710_v40, %v7949_v17  ;;  %v7979_v23 = vmul.f32 0.2, %v7814_v49  ;;  %v27204_v22 = vld [vmem:[#allocation190_spill] sm:$0xff] }
 0x5dc   :  { %v27206_v54 = vpack.c.bf16 %v27204_v22, %v27205_v36  ;;  %v24038_v4 = vpack.c.bf16 %v8033_v47, %v8026_v13  ;;  %v8077_v24 = vsel %vm7909_vm3, %v17773_v33, %v7993_v38  ;;  %v19358_v17 = vld [vmem:[%s26602_s3 + $0x230] ss:$8 sps:$4 sm:$0xff]   ;;  %v8034_v48 = vsel %vm7866_vm7, %v7712_v0, %v7950_v60  ;;  %v7716_v22 = vpop.f32.mrb[0].mxu1  ;;  %v19366_v38 = vld [vmem:[%s26602_s3 + $0x244] ss:$8 sps:$4 sm:$0xff]  }
 0x5dd   :  { %v24044_v40 = vpack.c.bf16 %v8077_v24, %v8070_v35  ;;  %v8063_v46 = vsel %vm7895_vm8, %v7814_v49, %v7979_v23  ;;  %v24051_v33 = vld [vmem:[%s26602_s3 + $0x3b0] ss:$8 sps:$4 sm:$0xff]   ;;  %v7956_v24 = vmul.f32 0.2, %v7716_v22  ;;  %v7718_v0 = vpop.f32.mrb[1].mxu1  ;;  %v24067_v32 = vpack.c.bf16 %v8034_v48, %v8027_v26  ;;  %10588 = vmatpush1.bf16.msra.mxu1 %v19358_v17 }
 0x5de   :  { %14179 = vmatprep.mubr.bf16.mxu0 %v27206_v54  ;;  %27207 = vst [vmem:[#allocation190_spill] sm:$0xff] %v24038_v4  ;;  %v24056_v39 = vpack.c.bf16 %v8063_v46, %v8056_v19  ;;  %v19364_v35 = vld [vmem:[%s26602_s3 + $0x240] ss:$8 sps:$4 sm:$0xff]   ;;  %v24065_v49 = vld [vmem:[%s26602_s3 + $0x3c4] ss:$8 sps:$4 sm:$0xff]   ;;  %vm7872_vm9 = vcmp.ge.f32.partialorder %v7716_v22, 0.0  ;;  %14170 = vmatpush1.bf16.msra.mxu0 %v24051_v33 }
 0x5df   :  { %27208 = vst [vmem:[#allocation188_spill] sm:$0xff] %v24044_v40  ;;  %27210 = vst [vmem:[#allocation296_spill] sm:$0xff] %v24067_v32  ;;  %v7957_v43 = vmul.f32 0.2, %v7718_v0  ;;  %v7720_v57 = vpop.f32.mrb[2].mxu1  ;;  %vm7873_vm10 = vcmp.ge.f32.partialorder %v7718_v0, 0.0  ;;  %10589 = vmatprep.subr.bf16.mxu1 %v19366_v38  ;;  %v8040_v26 = vsel %vm7872_vm9, %v7716_v22, %v7956_v24  ;;  %14171 = vmatprep.subr.bf16.mxu0 %v24065_v49 }
 0x5e0   :  { %27209 = vst [vmem:[#allocation295_spill] sm:$0xff] %v24056_v39  ;;  %v24072_v46 = vld [vmem:[%s26602_s3 + $0x3c0] ss:$8 sps:$4 sm:$0xff]   ;;  %vm7879_vm11 = vcmp.ge.f32.partialorder %v7720_v57, 0.0  ;;  %v7963_v13 = vmul.f32 0.2, %v7720_v57  ;;  %10521 = vmatmul.mubr.bf16.gmra.mrb[20].mxu1 %v23755_v63 }
 0x5e1   :  { %v7722_v47 = vpop.f32.mrb[3].mxu1  ;;  %v19372_v48 = vld [vmem:[%s26602_s3 + $0x254] ss:$8 sps:$4 sm:$0xff]   ;;  %v8041_v54 = vsel %vm7873_vm10, %v7718_v0, %v7957_v43  ;;  %10530 = vmatprep.mubr.bf16.mxu1 %v23797_v56  ;;  %10590 = vmatpush1.bf16.msra.mxu1 %v19364_v35  ;;  %v19370_v22 = vld [vmem:[%s26602_s3 + $0x250] ss:$8 sps:$4 sm:$0xff]   ;;  %vm8163_vm3 = vcmask 785408  }
 0x5e2   :  { %vm7880_vm4 = vcmp.ge.f32.partialorder %v7722_v47, 0.0  ;;  %v7964_v60 = vmul.f32 0.2, %v7722_v47  ;;  %v8047_v23 = vsel %vm7879_vm11, %v7720_v57, %v7963_v13  ;;  %v24082_v36 = vld [vmem:[%s26602_s3 + $0x3d4] ss:$8 sps:$4 sm:$0xff]   ;;  %14172 = vmatpush1.bf16.msra.mxu0 %v24072_v46  ;;  %10591 = vmatprep.subr.bf16.mxu1 %v19372_v48 }
 0x5e3   :  { %v24084_v19 = vpack.c.bf16 %v8047_v23, %v8040_v26  ;;  %v7726_v24 = vpop.f32.mrb[4].mxu1  ;;  %v24097_v0 = vld [vmem:[%s26602_s3 + $0x3d0] ss:$8 sps:$4 sm:$0xff]   ;;  %v19378_v43 = vld [vmem:[%s26602_s3 + $0x264] ss:$8 sps:$4 sm:$0xff]   ;;  %14173 = vmatprep.subr.bf16.mxu0 %v24082_v36 }
 0x5e4   :  { %v8048_v17 = vsel %vm7880_vm4, %v7722_v47, %v7964_v60  ;;  %v7970_v35 = vmul.f32 0.2, %v7726_v24  ;;  %v7728_v57 = vpop.f32.mrb[5].mxu1  ;;  %v19376_v13 = vld [vmem:[%s26602_s3 + $0x260] ss:$8 sps:$4 sm:$0xff]   ;;  %vm7886_vm12 = vcmp.ge.f32.partialorder %v7726_v24, 0.0 }
 0x5e5   :  { %27211 = vst [vmem:[#allocation297_spill] sm:$0xff] %v24084_v19  ;;  %v24091_v38 = vpack.c.bf16 %v8048_v17, %v8041_v54  ;;  %v24109_v47 = vld [vmem:[%s26602_s3 + $0x3e4] ss:$8 sps:$4 sm:$0xff]   ;;  %v7971_v60 = vmul.f32 0.2, %v7728_v57  ;;  %v7730_v48 = vpop.f32.mrb[6].mxu1  ;;  %10592 = vmatpush1.bf16.msra.mxu1 %v19370_v22 }
 0x5e6   :  { %v24114_v26 = vld [vmem:[%s26602_s3 + $0x3e0] ss:$8 sps:$4 sm:$0xff]   ;;  %vm7887_vm13 = vcmp.ge.f32.partialorder %v7728_v57, 0.0  ;;  %vm7893_vm14 = vcmp.ge.f32.partialorder %v7730_v48, 0.0  ;;  %v7977_v23 = vmul.f32 0.2, %v7730_v48  ;;  %14174 = vmatpush1.bf16.msra.mxu0 %v24097_v0  ;;  %10593 = vmatprep.subr.bf16.mxu1 %v19378_v43  ;;  %v8054_v63 = vsel %vm7886_vm12, %v7726_v24, %v7970_v35 }
 0x5e7   :  { %27212 = vst [vmem:[#allocation298_spill] sm:$0xff] %v24091_v38  ;;  %v7732_v54 = vpop.f32.mrb[7].mxu1  ;;  %v19384_v56 = vld [vmem:[%s26602_s3 + $0x274] ss:$8 sps:$4 sm:$0xff]   ;;  %14175 = vmatprep.subr.bf16.mxu0 %v24109_v47  ;;  %v8055_v40 = vsel %vm7887_vm13, %v7728_v57, %v7971_v60  ;;  %v19382_v24 = vld [vmem:[%s26602_s3 + $0x270] ss:$8 sps:$4 sm:$0xff]  }
 0x5e8   :  { %vm7894_vm1 = vcmp.ge.f32.partialorder %v7732_v54, 0.0  ;;  %v7978_v17 = vmul.f32 0.2, %v7732_v54  ;;  %v8061_v28 = vsel %vm7893_vm14, %v7730_v48, %v7977_v23  ;;  %v24124_v22 = vld [vmem:[%s26602_s3 + $0x3f4] ss:$8 sps:$4 sm:$0xff]   ;;  %10531 = vmatmul.mubr.bf16.gmra.mrb[24].mxu1 %v23785_v31 }
 0x5e9   :  { %v24126_v39 = vpack.c.bf16 %v8061_v28, %v8054_v63  ;;  %10540 = vmatprep.mubr.bf16.mxu1 %v23817_v44  ;;  %10594 = vmatpush1.bf16.msra.mxu1 %v19376_v13  ;;  %v24139_v63 = vld [vmem:[%s26602_s3 + $0x3f0] ss:$8 sps:$4 sm:$0xff]   ;;  %v19390_v28 = vld [vmem:[%s26602_s3 + $0x284] ss:$8 sps:$4 sm:$0xff]   ;;  %v19388_v23 = vld [vmem:[%s26602_s3 + $0x280] ss:$8 sps:$4 sm:$0xff]  }
 0x5ea   :  { %v8062_v43 = vsel %vm7894_vm1, %v7732_v54, %v7978_v17  ;;  %14176 = vmatpush1.bf16.msra.mxu0 %v24114_v26  ;;  %10595 = vmatprep.subr.bf16.mxu1 %v19384_v56  ;;  %27215 = vst [vmem:[#allocation301_spill] sm:$0xff] %v24139_v63  ;;  %v19396_v44 = vld [vmem:[%s26602_s3 + $0x294] ss:$8 sps:$4 sm:$0xff]  }
 0x5eb   :  { %27213 = vst [vmem:[#allocation299_spill] sm:$0xff] %v24126_v39  ;;  %v24133_v35 = vpack.c.bf16 %v8062_v43, %v8055_v40  ;;  %v7736_v48 = vpop.f32.mrb[8].mxu1  ;;  %14177 = vmatprep.subr.bf16.mxu0 %v24124_v22  ;;  %v24148_v40 = vld [vmem:[%s26602_s3 + $0x404] ss:$8 sps:$4 sm:$0xff]  }
 0x5ec   :  { %v7984_v57 = vmul.f32 0.2, %v7736_v48  ;;  %v7738_v13 = vpop.f32.mrb[9].mxu1  ;;  %vm7900_vm5 = vcmp.ge.f32.partialorder %v7736_v48, 0.0 }
 0x5ed   :  { %27214 = vst [vmem:[#allocation300_spill] sm:$0xff] %v24133_v35  ;;  %v7985_v56 = vmul.f32 0.2, %v7738_v13  ;;  %v7740_v60 = vpop.f32.mrb[10].mxu1  ;;  %10596 = vmatpush1.bf16.msra.mxu1 %v19382_v24  ;;  %vm7901_vm15 = vcmp.ge.f32.partialorder %v7738_v13, 0.0 }
 0x5ee   :  { %vm7907_vm2 = vcmp.ge.f32.partialorder %v7740_v60, 0.0  ;;  %v7991_v54 = vmul.f32 0.2, %v7740_v60  ;;  %v7742_v17 = vpop.f32.mrb[11].mxu1  ;;  %14178 = vmatpush1.bf16.msra.mxu0 %v24139_v63  ;;  %10597 = vmatprep.subr.bf16.mxu1 %v19390_v28  ;;  %v8068_v31 = vsel %vm7900_vm5, %v7736_v48, %v7984_v57  ;;  %v24169_v63 = vld [vmem:[%s26602_s3 + $0x414] ss:$8 sps:$4 sm:$0xff]  }
 0x5ef   :  { %vm7908_vm6 = vcmp.ge.f32.partialorder %v7742_v17, 0.0  ;;  %v7992_v43 = vmul.f32 0.2, %v7742_v17  ;;  %14240 = vmatprep.subr.bf16.mxu0 %v24148_v40  ;;  %v8069_v24 = vsel %vm7901_vm15, %v7738_v13, %v7985_v56  ;;  %v19394_v48 = vld [vmem:[%s26602_s3 + $0x290] ss:$8 sps:$4 sm:$0xff]  }
 0x5f0   :  { %v8075_v8 = vsel %vm7907_vm2, %v7740_v60, %v7991_v54  ;;  %10541 = vmatmul.mubr.bf16.gmra.mrb[28].mxu1 %v23812_v37  ;;  %v27218_v13 = vld [vmem:[#allocation161_spill] sm:$0xff]  ;;  %v27237_v37 = vld [vmem:[#allocation191_spill] sm:$0xff] }
 0x5f1   :  { %v24163_v52 = vpack.c.bf16 %v8075_v8, %v8068_v31  ;;  %v8076_v28 = vsel %vm7908_vm6, %v7742_v17, %v7992_v43  ;;  %10550 = vmatprep.mubr.bf16.mxu1 %v23850_v58  ;;  %10598 = vmatpush1.bf16.msra.mxu1 %v19388_v23  ;;  %v19402_v31 = vld [vmem:[%s26602_s3 + $0x2a4] ss:$8 sps:$4 sm:$0xff]   ;;  %v27219_v8 = vpack.c.bf16 %v23138_v41, %v23135_v16  ;;  %v24188_v56 = vld [vmem:[%s26602_s3 + $0x410] ss:$8 sps:$4 sm:$0xff]   ;;  %v19400_v16 = vld [vmem:[%s26602_s3 + $0x2a0] ss:$8 sps:$4 sm:$0xff]  }
 0x5f2   :  { %v24175_v57 = vpack.c.bf16 %v8076_v28, %v8069_v24  ;;  %14180 = vmatmul.mubr.bf16.vlgmr.msra.gmra.mrb[184].mxu0 %v27218_v13  ;;  %10599 = vmatprep.subr.bf16.mxu1 %v19396_v44  ;;  %v24194_v44 = vld [vmem:[%s26602_s3 + $0x424] ss:$8 sps:$4 sm:$0xff]   ;;  %v19408_v41 = vld [vmem:[%s26602_s3 + $0x2b4] ss:$8 sps:$4 sm:$0xff]   ;;  %v24206_v60 = vld [vmem:[%s26602_s3 + $0x420] ss:$8 sps:$4 sm:$0xff]   ;;  %v27233_v58 = vpack.c.bf16 %v23343_v18, %v23335_v6 }
 0x5f3   :  { %27216 = vst [vmem:[#allocation302_spill] sm:$0xff] %v24163_v52  ;;  %14189 = vmatprep.mubr.bf16.mxu0 %v27219_v8  ;;  %14241 = vmatpush1.bf16.msra.mxu0 %v24160_v34  ;;  %v24213_v23 = vld [vmem:[%s26602_s3 + $0x434] ss:$8 sps:$4 sm:$0xff]   ;;  %v19406_v54 = vld [vmem:[%s26602_s3 + $0x2b0] ss:$8 sps:$4 sm:$0xff]  }
 0x5f4   :  { %27217 = vst [vmem:[#allocation303_spill] sm:$0xff] %v24175_v57  ;;  %14242 = vmatprep.subr.bf16.mxu0 %v24169_v63  ;;  %v27220_v17 = vld [vmem:[#allocation159_spill] sm:$0xff]  ;;  %v19414_v43 = vld [vmem:[%s26602_s3 + $0x2c4] ss:$8 sps:$4 sm:$0xff]   ;;  %v27221_v24 = vld [vmem:[#allocation202_spill] sm:$0xff] }
 0x5f5   :  { %10600 = vmatpush1.bf16.msra.mxu1 %v19394_v48  ;;  %v27222_v28 = vpack.c.bf16 %v23192_v61, %v27221_v24  ;;  %v24230_v48 = vld [vmem:[%s26602_s3 + $0x430] ss:$8 sps:$4 sm:$0xff]   ;;  %v19412_v61 = vld [vmem:[%s26602_s3 + $0x2c0] ss:$8 sps:$4 sm:$0xff]   ;;  %v19420_v8 = vld [vmem:[%s26602_s3 + $0x2d4] ss:$8 sps:$4 sm:$0xff]  }
 0x5f6   :  { %10601 = vmatprep.subr.bf16.mxu1 %v19402_v31  ;;  %v24236_v31 = vld [vmem:[%s26602_s3 + $0x444] ss:$8 sps:$4 sm:$0xff]   ;;  %v19448_v18 = vld [vmem:[%s26602_s3 + $0x320] ss:$8 sps:$4 sm:$0xff]  }
 0x5f7   :  { %14243 = vmatpush1.bf16.msra.mxu0 %v24188_v56  ;;  %v19426_v24 = vld [vmem:[%s26602_s3 + $0x2e4] ss:$8 sps:$4 sm:$0xff]   ;;  %v24374_v6 = vld [vmem:[%s26602_s3 + $0x4a0] ss:$8 sps:$4 sm:$0xff]  }
 0x5f8   :  { %10551 = vmatmul.mubr.bf16.gmra.mrb[32].mxu1 %v23835_v14  ;;  %14244 = vmatprep.subr.bf16.mxu0 %v24194_v44  ;;  %v19450_v14 = vld [vmem:[%s26602_s3 + $0x324] ss:$8 sps:$4 sm:$0xff]  }
 0x5f9   :  { %10560 = vmatprep.mubr.bf16.mxu1 %v23874_v9  ;;  %10602 = vmatpush1.bf16.msra.mxu1 %v19400_v16  ;;  %v24248_v16 = vld [vmem:[%s26602_s3 + $0x440] ss:$8 sps:$4 sm:$0xff]  }
 0x5fa   :  { %14190 = vmatmul.mubr.bf16.gmra.mrb[188].mxu0 %v27220_v17  ;;  %10603 = vmatprep.subr.bf16.mxu1 %v19408_v41  ;;  %v24255_v41 = vld [vmem:[%s26602_s3 + $0x454] ss:$8 sps:$4 sm:$0xff]   ;;  %v27225_v17 = vld [vmem:[#allocation209_spill] sm:$0xff] }
 0x5fb   :  { %14199 = vmatprep.mubr.bf16.mxu0 %v27222_v28  ;;  %14245 = vmatpush1.bf16.msra.mxu0 %v24206_v60  ;;  %v27224_v28 = vld [vmem:[#allocation211_spill] sm:$0xff] }
 0x5fc   :  { %14246 = vmatprep.subr.bf16.mxu0 %v24213_v23  ;;  %v27226_v13 = vpack.c.bf16 %v27224_v28, %v27225_v17  ;;  %v19424_v17 = vld [vmem:[%s26602_s3 + $0x2e0] ss:$8 sps:$4 sm:$0xff]  }
 0x5fd   :  { %10604 = vmatpush1.bf16.msra.mxu1 %v19406_v54  ;;  %v19418_v54 = vld [vmem:[%s26602_s3 + $0x2d0] ss:$8 sps:$4 sm:$0xff]   ;;  %v24290_v28 = vld [vmem:[%s26602_s3 + $0x460] ss:$8 sps:$4 sm:$0xff]  }
 0x5fe   :  { %10605 = vmatprep.subr.bf16.mxu1 %v19414_v43  ;;  %v27223_v43 = vld [vmem:[#allocation165_spill] sm:$0xff] }
 0x5ff   :  { %14247 = vmatpush1.bf16.msra.mxu0 %v24230_v48 }
 0x600   :  { %10561 = vmatmul.mubr.bf16.gmra.mrb[36].mxu1 %v23864_v51  ;;  %14248 = vmatprep.subr.bf16.mxu0 %v24236_v31  ;;  %v27229_v51 = vld [vmem:[#allocation217_spill] sm:$0xff] }
 0x601   :  { %10570 = vmatprep.mubr.bf16.mxu1 %v23923_v50  ;;  %10606 = vmatpush1.bf16.msra.mxu1 %v19412_v61  ;;  %v24272_v61 = vld [vmem:[%s26602_s3 + $0x450] ss:$8 sps:$4 sm:$0xff]  }
 0x602   :  { %14200 = vmatmul.mubr.bf16.gmra.mrb[192].mxu0 %v27223_v43  ;;  %10607 = vmatprep.subr.bf16.mxu1 %v19420_v8  ;;  %v24278_v8 = vld [vmem:[%s26602_s3 + $0x464] ss:$8 sps:$4 sm:$0xff]   ;;  %v27227_v43 = vld [vmem:[#allocation163_spill] sm:$0xff] }
 0x603   :  { %14209 = vmatprep.mubr.bf16.mxu0 %v27226_v13  ;;  %14249 = vmatpush1.bf16.msra.mxu0 %v24248_v16  ;;  %v19432_v13 = vld [vmem:[%s26602_s3 + $0x2f4] ss:$8 sps:$4 sm:$0xff]  }
 0x604   :  { %14250 = vmatprep.subr.bf16.mxu0 %v24255_v41  ;;  %v27228_v50 = vld [vmem:[#allocation219_spill] sm:$0xff] }
 0x605   :  { %10608 = vmatpush1.bf16.msra.mxu1 %v19418_v54  ;;  %v24297_v54 = vld [vmem:[%s26602_s3 + $0x474] ss:$8 sps:$4 sm:$0xff]   ;;  %v27230_v9 = vpack.c.bf16 %v27228_v50, %v27229_v51  ;;  %v19436_v51 = vld [vmem:[%s26602_s3 + $0x300] ss:$8 sps:$4 sm:$0xff]  }
 0x606   :  { %10609 = vmatprep.subr.bf16.mxu1 %v19426_v24  ;;  %v19430_v24 = vld [vmem:[%s26602_s3 + $0x2f0] ss:$8 sps:$4 sm:$0xff]   ;;  %v19444_v50 = vld [vmem:[%s26602_s3 + $0x314] ss:$8 sps:$4 sm:$0xff]  }
 0x607   :  { %14251 = vmatpush1.bf16.msra.mxu0 %v24272_v61 }
 0x608   :  { %10571 = vmatmul.mubr.bf16.gmra.mrb[40].mxu1 %v23900_v27  ;;  %14252 = vmatprep.subr.bf16.mxu0 %v24278_v8  ;;  %v19438_v27 = vld [vmem:[%s26602_s3 + $0x304] ss:$8 sps:$4 sm:$0xff]  }
 0x609   :  { %10610 = vmatpush1.bf16.msra.mxu1 %v19424_v17  ;;  %10613 = vmatprep.mubr.bf16.mxu1 %v23940_v3  ;;  %v24314_v17 = vld [vmem:[%s26602_s3 + $0x470] ss:$8 sps:$4 sm:$0xff]  }
 0x60a   :  { %14210 = vmatmul.mubr.bf16.gmra.mrb[196].mxu0 %v27227_v43  ;;  %10611 = vmatprep.subr.bf16.mxu1 %v19432_v13  ;;  %v24320_v13 = vld [vmem:[%s26602_s3 + $0x484] ss:$8 sps:$4 sm:$0xff]  }
 0x60b   :  { %14219 = vmatprep.mubr.bf16.mxu0 %v27230_v9  ;;  %14253 = vmatpush1.bf16.msra.mxu0 %v24290_v28  ;;  %v24332_v9 = vld [vmem:[%s26602_s3 + $0x480] ss:$8 sps:$4 sm:$0xff]  }
 0x60c   :  { %14254 = vmatprep.subr.bf16.mxu0 %v24297_v54  ;;  %v27232_v43 = vld [vmem:[#allocation169_spill] sm:$0xff] }
 0x60d   :  { %10612 = vmatpush1.bf16.msra.mxu1 %v19430_v24  ;;  %v24339_v24 = vld [vmem:[%s26602_s3 + $0x494] ss:$8 sps:$4 sm:$0xff]  }
 0x60e   :  { %10694 = vmatprep.subr.bf16.mxu1 %v19438_v27  ;;  %27231 = vst [vmem:[#allocation202_spill] sm:$0xff] %v24339_v24  ;;  %v19442_v27 = vld [vmem:[%s26602_s3 + $0x310] ss:$8 sps:$4 sm:$0xff]  }
 0x60f   :  { %14255 = vmatpush1.bf16.msra.mxu0 %v24314_v17 }
 0x610   :  { %10614 = vmatmul.mubr.bf16.vlgmr.msra.gmra.mrb[12].mxu1 %v23940_v3  ;;  %14256 = vmatprep.subr.bf16.mxu0 %v24320_v13 }
 0x611   :  { %10695 = vmatpush1.bf16.msra.mxu1 %v19436_v51  ;;  %10623 = vmatprep.mubr.bf16.mxu1 %v23940_v3  ;;  %v24356_v51 = vld [vmem:[%s26602_s3 + $0x490] ss:$8 sps:$4 sm:$0xff]  }
 0x612   :  { %14220 = vmatmul.mubr.bf16.gmra.mrb[200].mxu0 %v27232_v43  ;;  %10696 = vmatprep.subr.bf16.mxu1 %v19444_v50  ;;  %27234 = vst [vmem:[#allocation211_spill] sm:$0xff] %v24356_v51  ;;  %v24362_v50 = vld [vmem:[%s26602_s3 + $0x4a4] ss:$8 sps:$4 sm:$0xff]   ;;  %v27236_v43 = vld [vmem:[#allocation167_spill] sm:$0xff] }
 0x613   :  { %14229 = vmatprep.mubr.bf16.mxu0 %v27233_v58  ;;  %14257 = vmatpush1.bf16.msra.mxu0 %v24332_v9  ;;  %27235 = vst [vmem:[#allocation209_spill] sm:$0xff] %v24362_v50  ;;  %v19456_v58 = vld [vmem:[%s26602_s3 + $0x334] ss:$8 sps:$4 sm:$0xff]  }
 0x614   :  { %14258 = vmatprep.subr.bf16.mxu0 %v24339_v24  ;;  %v24395_v24 = vld [vmem:[%s26602_s3 + $0x4b0] ss:$8 sps:$4 sm:$0xff]  }
 0x615   :  { %10697 = vmatpush1.bf16.msra.mxu1 %v19442_v27  ;;  %v24381_v27 = vld [vmem:[%s26602_s3 + $0x4b4] ss:$8 sps:$4 sm:$0xff]  }
 0x616   :  { %10698 = vmatprep.subr.bf16.mxu1 %v19450_v14  ;;  %v19454_v14 = vld [vmem:[%s26602_s3 + $0x330] ss:$8 sps:$4 sm:$0xff]  }
 0x617   :  { %14259 = vmatpush1.bf16.msra.mxu0 %v24356_v51  ;;  %v27238_v51 = vld [vmem:[#allocation189_spill] sm:$0xff] }
 0x618   :  { %10624 = vmatmul.mubr.bf16.gmra.mrb[16].mxu1 %v23940_v3  ;;  %14260 = vmatprep.subr.bf16.mxu0 %v24362_v50  ;;  %v27239_v50 = vpack.c.bf16 %v27237_v37, %v27238_v51  ;;  %v24408_v37 = vld [vmem:[%s26602_s3 + $0x4c0] ss:$8 sps:$4 sm:$0xff]   ;;  %v24415_v51 = vld [vmem:[%s26602_s3 + $0x4d4] ss:$8 sps:$4 sm:$0xff]  }
 0x619   :  { %10633 = vmatprep.mubr.bf16.mxu1 %v23973_v45  ;;  %10699 = vmatpush1.bf16.msra.mxu1 %v19448_v18  ;;  %v24401_v18 = vld [vmem:[%s26602_s3 + $0x4c4] ss:$8 sps:$4 sm:$0xff]  }
 0x61a   :  { %14230 = vmatmul.mubr.bf16.gmra.mrb[204].mxu0 %v27236_v43  ;;  %10700 = vmatprep.subr.bf16.mxu1 %v19456_v58  ;;  %v27244_v43 = vld [vmem:[#allocation196_spill] sm:$0xff] }
 0x61b   :  { %14261 = vmatpush1.bf16.msra.mxu0 %v24374_v6  ;;  %14272 = vmatprep.mubr.bf16.mxu0 %v27239_v50  ;;  %v24430_v50 = vld [vmem:[%s26602_s3 + $0x4e4] ss:$8 sps:$4 sm:$0xff]  }
 0x61c   :  { %14262 = vmatprep.subr.bf16.mxu0 %v24381_v27 }
 0x61d   :  { %10701 = vmatpush1.bf16.msra.mxu1 %v19454_v14  ;;  %v27243_v14 = vld [vmem:[#allocation197_spill] sm:$0xff] }
 0x61e   :  { %10702 = vmatprep.subr.bf16.mxu1 %v23869_v12  ;;  %v24424_v12 = vld [vmem:[%s26602_s3 + $0x4d0] ss:$8 sps:$4 sm:$0xff]  }
 0x61f   :  { %14263 = vmatpush1.bf16.msra.mxu0 %v24395_v24 }
 0x620   :  { %10634 = vmatmul.mubr.bf16.gmra.mrb[20].mxu1 %v23932_v11  ;;  %14264 = vmatprep.subr.bf16.mxu0 %v24401_v18 }
 0x621   :  { %10643 = vmatprep.mubr.bf16.mxu1 %v24021_v59  ;;  %10703 = vmatpush1.bf16.msra.mxu1 %v23879_v5  ;;  %v24438_v5 = vld [vmem:[%s26602_s3 + $0x4e0] ss:$8 sps:$4 sm:$0xff]  }
 0x622   :  { %10704 = vmatprep.subr.bf16.mxu1 %v23884_v30  ;;  %v24445_v30 = vld [vmem:[%s26602_s3 + $0x4f4] ss:$8 sps:$4 sm:$0xff]  }
 0x623   :  { %14265 = vmatpush1.bf16.msra.mxu0 %v24408_v37 }
 0x624   :  { %14266 = vmatprep.subr.bf16.mxu0 %v24415_v51 }
 0x625   :  { %10705 = vmatpush1.bf16.msra.mxu1 %v23898_v20  ;;  %v24454_v20 = vld [vmem:[%s26602_s3 + $0x4f0] ss:$8 sps:$4 sm:$0xff]  }
 0x626   :  { %10706 = vmatprep.subr.bf16.mxu1 %v23906_v15  ;;  %v24460_v15 = vld [vmem:[%s26602_s3 + $0x504] ss:$8 sps:$4 sm:$0xff]  }
 0x627   :  { %14267 = vmatpush1.bf16.msra.mxu0 %v24424_v12 }
 0x628   :  { %10644 = vmatmul.mubr.bf16.gmra.mrb[24].mxu1 %v23982_v29  ;;  %14268 = vmatprep.subr.bf16.mxu0 %v24430_v50 }
 0x629   :  { %10653 = vmatprep.mubr.bf16.mxu1 %v24067_v32  ;;  %10707 = vmatpush1.bf16.msra.mxu1 %v23912_v53  ;;  %v24468_v53 = vld [vmem:[%s26602_s3 + $0x500] ss:$8 sps:$4 sm:$0xff]   ;;  %v24490_v32 = vld [vmem:[%s26602_s3 + $0x510] ss:$8 sps:$4 sm:$0xff]  }
 0x62a   :  { %10708 = vmatprep.subr.bf16.mxu1 %v23918_v25  ;;  %v24475_v25 = vld [vmem:[%s26602_s3 + $0x514] ss:$8 sps:$4 sm:$0xff]  }
 0x62b   :  { %14269 = vmatpush1.bf16.msra.mxu0 %v24438_v5 }
 0x62c   :  { %14270 = vmatprep.subr.bf16.mxu0 %v24445_v30 }
 0x62d   :  { %10709 = vmatpush1.bf16.msra.mxu1 %v23938_v10  ;;  %v27240_v10 = vld [vmem:[#allocation193_spill] sm:$0xff] }
 0x62e   :  { %10710 = vmatprep.subr.bf16.mxu1 %v23951_v42  ;;  %v27241_v42 = vld [vmem:[#allocation192_spill] sm:$0xff] }
 0x62f   :  { %14271 = vmatpush1.bf16.msra.mxu0 %v24454_v20  ;;  %v27242_v58 = vpack.c.bf16 %v27240_v10, %v27241_v42  ;;  %v27249_v10 = vld [vmem:[#allocation204_spill] sm:$0xff]  ;;  %v27250_v42 = vld [vmem:[#allocation203_spill] sm:$0xff] }
 0x630   :  { %10654 = vmatmul.mubr.bf16.gmra.mrb[28].mxu1 %v24038_v4  ;;  %14333 = vmatprep.subr.bf16.mxu0 %v24460_v15  ;;  %v27245_v4 = vpack.c.bf16 %v27243_v14, %v27244_v43  ;;  %v24526_v14 = vld [vmem:[%s26602_s3 + $0x530] ss:$8 sps:$4 sm:$0xff]  }
 0x631   :  { %10663 = vmatprep.mubr.bf16.mxu1 %v24091_v38  ;;  %10711 = vmatpush1.bf16.msra.mxu1 %v23961_v1  ;;  %v24496_v1 = vld [vmem:[%s26602_s3 + $0x524] ss:$8 sps:$4 sm:$0xff]   ;;  %v24816_v38 = vld [vmem:[%s26602_s3 + $0x630] ss:$8 sps:$4 sm:$0xff]  }
 0x632   :  { %14273 = vmatmul.mubr.bf16.vlgmr.msra.gmra.mrb[184].mxu0 %v27242_v58  ;;  %10712 = vmatprep.subr.bf16.mxu1 %v23970_v21  ;;  %v24504_v21 = vld [vmem:[%s26602_s3 + $0x520] ss:$8 sps:$4 sm:$0xff]   ;;  %v27251_v58 = vpack.c.bf16 %v27249_v10, %v27250_v42  ;;  %v27256_v10 = vld [vmem:[#allocation210_spill] sm:$0xff] }
 0x633   :  { %14282 = vmatprep.mubr.bf16.mxu0 %v27245_v4  ;;  %14334 = vmatpush1.bf16.msra.mxu0 %v24468_v53  ;;  %v24511_v4 = vld [vmem:[%s26602_s3 + $0x534] ss:$8 sps:$4 sm:$0xff]  }
 0x634   :  { %14335 = vmatprep.subr.bf16.mxu0 %v24475_v25 }
 0x635   :  { %10713 = vmatpush1.bf16.msra.mxu1 %v23991_v62  ;;  %v27246_v62 = vld [vmem:[#allocation198_spill] sm:$0xff] }
 0x636   :  { %10714 = vmatprep.subr.bf16.mxu1 %v24003_v2  ;;  %v27247_v2 = vld [vmem:[#allocation200_spill] sm:$0xff] }
 0x637   :  { %14336 = vmatpush1.bf16.msra.mxu0 %v24490_v32  ;;  %v27248_v43 = vpack.c.bf16 %v27246_v62, %v27247_v2  ;;  %v24547_v62 = vld [vmem:[%s26602_s3 + $0x554] ss:$8 sps:$4 sm:$0xff]  }
 0x638   :  { %10664 = vmatmul.mubr.bf16.gmra.mrb[32].mxu1 %v24084_v19  ;;  %14337 = vmatprep.subr.bf16.mxu0 %v24496_v1 }
 0x639   :  { %10673 = vmatprep.mubr.bf16.mxu1 %v24133_v35  ;;  %10715 = vmatpush1.bf16.msra.mxu1 %v24015_v55  ;;  %v24532_v55 = vld [vmem:[%s26602_s3 + $0x544] ss:$8 sps:$4 sm:$0xff]   ;;  %v24638_v35 = vld [vmem:[%s26602_s3 + $0x590] ss:$8 sps:$4 sm:$0xff]  }
 0x63a   :  { %14283 = vmatmul.mubr.bf16.gmra.mrb[188].mxu0 %v27248_v43  ;;  %10716 = vmatprep.subr.bf16.mxu1 %v24031_v7  ;;  %v24540_v7 = vld [vmem:[%s26602_s3 + $0x540] ss:$8 sps:$4 sm:$0xff]  }
 0x63b   :  { %14292 = vmatprep.mubr.bf16.mxu0 %v27251_v58  ;;  %14338 = vmatpush1.bf16.msra.mxu0 %v24504_v21  ;;  %v27255_v43 = vld [vmem:[#allocation212_spill] sm:$0xff]  ;;  %v24562_v58 = vld [vmem:[%s26602_s3 + $0x550] ss:$8 sps:$4 sm:$0xff]  }
 0x63c   :  { %14339 = vmatprep.subr.bf16.mxu0 %v24511_v4  ;;  %v27257_v42 = vpack.c.bf16 %v27255_v43, %v27256_v10  ;;  %v27262_v43 = vld [vmem:[#allocation213_spill] sm:$0xff] }
 0x63d   :  { %10717 = vmatpush1.bf16.msra.mxu1 %v24051_v33  ;;  %v27252_v33 = vld [vmem:[#allocation206_spill] sm:$0xff] }
 0x63e   :  { %10718 = vmatprep.subr.bf16.mxu1 %v24065_v49  ;;  %v27253_v49 = vld [vmem:[#allocation205_spill] sm:$0xff] }
 0x63f   :  { %14340 = vmatpush1.bf16.msra.mxu0 %v24526_v14  ;;  %v27254_v2 = vpack.c.bf16 %v27252_v33, %v27253_v49  ;;  %v24583_v33 = vld [vmem:[%s26602_s3 + $0x574] ss:$8 sps:$4 sm:$0xff]  }
 0x640   :  { %10674 = vmatmul.mubr.bf16.gmra.mrb[36].mxu1 %v24126_v39  ;;  %14341 = vmatprep.subr.bf16.mxu0 %v24532_v55 }
 0x641   :  { %10683 = vmatprep.mubr.bf16.mxu1 %v24175_v57  ;;  %10719 = vmatpush1.bf16.msra.mxu1 %v24072_v46  ;;  %v24568_v46 = vld [vmem:[%s26602_s3 + $0x564] ss:$8 sps:$4 sm:$0xff]  }
 0x642   :  { %14293 = vmatmul.mubr.bf16.gmra.mrb[192].mxu0 %v27254_v2  ;;  %10720 = vmatprep.subr.bf16.mxu1 %v24082_v36  ;;  %v24576_v36 = vld [vmem:[%s26602_s3 + $0x560] ss:$8 sps:$4 sm:$0xff]   ;;  %v27261_v2 = vld [vmem:[#allocation214_spill] sm:$0xff] }
 0x643   :  { %14302 = vmatprep.mubr.bf16.mxu0 %v27257_v42  ;;  %14342 = vmatpush1.bf16.msra.mxu0 %v24540_v7  ;;  %v27263_v10 = vpack.c.bf16 %v27261_v2, %v27262_v43  ;;  %v27264_v42 = vld [vmem:[#allocation220_spill] sm:$0xff]  ;;  %v27272_v43 = vld [vmem:[#allocation222_spill] sm:$0xff] }
 0x644   :  { %14343 = vmatprep.subr.bf16.mxu0 %v24547_v62 }
 0x645   :  { %10721 = vmatpush1.bf16.msra.mxu1 %v24097_v0  ;;  %v27258_v0 = vld [vmem:[#allocation9_spill] sm:$0xff] }
 0x646   :  { %10722 = vmatprep.subr.bf16.mxu1 %v24109_v47  ;;  %v27259_v47 = vld [vmem:[#allocation8_spill] sm:$0xff] }
 0x647   :  { %14344 = vmatpush1.bf16.msra.mxu0 %v24562_v58  ;;  %v27260_v49 = vpack.c.bf16 %v27258_v0, %v27259_v47  ;;  %v24606_v0 = vld [vmem:[%s26602_s3 + $0x584] ss:$8 sps:$4 sm:$0xff]  }
 0x648   :  { %10684 = vmatmul.mubr.bf16.gmra.mrb[40].mxu1 %v24163_v52  ;;  %14345 = vmatprep.subr.bf16.mxu0 %v24568_v46  ;;  %v27265_v52 = vld [vmem:[#allocation218_spill] sm:$0xff]  ;;  %v27267_v47 = vld [vmem:[#allocation301_spill] sm:$0xff] }
 0x649   :  { %10723 = vmatpush1.bf16.msra.mxu1 %v24114_v26  ;;  %10726 = vmatprep.mubr.bf16.mxu1 %v27260_v49  ;;  %v27266_v57 = vpack.c.bf16 %v27264_v42, %v27265_v52  ;;  %v24600_v26 = vld [vmem:[%s26602_s3 + $0x570] ss:$8 sps:$4 sm:$0xff]   ;;  %v24614_v52 = vld [vmem:[%s26602_s3 + $0x580] ss:$8 sps:$4 sm:$0xff]  }
 0x64a   :  { %14303 = vmatmul.mubr.bf16.gmra.mrb[196].mxu0 %v27263_v10  ;;  %10724 = vmatprep.subr.bf16.mxu1 %v24124_v22  ;;  %v24621_v22 = vld [vmem:[%s26602_s3 + $0x594] ss:$8 sps:$4 sm:$0xff]  }
 0x64b   :  { %14312 = vmatprep.mubr.bf16.mxu0 %v27266_v57  ;;  %14346 = vmatpush1.bf16.msra.mxu0 %v24576_v36  ;;  %v27268_v57 = vld [vmem:[#allocation22_spill] sm:$0xff] }
 0x64c   :  { %14347 = vmatprep.subr.bf16.mxu0 %v24583_v33  ;;  %v27269_v49 = vld [vmem:[#allocation26_spill] sm:$0xff] }
 0x64d   :  { %10725 = vmatpush1.bf16.msra.mxu1 %v27267_v47  ;;  %v27270_v2 = vpack.c.bf16 %v27268_v57, %v27269_v49  ;;  %v27274_v42 = vld [vmem:[#allocation226_spill] sm:$0xff]  ;;  %v27275_v47 = vld [vmem:[#allocation225_spill] sm:$0xff] }
 0x64e   :  { %10807 = vmatprep.subr.bf16.mxu1 %v24148_v40  ;;  %v27271_v40 = vld [vmem:[#allocation221_spill] sm:$0xff]  ;;  %v27276_v39 = vpack.c.bf16 %v27274_v42, %v27275_v47  ;;  %v27286_v47 = vld [vmem:[#allocation292_spill] sm:$0xff] }
 0x64f   :  { %14348 = vmatpush1.bf16.msra.mxu0 %v24600_v26  ;;  %v27273_v10 = vpack.c.bf16 %v27271_v40, %v27272_v43  ;;  %v27277_v57 = vld [vmem:[#allocation41_spill] sm:$0xff]  ;;  %v27284_v43 = vld [vmem:[#allocation231_spill] sm:$0xff] }
 0x650   :  { %10727 = vmatmul.mubr.bf16.vlgmr.msra.gmra.mrb[12].mxu1 %v23940_v3  ;;  %14349 = vmatprep.subr.bf16.mxu0 %v24606_v0  ;;  %v24676_v42 = vld [vmem:[%s26602_s3 + $0x5b0] ss:$8 sps:$4 sm:$0xff]  }
 0x651   :  { %10736 = vmatprep.mubr.bf16.mxu1 %v27270_v2  ;;  %10808 = vmatpush1.bf16.msra.mxu1 %v24160_v34  ;;  %v24644_v34 = vld [vmem:[%s26602_s3 + $0x5a4] ss:$8 sps:$4 sm:$0xff]   ;;  %v27281_v2 = vld [vmem:[#allocation227_spill] sm:$0xff] }
 0x652   :  { %14313 = vmatmul.mubr.bf16.gmra.mrb[200].mxu0 %v27273_v10  ;;  %10809 = vmatprep.subr.bf16.mxu1 %v24169_v63  ;;  %v24659_v63 = vld [vmem:[%s26602_s3 + $0x5b4] ss:$8 sps:$4 sm:$0xff]  }
 0x653   :  { %14322 = vmatprep.mubr.bf16.mxu0 %v27276_v39  ;;  %14350 = vmatpush1.bf16.msra.mxu0 %v24614_v52  ;;  %v24652_v39 = vld [vmem:[%s26602_s3 + $0x5a0] ss:$8 sps:$4 sm:$0xff]  }
 0x654   :  { %14351 = vmatprep.subr.bf16.mxu0 %v24621_v22 }
 0x655   :  { %10810 = vmatpush1.bf16.msra.mxu1 %v24188_v56  ;;  %v27278_v56 = vld [vmem:[#allocation34_spill] sm:$0xff] }
 0x656   :  { %10811 = vmatprep.subr.bf16.mxu1 %v24194_v44  ;;  %v27279_v49 = vpack.c.bf16 %v27277_v57, %v27278_v56  ;;  %v27280_v44 = vld [vmem:[#allocation228_spill] sm:$0xff]  ;;  %v24697_v57 = vld [vmem:[%s26602_s3 + $0x5d4] ss:$8 sps:$4 sm:$0xff]  }
 0x657   :  { %14352 = vmatpush1.bf16.msra.mxu0 %v24638_v35  ;;  %v27282_v40 = vpack.c.bf16 %v27280_v44, %v27281_v2  ;;  %v27287_v56 = vld [vmem:[#allocation47_spill] sm:$0xff]  ;;  %v24714_v44 = vld [vmem:[%s26602_s3 + $0x5e4] ss:$8 sps:$4 sm:$0xff]  }
 0x658   :  { %10737 = vmatmul.mubr.bf16.gmra.mrb[16].mxu1 %v23940_v3  ;;  %14353 = vmatprep.subr.bf16.mxu0 %v24644_v34  ;;  %v27283_v3 = vld [vmem:[#allocation233_spill] sm:$0xff]  ;;  %v24729_v2 = vld [vmem:[%s26602_s3 + $0x5f4] ss:$8 sps:$4 sm:$0xff]  }
 0x659   :  { %10746 = vmatprep.mubr.bf16.mxu1 %v27279_v49  ;;  %10812 = vmatpush1.bf16.msra.mxu1 %v24206_v60  ;;  %v27285_v10 = vpack.c.bf16 %v27283_v3, %v27284_v43  ;;  %v24682_v60 = vld [vmem:[%s26602_s3 + $0x5c4] ss:$8 sps:$4 sm:$0xff]  }
 0x65a   :  { %14323 = vmatmul.mubr.bf16.gmra.mrb[204].mxu0 %v27282_v40  ;;  %10813 = vmatprep.subr.bf16.mxu1 %v24213_v23  ;;  %v24690_v23 = vld [vmem:[%s26602_s3 + $0x5c0] ss:$8 sps:$4 sm:$0xff]   ;;  %v24746_v43 = vld [vmem:[%s26602_s3 + $0x604] ss:$8 sps:$4 sm:$0xff]  }
 0x65b   :  { %14354 = vmatpush1.bf16.msra.mxu0 %v24652_v39  ;;  %14365 = vmatprep.mubr.bf16.mxu0 %v27285_v10  ;;  %v27291_v40 = vld [vmem:[#allocation51_spill] sm:$0xff] }
 0x65c   :  { %14355 = vmatprep.subr.bf16.mxu0 %v24659_v63  ;;  %v24761_v10 = vld [vmem:[%s26602_s3 + $0x614] ss:$8 sps:$4 sm:$0xff]  }
 0x65d   :  { %10814 = vmatpush1.bf16.msra.mxu1 %v24230_v48  ;;  %v27288_v48 = vld [vmem:[#allocation44_spill] sm:$0xff] }
 0x65e   :  { %10815 = vmatprep.subr.bf16.mxu1 %v24236_v31  ;;  %v27289_v49 = vpack.c.bf16 %v27287_v56, %v27288_v48  ;;  %v24708_v31 = vld [vmem:[%s26602_s3 + $0x5d0] ss:$8 sps:$4 sm:$0xff]  }
 0x65f   :  { %14356 = vmatpush1.bf16.msra.mxu0 %v24676_v42  ;;  %v27295_v56 = vld [vmem:[#allocation57_spill] sm:$0xff] }
 0x660   :  { %10747 = vmatmul.mubr.bf16.gmra.mrb[20].mxu1 %v27286_v47  ;;  %14357 = vmatprep.subr.bf16.mxu0 %v24682_v60  ;;  %v24778_v47 = vld [vmem:[%s26602_s3 + $0x610] ss:$8 sps:$4 sm:$0xff]  }
 0x661   :  { %10756 = vmatprep.mubr.bf16.mxu1 %v27289_v49  ;;  %10816 = vmatpush1.bf16.msra.mxu1 %v24248_v16  ;;  %v24722_v16 = vld [vmem:[%s26602_s3 + $0x5e0] ss:$8 sps:$4 sm:$0xff]   ;;  %v27299_v49 = vld [vmem:[#allocation194_spill] sm:$0xff] }
 0x662   :  { %10817 = vmatprep.subr.bf16.mxu1 %v24255_v41  ;;  %v27290_v41 = vld [vmem:[#allocation291_spill] sm:$0xff] }
 0x663   :  { %14358 = vmatpush1.bf16.msra.mxu0 %v24690_v23 }
 0x664   :  { %14359 = vmatprep.subr.bf16.mxu0 %v24697_v57 }
 0x665   :  { %10818 = vmatpush1.bf16.msra.mxu1 %v24272_v61  ;;  %v27292_v61 = vld [vmem:[#allocation49_spill] sm:$0xff] }
 0x666   :  { %10819 = vmatprep.subr.bf16.mxu1 %v24278_v8  ;;  %v27293_v3 = vpack.c.bf16 %v27291_v40, %v27292_v61  ;;  %v24740_v8 = vld [vmem:[%s26602_s3 + $0x5f0] ss:$8 sps:$4 sm:$0xff]  }
 0x667   :  { %14360 = vmatpush1.bf16.msra.mxu0 %v24708_v31  ;;  %v27301_v61 = vld [vmem:[#allocation202_spill] sm:$0xff] }
 0x668   :  { %10757 = vmatmul.mubr.bf16.gmra.mrb[24].mxu1 %v27290_v41  ;;  %14361 = vmatprep.subr.bf16.mxu0 %v24714_v44 }
 0x669   :  { %10766 = vmatprep.mubr.bf16.mxu1 %v27293_v3  ;;  %10820 = vmatpush1.bf16.msra.mxu1 %v24290_v28  ;;  %v24754_v28 = vld [vmem:[%s26602_s3 + $0x600] ss:$8 sps:$4 sm:$0xff]  }
 0x66a   :  { %10821 = vmatprep.subr.bf16.mxu1 %v24297_v54  ;;  %v27294_v54 = vld [vmem:[#allocation294_spill] sm:$0xff]  ;;  %v27302_v3 = vld [vmem:[#allocation240_spill] sm:$0xff] }
 0x66b   :  { %14362 = vmatpush1.bf16.msra.mxu0 %v24722_v16 }
 0x66c   :  { %14363 = vmatprep.subr.bf16.mxu0 %v24729_v2 }
 0x66d   :  { %10822 = vmatpush1.bf16.msra.mxu1 %v24314_v17  ;;  %v27296_v17 = vld [vmem:[#allocation54_spill] sm:$0xff] }
 0x66e   :  { %10823 = vmatprep.subr.bf16.mxu1 %v24320_v13  ;;  %v27297_v48 = vpack.c.bf16 %v27295_v56, %v27296_v17  ;;  %v27298_v13 = vld [vmem:[#allocation195_spill] sm:$0xff]  ;;  %v27306_v17 = vld [vmem:[#allocation209_spill] sm:$0xff] }
 0x66f   :  { %14364 = vmatpush1.bf16.msra.mxu0 %v24740_v8  ;;  %v27300_v40 = vpack.c.bf16 %v27298_v13, %v27299_v49  ;;  %v27305_v56 = vld [vmem:[#allocation211_spill] sm:$0xff]  ;;  %v27308_v13 = vld [vmem:[#allocation61_spill] sm:$0xff] }
 0x670   :  { %10767 = vmatmul.mubr.bf16.gmra.mrb[28].mxu1 %v27294_v54  ;;  %14426 = vmatprep.subr.bf16.mxu0 %v24746_v43  ;;  %v27303_v54 = vld [vmem:[#allocation239_spill] sm:$0xff] }
 0x671   :  { %10776 = vmatprep.mubr.bf16.mxu1 %v27297_v48  ;;  %10824 = vmatpush1.bf16.msra.mxu1 %v24332_v9  ;;  %v27304_v41 = vpack.c.bf16 %v27302_v3, %v27303_v54  ;;  %v24784_v9 = vld [vmem:[%s26602_s3 + $0x624] ss:$8 sps:$4 sm:$0xff]   ;;  %v24799_v48 = vld [vmem:[%s26602_s3 + $0x634] ss:$8 sps:$4 sm:$0xff]  }
 0x672   :  { %14366 = vmatmul.mubr.bf16.vlgmr.msra.gmra.mrb[184].mxu0 %v27300_v40  ;;  %10825 = vmatprep.subr.bf16.mxu1 %v27301_v61  ;;  %v27307_v54 = vld [vmem:[#allocation293_spill] sm:$0xff]  ;;  %v27309_v49 = vld [vmem:[#allocation59_spill] sm:$0xff] }
 0x673   :  { %14375 = vmatprep.mubr.bf16.mxu0 %v27304_v41  ;;  %14427 = vmatpush1.bf16.msra.mxu0 %v24754_v28  ;;  %v24792_v41 = vld [vmem:[%s26602_s3 + $0x620] ss:$8 sps:$4 sm:$0xff]   ;;  %v27310_v40 = vpack.c.bf16 %v27308_v13, %v27309_v49 }
 0x674   :  { %14428 = vmatprep.subr.bf16.mxu0 %v24761_v10  ;;  %v27311_v61 = vld [vmem:[#allocation199_spill] sm:$0xff]  ;;  %v27312_v3 = vld [vmem:[#allocation201_spill] sm:$0xff] }
 0x675   :  { %10826 = vmatpush1.bf16.msra.mxu1 %v27305_v56  ;;  %v27313_v56 = vpack.c.bf16 %v27311_v61, %v27312_v3  ;;  %v27318_v13 = vld [vmem:[#allocation67_spill] sm:$0xff]  ;;  %v27324_v3 = vld [vmem:[#allocation256_spill] sm:$0xff] }
 0x676   :  { %10827 = vmatprep.subr.bf16.mxu1 %v27306_v17  ;;  %v27314_v17 = vld [vmem:[#allocation249_spill] sm:$0xff] }
 0x677   :  { %14429 = vmatpush1.bf16.msra.mxu0 %v24778_v47 }
 0x678   :  { %10777 = vmatmul.mubr.bf16.gmra.mrb[32].mxu1 %v27307_v54  ;;  %14430 = vmatprep.subr.bf16.mxu0 %v24784_v9  ;;  %v27315_v54 = vld [vmem:[#allocation247_spill] sm:$0xff] }
 0x679   :  { %10786 = vmatprep.mubr.bf16.mxu1 %v27310_v40  ;;  %10828 = vmatpush1.bf16.msra.mxu1 %v24374_v6  ;;  %v27316_v19 = vpack.c.bf16 %v27314_v17, %v27315_v54  ;;  %v24822_v6 = vld [vmem:[%s26602_s3 + $0x644] ss:$8 sps:$4 sm:$0xff]   ;;  %v24837_v54 = vld [vmem:[%s26602_s3 + $0x654] ss:$8 sps:$4 sm:$0xff]  }
 0x67a   :  { %14376 = vmatmul.mubr.bf16.gmra.mrb[188].mxu0 %v27313_v56  ;;  %10829 = vmatprep.subr.bf16.mxu1 %v24381_v27  ;;  %v27317_v27 = vld [vmem:[#allocation295_spill] sm:$0xff]  ;;  %v27322_v40 = vld [vmem:[#allocation208_spill] sm:$0xff] }
 0x67b   :  { %14385 = vmatprep.mubr.bf16.mxu0 %v27316_v19  ;;  %14431 = vmatpush1.bf16.msra.mxu0 %v24792_v41  ;;  %v24830_v19 = vld [vmem:[%s26602_s3 + $0x640] ss:$8 sps:$4 sm:$0xff]  }
 0x67c   :  { %14432 = vmatprep.subr.bf16.mxu0 %v24799_v48  ;;  %v27325_v56 = vld [vmem:[#allocation255_spill] sm:$0xff] }
 0x67d   :  { %10830 = vmatpush1.bf16.msra.mxu1 %v24395_v24  ;;  %v27319_v24 = vld [vmem:[#allocation66_spill] sm:$0xff]  ;;  %v27326_v17 = vpack.c.bf16 %v27324_v3, %v27325_v56  ;;  %v27334_v3 = vld [vmem:[#allocation260_spill] sm:$0xff]  ;;  %v27335_v56 = vld [vmem:[#allocation259_spill] sm:$0xff] }
 0x67e   :  { %10831 = vmatprep.subr.bf16.mxu1 %v24401_v18  ;;  %v27320_v49 = vpack.c.bf16 %v27318_v13, %v27319_v24  ;;  %v27321_v18 = vld [vmem:[#allocation207_spill] sm:$0xff]  ;;  %v27327_v13 = vld [vmem:[#allocation188_spill] sm:$0xff] }
 0x67f   :  { %14433 = vmatpush1.bf16.msra.mxu0 %v24816_v38  ;;  %v27323_v61 = vpack.c.bf16 %v27321_v18, %v27322_v40  ;;  %v24875_v24 = vld [vmem:[%s26602_s3 + $0x674] ss:$8 sps:$4 sm:$0xff]   ;;  %v27331_v18 = vld [vmem:[#allocation216_spill] sm:$0xff] }
 0x680   :  { %10787 = vmatmul.mubr.bf16.gmra.mrb[36].mxu1 %v27317_v27  ;;  %14434 = vmatprep.subr.bf16.mxu0 %v24822_v6  ;;  %v24854_v27 = vld [vmem:[%s26602_s3 + $0x650] ss:$8 sps:$4 sm:$0xff]  }
 0x681   :  { %10796 = vmatprep.mubr.bf16.mxu1 %v27320_v49  ;;  %10832 = vmatpush1.bf16.msra.mxu1 %v24408_v37  ;;  %v24860_v37 = vld [vmem:[%s26602_s3 + $0x664] ss:$8 sps:$4 sm:$0xff]   ;;  %v27332_v40 = vld [vmem:[#allocation215_spill] sm:$0xff] }
 0x682   :  { %14386 = vmatmul.mubr.bf16.gmra.mrb[192].mxu0 %v27323_v61  ;;  %10833 = vmatprep.subr.bf16.mxu1 %v24415_v51  ;;  %v24868_v51 = vld [vmem:[%s26602_s3 + $0x660] ss:$8 sps:$4 sm:$0xff]   ;;  %v27333_v61 = vpack.c.bf16 %v27331_v18, %v27332_v40  ;;  %v24915_v40 = vld [vmem:[%s26602_s3 + $0x694] ss:$8 sps:$4 sm:$0xff]  }
 0x683   :  { %14395 = vmatprep.mubr.bf16.mxu0 %v27326_v17  ;;  %14435 = vmatpush1.bf16.msra.mxu0 %v24830_v19  ;;  %v27336_v17 = vpack.c.bf16 %v27334_v3, %v27335_v56  ;;  %v27343_v3 = vld [vmem:[#allocation223_spill] sm:$0xff]  ;;  %v27344_v56 = vld [vmem:[#allocation224_spill] sm:$0xff] }
 0x684   :  { %14436 = vmatprep.subr.bf16.mxu0 %v24837_v54 }
 0x685   :  { %10834 = vmatpush1.bf16.msra.mxu1 %v24424_v12  ;;  %v27328_v12 = vld [vmem:[#allocation71_spill] sm:$0xff] }
 0x686   :  { %10835 = vmatprep.subr.bf16.mxu1 %v24430_v50  ;;  %v27329_v50 = vld [vmem:[#allocation70_spill] sm:$0xff] }
 0x687   :  { %14437 = vmatpush1.bf16.msra.mxu0 %v24854_v27  ;;  %v27330_v49 = vpack.c.bf16 %v27328_v12, %v27329_v50  ;;  %v24898_v12 = vld [vmem:[%s26602_s3 + $0x684] ss:$8 sps:$4 sm:$0xff]   ;;  %v27337_v50 = vld [vmem:[#allocation11_spill] sm:$0xff] }
 0x688   :  { %10797 = vmatmul.mubr.bf16.gmra.mrb[40].mxu1 %v27327_v13  ;;  %14438 = vmatprep.subr.bf16.mxu0 %v24860_v37  ;;  %v24932_v13 = vld [vmem:[%s26602_s3 + $0x690] ss:$8 sps:$4 sm:$0xff]  }
 0x689   :  { %10836 = vmatpush1.bf16.msra.mxu1 %v24438_v5  ;;  %10839 = vmatprep.mubr.bf16.mxu1 %v27330_v49  ;;  %v24892_v5 = vld [vmem:[%s26602_s3 + $0x670] ss:$8 sps:$4 sm:$0xff]  }
 0x68a   :  { %14396 = vmatmul.mubr.bf16.gmra.mrb[196].mxu0 %v27333_v61  ;;  %10837 = vmatprep.subr.bf16.mxu1 %v24445_v30  ;;  %v24906_v30 = vld [vmem:[%s26602_s3 + $0x680] ss:$8 sps:$4 sm:$0xff]   ;;  %v27338_v49 = vld [vmem:[#allocation10_spill] sm:$0xff] }
 0x68b   :  { %14405 = vmatprep.mubr.bf16.mxu0 %v27336_v17  ;;  %14439 = vmatpush1.bf16.msra.mxu0 %v24868_v51  ;;  %v27339_v18 = vpack.c.bf16 %v27337_v50, %v27338_v49  ;;  %v27345_v17 = vpack.c.bf16 %v27343_v3, %v27344_v56  ;;  %v27346_v50 = vld [vmem:[#allocation264_spill] sm:$0xff]  ;;  %v27347_v49 = vld [vmem:[#allocation263_spill] sm:$0xff] }
 0x68c   :  { %14440 = vmatprep.subr.bf16.mxu0 %v24875_v24  ;;  %v24955_v3 = vld [vmem:[%s26602_s3 + $0x6b4] ss:$8 sps:$4 sm:$0xff]  }
 0x68d   :  { %10838 = vmatpush1.bf16.msra.mxu1 %v24454_v20  ;;  %v27340_v20 = vld [vmem:[#allocation75_spill] sm:$0xff] }
 0x68e   :  { %10920 = vmatprep.subr.bf16.mxu1 %v24460_v15  ;;  %v27341_v15 = vld [vmem:[#allocation74_spill] sm:$0xff] }
 0x68f   :  { %14441 = vmatpush1.bf16.msra.mxu0 %v24892_v5  ;;  %v27342_v61 = vpack.c.bf16 %v27340_v20, %v27341_v15  ;;  %v27349_v20 = vld [vmem:[#allocation17_spill] sm:$0xff]  ;;  %v27350_v15 = vld [vmem:[#allocation16_spill] sm:$0xff] }
 0x690   :  { %10840 = vmatmul.mubr.bf16.vlgmr.msra.gmra.mrb[12].mxu1 %v27339_v18  ;;  %14442 = vmatprep.subr.bf16.mxu0 %v24898_v12  ;;  %v27348_v18 = vpack.c.bf16 %v27346_v50, %v27347_v49  ;;  %v27356_v50 = vld [vmem:[#allocation230_spill] sm:$0xff] }
 0x691   :  { %10849 = vmatprep.mubr.bf16.mxu1 %v27342_v61  ;;  %10921 = vmatpush1.bf16.msra.mxu1 %v24468_v53  ;;  %v24938_v53 = vld [vmem:[%s26602_s3 + $0x6a4] ss:$8 sps:$4 sm:$0xff]   ;;  %v27351_v61 = vpack.c.bf16 %v27349_v20, %v27350_v15  ;;  %v27359_v20 = vld [vmem:[#allocation238_spill] sm:$0xff] }
 0x692   :  { %14406 = vmatmul.mubr.bf16.gmra.mrb[200].mxu0 %v27345_v17  ;;  %10922 = vmatprep.subr.bf16.mxu1 %v24475_v25  ;;  %v24946_v25 = vld [vmem:[%s26602_s3 + $0x6a0] ss:$8 sps:$4 sm:$0xff]  }
 0x693   :  { %14415 = vmatprep.mubr.bf16.mxu0 %v27348_v18  ;;  %14443 = vmatpush1.bf16.msra.mxu0 %v24906_v30  ;;  %v27355_v17 = vld [vmem:[#allocation229_spill] sm:$0xff] }
 0x694   :  { %14444 = vmatprep.subr.bf16.mxu0 %v24915_v40  ;;  %v27357_v49 = vpack.c.bf16 %v27355_v17, %v27356_v50  ;;  %v27358_v18 = vld [vmem:[#allocation237_spill] sm:$0xff]  ;;  %v24995_v17 = vld [vmem:[%s26602_s3 + $0x6d4] ss:$8 sps:$4 sm:$0xff]  }
 0x695   :  { %10923 = vmatpush1.bf16.msra.mxu1 %v24490_v32  ;;  %v27352_v32 = vld [vmem:[#allocation79_spill] sm:$0xff]  ;;  %v27360_v15 = vpack.c.bf16 %v27358_v18, %v27359_v20  ;;  %v25012_v18 = vld [vmem:[%s26602_s3 + $0x6e4] ss:$8 sps:$4 sm:$0xff]  }
 0x696   :  { %10924 = vmatprep.subr.bf16.mxu1 %v24496_v1  ;;  %v27353_v1 = vld [vmem:[#allocation78_spill] sm:$0xff]  ;;  %v27368_v20 = vld [vmem:[#allocation28_spill] sm:$0xff] }
 0x697   :  { %14445 = vmatpush1.bf16.msra.mxu0 %v24932_v13  ;;  %v27354_v56 = vpack.c.bf16 %v27352_v32, %v27353_v1  ;;  %v27361_v32 = vld [vmem:[#allocation21_spill] sm:$0xff]  ;;  %v27362_v1 = vld [vmem:[#allocation20_spill] sm:$0xff] }
 0x698   :  { %10850 = vmatmul.mubr.bf16.gmra.mrb[16].mxu1 %v27351_v61  ;;  %14446 = vmatprep.subr.bf16.mxu0 %v24938_v53  ;;  %v24972_v61 = vld [vmem:[%s26602_s3 + $0x6b0] ss:$8 sps:$4 sm:$0xff]  }
 0x699   :  { %10859 = vmatprep.mubr.bf16.mxu1 %v27354_v56  ;;  %10925 = vmatpush1.bf16.msra.mxu1 %v24504_v21  ;;  %v24978_v21 = vld [vmem:[%s26602_s3 + $0x6c4] ss:$8 sps:$4 sm:$0xff]   ;;  %v27363_v56 = vpack.c.bf16 %v27361_v32, %v27362_v1  ;;  %v25029_v32 = vld [vmem:[%s26602_s3 + $0x6f4] ss:$8 sps:$4 sm:$0xff]  }
 0x69a   :  { %14416 = vmatmul.mubr.bf16.gmra.mrb[204].mxu0 %v27357_v49  ;;  %10926 = vmatprep.subr.bf16.mxu1 %v24511_v4  ;;  %v24986_v4 = vld [vmem:[%s26602_s3 + $0x6c0] ss:$8 sps:$4 sm:$0xff]   ;;  %v25006_v49 = vld [vmem:[%s26602_s3 + $0x6d0] ss:$8 sps:$4 sm:$0xff]  }
 0x69b   :  { %14447 = vmatpush1.bf16.msra.mxu0 %v24946_v25  ;;  %14458 = vmatprep.mubr.bf16.mxu0 %v27360_v15 }
 0x69c   :  { %14448 = vmatprep.subr.bf16.mxu0 %v24955_v3 }
 0x69d   :  { %10927 = vmatpush1.bf16.msra.mxu1 %v24526_v14  ;;  %v27364_v14 = vld [vmem:[#allocation83_spill] sm:$0xff] }
 0x69e   :  { %10928 = vmatprep.subr.bf16.mxu1 %v24532_v55  ;;  %v27365_v55 = vld [vmem:[#allocation82_spill] sm:$0xff] }
 0x69f   :  { %14449 = vmatpush1.bf16.msra.mxu0 %v24972_v61  ;;  %v27366_v50 = vpack.c.bf16 %v27364_v14, %v27365_v55  ;;  %v25046_v14 = vld [vmem:[%s26602_s3 + $0x704] ss:$8 sps:$4 sm:$0xff]  }
 0x6a0   :  { %10860 = vmatmul.mubr.bf16.gmra.mrb[20].mxu1 %v27363_v56  ;;  %14450 = vmatprep.subr.bf16.mxu0 %v24978_v21  ;;  %v25040_v56 = vld [vmem:[%s26602_s3 + $0x6f0] ss:$8 sps:$4 sm:$0xff]   ;;  %v27374_v55 = vld [vmem:[#allocation36_spill] sm:$0xff] }
 0x6a1   :  { %10869 = vmatprep.mubr.bf16.mxu1 %v27366_v50  ;;  %10929 = vmatpush1.bf16.msra.mxu1 %v24540_v7  ;;  %v25020_v7 = vld [vmem:[%s26602_s3 + $0x6e0] ss:$8 sps:$4 sm:$0xff]  }
 0x6a2   :  { %10930 = vmatprep.subr.bf16.mxu1 %v24547_v62  ;;  %v27367_v62 = vld [vmem:[#allocation29_spill] sm:$0xff] }
 0x6a3   :  { %14451 = vmatpush1.bf16.msra.mxu0 %v24986_v4  ;;  %v27369_v15 = vpack.c.bf16 %v27367_v62, %v27368_v20  ;;  %v25063_v62 = vld [vmem:[%s26602_s3 + $0x714] ss:$8 sps:$4 sm:$0xff]  }
 0x6a4   :  { %14452 = vmatprep.subr.bf16.mxu0 %v24995_v17 }
 0x6a5   :  { %10931 = vmatpush1.bf16.msra.mxu1 %v24562_v58  ;;  %v27370_v58 = vld [vmem:[#allocation87_spill] sm:$0xff] }
 0x6a6   :  { %10932 = vmatprep.subr.bf16.mxu1 %v24568_v46  ;;  %v27371_v46 = vld [vmem:[#allocation86_spill] sm:$0xff] }
 0x6a7   :  { %14453 = vmatpush1.bf16.msra.mxu0 %v25006_v49  ;;  %v27372_v1 = vpack.c.bf16 %v27370_v58, %v27371_v46  ;;  %v27380_v58 = vld [vmem:[#allocation235_spill] sm:$0xff] }
 0x6a8   :  { %10870 = vmatmul.mubr.bf16.gmra.mrb[24].mxu1 %v27369_v15  ;;  %14454 = vmatprep.subr.bf16.mxu0 %v25012_v18  ;;  %v27379_v15 = vld [vmem:[#allocation236_spill] sm:$0xff] }
 0x6a9   :  { %10879 = vmatprep.mubr.bf16.mxu1 %v27372_v1  ;;  %10933 = vmatpush1.bf16.msra.mxu1 %v24576_v36  ;;  %v25054_v36 = vld [vmem:[%s26602_s3 + $0x700] ss:$8 sps:$4 sm:$0xff]   ;;  %v27381_v46 = vpack.c.bf16 %v27379_v15, %v27380_v58  ;;  %v27382_v1 = vld [vmem:[#allocation234_spill] sm:$0xff] }
 0x6aa   :  { %10934 = vmatprep.subr.bf16.mxu1 %v24583_v33  ;;  %v27373_v33 = vld [vmem:[#allocation39_spill] sm:$0xff] }
 0x6ab   :  { %14455 = vmatpush1.bf16.msra.mxu0 %v25020_v7  ;;  %v27375_v50 = vpack.c.bf16 %v27373_v33, %v27374_v55  ;;  %v27383_v33 = vld [vmem:[#allocation232_spill] sm:$0xff]  ;;  %v25103_v15 = vld [vmem:[%s26602_s3 + $0x734] ss:$8 sps:$4 sm:$0xff]  }
 0x6ac   :  { %14456 = vmatprep.subr.bf16.mxu0 %v25029_v32  ;;  %v27384_v55 = vpack.c.bf16 %v27382_v1, %v27383_v33  ;;  %v27392_v1 = vld [vmem:[#allocation243_spill] sm:$0xff] }
 0x6ad   :  { %10935 = vmatpush1.bf16.msra.mxu1 %v24600_v26  ;;  %v27376_v26 = vld [vmem:[#allocation91_spill] sm:$0xff] }
 0x6ae   :  { %10936 = vmatprep.subr.bf16.mxu1 %v24606_v0  ;;  %v27377_v0 = vld [vmem:[#allocation90_spill] sm:$0xff] }
 0x6af   :  { %14457 = vmatpush1.bf16.msra.mxu0 %v25040_v56  ;;  %v27378_v20 = vpack.c.bf16 %v27376_v26, %v27377_v0  ;;  %v27385_v26 = vld [vmem:[#allocation48_spill] sm:$0xff]  ;;  %v27386_v0 = vld [vmem:[#allocation43_spill] sm:$0xff] }
 0x6b0   :  { %10880 = vmatmul.mubr.bf16.gmra.mrb[28].mxu1 %v27375_v50  ;;  %14519 = vmatprep.subr.bf16.mxu0 %v25046_v14  ;;  %v25080_v50 = vld [vmem:[%s26602_s3 + $0x710] ss:$8 sps:$4 sm:$0xff]  }
 0x6b1   :  { %10889 = vmatprep.mubr.bf16.mxu1 %v27378_v20  ;;  %10937 = vmatpush1.bf16.msra.mxu1 %v24614_v52  ;;  %v25086_v52 = vld [vmem:[%s26602_s3 + $0x724] ss:$8 sps:$4 sm:$0xff]   ;;  %v27387_v20 = vpack.c.bf16 %v27385_v26, %v27386_v0  ;;  %v27395_v26 = vld [vmem:[#allocation246_spill] sm:$0xff] }
 0x6b2   :  { %14459 = vmatmul.mubr.bf16.vlgmr.msra.gmra.mrb[184].mxu0 %v27381_v46  ;;  %10938 = vmatprep.subr.bf16.mxu1 %v24621_v22  ;;  %v25094_v22 = vld [vmem:[%s26602_s3 + $0x720] ss:$8 sps:$4 sm:$0xff]  }
 0x6b3   :  { %14468 = vmatprep.mubr.bf16.mxu0 %v27384_v55  ;;  %14520 = vmatpush1.bf16.msra.mxu0 %v25054_v36  ;;  %v27391_v46 = vld [vmem:[#allocation244_spill] sm:$0xff]  ;;  %v27394_v55 = vld [vmem:[#allocation245_spill] sm:$0xff] }
 0x6b4   :  { %14521 = vmatprep.subr.bf16.mxu0 %v25063_v62  ;;  %v27393_v33 = vpack.c.bf16 %v27391_v46, %v27392_v1  ;;  %v27396_v0 = vpack.c.bf16 %v27394_v55, %v27395_v26  ;;  %v25143_v46 = vld [vmem:[%s26602_s3 + $0x754] ss:$8 sps:$4 sm:$0xff]  }
 0x6b5   :  { %10939 = vmatpush1.bf16.msra.mxu1 %v24638_v35  ;;  %v27388_v35 = vld [vmem:[#allocation95_spill] sm:$0xff] }
 0x6b6   :  { %10940 = vmatprep.subr.bf16.mxu1 %v24644_v34  ;;  %v27389_v34 = vld [vmem:[#allocation94_spill] sm:$0xff]  ;;  %v27404_v55 = vld [vmem:[#allocation251_spill] sm:$0xff] }
 0x6b7   :  { %14522 = vmatpush1.bf16.msra.mxu0 %v25080_v50  ;;  %v27390_v58 = vpack.c.bf16 %v27388_v35, %v27389_v34  ;;  %v27397_v35 = vld [vmem:[#allocation58_spill] sm:$0xff]  ;;  %v27398_v34 = vld [vmem:[#allocation53_spill] sm:$0xff] }
 0x6b8   :  { %10890 = vmatmul.mubr.bf16.gmra.mrb[32].mxu1 %v27387_v20  ;;  %14523 = vmatprep.subr.bf16.mxu0 %v25086_v52  ;;  %v25120_v20 = vld [vmem:[%s26602_s3 + $0x730] ss:$8 sps:$4 sm:$0xff]  }
 0x6b9   :  { %10899 = vmatprep.mubr.bf16.mxu1 %v27390_v58  ;;  %10941 = vmatpush1.bf16.msra.mxu1 %v24652_v39  ;;  %v25126_v39 = vld [vmem:[%s26602_s3 + $0x744] ss:$8 sps:$4 sm:$0xff]   ;;  %v27399_v58 = vpack.c.bf16 %v27397_v35, %v27398_v34 }
 0x6ba   :  { %14469 = vmatmul.mubr.bf16.gmra.mrb[188].mxu0 %v27393_v33  ;;  %10942 = vmatprep.subr.bf16.mxu1 %v24659_v63  ;;  %v25134_v63 = vld [vmem:[%s26602_s3 + $0x740] ss:$8 sps:$4 sm:$0xff]  }
 0x6bb   :  { %14478 = vmatprep.mubr.bf16.mxu0 %v27396_v0  ;;  %14524 = vmatpush1.bf16.msra.mxu0 %v25094_v22  ;;  %v27403_v33 = vld [vmem:[#allocation252_spill] sm:$0xff]  ;;  %v27406_v0 = vld [vmem:[#allocation242_spill] sm:$0xff]  ;;  %v27407_v35 = vld [vmem:[#allocation241_spill] sm:$0xff] }
 0x6bc   :  { %14525 = vmatprep.subr.bf16.mxu0 %v25103_v15  ;;  %v27405_v26 = vpack.c.bf16 %v27403_v33, %v27404_v55  ;;  %v27408_v34 = vpack.c.bf16 %v27406_v0, %v27407_v35  ;;  %v25183_v33 = vld [vmem:[%s26602_s3 + $0x774] ss:$8 sps:$4 sm:$0xff]   ;;  %v27416_v0 = vld [vmem:[#allocation257_spill] sm:$0xff] }
 0x6bd   :  { %10943 = vmatpush1.bf16.msra.mxu1 %v24676_v42  ;;  %v27400_v42 = vld [vmem:[#allocation99_spill] sm:$0xff] }
 0x6be   :  { %10944 = vmatprep.subr.bf16.mxu1 %v24682_v60  ;;  %v27401_v60 = vld [vmem:[#allocation98_spill] sm:$0xff] }
 0x6bf   :  { %14526 = vmatpush1.bf16.msra.mxu0 %v25120_v20  ;;  %v27402_v1 = vpack.c.bf16 %v27400_v42, %v27401_v60  ;;  %v27409_v42 = vld [vmem:[#allocation68_spill] sm:$0xff]  ;;  %v27410_v60 = vld [vmem:[#allocation63_spill] sm:$0xff] }
 0x6c0   :  { %10900 = vmatmul.mubr.bf16.gmra.mrb[36].mxu1 %v27399_v58  ;;  %14527 = vmatprep.subr.bf16.mxu0 %v25126_v39  ;;  %v25160_v58 = vld [vmem:[%s26602_s3 + $0x750] ss:$8 sps:$4 sm:$0xff]  }
 0x6c1   :  { %10909 = vmatprep.mubr.bf16.mxu1 %v27402_v1  ;;  %10945 = vmatpush1.bf16.msra.mxu1 %v24690_v23  ;;  %v25166_v23 = vld [vmem:[%s26602_s3 + $0x764] ss:$8 sps:$4 sm:$0xff]   ;;  %v27411_v1 = vpack.c.bf16 %v27409_v42, %v27410_v60 }
 0x6c2   :  { %14479 = vmatmul.mubr.bf16.gmra.mrb[192].mxu0 %v27405_v26  ;;  %10946 = vmatprep.subr.bf16.mxu1 %v24697_v57  ;;  %v25174_v57 = vld [vmem:[%s26602_s3 + $0x760] ss:$8 sps:$4 sm:$0xff]   ;;  %v27415_v26 = vld [vmem:[#allocation258_spill] sm:$0xff] }
 0x6c3   :  { %14488 = vmatprep.mubr.bf16.mxu0 %v27408_v34  ;;  %14528 = vmatpush1.bf16.msra.mxu0 %v25134_v63  ;;  %v27417_v35 = vpack.c.bf16 %v27415_v26, %v27416_v0  ;;  %v27418_v34 = vld [vmem:[#allocation254_spill] sm:$0xff]  ;;  %v27419_v42 = vld [vmem:[#allocation253_spill] sm:$0xff] }
 0x6c4   :  { %14529 = vmatprep.subr.bf16.mxu0 %v25143_v46  ;;  %v27420_v60 = vpack.c.bf16 %v27418_v34, %v27419_v42  ;;  %v25223_v26 = vld [vmem:[%s26602_s3 + $0x794] ss:$8 sps:$4 sm:$0xff]   ;;  %v27428_v34 = vld [vmem:[#allocation261_spill] sm:$0xff] }
 0x6c5   :  { %10947 = vmatpush1.bf16.msra.mxu1 %v24708_v31  ;;  %v27412_v31 = vld [vmem:[#allocation7_spill] sm:$0xff] }
 0x6c6   :  { %10948 = vmatprep.subr.bf16.mxu1 %v24714_v44  ;;  %v27413_v44 = vld [vmem:[#allocation6_spill] sm:$0xff] }
 0x6c7   :  { %14530 = vmatpush1.bf16.msra.mxu0 %v25160_v58  ;;  %v27414_v55 = vpack.c.bf16 %v27412_v31, %v27413_v44  ;;  %v27421_v31 = vld [vmem:[#allocation73_spill] sm:$0xff]  ;;  %v27422_v44 = vld [vmem:[#allocation72_spill] sm:$0xff] }
 0x6c8   :  { %10910 = vmatmul.mubr.bf16.gmra.mrb[40].mxu1 %v27411_v1  ;;  %14531 = vmatprep.subr.bf16.mxu0 %v25166_v23  ;;  %v25206_v1 = vld [vmem:[%s26602_s3 + $0x784] ss:$8 sps:$4 sm:$0xff]  }
 0x6c9   :  { %10949 = vmatpush1.bf16.msra.mxu1 %v24722_v16  ;;  %10952 = vmatprep.mubr.bf16.mxu1 %v27414_v55  ;;  %v25200_v16 = vld [vmem:[%s26602_s3 + $0x770] ss:$8 sps:$4 sm:$0xff]   ;;  %v27423_v55 = vpack.c.bf16 %v27421_v31, %v27422_v44  ;;  %v27431_v31 = vld [vmem:[#allocation248_spill] sm:$0xff] }
 0x6ca   :  { %14489 = vmatmul.mubr.bf16.gmra.mrb[196].mxu0 %v27417_v35  ;;  %10950 = vmatprep.subr.bf16.mxu1 %v24729_v2  ;;  %v25214_v2 = vld [vmem:[%s26602_s3 + $0x780] ss:$8 sps:$4 sm:$0xff]   ;;  %v27427_v35 = vld [vmem:[#allocation262_spill] sm:$0xff] }
 0x6cb   :  { %14498 = vmatprep.mubr.bf16.mxu0 %v27420_v60  ;;  %14532 = vmatpush1.bf16.msra.mxu0 %v25174_v57  ;;  %v27429_v42 = vpack.c.bf16 %v27427_v35, %v27428_v34  ;;  %v27430_v60 = vld [vmem:[#allocation250_spill] sm:$0xff] }
 0x6cc   :  { %14533 = vmatprep.subr.bf16.mxu0 %v25183_v33  ;;  %v27432_v44 = vpack.c.bf16 %v27430_v60, %v27431_v31  ;;  %v25263_v35 = vld [vmem:[%s26602_s3 + $0x7b4] ss:$8 sps:$4 sm:$0xff]   ;;  %v27440_v60 = vld [vmem:[#allocation265_spill] sm:$0xff] }
 0x6cd   :  { %10951 = vmatpush1.bf16.msra.mxu1 %v24740_v8  ;;  %v27424_v8 = vld [vmem:[#allocation15_spill] sm:$0xff] }
 0x6ce   :  { %11033 = vmatprep.subr.bf16.mxu1 %v24746_v43  ;;  %v27425_v43 = vld [vmem:[#allocation14_spill] sm:$0xff] }
 0x6cf   :  { %14534 = vmatpush1.bf16.msra.mxu0 %v25200_v16  ;;  %v27426_v0 = vpack.c.bf16 %v27424_v8, %v27425_v43  ;;  %v27433_v8 = vld [vmem:[#allocation77_spill] sm:$0xff]  ;;  %v27434_v43 = vld [vmem:[#allocation76_spill] sm:$0xff] }
 0x6d0   :  { %10953 = vmatmul.mubr.bf16.vlgmr.msra.gmra.mrb[12].mxu1 %v27423_v55  ;;  %14535 = vmatprep.subr.bf16.mxu0 %v25206_v1  ;;  %v25240_v55 = vld [vmem:[%s26602_s3 + $0x790] ss:$8 sps:$4 sm:$0xff]  }
 0x6d1   :  { %10962 = vmatprep.mubr.bf16.mxu1 %v27426_v0  ;;  %11034 = vmatpush1.bf16.msra.mxu1 %v24754_v28  ;;  %v25246_v28 = vld [vmem:[%s26602_s3 + $0x7a4] ss:$8 sps:$4 sm:$0xff]   ;;  %v27435_v0 = vpack.c.bf16 %v27433_v8, %v27434_v43  ;;  %v25278_v8 = vld [vmem:[%s26602_s3 + $0x7b0] ss:$8 sps:$4 sm:$0xff]  }
 0x6d2   :  { %14499 = vmatmul.mubr.bf16.gmra.mrb[200].mxu0 %v27429_v42  ;;  %11035 = vmatprep.subr.bf16.mxu1 %v24761_v10  ;;  %v25254_v10 = vld [vmem:[%s26602_s3 + $0x7a0] ss:$8 sps:$4 sm:$0xff]   ;;  %v27439_v42 = vld [vmem:[#allocation266_spill] sm:$0xff] }
 0x6d3   :  { %14508 = vmatprep.mubr.bf16.mxu0 %v27432_v44  ;;  %14536 = vmatpush1.bf16.msra.mxu0 %v25214_v2  ;;  %v27441_v31 = vpack.c.bf16 %v27439_v42, %v27440_v60  ;;  %v27442_v44 = vld [vmem:[#allocation269_spill] sm:$0xff] }
 0x6d4   :  { %14537 = vmatprep.subr.bf16.mxu0 %v25223_v26  ;;  %v27443_v43 = vld [vmem:[#allocation81_spill] sm:$0xff] }
 0x6d5   :  { %11036 = vmatpush1.bf16.msra.mxu1 %v24778_v47  ;;  %v27436_v47 = vld [vmem:[#allocation25_spill] sm:$0xff] }
 0x6d6   :  { %11037 = vmatprep.subr.bf16.mxu1 %v24784_v9  ;;  %v27437_v9 = vld [vmem:[#allocation27_spill] sm:$0xff]  ;;  %v25318_v60 = vld [vmem:[%s26602_s3 + $0x7e4] ss:$8 sps:$4 sm:$0xff]  }
 0x6d7   :  { %14538 = vmatpush1.bf16.msra.mxu0 %v25240_v55  ;;  %v27438_v34 = vpack.c.bf16 %v27436_v47, %v27437_v9  ;;  %v25301_v9 = vld [vmem:[%s26602_s3 + $0x7d4] ss:$8 sps:$4 sm:$0xff]   ;;  %v25312_v42 = vld [vmem:[%s26602_s3 + $0x7d0] ss:$8 sps:$4 sm:$0xff]  }
 0x6d8   :  { %10963 = vmatmul.mubr.bf16.gmra.mrb[16].mxu1 %v27435_v0  ;;  %14539 = vmatprep.subr.bf16.mxu0 %v25246_v28  ;;  %v27444_v0 = vld [vmem:[#allocation80_spill] sm:$0xff] }
 0x6d9   :  { %10972 = vmatprep.mubr.bf16.mxu1 %v27438_v34  ;;  %11038 = vmatpush1.bf16.msra.mxu1 %v24792_v41  ;;  %v25284_v41 = vld [vmem:[%s26602_s3 + $0x7c4] ss:$8 sps:$4 sm:$0xff]   ;;  %v27445_v47 = vpack.c.bf16 %v27443_v43, %v27444_v0  ;;  %v25335_v43 = vld [vmem:[%s26602_s3 + $0x7f4] ss:$8 sps:$4 sm:$0xff]  }
 0x6da   :  { %14509 = vmatmul.mubr.bf16.gmra.mrb[204].mxu0 %v27441_v31  ;;  %11039 = vmatprep.subr.bf16.mxu1 %v24799_v48  ;;  %v25292_v48 = vld [vmem:[%s26602_s3 + $0x7c0] ss:$8 sps:$4 sm:$0xff]  }
 0x6db   :  { %14540 = vmatpush1.bf16.msra.mxu0 %v25254_v10  ;;  %14551 = vmatprep.mubr.bf16.mxu0 %v27442_v44  ;;  %v27450_v31 = vld [vmem:[#allocation84_spill] sm:$0xff] }
 0x6dc   :  { %14541 = vmatprep.subr.bf16.mxu0 %v25263_v35 }
 0x6dd   :  { %11040 = vmatpush1.bf16.msra.mxu1 %v24816_v38  ;;  %v27446_v38 = vld [vmem:[#allocation32_spill] sm:$0xff] }
 0x6de   :  { %11041 = vmatprep.subr.bf16.mxu1 %v24822_v6  ;;  %v27447_v6 = vld [vmem:[#allocation33_spill] sm:$0xff] }
 0x6df   :  { %14542 = vmatpush1.bf16.msra.mxu0 %v25278_v8  ;;  %v27448_v34 = vpack.c.bf16 %v27446_v38, %v27447_v6  ;;  %v25352_v38 = vld [vmem:[%s26602_s3 + $0x804] ss:$8 sps:$4 sm:$0xff]  }
 0x6e0   :  { %10973 = vmatmul.mubr.bf16.gmra.mrb[20].mxu1 %v27445_v47  ;;  %14543 = vmatprep.subr.bf16.mxu0 %v25284_v41  ;;  %v25346_v47 = vld [vmem:[%s26602_s3 + $0x7f0] ss:$8 sps:$4 sm:$0xff]   ;;  %v27456_v6 = vld [vmem:[#allocation88_spill] sm:$0xff] }
 0x6e1   :  { %10982 = vmatprep.mubr.bf16.mxu1 %v27448_v34  ;;  %11042 = vmatpush1.bf16.msra.mxu1 %v24830_v19  ;;  %v25326_v19 = vld [vmem:[%s26602_s3 + $0x7e0] ss:$8 sps:$4 sm:$0xff]  }
 0x6e2   :  { %11043 = vmatprep.subr.bf16.mxu1 %v24837_v54  ;;  %v27449_v54 = vld [vmem:[#allocation85_spill] sm:$0xff] }
 0x6e3   :  { %14544 = vmatpush1.bf16.msra.mxu0 %v25292_v48  ;;  %v27451_v44 = vpack.c.bf16 %v27449_v54, %v27450_v31  ;;  %v25369_v54 = vld [vmem:[%s26602_s3 + $0x814] ss:$8 sps:$4 sm:$0xff]  }
 0x6e4   :  { %14545 = vmatprep.subr.bf16.mxu0 %v25301_v9 }
 0x6e5   :  { %11044 = vmatpush1.bf16.msra.mxu1 %v24854_v27  ;;  %v27452_v27 = vld [vmem:[#allocation38_spill] sm:$0xff] }
 0x6e6   :  { %11045 = vmatprep.subr.bf16.mxu1 %v24860_v37  ;;  %v27453_v37 = vld [vmem:[#allocation35_spill] sm:$0xff] }
 0x6e7   :  { %14546 = vmatpush1.bf16.msra.mxu0 %v25312_v42  ;;  %v27454_v0 = vpack.c.bf16 %v27452_v27, %v27453_v37  ;;  %v27462_v27 = vld [vmem:[#allocation273_spill] sm:$0xff] }
 0x6e8   :  { %10983 = vmatmul.mubr.bf16.gmra.mrb[24].mxu1 %v27451_v44  ;;  %14547 = vmatprep.subr.bf16.mxu0 %v25318_v60  ;;  %v27461_v44 = vld [vmem:[#allocation267_spill] sm:$0xff] }
 0x6e9   :  { %10992 = vmatprep.mubr.bf16.mxu1 %v27454_v0  ;;  %11046 = vmatpush1.bf16.msra.mxu1 %v24868_v51  ;;  %v25360_v51 = vld [vmem:[%s26602_s3 + $0x800] ss:$8 sps:$4 sm:$0xff]   ;;  %v25382_v37 = vld [vmem:[%s26602_s3 + $0x810] ss:$8 sps:$4 sm:$0xff]   ;;  %v25388_v0 = vld [vmem:[%s26602_s3 + $0x824] ss:$8 sps:$4 sm:$0xff]  }
 0x6ea   :  { %11047 = vmatprep.subr.bf16.mxu1 %v24875_v24  ;;  %v27455_v24 = vld [vmem:[#allocation89_spill] sm:$0xff] }
 0x6eb   :  { %14548 = vmatpush1.bf16.msra.mxu0 %v25326_v19  ;;  %v27457_v34 = vpack.c.bf16 %v27455_v24, %v27456_v6  ;;  %v27464_v24 = vld [vmem:[#allocation92_spill] sm:$0xff] }
 0x6ec   :  { %14549 = vmatprep.subr.bf16.mxu0 %v25335_v43 }
 0x6ed   :  { %11048 = vmatpush1.bf16.msra.mxu1 %v24892_v5  ;;  %v27458_v5 = vld [vmem:[#allocation46_spill] sm:$0xff] }
 0x6ee   :  { %11049 = vmatprep.subr.bf16.mxu1 %v24898_v12  ;;  %v27459_v12 = vld [vmem:[#allocation42_spill] sm:$0xff] }
 0x6ef   :  { %14550 = vmatpush1.bf16.msra.mxu0 %v25346_v47  ;;  %v27460_v31 = vpack.c.bf16 %v27458_v5, %v27459_v12  ;;  %v27469_v12 = vld [vmem:[#allocation271_spill] sm:$0xff] }
 0x6f0   :  { %10993 = vmatmul.mubr.bf16.gmra.mrb[28].mxu1 %v27457_v34  ;;  %14612 = vmatprep.subr.bf16.mxu0 %v25352_v38  ;;  %v25405_v34 = vld [vmem:[%s26602_s3 + $0x834] ss:$8 sps:$4 sm:$0xff]  }
 0x6f1   :  { %11002 = vmatprep.mubr.bf16.mxu1 %v27460_v31  ;;  %11050 = vmatpush1.bf16.msra.mxu1 %v24906_v30  ;;  %v25396_v30 = vld [vmem:[%s26602_s3 + $0x820] ss:$8 sps:$4 sm:$0xff]  }
 0x6f2   :  { %14552 = vmatmul.mubr.bf16.vlgmr.msra.gmra.mrb[184].mxu0 %v27461_v44  ;;  %11051 = vmatprep.subr.bf16.mxu1 %v24915_v40  ;;  %v27463_v40 = vld [vmem:[#allocation93_spill] sm:$0xff] }
 0x6f3   :  { %14561 = vmatprep.mubr.bf16.mxu0 %v27462_v27  ;;  %14613 = vmatpush1.bf16.msra.mxu0 %v25360_v51  ;;  %v27465_v6 = vpack.c.bf16 %v27463_v40, %v27464_v24  ;;  %v27470_v31 = vld [vmem:[#allocation277_spill] sm:$0xff]  ;;  %v27472_v40 = vld [vmem:[#allocation96_spill] sm:$0xff] }
 0x6f4   :  { %14614 = vmatprep.subr.bf16.mxu0 %v25369_v54  ;;  %v25418_v44 = vld [vmem:[%s26602_s3 + $0x830] ss:$8 sps:$4 sm:$0xff]   ;;  %v25424_v27 = vld [vmem:[%s26602_s3 + $0x844] ss:$8 sps:$4 sm:$0xff]  }
 0x6f5   :  { %11052 = vmatpush1.bf16.msra.mxu1 %v24932_v13  ;;  %v27466_v13 = vld [vmem:[#allocation56_spill] sm:$0xff] }
 0x6f6   :  { %11053 = vmatprep.subr.bf16.mxu1 %v24938_v53  ;;  %v27467_v53 = vld [vmem:[#allocation52_spill] sm:$0xff] }
 0x6f7   :  { %14615 = vmatpush1.bf16.msra.mxu0 %v25382_v37  ;;  %v27468_v5 = vpack.c.bf16 %v27466_v13, %v27467_v53  ;;  %v27477_v53 = vld [vmem:[#allocation275_spill] sm:$0xff] }
 0x6f8   :  { %11003 = vmatmul.mubr.bf16.gmra.mrb[32].mxu1 %v27465_v6  ;;  %14616 = vmatprep.subr.bf16.mxu0 %v25388_v0  ;;  %v25441_v6 = vld [vmem:[%s26602_s3 + $0x854] ss:$8 sps:$4 sm:$0xff]  }
 0x6f9   :  { %11012 = vmatprep.mubr.bf16.mxu1 %v27468_v5  ;;  %11054 = vmatpush1.bf16.msra.mxu1 %v24946_v25  ;;  %v25432_v25 = vld [vmem:[%s26602_s3 + $0x840] ss:$8 sps:$4 sm:$0xff]  }
 0x6fa   :  { %14562 = vmatmul.mubr.bf16.gmra.mrb[188].mxu0 %v27469_v12  ;;  %11055 = vmatprep.subr.bf16.mxu1 %v24955_v3  ;;  %v27471_v3 = vld [vmem:[#allocation97_spill] sm:$0xff] }
 0x6fb   :  { %14571 = vmatprep.mubr.bf16.mxu0 %v27470_v31  ;;  %14617 = vmatpush1.bf16.msra.mxu0 %v25396_v30  ;;  %v27473_v24 = vpack.c.bf16 %v27471_v3, %v27472_v40  ;;  %v27478_v5 = vld [vmem:[#allocation281_spill] sm:$0xff]  ;;  %v27480_v3 = vld [vmem:[#allocation100_spill] sm:$0xff] }
 0x6fc   :  { %14618 = vmatprep.subr.bf16.mxu0 %v25405_v34  ;;  %v25454_v12 = vld [vmem:[%s26602_s3 + $0x850] ss:$8 sps:$4 sm:$0xff]   ;;  %v25460_v31 = vld [vmem:[%s26602_s3 + $0x864] ss:$8 sps:$4 sm:$0xff]  }
 0x6fd   :  { %11056 = vmatpush1.bf16.msra.mxu1 %v24972_v61  ;;  %v27474_v61 = vld [vmem:[#allocation65_spill] sm:$0xff] }
 0x6fe   :  { %11057 = vmatprep.subr.bf16.mxu1 %v24978_v21  ;;  %v27475_v21 = vld [vmem:[#allocation62_spill] sm:$0xff] }
 0x6ff   :  { %14619 = vmatpush1.bf16.msra.mxu0 %v25418_v44  ;;  %v27476_v13 = vpack.c.bf16 %v27474_v61, %v27475_v21  ;;  %v27485_v21 = vld [vmem:[#allocation279_spill] sm:$0xff] }
 0x700   :  { %11013 = vmatmul.mubr.bf16.gmra.mrb[36].mxu1 %v27473_v24  ;;  %14620 = vmatprep.subr.bf16.mxu0 %v25424_v27  ;;  %v25477_v24 = vld [vmem:[%s26602_s3 + $0x874] ss:$8 sps:$4 sm:$0xff]  }
 0x701   :  { %11022 = vmatprep.mubr.bf16.mxu1 %v27476_v13  ;;  %11058 = vmatpush1.bf16.msra.mxu1 %v24986_v4  ;;  %v25468_v4 = vld [vmem:[%s26602_s3 + $0x860] ss:$8 sps:$4 sm:$0xff]  }
 0x702   :  { %14572 = vmatmul.mubr.bf16.gmra.mrb[192].mxu0 %v27477_v53  ;;  %11059 = vmatprep.subr.bf16.mxu1 %v24995_v17  ;;  %v27479_v17 = vld [vmem:[#allocation101_spill] sm:$0xff] }
 0x703   :  { %14581 = vmatprep.mubr.bf16.mxu0 %v27478_v5  ;;  %14621 = vmatpush1.bf16.msra.mxu0 %v25432_v25  ;;  %v27481_v40 = vpack.c.bf16 %v27479_v17, %v27480_v3  ;;  %v27486_v13 = vld [vmem:[#allocation285_spill] sm:$0xff]  ;;  %v27488_v17 = vld [vmem:[#allocation12_spill] sm:$0xff] }
 0x704   :  { %14622 = vmatprep.subr.bf16.mxu0 %v25441_v6  ;;  %v25490_v53 = vld [vmem:[%s26602_s3 + $0x870] ss:$8 sps:$4 sm:$0xff]  }
 0x705   :  { %11060 = vmatpush1.bf16.msra.mxu1 %v25006_v49  ;;  %v27482_v49 = vld [vmem:[#allocation104_spill] sm:$0xff]  ;;  %v27487_v5 = vld [vmem:[#allocation13_spill] sm:$0xff] }
 0x706   :  { %11061 = vmatprep.subr.bf16.mxu1 %v25012_v18  ;;  %v27483_v18 = vld [vmem:[#allocation105_spill] sm:$0xff]  ;;  %v27489_v3 = vpack.c.bf16 %v27487_v5, %v27488_v17  ;;  %v27496_v5 = vld [vmem:[#allocation18_spill] sm:$0xff] }
 0x707   :  { %14623 = vmatpush1.bf16.msra.mxu0 %v25454_v12  ;;  %v27484_v61 = vpack.c.bf16 %v27482_v49, %v27483_v18  ;;  %v27493_v18 = vld [vmem:[#allocation283_spill] sm:$0xff] }
 0x708   :  { %11023 = vmatmul.mubr.bf16.gmra.mrb[40].mxu1 %v27481_v40  ;;  %14624 = vmatprep.subr.bf16.mxu0 %v25460_v31  ;;  %v25513_v40 = vld [vmem:[%s26602_s3 + $0x894] ss:$8 sps:$4 sm:$0xff]  }
 0x709   :  { %11062 = vmatpush1.bf16.msra.mxu1 %v25020_v7  ;;  %11065 = vmatprep.mubr.bf16.mxu1 %v27484_v61  ;;  %v25496_v7 = vld [vmem:[%s26602_s3 + $0x884] ss:$8 sps:$4 sm:$0xff]  }
 0x70a   :  { %14582 = vmatmul.mubr.bf16.gmra.mrb[196].mxu0 %v27485_v21  ;;  %11063 = vmatprep.subr.bf16.mxu1 %v25029_v32  ;;  %v25504_v32 = vld [vmem:[%s26602_s3 + $0x880] ss:$8 sps:$4 sm:$0xff]   ;;  %v25526_v21 = vld [vmem:[%s26602_s3 + $0x890] ss:$8 sps:$4 sm:$0xff]  }
 0x70b   :  { %14591 = vmatprep.mubr.bf16.mxu0 %v27486_v13  ;;  %14625 = vmatpush1.bf16.msra.mxu0 %v25468_v4  ;;  %v27494_v61 = vld [vmem:[#allocation289_spill] sm:$0xff] }
 0x70c   :  { %14626 = vmatprep.subr.bf16.mxu0 %v25477_v24  ;;  %v25532_v13 = vld [vmem:[%s26602_s3 + $0x8a4] ss:$8 sps:$4 sm:$0xff]  }
 0x70d   :  { %11064 = vmatpush1.bf16.msra.mxu1 %v25040_v56  ;;  %v27490_v56 = vld [vmem:[#allocation103_spill] sm:$0xff] }
 0x70e   :  { %11146 = vmatprep.subr.bf16.mxu1 %v25046_v14  ;;  %v27491_v14 = vld [vmem:[#allocation102_spill] sm:$0xff] }
 0x70f   :  { %14627 = vmatpush1.bf16.msra.mxu0 %v25490_v53  ;;  %v27492_v49 = vpack.c.bf16 %v27490_v56, %v27491_v14  ;;  %v27501_v14 = vld [vmem:[#allocation287_spill] sm:$0xff] }
 0x710   :  { %11066 = vmatmul.mubr.bf16.vlgmr.msra.gmra.mrb[12].mxu1 %v27489_v3  ;;  %14628 = vmatprep.subr.bf16.mxu0 %v25496_v7  ;;  %v25549_v3 = vld [vmem:[%s26602_s3 + $0x8b4] ss:$8 sps:$4 sm:$0xff]  }
 0x711   :  { %11075 = vmatprep.mubr.bf16.mxu1 %v27492_v49  ;;  %11147 = vmatpush1.bf16.msra.mxu1 %v25054_v36  ;;  %v25540_v36 = vld [vmem:[%s26602_s3 + $0x8a0] ss:$8 sps:$4 sm:$0xff]   ;;  %v27502_v49 = vld [vmem:[#allocation270_spill] sm:$0xff] }
 0x712   :  { %14592 = vmatmul.mubr.bf16.gmra.mrb[200].mxu0 %v27493_v18  ;;  %11148 = vmatprep.subr.bf16.mxu1 %v25063_v62  ;;  %v27495_v62 = vld [vmem:[#allocation19_spill] sm:$0xff] }
 0x713   :  { %14601 = vmatprep.mubr.bf16.mxu0 %v27494_v61  ;;  %14629 = vmatpush1.bf16.msra.mxu0 %v25504_v32  ;;  %v27497_v17 = vpack.c.bf16 %v27495_v62, %v27496_v5  ;;  %v25562_v18 = vld [vmem:[%s26602_s3 + $0x8b0] ss:$8 sps:$4 sm:$0xff]   ;;  %v25568_v61 = vld [vmem:[%s26602_s3 + $0x8c4] ss:$8 sps:$4 sm:$0xff]  }
 0x714   :  { %14630 = vmatprep.subr.bf16.mxu0 %v25513_v40  ;;  %v27504_v62 = vld [vmem:[#allocation23_spill] sm:$0xff] }
 0x715   :  { %11149 = vmatpush1.bf16.msra.mxu1 %v25080_v50  ;;  %v27498_v50 = vld [vmem:[#allocation109_spill] sm:$0xff] }
 0x716   :  { %11150 = vmatprep.subr.bf16.mxu1 %v25086_v52  ;;  %v27499_v52 = vld [vmem:[#allocation108_spill] sm:$0xff] }
 0x717   :  { %14631 = vmatpush1.bf16.msra.mxu0 %v25526_v21  ;;  %v27500_v56 = vpack.c.bf16 %v27498_v50, %v27499_v52  ;;  %v25596_v52 = vld [vmem:[%s26602_s3 + $0x8d0] ss:$8 sps:$4 sm:$0xff]  }
 0x718   :  { %11076 = vmatmul.mubr.bf16.gmra.mrb[16].mxu1 %v27497_v17  ;;  %14632 = vmatprep.subr.bf16.mxu0 %v25532_v13  ;;  %v25585_v17 = vld [vmem:[%s26602_s3 + $0x8d4] ss:$8 sps:$4 sm:$0xff]  }
 0x719   :  { %11085 = vmatprep.mubr.bf16.mxu1 %v27500_v56  ;;  %11151 = vmatpush1.bf16.msra.mxu1 %v25094_v22  ;;  %v25576_v22 = vld [vmem:[%s26602_s3 + $0x8c0] ss:$8 sps:$4 sm:$0xff]   ;;  %v25602_v56 = vld [vmem:[%s26602_s3 + $0x8e4] ss:$8 sps:$4 sm:$0xff]  }
 0x71a   :  { %14602 = vmatmul.mubr.bf16.gmra.mrb[204].mxu0 %v27501_v14  ;;  %11152 = vmatprep.subr.bf16.mxu1 %v25103_v15  ;;  %v27503_v15 = vld [vmem:[#allocation24_spill] sm:$0xff]  ;;  %v27510_v14 = vld [vmem:[#allocation30_spill] sm:$0xff] }
 0x71b   :  { %14633 = vmatpush1.bf16.msra.mxu0 %v25540_v36  ;;  %14644 = vmatprep.mubr.bf16.mxu0 %v27502_v49  ;;  %v27505_v5 = vpack.c.bf16 %v27503_v15, %v27504_v62  ;;  %v25619_v15 = vld [vmem:[%s26602_s3 + $0x8f4] ss:$8 sps:$4 sm:$0xff]  }
 0x71c   :  { %14634 = vmatprep.subr.bf16.mxu0 %v25549_v3 }
 0x71d   :  { %11153 = vmatpush1.bf16.msra.mxu1 %v25120_v20  ;;  %v27506_v20 = vld [vmem:[#allocation107_spill] sm:$0xff] }
 0x71e   :  { %11154 = vmatprep.subr.bf16.mxu1 %v25126_v39  ;;  %v27507_v39 = vld [vmem:[#allocation106_spill] sm:$0xff] }
 0x71f   :  { %14635 = vmatpush1.bf16.msra.mxu0 %v25562_v18  ;;  %v27508_v50 = vpack.c.bf16 %v27506_v20, %v27507_v39  ;;  %v25636_v20 = vld [vmem:[%s26602_s3 + $0x904] ss:$8 sps:$4 sm:$0xff]  }
 0x720   :  { %11086 = vmatmul.mubr.bf16.gmra.mrb[20].mxu1 %v27505_v5  ;;  %14636 = vmatprep.subr.bf16.mxu0 %v25568_v61  ;;  %v25630_v5 = vld [vmem:[%s26602_s3 + $0x8f0] ss:$8 sps:$4 sm:$0xff]  }
 0x721   :  { %11095 = vmatprep.mubr.bf16.mxu1 %v27508_v50  ;;  %11155 = vmatpush1.bf16.msra.mxu1 %v25134_v63  ;;  %v25610_v63 = vld [vmem:[%s26602_s3 + $0x8e0] ss:$8 sps:$4 sm:$0xff]  }
 0x722   :  { %11156 = vmatprep.subr.bf16.mxu1 %v25143_v46  ;;  %v27509_v46 = vld [vmem:[#allocation31_spill] sm:$0xff]  ;;  %v27516_v39 = vld [vmem:[#allocation37_spill] sm:$0xff] }
 0x723   :  { %14637 = vmatpush1.bf16.msra.mxu0 %v25576_v22  ;;  %v27511_v49 = vpack.c.bf16 %v27509_v46, %v27510_v14  ;;  %v25653_v46 = vld [vmem:[%s26602_s3 + $0x914] ss:$8 sps:$4 sm:$0xff]  }
 0x724   :  { %14638 = vmatprep.subr.bf16.mxu0 %v25585_v17 }
 0x725   :  { %11157 = vmatpush1.bf16.msra.mxu1 %v25160_v58  ;;  %v27512_v58 = vld [vmem:[#allocation113_spill] sm:$0xff] }
 0x726   :  { %11158 = vmatprep.subr.bf16.mxu1 %v25166_v23  ;;  %v27513_v23 = vld [vmem:[#allocation112_spill] sm:$0xff] }
 0x727   :  { %14639 = vmatpush1.bf16.msra.mxu0 %v25596_v52  ;;  %v27514_v62 = vpack.c.bf16 %v27512_v58, %v27513_v23  ;;  %v27522_v58 = vld [vmem:[#allocation274_spill] sm:$0xff] }
 0x728   :  { %11096 = vmatmul.mubr.bf16.gmra.mrb[24].mxu1 %v27511_v49  ;;  %14640 = vmatprep.subr.bf16.mxu0 %v25602_v56  ;;  %v27521_v49 = vld [vmem:[#allocation268_spill] sm:$0xff]  ;;  %v25666_v23 = vld [vmem:[%s26602_s3 + $0x910] ss:$8 sps:$4 sm:$0xff]  }
 0x729   :  { %11105 = vmatprep.mubr.bf16.mxu1 %v27514_v62  ;;  %11159 = vmatpush1.bf16.msra.mxu1 %v25174_v57  ;;  %v25644_v57 = vld [vmem:[%s26602_s3 + $0x900] ss:$8 sps:$4 sm:$0xff]   ;;  %v25672_v62 = vld [vmem:[%s26602_s3 + $0x924] ss:$8 sps:$4 sm:$0xff]  }
 0x72a   :  { %11160 = vmatprep.subr.bf16.mxu1 %v25183_v33  ;;  %v27515_v33 = vld [vmem:[#allocation40_spill] sm:$0xff] }
 0x72b   :  { %14641 = vmatpush1.bf16.msra.mxu0 %v25610_v63  ;;  %v27517_v50 = vpack.c.bf16 %v27515_v33, %v27516_v39  ;;  %v27524_v33 = vld [vmem:[#allocation45_spill] sm:$0xff] }
 0x72c   :  { %14642 = vmatprep.subr.bf16.mxu0 %v25619_v15 }
 0x72d   :  { %11161 = vmatpush1.bf16.msra.mxu1 %v25200_v16  ;;  %v27518_v16 = vld [vmem:[#allocation111_spill] sm:$0xff] }
 0x72e   :  { %11162 = vmatprep.subr.bf16.mxu1 %v25206_v1  ;;  %v27519_v1 = vld [vmem:[#allocation110_spill] sm:$0xff] }
 0x72f   :  { %14643 = vmatpush1.bf16.msra.mxu0 %v25630_v5  ;;  %v27520_v14 = vpack.c.bf16 %v27518_v16, %v27519_v1  ;;  %v27529_v1 = vld [vmem:[#allocation272_spill] sm:$0xff] }
 0x730   :  { %11106 = vmatmul.mubr.bf16.gmra.mrb[28].mxu1 %v27517_v50  ;;  %14705 = vmatprep.subr.bf16.mxu0 %v25636_v20  ;;  %v25689_v50 = vld [vmem:[%s26602_s3 + $0x934] ss:$8 sps:$4 sm:$0xff]  }
 0x731   :  { %11115 = vmatprep.mubr.bf16.mxu1 %v27520_v14  ;;  %11163 = vmatpush1.bf16.msra.mxu1 %v25214_v2  ;;  %v25680_v2 = vld [vmem:[%s26602_s3 + $0x920] ss:$8 sps:$4 sm:$0xff]   ;;  %v27530_v14 = vld [vmem:[#allocation278_spill] sm:$0xff] }
 0x732   :  { %14645 = vmatmul.mubr.bf16.vlgmr.msra.gmra.mrb[184].mxu0 %v27521_v49  ;;  %11164 = vmatprep.subr.bf16.mxu1 %v25223_v26  ;;  %v27523_v26 = vld [vmem:[#allocation50_spill] sm:$0xff] }
 0x733   :  { %14654 = vmatprep.mubr.bf16.mxu0 %v27522_v58  ;;  %14706 = vmatpush1.bf16.msra.mxu0 %v25644_v57  ;;  %v27525_v39 = vpack.c.bf16 %v27523_v26, %v27524_v33  ;;  %v25702_v49 = vld [vmem:[%s26602_s3 + $0x930] ss:$8 sps:$4 sm:$0xff]   ;;  %v25708_v58 = vld [vmem:[%s26602_s3 + $0x944] ss:$8 sps:$4 sm:$0xff]  }
 0x734   :  { %14707 = vmatprep.subr.bf16.mxu0 %v25653_v46  ;;  %v27532_v26 = vld [vmem:[#allocation55_spill] sm:$0xff] }
 0x735   :  { %11165 = vmatpush1.bf16.msra.mxu1 %v25240_v55  ;;  %v27526_v55 = vld [vmem:[#allocation117_spill] sm:$0xff] }
 0x736   :  { %11166 = vmatprep.subr.bf16.mxu1 %v25246_v28  ;;  %v27527_v28 = vld [vmem:[#allocation116_spill] sm:$0xff] }
 0x737   :  { %14708 = vmatpush1.bf16.msra.mxu0 %v25666_v23  ;;  %v27528_v16 = vpack.c.bf16 %v27526_v55, %v27527_v28  ;;  %v27537_v28 = vld [vmem:[#allocation276_spill] sm:$0xff] }
 0x738   :  { %11116 = vmatmul.mubr.bf16.gmra.mrb[32].mxu1 %v27525_v39  ;;  %14709 = vmatprep.subr.bf16.mxu0 %v25672_v62  ;;  %v25725_v39 = vld [vmem:[%s26602_s3 + $0x954] ss:$8 sps:$4 sm:$0xff]  }
 0x739   :  { %11125 = vmatprep.mubr.bf16.mxu1 %v27528_v16  ;;  %11167 = vmatpush1.bf16.msra.mxu1 %v25254_v10  ;;  %v25716_v10 = vld [vmem:[%s26602_s3 + $0x940] ss:$8 sps:$4 sm:$0xff]   ;;  %v27538_v16 = vld [vmem:[#allocation282_spill] sm:$0xff] }
 0x73a   :  { %14655 = vmatmul.mubr.bf16.gmra.mrb[188].mxu0 %v27529_v1  ;;  %11168 = vmatprep.subr.bf16.mxu1 %v25263_v35  ;;  %v27531_v35 = vld [vmem:[#allocation60_spill] sm:$0xff]  ;;  %v25738_v1 = vld [vmem:[%s26602_s3 + $0x950] ss:$8 sps:$4 sm:$0xff]  }
 0x73b   :  { %14664 = vmatprep.mubr.bf16.mxu0 %v27530_v14  ;;  %14710 = vmatpush1.bf16.msra.mxu0 %v25680_v2  ;;  %v27533_v33 = vpack.c.bf16 %v27531_v35, %v27532_v26  ;;  %v25744_v14 = vld [vmem:[%s26602_s3 + $0x964] ss:$8 sps:$4 sm:$0xff]  }
 0x73c   :  { %14711 = vmatprep.subr.bf16.mxu0 %v25689_v50  ;;  %v27540_v35 = vld [vmem:[#allocation64_spill] sm:$0xff] }
 0x73d   :  { %11169 = vmatpush1.bf16.msra.mxu1 %v25278_v8  ;;  %v27534_v8 = vld [vmem:[#allocation115_spill] sm:$0xff] }
 0x73e   :  { %11170 = vmatprep.subr.bf16.mxu1 %v25284_v41  ;;  %v27535_v41 = vld [vmem:[#allocation114_spill] sm:$0xff] }
 0x73f   :  { %14712 = vmatpush1.bf16.msra.mxu0 %v25702_v49  ;;  %v27536_v55 = vpack.c.bf16 %v27534_v8, %v27535_v41  ;;  %v27544_v8 = vld [vmem:[#allocation286_spill] sm:$0xff] }
 0x740   :  { %11126 = vmatmul.mubr.bf16.gmra.mrb[36].mxu1 %v27533_v33  ;;  %14713 = vmatprep.subr.bf16.mxu0 %v25708_v58  ;;  %v25761_v33 = vld [vmem:[%s26602_s3 + $0x974] ss:$8 sps:$4 sm:$0xff]   ;;  %v25772_v41 = vld [vmem:[%s26602_s3 + $0x970] ss:$8 sps:$4 sm:$0xff]  }
 0x741   :  { %11135 = vmatprep.mubr.bf16.mxu1 %v27536_v55  ;;  %11171 = vmatpush1.bf16.msra.mxu1 %v25292_v48  ;;  %v25752_v48 = vld [vmem:[%s26602_s3 + $0x960] ss:$8 sps:$4 sm:$0xff]   ;;  %v27545_v55 = vld [vmem:[#allocation118_spill] sm:$0xff] }
 0x742   :  { %14665 = vmatmul.mubr.bf16.gmra.mrb[192].mxu0 %v27537_v28  ;;  %11172 = vmatprep.subr.bf16.mxu1 %v25301_v9  ;;  %v27539_v9 = vld [vmem:[#allocation69_spill] sm:$0xff]  ;;  %v25793_v28 = vld [vmem:[%s26602_s3 + $0x994] ss:$8 sps:$4 sm:$0xff]  }
 0x743   :  { %14674 = vmatprep.mubr.bf16.mxu0 %v27538_v16  ;;  %14714 = vmatpush1.bf16.msra.mxu0 %v25716_v10  ;;  %v27541_v26 = vpack.c.bf16 %v27539_v9, %v27540_v35  ;;  %v27546_v16 = vld [vmem:[#allocation122_spill] sm:$0xff]  ;;  %v25810_v35 = vld [vmem:[%s26602_s3 + $0x9a4] ss:$8 sps:$4 sm:$0xff]  }
 0x744   :  { %14715 = vmatprep.subr.bf16.mxu0 %v25725_v39  ;;  %v25804_v9 = vld [vmem:[%s26602_s3 + $0x990] ss:$8 sps:$4 sm:$0xff]  }
 0x745   :  { %11173 = vmatpush1.bf16.msra.mxu1 %v25312_v42  ;;  %v27542_v42 = vld [vmem:[#allocation120_spill] sm:$0xff] }
 0x746   :  { %11174 = vmatprep.subr.bf16.mxu1 %v25318_v60  ;;  %v27543_v60 = vld [vmem:[#allocation280_spill] sm:$0xff] }
 0x747   :  { %14716 = vmatpush1.bf16.msra.mxu0 %v25738_v1 }
 0x748   :  { %11136 = vmatmul.mubr.bf16.gmra.mrb[40].mxu1 %v27541_v26  ;;  %14717 = vmatprep.subr.bf16.mxu0 %v25744_v14  ;;  %v25825_v26 = vld [vmem:[%s26602_s3 + $0x9b4] ss:$8 sps:$4 sm:$0xff]  }
 0x749   :  { %11175 = vmatpush1.bf16.msra.mxu1 %v25326_v19  ;;  %11178 = vmatprep.mubr.bf16.mxu1 %v27542_v42  ;;  %v25778_v19 = vld [vmem:[%s26602_s3 + $0x984] ss:$8 sps:$4 sm:$0xff]  }
 0x74a   :  { %14675 = vmatmul.mubr.bf16.gmra.mrb[196].mxu0 %v27543_v60  ;;  %11176 = vmatprep.subr.bf16.mxu1 %v25335_v43  ;;  %v25786_v43 = vld [vmem:[%s26602_s3 + $0x980] ss:$8 sps:$4 sm:$0xff]   ;;  %v25842_v60 = vld [vmem:[%s26602_s3 + $0x9c4] ss:$8 sps:$4 sm:$0xff]  }
 0x74b   :  { %14684 = vmatprep.mubr.bf16.mxu0 %v27544_v8  ;;  %14718 = vmatpush1.bf16.msra.mxu0 %v25752_v48  ;;  %v27550_v42 = vld [vmem:[#allocation128_spill] sm:$0xff] }
 0x74c   :  { %14719 = vmatprep.subr.bf16.mxu0 %v25761_v33  ;;  %v27553_v8 = vld [vmem:[#allocation132_spill] sm:$0xff] }
 0x74d   :  { %11177 = vmatpush1.bf16.msra.mxu1 %v25346_v47  ;;  %v27547_v47 = vld [vmem:[#allocation284_spill] sm:$0xff] }
 0x74e   :  { %11259 = vmatprep.subr.bf16.mxu1 %v25352_v38  ;;  %v27548_v38 = vld [vmem:[#allocation290_spill] sm:$0xff] }
 0x74f   :  { %14720 = vmatpush1.bf16.msra.mxu0 %v25772_v41 }
 0x750   :  { %11179 = vmatmul.mubr.bf16.vlgmr.msra.gmra.mrb[12].mxu1 %v27545_v55  ;;  %14721 = vmatprep.subr.bf16.mxu0 %v25778_v19  ;;  %v25887_v55 = vld [vmem:[%s26602_s3 + $0x9f4] ss:$8 sps:$4 sm:$0xff]  }
 0x751   :  { %11188 = vmatprep.mubr.bf16.mxu1 %v27546_v16  ;;  %11260 = vmatpush1.bf16.msra.mxu1 %v25360_v51  ;;  %v25818_v51 = vld [vmem:[%s26602_s3 + $0x9a0] ss:$8 sps:$4 sm:$0xff]  }
 0x752   :  { %14685 = vmatmul.mubr.bf16.gmra.mrb[200].mxu0 %v27547_v47  ;;  %11261 = vmatprep.subr.bf16.mxu1 %v25369_v54  ;;  %v27549_v54 = vld [vmem:[#allocation121_spill] sm:$0xff]  ;;  %v27555_v16 = vld [vmem:[#allocation136_spill] sm:$0xff]  ;;  %v25917_v47 = vld [vmem:[%s26602_s3 + $0xa14] ss:$8 sps:$4 sm:$0xff]  }
 0x753   :  { %14694 = vmatprep.mubr.bf16.mxu0 %v27548_v38  ;;  %14722 = vmatpush1.bf16.msra.mxu0 %v25786_v43  ;;  %v27557_v38 = vld [vmem:[#allocation140_spill] sm:$0xff] }
 0x754   :  { %14723 = vmatprep.subr.bf16.mxu0 %v25793_v28 }
 0x755   :  { %11262 = vmatpush1.bf16.msra.mxu1 %v25382_v37  ;;  %v27551_v37 = vld [vmem:[#allocation288_spill] sm:$0xff] }
 0x756   :  { %11263 = vmatprep.subr.bf16.mxu1 %v25388_v0  ;;  %v25836_v0 = vld [vmem:[%s26602_s3 + $0x9b0] ss:$8 sps:$4 sm:$0xff]  }
 0x757   :  { %14724 = vmatpush1.bf16.msra.mxu0 %v25804_v9 }
 0x758   :  { %11189 = vmatmul.mubr.bf16.gmra.mrb[16].mxu1 %v27549_v54  ;;  %14725 = vmatprep.subr.bf16.mxu0 %v25810_v35 }
 0x759   :  { %11198 = vmatprep.mubr.bf16.mxu1 %v27550_v42  ;;  %11264 = vmatpush1.bf16.msra.mxu1 %v25396_v30  ;;  %v27552_v30 = vld [vmem:[#allocation126_spill] sm:$0xff] }
 0x75a   :  { %14695 = vmatmul.mubr.bf16.gmra.mrb[204].mxu0 %v27551_v37  ;;  %11265 = vmatprep.subr.bf16.mxu1 %v25405_v34  ;;  %v25857_v34 = vld [vmem:[%s26602_s3 + $0x9d4] ss:$8 sps:$4 sm:$0xff]   ;;  %v25962_v42 = vld [vmem:[%s26602_s3 + $0xa30] ss:$8 sps:$4 sm:$0xff]   ;;  %v25968_v37 = vld [vmem:[%s26602_s3 + $0xa44] ss:$8 sps:$4 sm:$0xff]  }
 0x75b   :  { %14726 = vmatpush1.bf16.msra.mxu0 %v25818_v51  ;;  %14737 = vmatprep.mubr.bf16.mxu0 %v23973_v45  ;;  %v25850_v45 = vld [vmem:[%s26602_s3 + $0x9c0] ss:$8 sps:$4 sm:$0xff]  }
 0x75c   :  { %14727 = vmatprep.subr.bf16.mxu0 %v25825_v26 }
 0x75d   :  { %11266 = vmatpush1.bf16.msra.mxu1 %v25418_v44  ;;  %v25866_v44 = vld [vmem:[%s26602_s3 + $0x9d0] ss:$8 sps:$4 sm:$0xff]  }
 0x75e   :  { %11267 = vmatprep.subr.bf16.mxu1 %v25424_v27  ;;  %v25872_v27 = vld [vmem:[%s26602_s3 + $0x9e4] ss:$8 sps:$4 sm:$0xff]  }
 0x75f   :  { %14728 = vmatpush1.bf16.msra.mxu0 %v25836_v0 }
 0x760   :  { %11199 = vmatmul.mubr.bf16.gmra.mrb[20].mxu1 %v27552_v30  ;;  %14729 = vmatprep.subr.bf16.mxu0 %v25842_v60 }
 0x761   :  { %11208 = vmatprep.mubr.bf16.mxu1 %v27553_v8  ;;  %11268 = vmatpush1.bf16.msra.mxu1 %v25432_v25  ;;  %v25880_v25 = vld [vmem:[%s26602_s3 + $0x9e0] ss:$8 sps:$4 sm:$0xff]   ;;  %v25985_v8 = vld [vmem:[%s26602_s3 + $0xa54] ss:$8 sps:$4 sm:$0xff]  }
 0x762   :  { %11269 = vmatprep.subr.bf16.mxu1 %v25441_v6  ;;  %v27554_v6 = vld [vmem:[#allocation130_spill] sm:$0xff] }
 0x763   :  { %14730 = vmatpush1.bf16.msra.mxu0 %v25850_v45 }
 0x764   :  { %14731 = vmatprep.subr.bf16.mxu0 %v25857_v34 }
 0x765   :  { %11270 = vmatpush1.bf16.msra.mxu1 %v25454_v12  ;;  %v25896_v12 = vld [vmem:[%s26602_s3 + $0x9f0] ss:$8 sps:$4 sm:$0xff]  }
 0x766   :  { %11271 = vmatprep.subr.bf16.mxu1 %v25460_v31  ;;  %v25902_v31 = vld [vmem:[%s26602_s3 + $0xa04] ss:$8 sps:$4 sm:$0xff]  }
 0x767   :  { %14732 = vmatpush1.bf16.msra.mxu0 %v25866_v44 }
 0x768   :  { %11209 = vmatmul.mubr.bf16.gmra.mrb[24].mxu1 %v27554_v6  ;;  %14733 = vmatprep.subr.bf16.mxu0 %v25872_v27 }
 0x769   :  { %11218 = vmatprep.mubr.bf16.mxu1 %v27555_v16  ;;  %11272 = vmatpush1.bf16.msra.mxu1 %v25468_v4  ;;  %v25910_v4 = vld [vmem:[%s26602_s3 + $0xa00] ss:$8 sps:$4 sm:$0xff]   ;;  %v27569_v16 = vld [vmem:[#allocation190_spill] sm:$0xff] }
 0x76a   :  { %11273 = vmatprep.subr.bf16.mxu1 %v25477_v24  ;;  %v27556_v24 = vld [vmem:[#allocation134_spill] sm:$0xff] }
 0x76b   :  { %14734 = vmatpush1.bf16.msra.mxu0 %v25880_v25 }
 0x76c   :  { %14735 = vmatprep.subr.bf16.mxu0 %v25887_v55 }
 0x76d   :  { %11274 = vmatpush1.bf16.msra.mxu1 %v25490_v53  ;;  %v25928_v53 = vld [vmem:[%s26602_s3 + $0xa10] ss:$8 sps:$4 sm:$0xff]  }
 0x76e   :  { %11275 = vmatprep.subr.bf16.mxu1 %v25496_v7  ;;  %v25934_v7 = vld [vmem:[%s26602_s3 + $0xa24] ss:$8 sps:$4 sm:$0xff]  }
 0x76f   :  { %14736 = vmatpush1.bf16.msra.mxu0 %v25896_v12 }
 0x770   :  { %11219 = vmatmul.mubr.bf16.gmra.mrb[28].mxu1 %v27556_v24  ;;  %14798 = vmatprep.subr.bf16.mxu0 %v25902_v31  ;;  %v27570_v24 = vld [vmem:[#allocation298_spill] sm:$0xff] }
 0x771   :  { %11228 = vmatprep.mubr.bf16.mxu1 %v27557_v38  ;;  %11276 = vmatpush1.bf16.msra.mxu1 %v25504_v32  ;;  %v25949_v32 = vld [vmem:[%s26602_s3 + $0xa34] ss:$8 sps:$4 sm:$0xff]   ;;  %v25998_v38 = vld [vmem:[%s26602_s3 + $0xa50] ss:$8 sps:$4 sm:$0xff]  }
 0x772   :  { %14738 = vmatmul.mubr.bf16.vlgmr.msra.gmra.mrb[184].mxu0 %v23932_v11  ;;  %11277 = vmatprep.subr.bf16.mxu1 %v25513_v40  ;;  %v25942_v11 = vld [vmem:[%s26602_s3 + $0xa20] ss:$8 sps:$4 sm:$0xff]  }
 0x773   :  { %14747 = vmatprep.mubr.bf16.mxu0 %v24021_v59  ;;  %14799 = vmatpush1.bf16.msra.mxu0 %v25910_v4  ;;  %v27558_v59 = vld [vmem:[#allocation138_spill] sm:$0xff]  ;;  %v27559_v40 = vld [vmem:[#allocation147_spill] sm:$0xff] }
 0x774   :  { %14800 = vmatprep.subr.bf16.mxu0 %v25917_v47 }
 0x775   :  { %11278 = vmatpush1.bf16.msra.mxu1 %v25526_v21  ;;  %v27560_v21 = vld [vmem:[#allocation146_spill] sm:$0xff] }
 0x776   :  { %11279 = vmatprep.subr.bf16.mxu1 %v25532_v13  ;;  %v27561_v54 = vpack.c.bf16 %v27559_v40, %v27560_v21  ;;  %v27562_v13 = vld [vmem:[#allocation296_spill] sm:$0xff]  ;;  %v27572_v40 = vld [vmem:[#allocation150_spill] sm:$0xff] }
 0x777   :  { %14801 = vmatpush1.bf16.msra.mxu0 %v25928_v53 }
 0x778   :  { %11229 = vmatmul.mubr.bf16.gmra.mrb[32].mxu1 %v27558_v59  ;;  %14802 = vmatprep.subr.bf16.mxu0 %v25934_v7  ;;  %v26004_v59 = vld [vmem:[%s26602_s3 + $0xa64] ss:$8 sps:$4 sm:$0xff]  }
 0x779   :  { %11238 = vmatprep.mubr.bf16.mxu1 %v27561_v54  ;;  %11280 = vmatpush1.bf16.msra.mxu1 %v25540_v36  ;;  %v27563_v36 = vld [vmem:[#allocation144_spill] sm:$0xff]  ;;  %v26021_v54 = vld [vmem:[%s26602_s3 + $0xa74] ss:$8 sps:$4 sm:$0xff]  }
 0x77a   :  { %14748 = vmatmul.mubr.bf16.gmra.mrb[188].mxu0 %v23982_v29  ;;  %11281 = vmatprep.subr.bf16.mxu1 %v25549_v3  ;;  %v25976_v29 = vld [vmem:[%s26602_s3 + $0xa40] ss:$8 sps:$4 sm:$0xff]   ;;  %v27564_v3 = vld [vmem:[#allocation142_spill] sm:$0xff] }
 0x77b   :  { %14757 = vmatprep.mubr.bf16.mxu0 %v27562_v13  ;;  %14803 = vmatpush1.bf16.msra.mxu0 %v25942_v11  ;;  %v27565_v30 = vpack.c.bf16 %v27563_v36, %v27564_v3  ;;  %v27576_v13 = vld [vmem:[#allocation300_spill] sm:$0xff]  ;;  %v26032_v36 = vld [vmem:[%s26602_s3 + $0xa70] ss:$8 sps:$4 sm:$0xff]  }
 0x77c   :  { %14804 = vmatprep.subr.bf16.mxu0 %v25949_v32  ;;  %v27579_v3 = vld [vmem:[#allocation299_spill] sm:$0xff] }
 0x77d   :  { %11282 = vmatpush1.bf16.msra.mxu1 %v25562_v18  ;;  %v27566_v18 = vld [vmem:[#allocation155_spill] sm:$0xff] }
 0x77e   :  { %11283 = vmatprep.subr.bf16.mxu1 %v25568_v61  ;;  %v27567_v61 = vld [vmem:[#allocation154_spill] sm:$0xff] }
 0x77f   :  { %14805 = vmatpush1.bf16.msra.mxu0 %v25962_v42  ;;  %v27568_v6 = vpack.c.bf16 %v27566_v18, %v27567_v61  ;;  %v27583_v18 = vld [vmem:[#allocation302_spill] sm:$0xff] }
 0x780   :  { %11239 = vmatmul.mubr.bf16.gmra.mrb[36].mxu1 %v27565_v30  ;;  %14806 = vmatprep.subr.bf16.mxu0 %v25968_v37  ;;  %v27580_v30 = vld [vmem:[#allocation303_spill] sm:$0xff] }
 0x781   :  { %11248 = vmatprep.mubr.bf16.mxu1 %v27568_v6  ;;  %11284 = vmatpush1.bf16.msra.mxu1 %v25576_v22  ;;  %v26012_v22 = vld [vmem:[%s26602_s3 + $0xa60] ss:$8 sps:$4 sm:$0xff]  }
 0x782   :  { %14758 = vmatmul.mubr.bf16.gmra.mrb[192].mxu0 %v27569_v16  ;;  %11285 = vmatprep.subr.bf16.mxu1 %v25585_v17  ;;  %v27571_v17 = vld [vmem:[#allocation152_spill] sm:$0xff] }
 0x783   :  { %14767 = vmatprep.mubr.bf16.mxu0 %v27570_v24  ;;  %14807 = vmatpush1.bf16.msra.mxu0 %v25976_v29  ;;  %v27573_v21 = vpack.c.bf16 %v27571_v17, %v27572_v40  ;;  %v27608_v6 = vld [vmem:[#allocation160_spill] sm:$0xff]  ;;  %v27628_v24 = vld [vmem:[#allocation186_spill] sm:$0xff]  ;;  %v27633_v40 = vld [vmem:[#allocation161_spill] sm:$0xff] }
 0x784   :  { %14808 = vmatprep.subr.bf16.mxu0 %v25985_v8  ;;  %v27609_v16 = vld [vmem:[#allocation188_spill] sm:$0xff] }
 0x785   :  { %11286 = vmatpush1.bf16.msra.mxu1 %v25596_v52  ;;  %v27574_v52 = vld [vmem:[#allocation123_spill] sm:$0xff] }
 0x786   :  { %11287 = vmatprep.subr.bf16.mxu1 %v25602_v56  ;;  %v27575_v56 = vld [vmem:[#allocation297_spill] sm:$0xff] }
 0x787   :  { %14809 = vmatpush1.bf16.msra.mxu0 %v25998_v38 }
 0x788   :  { %11249 = vmatmul.mubr.bf16.gmra.mrb[40].mxu1 %v27573_v21  ;;  %14810 = vmatprep.subr.bf16.mxu0 %v26004_v59  ;;  %v27634_v21 = vld [vmem:[#allocation159_spill] sm:$0xff] }
 0x789   :  { %11288 = vmatpush1.bf16.msra.mxu1 %v25610_v63  ;;  %11291 = vmatprep.mubr.bf16.mxu1 %v27574_v52  ;;  %v27577_v63 = vld [vmem:[#allocation119_spill] sm:$0xff] }
 0x78a   :  { %14768 = vmatmul.mubr.bf16.gmra.mrb[196].mxu0 %v27575_v56  ;;  %11289 = vmatprep.subr.bf16.mxu1 %v25619_v15  ;;  %v27578_v15 = vld [vmem:[#allocation124_spill] sm:$0xff]  ;;  %v27636_v52 = vld [vmem:[#allocation163_spill] sm:$0xff]  ;;  %v27637_v56 = vld [vmem:[#allocation169_spill] sm:$0xff] }
 0x78b   :  { %14777 = vmatprep.mubr.bf16.mxu0 %v27576_v13  ;;  %14811 = vmatpush1.bf16.msra.mxu0 %v26012_v22  ;;  %v27638_v13 = vld [vmem:[#allocation167_spill] sm:$0xff] }
 0x78c   :  { %14812 = vmatprep.subr.bf16.mxu0 %v26021_v54 }
 0x78d   :  { %11290 = vmatpush1.bf16.msra.mxu1 %v25630_v5  ;;  %v27581_v5 = vld [vmem:[#allocation125_spill] sm:$0xff] }
 0x78e   :  { %11372 = vmatprep.subr.bf16.mxu1 %v25636_v20  ;;  %v27582_v20 = vld [vmem:[#allocation129_spill] sm:$0xff] }
 0x78f   :  { %14813 = vmatpush1.bf16.msra.mxu0 %v26032_v36 }
 0x790   :  { %11292 = vmatmul.mubr.bf16.vlgmr.msra.gmra.mrb[12].mxu1 %v27577_v63  ;;  %v27640_v63 = vld [vmem:[#allocation173_spill] sm:$0xff] }
 0x791   :  { %11301 = vmatprep.mubr.bf16.mxu1 %v27578_v15  ;;  %11373 = vmatpush1.bf16.msra.mxu1 %v25644_v57  ;;  %v26051_v57 = vld [vmem:[#allocation4 + $0x80] sm:$0xff] }
 0x792   :  { %14778 = vmatmul.mubr.bf16.gmra.mrb[200].mxu0 %v27579_v3  ;;  %11374 = vmatprep.subr.bf16.mxu1 %v25653_v46  ;;  %v27584_v46 = vld [vmem:[#allocation127_spill] sm:$0xff]  ;;  %8164 = vst.msk [vmem:[#allocation4 + $0x88] sm:$0xff] %vm8163_vm3, %v26051_v57  ;;  %8166 = vst.msk [vmem:[#allocation4 + $0x98] sm:$0xff] %vm8163_vm3, %v26051_v57 }
 0x793   :  { %14787 = vmatprep.mubr.bf16.mxu0 %v27580_v30  ;;  %8168 = vst.msk [vmem:[#allocation4 + $0x108] sm:$0xff] %vm8163_vm3, %v26051_v57  ;;  %8170 = vst.msk [vmem:[#allocation4 + $0x118] sm:$0xff] %vm8163_vm3, %v26051_v57  ;;  %v27642_v3 = vld [vmem:[#allocation171_spill] sm:$0xff]  ;;  %v27643_v30 = vld [vmem:[#allocation170_spill] sm:$0xff] }
 0x795   :  { %11375 = vmatpush1.bf16.msra.mxu1 %v25666_v23  ;;  %v27585_v23 = vld [vmem:[#allocation133_spill] sm:$0xff] }
 0x796   :  { %11376 = vmatprep.subr.bf16.mxu1 %v25672_v62  ;;  %v27586_v62 = vld [vmem:[#allocation292_spill] sm:$0xff] }
 0x798   :  { %11302 = vmatmul.mubr.bf16.gmra.mrb[16].mxu1 %v27581_v5  ;;  %v27644_v5 = vpack.c.bf16 %v27642_v3, %v27643_v30 }
 0x799   :  { %11311 = vmatprep.mubr.bf16.mxu1 %v27582_v20  ;;  %11377 = vmatpush1.bf16.msra.mxu1 %v25680_v2  ;;  %v27587_v2 = vld [vmem:[#allocation131_spill] sm:$0xff] }
 0x79a   :  { %14788 = vmatmul.mubr.bf16.gmra.mrb[204].mxu0 %v27583_v18  ;;  %11378 = vmatprep.subr.bf16.mxu1 %v25689_v50  ;;  %v27588_v50 = vld [vmem:[#allocation137_spill] sm:$0xff] }
 0x79b   :  { %14830 = vmatprep.mubr.bf16.mxu0 %v26051_v57 }
 0x79d   :  { %11379 = vmatpush1.bf16.msra.mxu1 %v25702_v49  ;;  %v27589_v49 = vld [vmem:[#allocation291_spill] sm:$0xff] }
 0x79e   :  { %11380 = vmatprep.subr.bf16.mxu1 %v25708_v58  ;;  %v27590_v58 = vld [vmem:[#allocation135_spill] sm:$0xff] }
 0x7a0   :  { %11312 = vmatmul.mubr.bf16.gmra.mrb[20].mxu1 %v27584_v46 }
 0x7a1   :  { %11321 = vmatprep.mubr.bf16.mxu1 %v27585_v23  ;;  %11381 = vmatpush1.bf16.msra.mxu1 %v25716_v10  ;;  %v27591_v10 = vld [vmem:[#allocation141_spill] sm:$0xff] }
 0x7a2   :  { %14831 = vmatmul.mubr.bf16.vlgmr.msra.gmra.mrb[184].mxu0 %v27586_v62  ;;  %11382 = vmatprep.subr.bf16.mxu1 %v25725_v39  ;;  %v27592_v39 = vld [vmem:[#allocation294_spill] sm:$0xff] }
 0x7a3   :  { %14840 = vmatprep.mubr.bf16.mxu0 %v26051_v57 }
 0x7a5   :  { %11383 = vmatpush1.bf16.msra.mxu1 %v25738_v1  ;;  %v27593_v1 = vld [vmem:[#allocation139_spill] sm:$0xff] }
 0x7a6   :  { %11384 = vmatprep.subr.bf16.mxu1 %v25744_v14  ;;  %v27594_v14 = vld [vmem:[#allocation148_spill] sm:$0xff] }
 0x7a8   :  { %11322 = vmatmul.mubr.bf16.gmra.mrb[24].mxu1 %v27587_v2 }
 0x7a9   :  { %11331 = vmatprep.mubr.bf16.mxu1 %v27588_v50  ;;  %11385 = vmatpush1.bf16.msra.mxu1 %v25752_v48  ;;  %v27595_v48 = vld [vmem:[#allocation149_spill] sm:$0xff] }
 0x7aa   :  { %14841 = vmatmul.mubr.bf16.gmra.mrb[188].mxu0 %v27589_v49  ;;  %11386 = vmatprep.subr.bf16.mxu1 %v25761_v33  ;;  %v27596_v33 = vpack.c.bf16 %v27594_v14, %v27595_v48 }
 0x7ab   :  { %14850 = vmatprep.mubr.bf16.mxu0 %v26051_v57 }
 0x7ad   :  { %11387 = vmatpush1.bf16.msra.mxu1 %v25772_v41  ;;  %v27597_v41 = vld [vmem:[#allocation293_spill] sm:$0xff] }
 0x7ae   :  { %11388 = vmatprep.subr.bf16.mxu1 %v25778_v19  ;;  %v27598_v19 = vld [vmem:[#allocation145_spill] sm:$0xff] }
 0x7b0   :  { %11332 = vmatmul.mubr.bf16.gmra.mrb[28].mxu1 %v27590_v58 }
 0x7b1   :  { %11341 = vmatprep.mubr.bf16.mxu1 %v27591_v10  ;;  %11389 = vmatpush1.bf16.msra.mxu1 %v25786_v43  ;;  %v27599_v43 = vld [vmem:[#allocation143_spill] sm:$0xff] }
 0x7b2   :  { %14851 = vmatmul.mubr.bf16.gmra.mrb[192].mxu0 %v27592_v39  ;;  %11390 = vmatprep.subr.bf16.mxu1 %v25793_v28  ;;  %v27600_v28 = vpack.c.bf16 %v27598_v19, %v27599_v43 }
 0x7b3   :  { %14860 = vmatprep.mubr.bf16.mxu0 %v26051_v57 }
 0x7b5   :  { %11391 = vmatpush1.bf16.msra.mxu1 %v25804_v9  ;;  %v27601_v9 = vld [vmem:[#allocation156_spill] sm:$0xff] }
 0x7b6   :  { %11392 = vmatprep.subr.bf16.mxu1 %v25810_v35  ;;  %v27602_v35 = vld [vmem:[#allocation157_spill] sm:$0xff] }
 0x7b7   :  { %v27603_v61 = vpack.c.bf16 %v27601_v9, %v27602_v35 }
 0x7b8   :  { %11342 = vmatmul.mubr.bf16.gmra.mrb[32].mxu1 %v27593_v1 }
 0x7b9   :  { %11351 = vmatprep.mubr.bf16.mxu1 %v27596_v33  ;;  %11393 = vmatpush1.bf16.msra.mxu1 %v25818_v51  ;;  %v27604_v51 = vld [vmem:[#allocation295_spill] sm:$0xff] }
 0x7ba   :  { %14861 = vmatmul.mubr.bf16.gmra.mrb[196].mxu0 %v27597_v41  ;;  %11394 = vmatprep.subr.bf16.mxu1 %v25825_v26  ;;  %v27605_v26 = vld [vmem:[#allocation153_spill] sm:$0xff] }
 0x7bb   :  { %14870 = vmatprep.mubr.bf16.mxu0 %v26051_v57 }
 0x7bd   :  { %11395 = vmatpush1.bf16.msra.mxu1 %v25836_v0  ;;  %v27606_v0 = vld [vmem:[#allocation151_spill] sm:$0xff] }
 0x7be   :  { %11396 = vmatprep.subr.bf16.mxu1 %v25842_v60  ;;  %v27607_v60 = vpack.c.bf16 %v27605_v26, %v27606_v0 }
 0x7c0   :  { %11352 = vmatmul.mubr.bf16.gmra.mrb[36].mxu1 %v27600_v28 }
 0x7c1   :  { %11361 = vmatprep.mubr.bf16.mxu1 %v27603_v61  ;;  %11397 = vmatpush1.bf16.msra.mxu1 %v25850_v45  ;;  %v27610_v45 = vld [vmem:[#allocation158_spill] sm:$0xff] }
 0x7c2   :  { %14871 = vmatmul.mubr.bf16.gmra.mrb[200].mxu0 %v27604_v51  ;;  %11398 = vmatprep.subr.bf16.mxu1 %v25857_v34  ;;  %v27611_v34 = vld [vmem:[#allocation164_spill] sm:$0xff] }
 0x7c3   :  { %14880 = vmatprep.mubr.bf16.mxu0 %v26051_v57 }
 0x7c5   :  { %11399 = vmatpush1.bf16.msra.mxu1 %v25866_v44  ;;  %v27612_v44 = vld [vmem:[#allocation162_spill] sm:$0xff] }
 0x7c6   :  { %11400 = vmatprep.subr.bf16.mxu1 %v25872_v27  ;;  %v27613_v27 = vld [vmem:[#allocation168_spill] sm:$0xff] }
 0x7c8   :  { %11362 = vmatmul.mubr.bf16.gmra.mrb[40].mxu1 %v27607_v60 }
 0x7c9   :  { %11401 = vmatpush1.bf16.msra.mxu1 %v25880_v25  ;;  %11404 = vmatprep.mubr.bf16.mxu1 %v27608_v6  ;;  %v27614_v25 = vld [vmem:[#allocation166_spill] sm:$0xff] }
 0x7ca   :  { %14881 = vmatmul.mubr.bf16.gmra.mrb[204].mxu0 %v27609_v16  ;;  %11402 = vmatprep.subr.bf16.mxu1 %v25887_v55  ;;  %v27615_v55 = vld [vmem:[#allocation175_spill] sm:$0xff] }
 0x7cd   :  { %11403 = vmatpush1.bf16.msra.mxu1 %v25896_v12  ;;  %v27616_v12 = vld [vmem:[#allocation172_spill] sm:$0xff] }
 0x7ce   :  { %11485 = vmatprep.subr.bf16.mxu1 %v25902_v31  ;;  %v27617_v31 = vld [vmem:[#allocation177_spill] sm:$0xff] }
 0x7d0   :  { %11405 = vmatmul.mubr.bf16.vlgmr.msra.gmra.mrb[12].mxu1 %v27610_v45 }
 0x7d1   :  { %11414 = vmatprep.mubr.bf16.mxu1 %v27611_v34  ;;  %11486 = vmatpush1.bf16.msra.mxu1 %v25910_v4  ;;  %v27618_v4 = vld [vmem:[#allocation176_spill] sm:$0xff] }
 0x7d2   :  { %11487 = vmatprep.subr.bf16.mxu1 %v25917_v47  ;;  %v27619_v47 = vld [vmem:[#allocation179_spill] sm:$0xff] }
 0x7d5   :  { %11488 = vmatpush1.bf16.msra.mxu1 %v25928_v53  ;;  %v27620_v53 = vld [vmem:[#allocation178_spill] sm:$0xff] }
 0x7d6   :  { %11489 = vmatprep.subr.bf16.mxu1 %v25934_v7  ;;  %v27621_v7 = vld [vmem:[#allocation183_spill] sm:$0xff] }
 0x7d8   :  { %11415 = vmatmul.mubr.bf16.gmra.mrb[16].mxu1 %v27612_v44 }
 0x7d9   :  { %11424 = vmatprep.mubr.bf16.mxu1 %v27613_v27  ;;  %11490 = vmatpush1.bf16.msra.mxu1 %v25942_v11  ;;  %v27622_v11 = vld [vmem:[#allocation182_spill] sm:$0xff] }
 0x7da   :  { %11491 = vmatprep.subr.bf16.mxu1 %v25949_v32  ;;  %v27623_v32 = vpack.c.bf16 %v27621_v7, %v27622_v11 }
 0x7dd   :  { %11492 = vmatpush1.bf16.msra.mxu1 %v25962_v42  ;;  %v27624_v42 = vld [vmem:[#allocation181_spill] sm:$0xff] }
 0x7de   :  { %11493 = vmatprep.subr.bf16.mxu1 %v25968_v37  ;;  %v27625_v37 = vld [vmem:[#allocation180_spill] sm:$0xff] }
 0x7e0   :  { %11425 = vmatmul.mubr.bf16.gmra.mrb[20].mxu1 %v27614_v25 }
 0x7e1   :  { %11434 = vmatprep.mubr.bf16.mxu1 %v27615_v55  ;;  %11494 = vmatpush1.bf16.msra.mxu1 %v25976_v29  ;;  %v27626_v29 = vpack.c.bf16 %v27624_v42, %v27625_v37 }
 0x7e2   :  { %11495 = vmatprep.subr.bf16.mxu1 %v25985_v8  ;;  %v27627_v8 = vld [vmem:[#allocation187_spill] sm:$0xff] }
 0x7e5   :  { %11496 = vmatpush1.bf16.msra.mxu1 %v25998_v38  ;;  %v27629_v38 = vpack.c.bf16 %v27627_v8, %v27628_v24 }
 0x7e6   :  { %11497 = vmatprep.subr.bf16.mxu1 %v26004_v59  ;;  %v27630_v59 = vld [vmem:[#allocation185_spill] sm:$0xff] }
 0x7e8   :  { %11435 = vmatmul.mubr.bf16.gmra.mrb[24].mxu1 %v27616_v12 }
 0x7e9   :  { %11444 = vmatprep.mubr.bf16.mxu1 %v27617_v31  ;;  %11498 = vmatpush1.bf16.msra.mxu1 %v26012_v22  ;;  %v27631_v22 = vld [vmem:[#allocation184_spill] sm:$0xff] }
 0x7ea   :  { %11499 = vmatprep.subr.bf16.mxu1 %v26021_v54  ;;  %v27632_v17 = vpack.c.bf16 %v27630_v59, %v27631_v22  ;;  %v27635_v54 = vld [vmem:[#allocation165_spill] sm:$0xff] }
 0x7ed   :  { %11500 = vmatpush1.bf16.msra.mxu1 %v26032_v36  ;;  %v27639_v36 = vld [vmem:[#allocation174_spill] sm:$0xff] }
 0x7ee   :  { %v27641_v15 = vpack.c.bf16 %v27639_v36, %v27640_v63 }
 0x7f0   :  { %11445 = vmatmul.mubr.bf16.gmra.mrb[28].mxu1 %v27618_v4 }
 0x7f1   :  { %11454 = vmatprep.mubr.bf16.mxu1 %v27619_v47 }
 0x7f8   :  { %11455 = vmatmul.mubr.bf16.gmra.mrb[32].mxu1 %v27620_v53 }
 0x7f9   :  { %11464 = vmatprep.mubr.bf16.mxu1 %v27623_v32 }
 0x800   :  { %11465 = vmatmul.mubr.bf16.gmra.mrb[36].mxu1 %v27626_v29 }
 0x801   :  { %11474 = vmatprep.mubr.bf16.mxu1 %v27629_v38 }
 0x808   :  { %11475 = vmatmul.mubr.bf16.gmra.mrb[40].mxu1 %v27632_v17 }
 0x809   :  { %11517 = vmatprep.mubr.bf16.mxu1 %v26051_v57 }
 0x810   :  { %11518 = vmatmul.mubr.bf16.vlgmr.msra.gmra.mrb[12].mxu1 %v27633_v40 }
 0x811   :  { %11527 = vmatprep.mubr.bf16.mxu1 %v26051_v57 }
 0x818   :  { %11528 = vmatmul.mubr.bf16.gmra.mrb[16].mxu1 %v27634_v21 }
 0x819   :  { %11537 = vmatprep.mubr.bf16.mxu1 %v26051_v57 }
 0x820   :  { %11538 = vmatmul.mubr.bf16.gmra.mrb[20].mxu1 %v27635_v54 }
 0x821   :  { %11547 = vmatprep.mubr.bf16.mxu1 %v26051_v57 }
 0x828   :  { %11548 = vmatmul.mubr.bf16.gmra.mrb[24].mxu1 %v27636_v52 }
 0x829   :  { %11557 = vmatprep.mubr.bf16.mxu1 %v26051_v57 }
 0x830   :  { %11558 = vmatmul.mubr.bf16.gmra.mrb[28].mxu1 %v27637_v56 }
 0x831   :  { %11567 = vmatprep.mubr.bf16.mxu1 %v26051_v57 }
 0x838   :  { %11568 = vmatmul.mubr.bf16.gmra.mrb[32].mxu1 %v27638_v13 }
 0x839   :  { %11577 = vmatprep.mubr.bf16.mxu1 %v26051_v57 }
 0x840   :  { %11578 = vmatmul.mubr.bf16.gmra.mrb[36].mxu1 %v27641_v15 }
 0x841   :  { %11587 = vmatprep.mubr.bf16.mxu1 %v26051_v57 }
 0x848   :  { %11588 = vmatmul.mubr.bf16.gmra.mrb[40].mxu1 %v27644_v5 }
 0x875   :  { %v14832_v20 = vpop.f32.mrb[184].mxu0 }
 0x876   :  { %v14915_v18 = vmul.f32 0.2, %v14832_v20  ;;  %v14834_v46 = vpop.f32.mrb[185].mxu0  ;;  %vm14891_vm7 = vcmp.ge.f32.partialorder %v14832_v20, 0.0 }
 0x877   :  { %v14916_v23 = vmul.f32 0.2, %v14834_v46  ;;  %v14836_v62 = vpop.f32.mrb[186].mxu0  ;;  %vm14892_vm8 = vcmp.ge.f32.partialorder %v14834_v46, 0.0 }
 0x878   :  { %vm14893_vm9 = vcmp.ge.f32.partialorder %v14836_v62, 0.0  ;;  %v14917_v2 = vmul.f32 0.2, %v14836_v62  ;;  %v14838_v50 = vpop.f32.mrb[187].mxu0  ;;  %v14939_v58 = vsel %vm14891_vm7, %v14832_v20, %v14915_v18 }
 0x879   :  { %vm14894_vm10 = vcmp.ge.f32.partialorder %v14838_v50, 0.0  ;;  %v14918_v49 = vmul.f32 0.2, %v14838_v50  ;;  %v14940_v39 = vsel %vm14892_vm8, %v14834_v46, %v14916_v23 }
 0x87a   :  { %v14941_v10 = vsel %vm14893_vm9, %v14836_v62, %v14917_v2 }
 0x87b   :  { %v26177_v1 = vpack.c.bf16 %v14941_v10, %v14939_v58  ;;  %v14942_v14 = vsel %vm14894_vm10, %v14838_v50, %v14918_v49 }
 0x87c   :  { %v14964_v48 = vpack.c.bf16 %v14942_v14, %v14940_v39 }
 0x87d   :  { %v14842_v33 = vpop.f32.mrb[188].mxu0 }
 0x87e   :  { %14976 = vst.msk [vmem:[#allocation4 + $0xa8] sm:$0xff] %vm8163_vm3, %v14964_v48  ;;  %v14919_v41 = vmul.f32 0.2, %v14842_v33  ;;  %v14844_v19 = vpop.f32.mrb[189].mxu0  ;;  %vm14895_vm11 = vcmp.ge.f32.partialorder %v14842_v33, 0.0 }
 0x87f   :  { %v14920_v43 = vmul.f32 0.2, %v14844_v19  ;;  %v14846_v28 = vpop.f32.mrb[190].mxu0  ;;  %vm14896_vm4 = vcmp.ge.f32.partialorder %v14844_v19, 0.0 }
 0x880   :  { %vm14897_vm12 = vcmp.ge.f32.partialorder %v14846_v28, 0.0  ;;  %v14921_v9 = vmul.f32 0.2, %v14846_v28  ;;  %v14848_v35 = vpop.f32.mrb[191].mxu0  ;;  %v14943_v51 = vsel %vm14895_vm11, %v14842_v33, %v14919_v41 }
 0x881   :  { %vm14898_vm13 = vcmp.ge.f32.partialorder %v14848_v35, 0.0  ;;  %v14922_v61 = vmul.f32 0.2, %v14848_v35  ;;  %v14944_v0 = vsel %vm14896_vm4, %v14844_v19, %v14920_v43 }
 0x882   :  { %v14945_v26 = vsel %vm14897_vm12, %v14846_v28, %v14921_v9 }
 0x883   :  { %v26180_v60 = vpack.c.bf16 %v14945_v26, %v14943_v51  ;;  %v14946_v6 = vsel %vm14898_vm13, %v14848_v35, %v14922_v61  ;;  %v19736_v51 = vld [vmem:[%s26603_s4 + $0x40] sm:$0xff]  }
 0x884   :  { %v14966_v16 = vpack.c.bf16 %v14946_v6, %v14944_v0  ;;  %v19737_v26 = vld [vmem:[%s26603_s4] sm:$0xff]   ;;  %17534 = vmatprep.subr.bf16.mxu0 %v19736_v51  ;;  %v19738_v0 = vld [vmem:[%s26603_s4 + $0x48] sm:$0xff]  }
 0x885   :  { %v14852_v45 = vpop.f32.mrb[192].mxu0  ;;  %17535 = vmatpush3.bf16.msra.mxu0 %v19737_v26  ;;  %v19739_v6 = vld [vmem:[%s26603_s4 + $0x8] sm:$0xff]  }
 0x886   :  { %14978 = vst.msk [vmem:[#allocation4 + $0xb8] sm:$0xff] %vm8163_vm3, %v14966_v16  ;;  %v14923_v34 = vmul.f32 0.2, %v14852_v45  ;;  %v14854_v44 = vpop.f32.mrb[193].mxu0  ;;  %vm14899_vm14 = vcmp.ge.f32.partialorder %v14852_v45, 0.0  ;;  %17536 = vmatprep.subr.bf16.mxu0 %v19738_v0  ;;  %v19740_v16 = vld [vmem:[%s26603_s4 + $0x50] sm:$0xff]  }
 0x887   :  { %v14924_v27 = vmul.f32 0.2, %v14854_v44  ;;  %v14856_v25 = vpop.f32.mrb[194].mxu0  ;;  %vm14900_vm1 = vcmp.ge.f32.partialorder %v14854_v44, 0.0 }
 0x888   :  { %vm14901_vm5 = vcmp.ge.f32.partialorder %v14856_v25, 0.0  ;;  %v14925_v55 = vmul.f32 0.2, %v14856_v25  ;;  %v14858_v12 = vpop.f32.mrb[195].mxu0  ;;  %v14947_v4 = vsel %vm14899_vm14, %v14852_v45, %v14923_v34  ;;  %v19741_v45 = vld [vmem:[%s26603_s4 + $0x10] sm:$0xff]   ;;  %v19742_v34 = vld [vmem:[%s26603_s4 + $0x58] sm:$0xff]  }
 0x889   :  { %vm14902_vm15 = vcmp.ge.f32.partialorder %v14858_v12, 0.0  ;;  %v14926_v31 = vmul.f32 0.2, %v14858_v12  ;;  %v14948_v53 = vsel %vm14900_vm1, %v14854_v44, %v14924_v27  ;;  %17537 = vmatpush3.bf16.msra.mxu0 %v19739_v6  ;;  %v19743_v44 = vld [vmem:[%s26603_s4 + $0x18] sm:$0xff]   ;;  %v19744_v27 = vld [vmem:[%s26603_s4 + $0x60] sm:$0xff]  }
 0x88a   :  { %v14949_v47 = vsel %vm14901_vm5, %v14856_v25, %v14925_v55  ;;  %17538 = vmatprep.subr.bf16.mxu0 %v19740_v16  ;;  %v19745_v25 = vld [vmem:[%s26603_s4 + $0x20] sm:$0xff]   ;;  %v19746_v55 = vld [vmem:[%s26603_s4 + $0x68] sm:$0xff]  }
 0x88b   :  { %v26183_v7 = vpack.c.bf16 %v14949_v47, %v14947_v4  ;;  %v14950_v11 = vsel %vm14902_vm15, %v14858_v12, %v14926_v31  ;;  %v19747_v12 = vld [vmem:[%s26603_s4 + $0x28] sm:$0xff]   ;;  %v19748_v31 = vld [vmem:[%s26603_s4 + $0x70] sm:$0xff]   ;;  %v19749_v4 = vld [vmem:[%s26603_s4 + $0xc0] sm:$0xff]  }
 0x88c   :  { %v14968_v32 = vpack.c.bf16 %v14950_v11, %v14948_v53  ;;  %v19751_v47 = vld [vmem:[%s26603_s4 + $0x80] sm:$0xff]   ;;  %v19750_v53 = vld [vmem:[%s26603_s4 + $0x30] sm:$0xff]   ;;  %v19752_v11 = vld [vmem:[%s26603_s4 + $0x78] sm:$0xff]   ;;  %17598 = vmatprep.subr.bf16.mxu1 %v19749_v4 }
 0x88d   :  { %v14862_v42 = vpop.f32.mrb[196].mxu0  ;;  %17539 = vmatpush3.bf16.msra.mxu0 %v19741_v45  ;;  %17599 = vmatpush3.bf16.msra.mxu1 %v19751_v47 }
 0x88e   :  { %14980 = vst.msk [vmem:[#allocation4 + $0xc8] sm:$0xff] %vm8163_vm3, %v14968_v32  ;;  %v14927_v37 = vmul.f32 0.2, %v14862_v42  ;;  %v14864_v29 = vpop.f32.mrb[197].mxu0  ;;  %vm14903_vm2 = vcmp.ge.f32.partialorder %v14862_v42, 0.0  ;;  %17540 = vmatprep.subr.bf16.mxu0 %v19742_v34  ;;  %v19754_v32 = vld [vmem:[%s26603_s4 + $0xc8] sm:$0xff]  }
 0x88f   :  { %v14928_v8 = vmul.f32 0.2, %v14864_v29  ;;  %v14866_v24 = vpop.f32.mrb[198].mxu0  ;;  %vm14904_vm6 = vcmp.ge.f32.partialorder %v14864_v29, 0.0  ;;  %17600 = vmatprep.subr.bf16.mxu1 %v19754_v32 }
 0x890   :  { %vm14905_vm7 = vcmp.ge.f32.partialorder %v14866_v24, 0.0  ;;  %v14929_v38 = vmul.f32 0.2, %v14866_v24  ;;  %v14868_v59 = vpop.f32.mrb[199].mxu0  ;;  %v14951_v17 = vsel %vm14903_vm2, %v14862_v42, %v14927_v37  ;;  %v19755_v42 = vld [vmem:[%s26603_s4 + $0x88] sm:$0xff]   ;;  %v19753_v37 = vld [vmem:[%s26603_s4 + $0x38] sm:$0xff]  }
 0x891   :  { %vm14906_vm8 = vcmp.ge.f32.partialorder %v14868_v59, 0.0  ;;  %v14930_v22 = vmul.f32 0.2, %v14868_v59  ;;  %v14952_v21 = vsel %vm14904_vm6, %v14864_v29, %v14928_v8  ;;  %17541 = vmatpush3.bf16.msra.mxu0 %v19743_v44  ;;  %17601 = vmatpush3.bf16.msra.mxu1 %v19755_v42  ;;  %v19757_v29 = vld [vmem:[%s26603_s4 + $0xd0] sm:$0xff]   ;;  %v19767_v44 = vld [vmem:[%s26603_s4 + $0xe8] sm:$0xff]  }
 0x892   :  { %v14953_v40 = vsel %vm14905_vm7, %v14866_v24, %v14929_v38  ;;  %17542 = vmatprep.subr.bf16.mxu0 %v19744_v27  ;;  %v19758_v8 = vld [vmem:[%s26603_s4 + $0x90] sm:$0xff]   ;;  %17602 = vmatprep.subr.bf16.mxu1 %v19757_v29  ;;  %v19768_v27 = vld [vmem:[%s26603_s4 + $0xa8] sm:$0xff]  }
 0x893   :  { %v26186_v54 = vpack.c.bf16 %v14953_v40, %v14951_v17  ;;  %v14954_v52 = vsel %vm14906_vm8, %v14868_v59, %v14930_v22 }
 0x894   :  { %v14970_v56 = vpack.c.bf16 %v14954_v52, %v14952_v21 }
 0x895   :  { %v14872_v13 = vpop.f32.mrb[200].mxu0  ;;  %17543 = vmatpush3.bf16.msra.mxu0 %v19745_v25  ;;  %17603 = vmatpush3.bf16.msra.mxu1 %v19758_v8 }
 0x896   :  { %14982 = vst.msk [vmem:[#allocation4 + $0xd8] sm:$0xff] %vm8163_vm3, %v14970_v56  ;;  %v14931_v36 = vmul.f32 0.2, %v14872_v13  ;;  %v14874_v63 = vpop.f32.mrb[201].mxu0  ;;  %vm14907_vm9 = vcmp.ge.f32.partialorder %v14872_v13, 0.0  ;;  %17544 = vmatprep.subr.bf16.mxu0 %v19746_v55 }
 0x897   :  { %v14932_v15 = vmul.f32 0.2, %v14874_v63  ;;  %v14876_v3 = vpop.f32.mrb[202].mxu0  ;;  %vm14908_vm10 = vcmp.ge.f32.partialorder %v14874_v63, 0.0 }
 0x898   :  { %vm14909_vm11 = vcmp.ge.f32.partialorder %v14876_v3, 0.0  ;;  %v14933_v30 = vmul.f32 0.2, %v14876_v3  ;;  %v14878_v5 = vpop.f32.mrb[203].mxu0  ;;  %v14955_v18 = vsel %vm14907_vm9, %v14872_v13, %v14931_v36  ;;  %v19760_v36 = vld [vmem:[%s26603_s4 + $0xd8] sm:$0xff]  }
 0x899   :  { %vm14910_vm4 = vcmp.ge.f32.partialorder %v14878_v5, 0.0  ;;  %v14934_v20 = vmul.f32 0.2, %v14878_v5  ;;  %v14956_v23 = vsel %vm14908_vm10, %v14874_v63, %v14932_v15  ;;  %17545 = vmatpush3.bf16.msra.mxu0 %v19747_v12  ;;  %v19761_v63 = vld [vmem:[%s26603_s4 + $0x98] sm:$0xff]   ;;  %17604 = vmatprep.subr.bf16.mxu1 %v19760_v36 }
 0x89a   :  { %v14957_v46 = vsel %vm14909_vm11, %v14876_v3, %v14933_v30  ;;  %17546 = vmatprep.subr.bf16.mxu0 %v19748_v31  ;;  %17605 = vmatpush3.bf16.msra.mxu1 %v19761_v63 }
 0x89b   :  { %v26189_v62 = vpack.c.bf16 %v14957_v46, %v14955_v18  ;;  %v14958_v2 = vsel %vm14910_vm4, %v14878_v5, %v14934_v20 }
 0x89c   :  { %v14972_v50 = vpack.c.bf16 %v14958_v2, %v14956_v23 }
 0x89d   :  { %v14882_v49 = vpop.f32.mrb[204].mxu0  ;;  %17547 = vmatpush3.bf16.msra.mxu0 %v19750_v53 }
 0x89e   :  { %14984 = vst.msk [vmem:[#allocation4 + $0xe8] sm:$0xff] %vm8163_vm3, %v14972_v50  ;;  %v14935_v58 = vmul.f32 0.2, %v14882_v49  ;;  %v14884_v10 = vpop.f32.mrb[205].mxu0  ;;  %vm14911_vm12 = vcmp.ge.f32.partialorder %v14882_v49, 0.0  ;;  %17548 = vmatprep.subr.bf16.mxu0 %v19752_v11 }
 0x89f   :  { %v14936_v39 = vmul.f32 0.2, %v14884_v10  ;;  %v14886_v14 = vpop.f32.mrb[206].mxu0  ;;  %vm14912_vm13 = vcmp.ge.f32.partialorder %v14884_v10, 0.0 }
 0x8a0   :  { %vm14913_vm14 = vcmp.ge.f32.partialorder %v14886_v14, 0.0  ;;  %v14937_v48 = vmul.f32 0.2, %v14886_v14  ;;  %v14888_v33 = vpop.f32.mrb[207].mxu0  ;;  %v14959_v19 = vsel %vm14911_vm12, %v14882_v49, %v14935_v58 }
 0x8a1   :  { %vm14914_vm1 = vcmp.ge.f32.partialorder %v14888_v33, 0.0  ;;  %v14938_v41 = vmul.f32 0.2, %v14888_v33  ;;  %v14960_v28 = vsel %vm14912_vm13, %v14884_v10, %v14936_v39  ;;  %17549 = vmatpush3.bf16.msra.mxu0 %v19753_v37 }
 0x8a2   :  { %v14961_v43 = vsel %vm14913_vm14, %v14886_v14, %v14937_v48  ;;  %15772 = vmatprep.subr.bf16.mxu0 %v26051_v57  ;;  %v19763_v14 = vld [vmem:[%s26603_s4 + $0xe0] sm:$0xff]  }
 0x8a3   :  { %v26192_v9 = vpack.c.bf16 %v14961_v43, %v14959_v19  ;;  %v14962_v35 = vsel %vm14914_vm1, %v14888_v33, %v14938_v41  ;;  %v19764_v48 = vld [vmem:[%s26603_s4 + $0xa0] sm:$0xff]   ;;  %17606 = vmatprep.subr.bf16.mxu1 %v19763_v14 }
 0x8a4   :  { %v14974_v61 = vpack.c.bf16 %v14962_v35, %v14960_v28  ;;  %17607 = vmatpush3.bf16.msra.mxu1 %v19764_v48 }
 0x8a5   :  { %17608 = vmatprep.subr.bf16.mxu1 %v19767_v44 }
 0x8a6   :  { %14986 = vst.msk [vmem:[#allocation4 + $0xf8] sm:$0xff] %vm8163_vm3, %v14974_v61 }
 0x8a8   :  { %17609 = vmatpush3.bf16.msra.mxu1 %v19768_v27 }
 0x8e3   :  { %v11519_v24 = vpop.f32.mrb[12].mxu1 }
 0x8e4   :  { %v11630_v38 = vmul.f32 0.2, %v11519_v24  ;;  %v11521_v59 = vpop.f32.mrb[13].mxu1  ;;  %vm11598_vm5 = vcmp.ge.f32.partialorder %v11519_v24, 0.0 }
 0x8e5   :  { %v11631_v22 = vmul.f32 0.2, %v11521_v59  ;;  %v11523_v17 = vpop.f32.mrb[14].mxu1  ;;  %vm11599_vm15 = vcmp.ge.f32.partialorder %v11521_v59, 0.0 }
 0x8e6   :  { %vm11600_vm2 = vcmp.ge.f32.partialorder %v11523_v17, 0.0  ;;  %v11632_v40 = vmul.f32 0.2, %v11523_v17  ;;  %v11525_v21 = vpop.f32.mrb[15].mxu1  ;;  %v11662_v56 = vsel %vm11598_vm5, %v11519_v24, %v11630_v38  ;;  %v19769_v38 = vld [vmem:[%s26603_s4 + $0xf0] sm:$0xff]  }
 0x8e7   :  { %vm11601_vm6 = vcmp.ge.f32.partialorder %v11525_v21, 0.0  ;;  %v11633_v52 = vmul.f32 0.2, %v11525_v21  ;;  %v11663_v15 = vsel %vm11599_vm15, %v11521_v59, %v11631_v22  ;;  %v19770_v59 = vld [vmem:[%s26603_s4 + $0xb0] sm:$0xff]   ;;  %17610 = vmatprep.subr.bf16.mxu1 %v19769_v38 }
 0x8e8   :  { %v11664_v13 = vsel %vm11600_vm2, %v11523_v17, %v11632_v40  ;;  %17611 = vmatpush3.bf16.msra.mxu1 %v19770_v59 }
 0x8e9   :  { %v11694_v3 = vpack.c.bf16 %v11664_v13, %v11662_v56  ;;  %v11665_v30 = vsel %vm11601_vm6, %v11525_v21, %v11633_v52  ;;  %v19772_v52 = vld [vmem:[%s26603_s4 + $0xf8] sm:$0xff]  }
 0x8ea   :  { %v11695_v5 = vpack.c.bf16 %v11665_v30, %v11663_v15  ;;  %v19773_v13 = vld [vmem:[%s26603_s4 + $0xb8] sm:$0xff]   ;;  %17612 = vmatprep.subr.bf16.mxu1 %v19772_v52 }
 0x8eb   :  { %v11529_v20 = vpop.f32.mrb[16].mxu1  ;;  %15039 = vrot.lane.b32.xlu0 %v11694_v3, %s19816_s8 }
 0x8ec   :  { %11711 = vst.msk [vmem:[#allocation4 + $0x8] sm:$0xff] %vm8163_vm3, %v11695_v5  ;;  %v11634_v18 = vmul.f32 0.2, %v11529_v20  ;;  %v11531_v46 = vpop.f32.mrb[17].mxu1  ;;  %vm11602_vm7 = vcmp.ge.f32.partialorder %v11529_v20, 0.0  ;;  %17613 = vmatpush3.bf16.msra.mxu1 %v19773_v13 }
 0x8ed   :  { %v11635_v23 = vmul.f32 0.2, %v11531_v46  ;;  %v11533_v2 = vpop.f32.mrb[18].mxu1  ;;  %vm11603_vm8 = vcmp.ge.f32.partialorder %v11531_v46, 0.0  ;;  %17774 = vmatprep.subr.bf16.mxu1 %v26051_v57 }
 0x8ee   :  { %vm11604_vm9 = vcmp.ge.f32.partialorder %v11533_v2, 0.0  ;;  %v11636_v50 = vmul.f32 0.2, %v11533_v2  ;;  %v11535_v49 = vpop.f32.mrb[19].mxu1  ;;  %v11666_v10 = vsel %vm11602_vm7, %v11529_v20, %v11634_v18 }
 0x8ef   :  { %vm11605_vm10 = vcmp.ge.f32.partialorder %v11535_v49, 0.0  ;;  %v11637_v58 = vmul.f32 0.2, %v11535_v49  ;;  %v11667_v33 = vsel %vm11603_vm8, %v11531_v46, %v11635_v23 }
 0x8f0   :  { %v11668_v39 = vsel %vm11604_vm9, %v11533_v2, %v11636_v50 }
 0x8f1   :  { %v11696_v41 = vpack.c.bf16 %v11668_v39, %v11666_v10  ;;  %v11669_v19 = vsel %vm11605_vm10, %v11535_v49, %v11637_v58 }
 0x8f2   :  { %v11697_v43 = vpack.c.bf16 %v11669_v19, %v11667_v33 }
 0x8f3   :  { %v11539_v28 = vpop.f32.mrb[20].mxu1  ;;  %15043 = vrot.lane.b32.xlu1 %v11696_v41, %s19816_s8  ;;  %v15004_v19 = vld [vmem:[#allocation4 + $0x8] sm:$0xff] }
 0x8f4   :  { %11713 = vst.msk [vmem:[#allocation4 + $0x18] sm:$0xff] %vm8163_vm3, %v11697_v43  ;;  %v11638_v35 = vmul.f32 0.2, %v11539_v28  ;;  %v11541_v61 = vpop.f32.mrb[21].mxu1  ;;  %vm11606_vm11 = vcmp.ge.f32.partialorder %v11539_v28, 0.0 }
 0x8f5   :  { %v11639_v51 = vmul.f32 0.2, %v11541_v61  ;;  %v11543_v26 = vpop.f32.mrb[22].mxu1  ;;  %vm11607_vm4 = vcmp.ge.f32.partialorder %v11541_v61, 0.0 }
 0x8f6   :  { %vm11608_vm12 = vcmp.ge.f32.partialorder %v11543_v26, 0.0  ;;  %v11640_v0 = vmul.f32 0.2, %v11543_v26  ;;  %v11545_v6 = vpop.f32.mrb[23].mxu1  ;;  %v11670_v45 = vsel %vm11606_vm11, %v11539_v28, %v11638_v35 }
 0x8f7   :  { %vm11609_vm13 = vcmp.ge.f32.partialorder %v11545_v6, 0.0  ;;  %v11641_v16 = vmul.f32 0.2, %v11545_v6  ;;  %v11671_v25 = vsel %vm11607_vm4, %v11541_v61, %v11639_v51 }
 0x8f8   :  { %v11672_v34 = vsel %vm11608_vm12, %v11543_v26, %v11640_v0 }
 0x8f9   :  { %v11698_v55 = vpack.c.bf16 %v11672_v34, %v11670_v45  ;;  %v11673_v12 = vsel %vm11609_vm13, %v11545_v6, %v11641_v16 }
 0x8fa   :  { %v11699_v31 = vpack.c.bf16 %v11673_v12, %v11671_v25 }
 0x8fb   :  { %v11549_v4 = vpop.f32.mrb[24].mxu1  ;;  %15047 = vrot.lane.b32.xlu0 %v11698_v55, %s19816_s8  ;;  %v15006_v38 = vld [vmem:[#allocation4 + $0x18] sm:$0xff] }
 0x8fc   :  { %11715 = vst.msk [vmem:[#allocation4 + $0x28] sm:$0xff] %vm8163_vm3, %v11699_v31  ;;  %v11642_v47 = vmul.f32 0.2, %v11549_v4  ;;  %v11551_v53 = vpop.f32.mrb[25].mxu1  ;;  %vm11610_vm14 = vcmp.ge.f32.partialorder %v11549_v4, 0.0 }
 0x8fd   :  { %v11643_v11 = vmul.f32 0.2, %v11551_v53  ;;  %v11553_v32 = vpop.f32.mrb[26].mxu1  ;;  %vm11611_vm1 = vcmp.ge.f32.partialorder %v11551_v53, 0.0 }
 0x8fe   :  { %vm11612_vm5 = vcmp.ge.f32.partialorder %v11553_v32, 0.0  ;;  %v11644_v42 = vmul.f32 0.2, %v11553_v32  ;;  %v11555_v37 = vpop.f32.mrb[27].mxu1  ;;  %v11674_v8 = vsel %vm11610_vm14, %v11549_v4, %v11642_v47 }
 0x8ff   :  { %vm11613_vm15 = vcmp.ge.f32.partialorder %v11555_v37, 0.0  ;;  %v11645_v29 = vmul.f32 0.2, %v11555_v37  ;;  %v11675_v22 = vsel %vm11611_vm1, %v11551_v53, %v11643_v11 }
 0x900   :  { %v11676_v24 = vsel %vm11612_vm5, %v11553_v32, %v11644_v42 }
 0x901   :  { %v11700_v17 = vpack.c.bf16 %v11676_v24, %v11674_v8  ;;  %v11677_v40 = vsel %vm11613_vm15, %v11555_v37, %v11645_v29 }
 0x902   :  { %v11701_v21 = vpack.c.bf16 %v11677_v40, %v11675_v22 }
 0x903   :  { %v11559_v56 = vpop.f32.mrb[28].mxu1  ;;  %15051 = vrot.lane.b32.xlu1 %v11700_v17, %s19816_s8  ;;  %v15008_v13 = vld [vmem:[#allocation4 + $0x28] sm:$0xff] }
 0x904   :  { %11717 = vst.msk [vmem:[#allocation4 + $0x38] sm:$0xff] %vm8163_vm3, %v11701_v21  ;;  %v11646_v36 = vmul.f32 0.2, %v11559_v56  ;;  %v11561_v63 = vpop.f32.mrb[29].mxu1  ;;  %vm11614_vm2 = vcmp.ge.f32.partialorder %v11559_v56, 0.0 }
 0x905   :  { %v11647_v15 = vmul.f32 0.2, %v11561_v63  ;;  %v11563_v3 = vpop.f32.mrb[30].mxu1  ;;  %vm11615_vm6 = vcmp.ge.f32.partialorder %v11561_v63, 0.0 }
 0x906   :  { %vm11616_vm7 = vcmp.ge.f32.partialorder %v11563_v3, 0.0  ;;  %v11648_v30 = vmul.f32 0.2, %v11563_v3  ;;  %v11565_v5 = vpop.f32.mrb[31].mxu1  ;;  %v11678_v18 = vsel %vm11614_vm2, %v11559_v56, %v11646_v36 }
 0x907   :  { %vm11617_vm8 = vcmp.ge.f32.partialorder %v11565_v5, 0.0  ;;  %v11649_v20 = vmul.f32 0.2, %v11565_v5  ;;  %v11679_v23 = vsel %vm11615_vm6, %v11561_v63, %v11647_v15  ;;  %v14992_v63 = vld [vmem:[#allocation4 + $0xa8] sm:$0xff]  ;;  %v14994_v15 = vld [vmem:[#allocation4 + $0xb8] sm:$0xff] }
 0x908   :  { %v11680_v46 = vsel %vm11616_vm7, %v11563_v3, %v11648_v30  ;;  %vm15136_vm7 = vcmask 523264  }
 0x909   :  { %v11702_v2 = vpack.c.bf16 %v11680_v46, %v11678_v18  ;;  %v11681_v50 = vsel %vm11617_vm8, %v11565_v5, %v11649_v20  ;;  %v26326_v5 = vld [vmem:[#allocation4 + $0xc8] sm:$0xff]  ;;  %v26331_v20 = vld [vmem:[#allocation4 + $0xd8] sm:$0xff]  ;;  %v26337_v46 = vld [vmem:[#allocation4 + $0x80] sm:$0xff] }
 0x90a   :  { %v11703_v49 = vpack.c.bf16 %v11681_v50, %v11679_v23  ;;  %v26342_v23 = vld [vmem:[#allocation4 + $0xe8] sm:$0xff]  ;;  %v26347_v50 = vld [vmem:[#allocation4 + $0xf8] sm:$0xff] }
 0x90b   :  { %v11569_v58 = vpop.f32.mrb[32].mxu1  ;;  %15055 = vrot.lane.b32.xlu0 %v11702_v2, %s19816_s8  ;;  %v15010_v36 = vld [vmem:[#allocation4 + $0x38] sm:$0xff] }
 0x90c   :  { %11719 = vst.msk [vmem:[#allocation4 + $0x48] sm:$0xff] %vm8163_vm3, %v11703_v49  ;;  %v11650_v10 = vmul.f32 0.2, %v11569_v58  ;;  %v11571_v39 = vpop.f32.mrb[33].mxu1  ;;  %vm11618_vm9 = vcmp.ge.f32.partialorder %v11569_v58, 0.0  ;;  %v15020_v49 = vld [vmem:[#allocation4 + $0x108] sm:$0xff] }
 0x90d   :  { %v11651_v14 = vmul.f32 0.2, %v11571_v39  ;;  %v11573_v48 = vpop.f32.mrb[34].mxu1  ;;  %vm11619_vm10 = vcmp.ge.f32.partialorder %v11571_v39, 0.0 }
 0x90e   :  { %vm11620_vm11 = vcmp.ge.f32.partialorder %v11573_v48, 0.0  ;;  %v11652_v33 = vmul.f32 0.2, %v11573_v48  ;;  %v11575_v41 = vpop.f32.mrb[35].mxu1  ;;  %v11682_v43 = vsel %vm11618_vm9, %v11569_v58, %v11650_v10  ;;  %v15022_v58 = vld [vmem:[#allocation4 + $0x118] sm:$0xff]  ;;  %v14988_v10 = vld [vmem:[#allocation4 + $0x88] sm:$0xff] }
 0x90f   :  { %vm11621_vm4 = vcmp.ge.f32.partialorder %v11575_v41, 0.0  ;;  %v11653_v57 = vmul.f32 0.2, %v11575_v41  ;;  %15041 = vrot.lane.b32.xlu0 %v15004_v19, %s19816_s8  ;;  %v11683_v35 = vsel %vm11619_vm10, %v11571_v39, %v11651_v14  ;;  %v19756_v14 = vld [vmem:[%s26603_s4 + $0x100] sm:$0xff]  }
 0x910   :  { %v11684_v28 = vsel %vm11620_vm11, %v11573_v48, %v11652_v33  ;;  %v19759_v33 = vld [vmem:[%s26603_s4 + $0x108] sm:$0xff]  }
 0x911   :  { %v11704_v61 = vpack.c.bf16 %v11684_v28, %v11682_v43  ;;  %v11685_v51 = vsel %vm11621_vm4, %v11575_v41, %v11653_v57  ;;  %v14990_v41 = vld [vmem:[#allocation4 + $0x98] sm:$0xff]  ;;  %v19762_v57 = vld [vmem:[%s26603_s4 + $0x110] sm:$0xff]   ;;  %v19765_v28 = vld [vmem:[%s26603_s4 + $0x118] sm:$0xff]  }
 0x912   :  { %v11705_v26 = vpack.c.bf16 %v11685_v51, %v11683_v35 }
 0x913   :  { %v11579_v0 = vpop.f32.mrb[36].mxu1  ;;  %15104 = vrot.lane.b32.xlu0 %v26177_v1, %s19808_s12  ;;  %15059 = vrot.lane.b32.xlu1 %v11704_v61, %s19816_s8  ;;  %v15012_v3 = vld [vmem:[#allocation4 + $0x48] sm:$0xff]  ;;  %v26382_v61 = vld [vmem:[%s26603_s4 + $0x120] sm:$0xff]  }
 0x914   :  { %11721 = vst.msk [vmem:[#allocation4 + $0x58] sm:$0xff] %vm8163_vm3, %v11705_v26  ;;  %v11654_v6 = vmul.f32 0.2, %v11579_v0  ;;  %v11581_v16 = vpop.f32.mrb[37].mxu1  ;;  %vm11622_vm12 = vcmp.ge.f32.partialorder %v11579_v0, 0.0  ;;  %v26392_v26 = vld [vmem:[%s26603_s4 + $0x128] sm:$0xff]  }
 0x915   :  { %v11655_v45 = vmul.f32 0.2, %v11581_v16  ;;  %v11583_v34 = vpop.f32.mrb[38].mxu1  ;;  %vm11623_vm13 = vcmp.ge.f32.partialorder %v11581_v16, 0.0 }
 0x916   :  { %vm11624_vm14 = vcmp.ge.f32.partialorder %v11583_v34, 0.0  ;;  %v11656_v44 = vmul.f32 0.2, %v11583_v34  ;;  %v11585_v27 = vpop.f32.mrb[39].mxu1  ;;  %v11686_v55 = vsel %vm11622_vm12, %v11579_v0, %v11654_v6  ;;  %v26401_v6 = vld [vmem:[%s26603_s4 + $0x130] sm:$0xff]  }
 0x917   :  { %vm11625_vm1 = vcmp.ge.f32.partialorder %v11585_v27, 0.0  ;;  %v11657_v25 = vmul.f32 0.2, %v11585_v27  ;;  %v11687_v31 = vsel %vm11623_vm13, %v11581_v16, %v11655_v45  ;;  %v26411_v16 = vld [vmem:[%s26603_s4 + $0x138] sm:$0xff]  }
 0x918   :  { %v11688_v12 = vsel %vm11624_vm14, %v11583_v34, %v11656_v44  ;;  %v26420_v34 = vld [vmem:[%s26603_s4 + $0x140] sm:$0xff]  }
 0x919   :  { %v11706_v4 = vpack.c.bf16 %v11688_v12, %v11686_v55  ;;  %v11689_v47 = vsel %vm11625_vm1, %v11585_v27, %v11657_v25  ;;  %v26431_v27 = vld [vmem:[%s26603_s4 + $0x148] sm:$0xff]  }
 0x91a   :  { %v11707_v53 = vpack.c.bf16 %v11689_v47, %v11687_v31 }
 0x91b   :  { %v11589_v11 = vpop.f32.mrb[40].mxu1  ;;  %15063 = vrot.lane.b32.xlu1 %v11706_v4, %s19816_s8  ;;  %v15014_v30 = vld [vmem:[#allocation4 + $0x58] sm:$0xff] }
 0x91c   :  { %11723 = vst.msk [vmem:[#allocation4 + $0x68] sm:$0xff] %vm8163_vm3, %v11707_v53  ;;  %v11658_v32 = vmul.f32 0.2, %v11589_v11  ;;  %v11591_v42 = vpop.f32.mrb[41].mxu1  ;;  %vm11626_vm5 = vcmp.ge.f32.partialorder %v11589_v11, 0.0 }
 0x91d   :  { %v11659_v37 = vmul.f32 0.2, %v11591_v42  ;;  %v11593_v29 = vpop.f32.mrb[42].mxu1  ;;  %vm11627_vm15 = vcmp.ge.f32.partialorder %v11591_v42, 0.0 }
 0x91e   :  { %vm11628_vm2 = vcmp.ge.f32.partialorder %v11593_v29, 0.0  ;;  %v11660_v8 = vmul.f32 0.2, %v11593_v29  ;;  %v11595_v24 = vpop.f32.mrb[43].mxu1  ;;  %v11690_v22 = vsel %vm11626_vm5, %v11589_v11, %v11658_v32 }
 0x91f   :  { %vm11629_vm6 = vcmp.ge.f32.partialorder %v11595_v24, 0.0  ;;  %v11661_v59 = vmul.f32 0.2, %v11595_v24  ;;  %15045 = vrot.lane.b32.xlu1 %v15006_v38, %s19816_s8  ;;  %v11691_v40 = vsel %vm11627_vm15, %v11591_v42, %v11659_v37 }
 0x920   :  { %v11692_v17 = vsel %vm11628_vm2, %v11593_v29, %v11660_v8 }
 0x921   :  { %v11708_v21 = vpack.c.bf16 %v11692_v17, %v11690_v22  ;;  %v11693_v52 = vsel %vm11629_vm6, %v11595_v24, %v11661_v59 }
 0x922   :  { %v11709_v56 = vpack.c.bf16 %v11693_v52, %v11691_v40 }
 0x923   :  { %15108 = vrot.lane.b32.xlu1 %v26180_v60, %s19808_s12  ;;  %15067 = vrot.lane.b32.xlu0 %v11708_v21, %s19816_s8  ;;  %v15016_v18 = vld [vmem:[#allocation4 + $0x68] sm:$0xff] }
 0x924   :  { %11725 = vst.msk [vmem:[#allocation4 + $0x78] sm:$0xff] %vm8163_vm3, %v11709_v56 }
 0x927   :  { %15112 = vrot.lane.b32.xlu1 %v26183_v7, %s19808_s12  ;;  %15049 = vrot.lane.b32.xlu0 %v15008_v13, %s19816_s8 }
 0x92b   :  { %15053 = vrot.lane.b32.xlu1 %v15010_v36, %s19816_s8  ;;  %15106 = vrot.lane.b32.xlu0 %v14992_v63, %s19808_s12  ;;  %v15018_v2 = vld [vmem:[#allocation4 + $0x78] sm:$0xff] }
 0x92f   :  { %15110 = vrot.lane.b32.xlu1 %v14994_v15, %s19808_s12  ;;  %15116 = vrot.lane.b32.xlu0 %v26186_v54, %s19808_s12 }
 0x933   :  { %15120 = vrot.lane.b32.xlu1 %v26189_v62, %s19808_s12  ;;  %15057 = vrot.lane.b32.xlu0 %v15012_v3, %s19816_s8 }
 0x937   :  { %15061 = vrot.lane.b32.xlu1 %v15014_v30, %s19816_s8  ;;  %15114 = vrot.lane.b32.xlu0 %v26326_v5, %s19808_s12 }
 0x93b   :  { %15118 = vrot.lane.b32.xlu1 %v26331_v20, %s19808_s12  ;;  %15124 = vrot.lane.b32.xlu0 %v26192_v9, %s19808_s12 }
 0x93f   :  { %15128 = vrot.lane.b32.xlu1 %v26337_v46, %s19808_s12  ;;  %15065 = vrot.lane.b32.xlu0 %v15016_v18, %s19816_s8 }
 0x943   :  { %15122 = vrot.lane.b32.xlu0 %v26342_v23, %s19808_s12  ;;  %15069 = vrot.lane.b32.xlu1 %v15018_v2, %s19816_s8 }
 0x947   :  { %15132 = vrot.lane.b32.xlu0 %v26337_v46, %s19808_s12  ;;  %15126 = vrot.lane.b32.xlu1 %v26347_v50, %s19808_s12 }
 0x94b   :  { %15130 = vrot.lane.b32.xlu0 %v15020_v49, %s19808_s12  ;;  %15134 = vrot.lane.b32.xlu1 %v15022_v58, %s19808_s12 }
 0x95d   :  { %v15040_v39 = vpop.permute.xlu0 %15039 }
 0x95e   :  { %v15155_v48 = vsel %vm8163_vm3, %v14988_v10, %v15040_v39 }
 0x95f   :  { %15610 = vmatprep.mubr.bf16.mxu0 %v15155_v48 }
 0x960   :  { %15611 = vmatmul.mubr.bf16.vlgmr.msra.gmra.mrb[208].mxu0 %v26337_v46 }
 0x961   :  { %15773 = vmatpush1.bf16.msra.mxu0 %v19756_v14 }
 0x962   :  { %15774 = vmatprep.subr.bf16.mxu0 %v26337_v46 }
 0x965   :  { %v26364_v19 = vpop.permute.xlu1 %15043  ;;  %15775 = vmatpush1.bf16.msra.mxu0 %v19759_v33 }
 0x966   :  { %v15159_v43 = vsel %vm8163_vm3, %v14990_v41, %v26364_v19  ;;  %15776 = vmatprep.subr.bf16.mxu0 %v26337_v46 }
 0x967   :  { %15618 = vmatprep.mubr.bf16.mxu0 %v15159_v43 }
 0x968   :  { %15619 = vmatmul.mubr.bf16.gmra.mrb[212].mxu0 %v26337_v46 }
 0x969   :  { %15777 = vmatpush1.bf16.msra.mxu0 %v19762_v57 }
 0x96a   :  { %15778 = vmatprep.subr.bf16.mxu0 %v26337_v46 }
 0x96d   :  { %v26377_v35 = vpop.permute.xlu0 %15047  ;;  %15779 = vmatpush1.bf16.msra.mxu0 %v19765_v28 }
 0x96e   :  { %v15163_v51 = vsel %vm8163_vm3, %v14992_v63, %v26377_v35  ;;  %15780 = vmatprep.subr.bf16.mxu0 %v26337_v46 }
 0x96f   :  { %15626 = vmatprep.mubr.bf16.mxu0 %v15163_v51 }
 0x970   :  { %15627 = vmatmul.mubr.bf16.gmra.mrb[216].mxu0 %v26177_v1 }
 0x971   :  { %15781 = vmatpush1.bf16.msra.mxu0 %v26382_v61 }
 0x972   :  { %15782 = vmatprep.subr.bf16.mxu0 %v26337_v46 }
 0x975   :  { %v26395_v0 = vpop.permute.xlu1 %15051  ;;  %15783 = vmatpush1.bf16.msra.mxu0 %v26392_v26 }
 0x976   :  { %v15167_v1 = vsel %vm8163_vm3, %v14994_v15, %v26395_v0  ;;  %15784 = vmatprep.subr.bf16.mxu0 %v26337_v46 }
 0x977   :  { %15634 = vmatprep.mubr.bf16.mxu0 %v15167_v1 }
 0x978   :  { %15635 = vmatmul.mubr.bf16.gmra.mrb[220].mxu0 %v26180_v60 }
 0x979   :  { %15785 = vmatpush1.bf16.msra.mxu0 %v26401_v6 }
 0x97a   :  { %15786 = vmatprep.subr.bf16.mxu0 %v26337_v46 }
 0x97d   :  { %v26414_v45 = vpop.permute.xlu0 %15055  ;;  %15787 = vmatpush1.bf16.msra.mxu0 %v26411_v16 }
 0x97e   :  { %v15171_v60 = vsel %vm8163_vm3, %v26326_v5, %v26414_v45  ;;  %15788 = vmatprep.subr.bf16.mxu0 %v26337_v46 }
 0x97f   :  { %15642 = vmatprep.mubr.bf16.mxu0 %v15171_v60 }
 0x980   :  { %15643 = vmatmul.mubr.bf16.gmra.mrb[224].mxu0 %v26183_v7 }
 0x981   :  { %v15042_v44 = vpop.permute.xlu0 %15041  ;;  %15789 = vmatpush1.bf16.msra.mxu0 %v26420_v34 }
 0x982   :  { %15790 = vmatprep.subr.bf16.mxu0 %v26337_v46  ;;  %v15072_v31 = vsel %vm8163_vm3, %v15040_v39, %v15042_v44 }
 0x985   :  { %v15105_v25 = vpop.permute.xlu0 %15104  ;;  %v26434_v55 = vpop.permute.xlu1 %15059  ;;  %15791 = vmatpush1.bf16.msra.mxu0 %v26431_v27 }
 0x986   :  { %v15175_v7 = vsel %vm8163_vm3, %v26331_v20, %v26434_v55  ;;  %v15188_v12 = vsel %vm15136_vm7, %v15042_v44, %v15105_v25 }
 0x987   :  { %15650 = vmatprep.mubr.bf16.mxu0 %v15175_v7  ;;  %15707 = vmatprep.mubr.bf16.mxu1 %v15188_v12 }
 0x988   :  { %15651 = vmatmul.mubr.bf16.gmra.mrb[228].mxu0 %v26186_v54  ;;  %15708 = vmatmul.mubr.bf16.vlgmr.msra.gmra.mrb[44].mxu1 %v15072_v31 }
 0x989   :  { %17784 = vmatpush1.bf16.msra.mxu1 %v19756_v14 }
 0x98a   :  { %17775 = vmatprep.subr.bf16.mxu1 %v26337_v46 }
 0x98d   :  { %v26444_v4 = vpop.permute.xlu1 %15063  ;;  %17785 = vmatpush1.bf16.msra.mxu1 %v19759_v33 }
 0x98e   :  { %v15179_v47 = vsel %vm8163_vm3, %v26342_v23, %v26444_v4  ;;  %17776 = vmatprep.subr.bf16.mxu1 %v26337_v46 }
 0x98f   :  { %15658 = vmatprep.mubr.bf16.mxu0 %v15179_v47 }
 0x990   :  { %15659 = vmatmul.mubr.bf16.gmra.mrb[232].mxu0 %v26189_v62 }
 0x991   :  { %v15046_v53 = vpop.permute.xlu1 %15045  ;;  %17786 = vmatpush1.bf16.msra.mxu1 %v19762_v57 }
 0x992   :  { %17777 = vmatprep.subr.bf16.mxu1 %v26337_v46  ;;  %v15073_v37 = vsel %vm8163_vm3, %v26364_v19, %v15046_v53 }
 0x995   :  { %v15109_v54 = vpop.permute.xlu1 %15108  ;;  %v26452_v11 = vpop.permute.xlu0 %15067  ;;  %17787 = vmatpush1.bf16.msra.mxu1 %v19765_v28 }
 0x996   :  { %v15183_v32 = vsel %vm8163_vm3, %v26347_v50, %v26452_v11  ;;  %v15192_v42 = vsel %vm15136_vm7, %v15046_v53, %v15109_v54  ;;  %17778 = vmatprep.subr.bf16.mxu1 %v26337_v46 }
 0x997   :  { %15666 = vmatprep.mubr.bf16.mxu0 %v15183_v32  ;;  %15715 = vmatprep.mubr.bf16.mxu1 %v15192_v42 }
 0x998   :  { %15667 = vmatmul.mubr.bf16.gmra.mrb[236].mxu0 %v26192_v9  ;;  %15716 = vmatmul.mubr.bf16.gmra.mrb[48].mxu1 %v15073_v37 }
 0x999   :  { %v15113_v62 = vpop.permute.xlu1 %15112  ;;  %v15050_v29 = vpop.permute.xlu0 %15049  ;;  %17788 = vmatpush1.bf16.msra.mxu1 %v26382_v61 }
 0x99a   :  { %v15196_v8 = vsel %vm15136_vm7, %v15050_v29, %v15113_v62  ;;  %17779 = vmatprep.subr.bf16.mxu1 %v26337_v46  ;;  %v15074_v9 = vsel %vm8163_vm3, %v26377_v35, %v15050_v29 }
 0x99b   :  { %15723 = vmatprep.mubr.bf16.mxu1 %v15196_v8 }
 0x99d   :  { %v15054_v24 = vpop.permute.xlu1 %15053  ;;  %v15107_v38 = vpop.permute.xlu0 %15106  ;;  %17789 = vmatpush1.bf16.msra.mxu1 %v26392_v26 }
 0x99e   :  { %v15137_v59 = vsel %vm15136_vm7, %v15105_v25, %v15107_v38  ;;  %17384 = vmatprep.mubr.msk.bf16.mxu0 %vm2271_vm0, %v15107_v38  ;;  %17780 = vmatprep.subr.bf16.mxu1 %v26337_v46  ;;  %v15075_v56 = vsel %vm8163_vm3, %v26395_v0, %v15054_v24 }
 0x9a0   :  { %15724 = vmatmul.mubr.bf16.gmra.mrb[52].mxu1 %v15074_v9  ;;  %15805 = vmatmul.mubr.bf16.vlgmr.msra.gmra.mrb[240].mxu0 %v15137_v59 }
 0x9a1   :  { %v15111_v22 = vpop.permute.xlu1 %15110  ;;  %v15117_v17 = vpop.permute.xlu0 %15116  ;;  %17790 = vmatpush1.bf16.msra.mxu1 %v26401_v6 }
 0x9a2   :  { %17385 = vmatprep.mubr.msk.bf16.mxu0 %vm2271_vm0, %v15111_v22  ;;  %v15200_v40 = vsel %vm15136_vm7, %v15054_v24, %v15117_v17  ;;  %17781 = vmatprep.subr.bf16.mxu1 %v26337_v46  ;;  %v15138_v13 = vsel %vm15136_vm7, %v15109_v54, %v15111_v22 }
 0x9a3   :  { %15731 = vmatprep.mubr.bf16.mxu1 %v15200_v40 }
 0x9a5   :  { %v15121_v21 = vpop.permute.xlu1 %15120  ;;  %v15058_v52 = vpop.permute.xlu0 %15057  ;;  %17791 = vmatpush1.bf16.msra.mxu1 %v26411_v16 }
 0x9a6   :  { %17782 = vmatprep.subr.bf16.mxu1 %v26337_v46  ;;  %v15204_v36 = vsel %vm15136_vm7, %v15058_v52, %v15121_v21  ;;  %v15076_v5 = vsel %vm8163_vm3, %v26414_v45, %v15058_v52 }
 0x9a8   :  { %15732 = vmatmul.mubr.bf16.gmra.mrb[56].mxu1 %v15075_v56  ;;  %15813 = vmatmul.mubr.bf16.gmra.mrb[244].mxu0 %v15138_v13 }
 0x9a9   :  { %v15062_v63 = vpop.permute.xlu1 %15061  ;;  %15739 = vmatprep.mubr.bf16.mxu1 %v15204_v36  ;;  %v15115_v15 = vpop.permute.xlu0 %15114  ;;  %17792 = vmatpush1.bf16.msra.mxu1 %v26420_v34 }
 0x9aa   :  { %17386 = vmatprep.mubr.msk.bf16.mxu0 %vm2271_vm0, %v15115_v15  ;;  %17783 = vmatprep.subr.bf16.mxu1 %v26337_v46  ;;  %v15139_v20 = vsel %vm15136_vm7, %v15113_v62, %v15115_v15  ;;  %v15077_v46 = vsel %vm8163_vm3, %v26434_v55, %v15062_v63 }
 0x9ad   :  { %v15125_v3 = vpop.permute.xlu0 %15124  ;;  %17793 = vmatpush1.bf16.msra.mxu1 %v26431_v27  ;;  %v15119_v30 = vpop.permute.xlu1 %15118 }
 0x9ae   :  { %v15208_v18 = vsel %vm15136_vm7, %v15062_v63, %v15125_v3  ;;  %v15140_v49 = vsel %vm15136_vm7, %v15117_v17, %v15119_v30 }
 0x9b0   :  { %15740 = vmatmul.mubr.bf16.gmra.mrb[60].mxu1 %v15076_v5  ;;  %15821 = vmatmul.mubr.bf16.gmra.mrb[248].mxu0 %v15139_v20 }
 0x9b1   :  { %15747 = vmatprep.mubr.bf16.mxu1 %v15208_v18  ;;  %17387 = vmatprep.mubr.msk.bf16.mxu0 %vm2271_vm0, %v15119_v30  ;;  %v15066_v23 = vpop.permute.xlu0 %15065  ;;  %v15129_v2 = vpop.permute.xlu1 %15128 }
 0x9b2   :  { %v15212_v58 = vsel %vm15136_vm7, %v15066_v23, %v15129_v2  ;;  %v15078_v14 = vsel %vm8163_vm3, %v26444_v4, %v15066_v23 }
 0x9b5   :  { %v15123_v50 = vpop.permute.xlu0 %15122  ;;  %v15070_v10 = vpop.permute.xlu1 %15069 }
 0x9b6   :  { %v15141_v48 = vsel %vm15136_vm7, %v15121_v21, %v15123_v50  ;;  %v15079_v19 = vsel %vm8163_vm3, %v26452_v11, %v15070_v10 }
 0x9b8   :  { %15748 = vmatmul.mubr.bf16.gmra.mrb[64].mxu1 %v15077_v46  ;;  %15829 = vmatmul.mubr.bf16.gmra.mrb[252].mxu0 %v15140_v49 }
 0x9b9   :  { %15755 = vmatprep.mubr.bf16.mxu1 %v15212_v58  ;;  %17388 = vmatprep.mubr.msk.bf16.mxu0 %vm2271_vm0, %v15123_v50  ;;  %v15133_v39 = vpop.permute.xlu0 %15132  ;;  %v15127_v33 = vpop.permute.xlu1 %15126 }
 0x9ba   :  { %v15216_v41 = vsel %vm15136_vm7, %v15070_v10, %v15133_v39  ;;  %v15142_v57 = vsel %vm15136_vm7, %v15125_v3, %v15127_v33 }
 0x9bd   :  { %v15131_v43 = vpop.permute.xlu0 %15130  ;;  %v15135_v28 = vpop.permute.xlu1 %15134 }
 0x9be   :  { %v15143_v35 = vsel %vm15136_vm7, %v15129_v2, %v15131_v43  ;;  %v15144_v61 = vsel %vm15136_vm7, %v15133_v39, %v15135_v28 }
 0x9c0   :  { %15756 = vmatmul.mubr.bf16.gmra.mrb[68].mxu1 %v15078_v14  ;;  %15837 = vmatmul.mubr.bf16.gmra.mrb[0].mxu0 %v15141_v48 }
 0x9c1   :  { %15763 = vmatprep.mubr.bf16.mxu1 %v15216_v41  ;;  %17389 = vmatprep.mubr.msk.bf16.mxu0 %vm2271_vm0, %v15127_v33 }
 0x9c8   :  { %15764 = vmatmul.mubr.bf16.gmra.mrb[72].mxu1 %v15079_v19  ;;  %15845 = vmatmul.mubr.bf16.gmra.mrb[4].mxu0 %v15142_v57 }
 0x9c9   :  { %17390 = vmatprep.mubr.msk.bf16.mxu0 %vm2271_vm0, %v15131_v43  ;;  %17391 = vmatprep.mubr.msk.bf16.mxu1 %vm2271_vm0, %v15135_v28 }
 0x9d0   :  { %15853 = vmatmul.mubr.bf16.gmra.mrb[8].mxu0 %v15143_v35  ;;  %15861 = vmatmul.mubr.bf16.vlgmr.msra.gmra.mrb[76].mxu1 %v15144_v61 }
 0xa33   :  { %v17550_v51 = vpop.f32.mrb[208].mxu0 }
 0xa34   :  { %v17551_v26 = vpop.f32.mrb[209].mxu0 }
 0xa35   :  { %v17552_v0 = vadd.f32 %v17551_v26, %v17550_v51  ;;  %v17553_v6 = vpop.f32.mrb[210].mxu0 }
 0xa36   :  { %v17554_v1 = vpop.f32.mrb[211].mxu0 }
 0xa37   :  { %v17555_v16 = vadd.f32 %v17554_v1, %v17553_v6 }
 0xa3b   :  { %v17556_v45 = vpop.f32.mrb[212].mxu0 }
 0xa3c   :  { %v17557_v34 = vpop.f32.mrb[213].mxu0 }
 0xa3d   :  { %v17558_v60 = vadd.f32 %v17557_v34, %v17556_v45  ;;  %v17559_v44 = vpop.f32.mrb[214].mxu0 }
 0xa3e   :  { %v17560_v27 = vpop.f32.mrb[215].mxu0 }
 0xa3f   :  { %v17561_v25 = vadd.f32 %v17560_v27, %v17559_v44  ;;  %v26534_v44 = vld [vmem:[%s26604_s5] ss:$0 sm:$0xff] }
 0xa43   :  { %v17562_v55 = vpop.f32.mrb[216].mxu0 }
 0xa44   :  { %v17563_v7 = vpop.f32.mrb[217].mxu0 }
 0xa45   :  { %v26507_v12 = vadd.f32 %v17563_v7, %v17562_v55  ;;  %v17565_v31 = vpop.f32.mrb[218].mxu0 }
 0xa46   :  { %v17566_v4 = vpop.f32.mrb[219].mxu0 }
 0xa47   :  { %v26509_v47 = vadd.f32 %v17566_v4, %v17565_v31 }
 0xa4b   :  { %v17568_v53 = vpop.f32.mrb[220].mxu0 }
 0xa4c   :  { %v17569_v54 = vpop.f32.mrb[221].mxu0 }
 0xa4d   :  { %v26511_v11 = vadd.f32 %v17569_v54, %v17568_v53  ;;  %v17571_v32 = vpop.f32.mrb[222].mxu0 }
 0xa4e   :  { %v17572_v42 = vpop.f32.mrb[223].mxu0 }
 0xa4f   :  { %v26513_v37 = vadd.f32 %v17572_v42, %v17571_v32 }
 0xa53   :  { %v17574_v62 = vpop.f32.mrb[224].mxu0 }
 0xa54   :  { %v17575_v29 = vpop.f32.mrb[225].mxu0 }
 0xa55   :  { %v26515_v8 = vadd.f32 %v17575_v29, %v17574_v62  ;;  %v17577_v24 = vpop.f32.mrb[226].mxu0 }
 0xa56   :  { %v17578_v38 = vpop.f32.mrb[227].mxu0 }
 0xa57   :  { %v26517_v59 = vadd.f32 %v17578_v38, %v17577_v24 }
 0xa5b   :  { %v17580_v9 = vpop.f32.mrb[228].mxu0  ;;  %v17614_v22 = vpop.f32.mrb[44].mxu1 }
 0xa5c   :  { %v17581_v17 = vpop.f32.mrb[229].mxu0  ;;  %v17615_v40 = vpop.f32.mrb[45].mxu1 }
 0xa5d   :  { %v26519_v21 = vadd.f32 %v17581_v17, %v17580_v9  ;;  %v17616_v52 = vadd.f32 %v17615_v40, %v17614_v22  ;;  %v17583_v56 = vpop.f32.mrb[230].mxu0  ;;  %v17617_v13 = vpop.f32.mrb[46].mxu1 }
 0xa5e   :  { %v17584_v36 = vpop.f32.mrb[231].mxu0  ;;  %v17618_v63 = vpop.f32.mrb[47].mxu1 }
 0xa5f   :  { %v26521_v15 = vadd.f32 %v17584_v36, %v17583_v56  ;;  %v17619_v3 = vadd.f32 %v17618_v63, %v17617_v13  ;;  %v15710_v30 = vadd.f32 %v17616_v52, %v17552_v0 }
 0xa61   :  { %v15713_v5 = vadd.f32 %v17619_v3, %v17555_v16 }
 0xa63   :  { %v17586_v20 = vpop.f32.mrb[232].mxu0 }
 0xa64   :  { %v17587_v18 = vpop.f32.mrb[233].mxu0 }
 0xa65   :  { %v26523_v23 = vadd.f32 %v17587_v18, %v17586_v20  ;;  %v17589_v2 = vpop.f32.mrb[234].mxu0 }
 0xa66   :  { %v17590_v46 = vpop.f32.mrb[235].mxu0 }
 0xa67   :  { %v26525_v50 = vadd.f32 %v17590_v46, %v17589_v2 }
 0xa6b   :  { %v17592_v49 = vpop.f32.mrb[236].mxu0  ;;  %v17620_v58 = vpop.f32.mrb[48].mxu1 }
 0xa6c   :  { %v17593_v10 = vpop.f32.mrb[237].mxu0  ;;  %v17621_v39 = vpop.f32.mrb[49].mxu1 }
 0xa6d   :  { %v26527_v14 = vadd.f32 %v17593_v10, %v17592_v49  ;;  %v17622_v48 = vadd.f32 %v17621_v39, %v17620_v58  ;;  %v17595_v33 = vpop.f32.mrb[238].mxu0  ;;  %v17623_v41 = vpop.f32.mrb[50].mxu1 }
 0xa6e   :  { %v17596_v19 = vpop.f32.mrb[239].mxu0  ;;  %v17624_v57 = vpop.f32.mrb[51].mxu1 }
 0xa6f   :  { %v26529_v43 = vadd.f32 %v17596_v19, %v17595_v33  ;;  %v17625_v28 = vadd.f32 %v17624_v57, %v17623_v41  ;;  %v15718_v35 = vadd.f32 %v17622_v48, %v17558_v60 }
 0xa71   :  { %v15721_v61 = vadd.f32 %v17625_v28, %v17561_v25 }
 0xa73   :  { %v17626_v51 = vpop.f32.mrb[52].mxu1  ;;  %v15806_v26 = vpop.f32.mrb[240].mxu0 }
 0xa74   :  { %v15807_v0 = vadd.f32 %v15806_v26, %v15710_v30  ;;  %v17627_v6 = vpop.f32.mrb[53].mxu1  ;;  %v15808_v1 = vpop.f32.mrb[241].mxu0 }
 0xa75   :  { %v17628_v16 = vadd.f32 %v17627_v6, %v17626_v51  ;;  %v17629_v45 = vpop.f32.mrb[54].mxu1  ;;  %v15809_v34 = vpop.f32.mrb[242].mxu0 }
 0xa76   :  { %vm15869_vm0 = vcmp.ge.f32.partialorder %v15807_v0, 0.0  ;;  %v15885_v27 = vmul.f32 0.2, %v15807_v0  ;;  %v15810_v55 = vadd.f32 %v15809_v34, %v15713_v5  ;;  %v17630_v7 = vpop.f32.mrb[55].mxu1  ;;  %v15811_v31 = vpop.f32.mrb[243].mxu0 }
 0xa77   :  { %v17631_v60 = vadd.f32 %v17630_v7, %v17629_v45  ;;  %v15726_v25 = vadd.f32 %v17628_v16, %v26507_v12 }
 0xa78   :  { %vm15870_vm3 = vcmp.ge.f32.partialorder %v15810_v55, 0.0  ;;  %v15886_v4 = vmul.f32 0.2, %v15810_v55  ;;  %v15901_v53 = vsel %vm15869_vm0, %v15807_v0, %v15885_v27 }
 0xa79   :  { %v15924_v54 = vmul.f32 %v26534_v44, %v15901_v53  ;;  %v15729_v32 = vadd.f32 %v17631_v60, %v26509_v47 }
 0xa7a   :  { %v15902_v42 = vsel %vm15870_vm3, %v15810_v55, %v15886_v4 }
 0xa7b   :  { %v17632_v62 = vpop.f32.mrb[56].mxu1  ;;  %v15814_v29 = vpop.f32.mrb[244].mxu0  ;;  %v15940_v24 = vsel %vm15136_vm7, %v15924_v54, 0.0  ;;  %v15925_v38 = vmul.f32 %v26534_v44, %v15902_v42 }
 0xa7c   :  { %v15815_v9 = vadd.f32 %v15814_v29, %v15718_v35  ;;  %v17633_v22 = vpop.f32.mrb[57].mxu1  ;;  %v15816_v17 = vpop.f32.mrb[245].mxu0  ;;  %15941 = vadd.xlane.f32.xlu0 %v15940_v24 }
 0xa7d   :  { %v17634_v40 = vadd.f32 %v17633_v22, %v17632_v62  ;;  %v17635_v12 = vpop.f32.mrb[58].mxu1  ;;  %v15817_v52 = vpop.f32.mrb[246].mxu0  ;;  %v15943_v56 = vsel %vm15136_vm7, %v15925_v38, 0.0 }
 0xa7e   :  { %vm15871_vm8 = vcmp.ge.f32.partialorder %v15815_v9, 0.0  ;;  %v15887_v13 = vmul.f32 0.2, %v15815_v9  ;;  %v15818_v36 = vadd.f32 %v15817_v52, %v15721_v61  ;;  %v17636_v47 = vpop.f32.mrb[59].mxu1  ;;  %v15819_v63 = vpop.f32.mrb[247].mxu0  ;;  %15944 = vadd.xlane.f32.xlu1 %v15943_v56 }
 0xa7f   :  { %v17637_v3 = vadd.f32 %v17636_v47, %v17635_v12  ;;  %v15734_v30 = vadd.f32 %v17634_v40, %v26511_v11 }
 0xa80   :  { %vm15872_vm9 = vcmp.ge.f32.partialorder %v15818_v36, 0.0  ;;  %v15888_v5 = vmul.f32 0.2, %v15818_v36  ;;  %v15903_v20 = vsel %vm15871_vm8, %v15815_v9, %v15887_v13 }
 0xa81   :  { %v15926_v18 = vmul.f32 %v26534_v44, %v15903_v20  ;;  %v15737_v2 = vadd.f32 %v17637_v3, %v26513_v37 }
 0xa82   :  { %v15904_v46 = vsel %vm15872_vm9, %v15818_v36, %v15888_v5 }
 0xa83   :  { %v17638_v49 = vpop.f32.mrb[60].mxu1  ;;  %v15822_v58 = vpop.f32.mrb[248].mxu0  ;;  %v15946_v10 = vsel %vm15136_vm7, %v15926_v18, 0.0  ;;  %v15927_v39 = vmul.f32 %v26534_v44, %v15904_v46 }
 0xa84   :  { %v15823_v48 = vadd.f32 %v15822_v58, %v15726_v25  ;;  %v17639_v33 = vpop.f32.mrb[61].mxu1  ;;  %v15824_v41 = vpop.f32.mrb[249].mxu0  ;;  %15947 = vadd.xlane.f32.xlu0 %v15946_v10 }
 0xa85   :  { %v17640_v19 = vadd.f32 %v17639_v33, %v17638_v49  ;;  %v17641_v11 = vpop.f32.mrb[62].mxu1  ;;  %v15825_v57 = vpop.f32.mrb[250].mxu0  ;;  %v15949_v26 = vsel %vm15136_vm7, %v15927_v39, 0.0 }
 0xa86   :  { %vm15873_vm10 = vcmp.ge.f32.partialorder %v15823_v48, 0.0  ;;  %v15889_v28 = vmul.f32 0.2, %v15823_v48  ;;  %v15826_v35 = vadd.f32 %v15825_v57, %v15729_v32  ;;  %v17642_v61 = vpop.f32.mrb[63].mxu1  ;;  %v15827_v51 = vpop.f32.mrb[251].mxu0 }
 0xa87   :  { %v17643_v37 = vadd.f32 %v17642_v61, %v17641_v11  ;;  %v15742_v0 = vadd.f32 %v17640_v19, %v26515_v8 }
 0xa88   :  { %vm15874_vm11 = vcmp.ge.f32.partialorder %v15826_v35, 0.0  ;;  %v15890_v6 = vmul.f32 0.2, %v15826_v35  ;;  %15950 = vadd.xlane.f32.xlu0 %v15949_v26  ;;  %v15905_v1 = vsel %vm15873_vm10, %v15823_v48, %v15889_v28 }
 0xa89   :  { %v15928_v16 = vmul.f32 %v26534_v44, %v15905_v1  ;;  %v15745_v45 = vadd.f32 %v17643_v37, %v26517_v59 }
 0xa8a   :  { %v15906_v34 = vsel %vm15874_vm11, %v15826_v35, %v15890_v6 }
 0xa8b   :  { %v17644_v27 = vpop.f32.mrb[64].mxu1  ;;  %v15830_v55 = vpop.f32.mrb[252].mxu0  ;;  %v15952_v7 = vsel %vm15136_vm7, %v15928_v16, 0.0  ;;  %v15929_v31 = vmul.f32 %v26534_v44, %v15906_v34 }
 0xa8c   :  { %v15831_v60 = vadd.f32 %v15830_v55, %v15734_v30  ;;  %v17645_v25 = vpop.f32.mrb[65].mxu1  ;;  %v15832_v4 = vpop.f32.mrb[253].mxu0  ;;  %15953 = vadd.xlane.f32.xlu1 %v15952_v7 }
 0xa8d   :  { %v17646_v8 = vadd.f32 %v17645_v25, %v17644_v27  ;;  %v17647_v53 = vpop.f32.mrb[66].mxu1  ;;  %v15833_v54 = vpop.f32.mrb[254].mxu0  ;;  %v15955_v32 = vsel %vm15136_vm7, %v15929_v31, 0.0 }
 0xa8e   :  { %vm15875_vm4 = vcmp.ge.f32.partialorder %v15831_v60, 0.0  ;;  %v15891_v42 = vmul.f32 0.2, %v15831_v60  ;;  %v15834_v62 = vadd.f32 %v15833_v54, %v15737_v2  ;;  %v17648_v59 = vpop.f32.mrb[67].mxu1  ;;  %v15835_v29 = vpop.f32.mrb[255].mxu0  ;;  %15956 = vadd.xlane.f32.xlu0 %v15955_v32 }
 0xa8f   :  { %v17649_v24 = vadd.f32 %v17648_v59, %v17647_v53  ;;  %v15750_v38 = vadd.f32 %v17646_v8, %v26519_v21 }
 0xa90   :  { %vm15876_vm12 = vcmp.ge.f32.partialorder %v15834_v62, 0.0  ;;  %v15892_v9 = vmul.f32 0.2, %v15834_v62  ;;  %v15907_v22 = vsel %vm15875_vm4, %v15831_v60, %v15891_v42 }
 0xa91   :  { %v15930_v17 = vmul.f32 %v26534_v44, %v15907_v22  ;;  %v15753_v40 = vadd.f32 %v17649_v24, %v26521_v15 }
 0xa92   :  { %v15908_v12 = vsel %vm15876_vm12, %v15834_v62, %v15892_v9 }
 0xa93   :  { %v17650_v52 = vpop.f32.mrb[68].mxu1  ;;  %v15838_v56 = vpop.f32.mrb[0].mxu0  ;;  %v15958_v13 = vsel %vm15136_vm7, %v15930_v17, 0.0  ;;  %v15931_v36 = vmul.f32 %v26534_v44, %v15908_v12 }
 0xa94   :  { %v15839_v47 = vadd.f32 %v15838_v56, %v15742_v0  ;;  %v17651_v63 = vpop.f32.mrb[69].mxu1  ;;  %v15840_v3 = vpop.f32.mrb[1].mxu0  ;;  %15959 = vadd.xlane.f32.xlu1 %v15958_v13 }
 0xa95   :  { %v17652_v30 = vadd.f32 %v17651_v63, %v17650_v52  ;;  %v17653_v21 = vpop.f32.mrb[70].mxu1  ;;  %v15841_v5 = vpop.f32.mrb[2].mxu0  ;;  %v15961_v20 = vsel %vm15136_vm7, %v15931_v36, 0.0 }
 0xa96   :  { %vm15877_vm13 = vcmp.ge.f32.partialorder %v15839_v47, 0.0  ;;  %v15893_v18 = vmul.f32 0.2, %v15839_v47  ;;  %v15842_v2 = vadd.f32 %v15841_v5, %v15745_v45  ;;  %v17654_v15 = vpop.f32.mrb[71].mxu1  ;;  %v15843_v46 = vpop.f32.mrb[3].mxu0  ;;  %15962 = vadd.xlane.f32.xlu0 %v15961_v20 }
 0xa97   :  { %v17655_v49 = vadd.f32 %v17654_v15, %v17653_v21  ;;  %v15758_v58 = vadd.f32 %v17652_v30, %v26523_v23 }
 0xa98   :  { %vm15878_vm14 = vcmp.ge.f32.partialorder %v15842_v2, 0.0  ;;  %v15894_v10 = vmul.f32 0.2, %v15842_v2  ;;  %v15909_v39 = vsel %vm15877_vm13, %v15839_v47, %v15893_v18 }
 0xa99   :  { %v15932_v48 = vmul.f32 %v26534_v44, %v15909_v39  ;;  %v15761_v33 = vadd.f32 %v17655_v49, %v26525_v50 }
 0xa9a   :  { %v15910_v41 = vsel %vm15878_vm14, %v15842_v2, %v15894_v10  ;;  %v12_v2 = vstv %s26605_s6 }
 0xa9b   :  { %v17656_v19 = vpop.f32.mrb[72].mxu1  ;;  %v15846_v11 = vpop.f32.mrb[4].mxu0  ;;  %v15964_v57 = vsel %vm15136_vm7, %v15932_v48, 0.0  ;;  %v15933_v28 = vmul.f32 %v26534_v44, %v15910_v41  ;;  %13 = vst [vmem:[#allocation5] sm:$0x1] %v12_v2 }
 0xa9c   :  { %v15847_v35 = vadd.f32 %v15846_v11, %v15750_v38  ;;  %15965 = vadd.xlane.f32.xlu1 %v15964_v57  ;;  %v17657_v61 = vpop.f32.mrb[73].mxu1  ;;  %v15848_v51 = vpop.f32.mrb[5].mxu0 }
 0xa9d   :  { %v17658_v37 = vadd.f32 %v17657_v61, %v17656_v19  ;;  %v17659_v23 = vpop.f32.mrb[74].mxu1  ;;  %v15849_v26 = vpop.f32.mrb[6].mxu0  ;;  %v15967_v0 = vsel %vm15136_vm7, %v15933_v28, 0.0 }
 0xa9e   :  { %vm15879_vm1 = vcmp.ge.f32.partialorder %v15847_v35, 0.0  ;;  %v15895_v6 = vmul.f32 0.2, %v15847_v35  ;;  %v15850_v1 = vadd.f32 %v15849_v26, %v15753_v40  ;;  %15968 = vadd.xlane.f32.xlu0 %v15967_v0  ;;  %v17660_v50 = vpop.f32.mrb[75].mxu1  ;;  %v15851_v16 = vpop.f32.mrb[7].mxu0 }
 0xa9f   :  { %v17661_v45 = vadd.f32 %v17660_v50, %v17659_v23  ;;  %v15766_v34 = vadd.f32 %v17658_v37, %v26527_v14 }
 0xaa0   :  { %vm15880_vm5 = vcmp.ge.f32.partialorder %v15850_v1, 0.0  ;;  %v15896_v27 = vmul.f32 0.2, %v15850_v1  ;;  %v15911_v55 = vsel %vm15879_vm1, %v15847_v35, %v15895_v6 }
 0xaa1   :  { %v15934_v7 = vmul.f32 %v26534_v44, %v15911_v55  ;;  %v15769_v31 = vadd.f32 %v17661_v45, %v26529_v43 }
 0xaa2   :  { %v15912_v60 = vsel %vm15880_vm5, %v15850_v1, %v15896_v27  ;;  %v17393_v61 = vld [vmem:[#allocation5] ss:$0 sm:$0xff] }
 0xaa3   :  { %v15854_v25 = vpop.f32.mrb[8].mxu0  ;;  %v15862_v4 = vpop.f32.mrb[76].mxu1  ;;  %v15970_v8 = vsel %vm15136_vm7, %v15934_v7, 0.0  ;;  %v15935_v53 = vmul.f32 %v26534_v44, %v15912_v60 }
 0xaa4   :  { %v15855_v54 = vadd.f32 %v15854_v25, %v15758_v58  ;;  %v15863_v32 = vadd.f32 %v15862_v4, %v15766_v34  ;;  %v15856_v42 = vpop.f32.mrb[9].mxu0  ;;  %15971 = vadd.xlane.f32.xlu1 %v15970_v8  ;;  %v15864_v62 = vpop.f32.mrb[77].mxu1 }
 0xaa5   :  { %v15857_v14 = vpop.f32.mrb[10].mxu0  ;;  %v15865_v59 = vpop.f32.mrb[78].mxu1  ;;  %v15973_v29 = vsel %vm15136_vm7, %v15935_v53, 0.0 }
 0xaa6   :  { %vm15881_vm15 = vcmp.ge.f32.partialorder %v15855_v54, 0.0  ;;  %v15897_v24 = vmul.f32 0.2, %v15855_v54  ;;  %vm15883_vm2 = vcmp.ge.f32.partialorder %v15863_v32, 0.0  ;;  %v15899_v43 = vmul.f32 0.2, %v15863_v32  ;;  %15974 = vadd.xlane.f32.xlu0 %v15973_v29 }
 0xaa7   :  { %v15858_v38 = vadd.f32 %v15857_v14, %v15761_v33  ;;  %v15866_v9 = vadd.f32 %v15865_v59, %v15769_v31  ;;  %v15859_v22 = vpop.f32.mrb[11].mxu0  ;;  %v15867_v17 = vpop.f32.mrb[79].mxu1 }
 0xaa8   :  { %v15913_v40 = vsel %vm15881_vm15, %v15855_v54, %v15897_v24  ;;  %v15915_v12 = vsel %vm15883_vm2, %v15863_v32, %v15899_v43 }
 0xaa9   :  { %vm15882_vm6 = vcmp.ge.f32.partialorder %v15858_v38, 0.0  ;;  %v15898_v52 = vmul.f32 0.2, %v15858_v38  ;;  %vm15884_vm0 = vcmp.ge.f32.partialorder %v15866_v9, 0.0  ;;  %v15900_v56 = vmul.f32 0.2, %v15866_v9 }
 0xaaa   :  { %v15936_v13 = vmul.f32 %v26534_v44, %v15913_v40  ;;  %v15938_v30 = vmul.f32 %v26534_v44, %v15915_v12 }
 0xaab   :  { %v15914_v36 = vsel %vm15882_vm6, %v15858_v38, %v15898_v52  ;;  %v15916_v47 = vsel %vm15884_vm0, %v15866_v9, %v15900_v56 }
 0xaac   :  { %v15976_v63 = vsel %vm15136_vm7, %v15936_v13, 0.0  ;;  %v15937_v3 = vmul.f32 %v26534_v44, %v15914_v36  ;;  %v15939_v5 = vmul.f32 %v26534_v44, %v15916_v47  ;;  %v15982_v20 = vsel %vm15136_vm7, %v15938_v30, 0.0 }
 0xaad   :  { %15977 = vadd.xlane.f32.xlu1 %v15976_v63 }
 0xaae   :  { %v15979_v21 = vsel %vm15136_vm7, %v15937_v3, 0.0  ;;  %v15985_v18 = vsel %vm15136_vm7, %v15939_v5, 0.0  ;;  %vm16011_vm7 = vcmask 7168  }
 0xaaf   :  { %15980 = vadd.xlane.f32.xlu0 %v15979_v21 }
 0xab1   :  { %15983 = vadd.xlane.f32.xlu1 %v15982_v20 }
 0xab3   :  { %15986 = vadd.xlane.f32.xlu0 %v15985_v18 }
 0xb09   :  { %v15942_v15 = vpop.xlane.xlu0 %15941 }
 0xb0b   :  { %v15945_v49 = vpop.xlane.xlu1 %15944 }
 0xb11   :  { %v15948_v46 = vpop.xlane.xlu0 %15947 }
 0xb15   :  { %v15951_v58 = vpop.xlane.xlu0 %15950 }
 0xb19   :  { %v15954_v10 = vpop.xlane.xlu1 %15953 }
 0xb1a   :  { %v15988_v11 = vadd.f32 %v15954_v10, %v15942_v15 }
 0xb1b   :  { %v15957_v39 = vpop.xlane.xlu0 %15956 }
 0xb1c   :  { %v15989_v28 = vadd.f32 %v15957_v39, %v15945_v49 }
 0xb21   :  { %v15960_v48 = vpop.xlane.xlu1 %15959 }
 0xb22   :  { %v15990_v37 = vadd.f32 %v15960_v48, %v15948_v46 }
 0xb23   :  { %v15963_v44 = vpop.xlane.xlu0 %15962 }
 0xb24   :  { %v15991_v6 = vadd.f32 %v15963_v44, %v15951_v58 }
 0xb29   :  { %v15966_v33 = vpop.xlane.xlu1 %15965 }
 0xb2a   :  { %v15992_v35 = vadd.f32 %v15988_v11, %v15966_v33 }
 0xb2b   :  { %v15969_v41 = vpop.xlane.xlu0 %15968 }
 0xb2c   :  { %v15993_v23 = vadd.f32 %v15989_v28, %v15969_v41 }
 0xb31   :  { %v15972_v19 = vpop.xlane.xlu1 %15971 }
 0xb32   :  { %v15994_v1 = vadd.f32 %v15990_v37, %v15972_v19 }
 0xb33   :  { %v15975_v57 = vpop.xlane.xlu0 %15974 }
 0xb34   :  { %v15995_v34 = vadd.f32 %v15991_v6, %v15975_v57 }
 0xb3a   :  { %v15978_v51 = vpop.xlane.xlu1 %15977 }
 0xb3b   :  { %v15996_v26 = vadd.f32 %v15992_v35, %v15978_v51 }
 0xb3c   :  { %v15981_v0 = vpop.xlane.xlu0 %15980 }
 0xb3d   :  { %v16007_v50 = vadd.f32 %v17393_v61, %v15996_v26  ;;  %v15997_v16 = vadd.f32 %v15993_v23, %v15981_v0 }
 0xb3e   :  { %v15984_v45 = vpop.xlane.xlu1 %15983 }
 0xb3f   :  { %16012 = vst.msk [vmem:[%s26606_s7] sm:$0xff] %vm16011_vm7, %v16007_v50  ;;  %v16008_v27 = vadd.f32 %v17393_v61, %v15997_v16  ;;  %v15998_v55 = vadd.f32 %v15994_v1, %v15984_v45 }
 0xb40   :  { %v15987_v7 = vpop.xlane.xlu0 %15986 }
 0xb41   :  { %16013 = vst.msk [vmem:[%s26606_s7 + $0x8] sm:$0xff] %vm16011_vm7, %v16008_v27  ;;  %v16009_v31 = vadd.f32 %v17393_v61, %v15998_v55  ;;  %v15999_v60 = vadd.f32 %v15995_v34, %v15987_v7 }
 0xb43   :  { %16014 = vst.msk [vmem:[%s26606_s7 + $0x10] sm:$0xff] %vm16011_vm7, %v16009_v31  ;;  %v16010_v25 = vadd.f32 %v17393_v61, %v15999_v60 }
 0xb45   :  { %16015 = vst.msk [vmem:[%s26606_s7 + $0x18] sm:$0xff] %vm16011_vm7, %v16010_v25 }

</bundles_post_ra>
